<compile_context>
chip_gen: v6e
topology: v6e:2x2x1
jax: 0.10.0
libtpu: 0.0.40
codegen_flags: <defaults>
</compile_context>

<pallas_src>
import functools

import jax
import jax.numpy as jnp
from jax.experimental import pallas as pl
from jax.experimental.pallas import tpu as pltpu

MASKING_VALUE = 999.0


# ---------------------------------------------------------------------------- conv-tower kernel
def _sat1_conv_kernel(x_ref, w1_ref, b1_ref, w2_ref, b2_ref, w3_ref, b3_ref,
                      f_ref, *, d, s, k1, k2, k3):
    """conv1(PartialConv3d)+ReLU+pool, conv2+ReLU+pool, conv3+ReLU+pool for one batch element.

    Emits the pooled conv3 features in (time, space, channel) row order, lane-dense on the
    256 channel lanes; the MLP head is applied by a separate batched kernel.
    """
    co1 = w1_ref.shape[1]
    co2 = w2_ref.shape[1]
    co3 = w3_ref.shape[1]

    # ---- layer 1: PartialConv3d(1 -> 64, (k1,1,1)) + ReLU + MaxPool3d((2,1,1)) ---------------
    x = x_ref[0]                                                   # (D*S, 1)
    mask = jnp.where(x == MASKING_VALUE, 0.0, 1.0).astype(jnp.float32)
    xm = x * mask

    d1c = d - k1 + 1
    upd = mask[0:d1c * s, :]                                       # update_mask = conv(mask, 1s)
    for kk in range(1, k1):
        upd = upd + mask[kk * s:(kk + d1c) * s, :]
    updc = jnp.clip(upd, 0.0, 1.0)
    ratio = (float(k1) / (upd + 1e-8)) * updc                      # slide_winsize = 1*k1*1*1

    raw = xm[0:d1c * s, :] * w1_ref[0:1, :]                        # bias-free conv on masked x
    for kk in range(1, k1):
        raw = raw + xm[kk * s:(kk + d1c) * s, :] * w1_ref[kk:kk + 1, :]

    # output = ((raw_out - b) * mask_ratio + b) * update_mask, with raw_out = raw + b
    y = (raw * ratio + b1_ref[...]) * updc
    y = jnp.maximum(y, 0.0)                                        # ReLU
    d1 = d1c // 2                                                  # MaxPool floors odd lengths
    y1 = y[:2 * d1 * s].reshape(d1, 2, s, co1).max(axis=1)         # (d1, S, 64)

    # ---- layer 2: Conv3d(64 -> 128, (k2,1,1)) + ReLU + MaxPool3d((2,1,1)) --------------------
    # Tap-fused im2col matmul: one K = k2*64 MXU pass instead of k2 K=64 passes.
    d2c = d1 - k2 + 1
    lhs2 = jnp.concatenate(
        [y1[kk:kk + d2c].reshape(d2c * s, co1) for kk in range(k2)], axis=1)
    z2 = jnp.dot(lhs2, w2_ref[...], preferred_element_type=jnp.float32) + b2_ref[...]
    z2 = jnp.maximum(z2, 0.0).reshape(d2c, s, co2)
    d2 = d2c // 2
    y2 = z2[:2 * d2].reshape(d2, 2, s, co2).max(axis=1)            # (d2, S, 128)

    # ---- layer 3: Conv3d(128 -> 256, (k3,1,1)) + ReLU + MaxPool3d((2,1,1)) -------------------
    d3c = d2 - k3 + 1
    lhs3 = jnp.concatenate(
        [y2[kk:kk + d3c].reshape(d3c * s, co2) for kk in range(k3)], axis=1)
    z3 = jnp.dot(lhs3, w3_ref[...], preferred_element_type=jnp.float32) + b3_ref[...]
    z3 = jnp.maximum(z3, 0.0).reshape(d3c, s, co3)
    d3 = d3c // 2
    y3 = z3[:2 * d3].reshape(d3, 2, s, co3).max(axis=1)            # (d3, S, 256)

    # ---- lane-dense pooled-feature output in (time, space, channel) row order ----------------
    f_ref[0] = y3.reshape(d3 * s, co3).astype(f_ref.dtype)


# ----------------------------------------------------------------------------------- MLP head
def _sat1_head_kernel(f_ref, wl_ref, bl_ref, wf_ref, bf_ref, o_ref):
    """Flatten -> Linear(128) -> ReLU -> Dropout(identity) -> Linear(n_classes), batched over B.

    One (B, feat) x (feat, 128) matmul: wl is DMA'd from HBM exactly once, full-K contraction,
    MXU rows filled with the whole batch.
    """
    h = jnp.dot(f_ref[...], wl_ref[...], preferred_element_type=jnp.float32) + bl_ref[...]
    h = jnp.maximum(h, 0.0)
    # TODO(synk): nn.Dropout(0.5) is the identity here (eval mode); no train-mode RNG path.
    o_ref[...] = (jnp.dot(h, wf_ref[...], preferred_element_type=jnp.float32)
                  + bf_ref[...]).astype(o_ref.dtype)


# -------------------------------------------------------------------------------------- wrapper
def prepare_params(raw, d, h, w):
    """One-time repacking of PyTorch-layout weights into the kernel layouts.

    raw layouts (mirroring the nn.Module):
      w1: (k1, 64)          <- conv1.weight (64, 1, k1, 1, 1): [o, 0, k] -> [k, o];  b1: (64,)
      w2: (k2, 64, 128)     <- conv2.weight (128, 64, k2, 1, 1): [o, i, k] -> [k, i, o]
      w3: (k3, 128, 256)    <- conv3.weight (256, 128, k3, 1, 1)
      wl: (feat_in, 128)    <- linear.weight.T, rows in PyTorch flatten (C, D, H, W) order
      wf: (128, n_classes)  <- linear_final.weight.T
    """
    s = h * w
    k1, co1 = raw["w1"].shape
    k2, ci2, co2 = raw["w2"].shape
    k3, ci3, co3 = raw["w3"].shape
    d1 = (d - k1 + 1) // 2
    d2 = (d1 - k2 + 1) // 2
    d3 = (d2 - k3 + 1) // 2
    nl = raw["wl"].shape[1]
    assert raw["wl"].shape[0] == co3 * d3 * s
    # Permute Linear rows from PyTorch's (C, D, H*W) flatten order to the kernels' (D, H*W, C)
    # order so no feature transpose / relayout is ever needed at runtime.
    wl = raw["wl"].reshape(co3, d3, s, nl).transpose(1, 2, 0, 3).reshape(d3 * s * co3, nl)
    return {
        "w1": raw["w1"],
        "b1": raw["b1"].reshape(1, co1),
        "w2": raw["w2"].reshape(k2 * ci2, co2),        # tap-fused (k2*Ci, Co)
        "b2": raw["b2"].reshape(1, co2),
        "w3": raw["w3"].reshape(k3 * ci3, co3),        # tap-fused (k3*Ci, Co)
        "b3": raw["b3"].reshape(1, co3),
        "wl": wl,                                      # f32 kept for exact module numerics
        "bl": raw["bl"].reshape(1, nl),
        "wf": raw["wf"],
        "bf": raw["bf"].reshape(1, -1),
    }


def sat1_topological_forward(x, params):
    """x: [B, D, H, W] float32 -> logits [B, n_classes] (SAT1Topological.forward, eval mode)."""
    B, D, H, W = x.shape
    S = H * W
    x_col = x.reshape(B, D * S, 1)

    w1, b1 = params["w1"], params["b1"]
    w2, b2 = params["w2"], params["b2"]
    w3, b3 = params["w3"], params["b3"]
    wl, bl = params["wl"], params["bl"]
    wf, bf = params["wf"], params["bf"]

    k1, co1 = w1.shape
    co2, co3 = w2.shape[1], w3.shape[1]
    k2 = w2.shape[0] // co1
    k3 = w3.shape[0] // co2
    nc = wf.shape[1]

    d1 = (D - k1 + 1) // 2
    d2 = (d1 - k2 + 1) // 2
    d3 = (d2 - k3 + 1) // 2

    conv_kern = functools.partial(_sat1_conv_kernel, d=D, s=S, k1=k1, k2=k2, k3=k3)

    def _const(b):
        return (0, 0)

    # --- kernel 1: conv tower, grid over batch, weights fetched once (constant index_map) -----
    feats = pl.pallas_call(
        conv_kern,
        out_shape=jax.ShapeDtypeStruct((B, d3 * S, co3), jnp.float32),
        grid=(B,),
        in_specs=[
            pl.BlockSpec((1, D * S, 1), lambda b: (b, 0, 0)),
            pl.BlockSpec(w1.shape, _const),
            pl.BlockSpec(b1.shape, _const),
            pl.BlockSpec(w2.shape, _const),
            pl.BlockSpec(b2.shape, _const),
            pl.BlockSpec(w3.shape, _const),
            pl.BlockSpec(b3.shape, _const),
        ],
        out_specs=pl.BlockSpec((1, d3 * S, co3), lambda b: (b, 0, 0)),
        compiler_params=pltpu.CompilerParams(
            # "parallel" lets the B axis be sharded across the 2 TensorCores on v7x; swap to
            # pltpu.CORE_PARALLEL / core_map if profiling shows a single busy core.
            dimension_semantics=("parallel",),
        ),
    )(x_col, w1, b1, w2, b2, w3, b3)

    # Row-major merge (D, S, C) -> feat; free bitcast, order matches the wl row permutation.
    feats2 = feats.reshape(B, d3 * S * co3)

    # --- kernel 2: batched MLP head; wl (4 MiB) streamed from HBM exactly once ----------------
    # No grid: whole operands resident in VMEM (~4.2 MiB total; fits every generation).
    out = pl.pallas_call(
        _sat1_head_kernel,
        out_shape=jax.ShapeDtypeStruct((B, nc), x.dtype),
    )(feats2, wl, bl, wf, bf)
    return out


# -------------------------------------------------------------------------- pure-JAX reference
def _reference_forward(x, params):
    """Straight jnp mirror of the module (HIGHEST-precision dots) for a correctness check."""
    hp = functools.partial(jnp.dot, precision=jax.lax.Precision.HIGHEST)
    B, D, H, W = x.shape
    S = H * W
    w1, b1 = params["w1"], params["b1"]
    w2, b2 = params["w2"], params["b2"]
    w3, b3 = params["w3"], params["b3"]
    wl, bl = params["wl"], params["bl"]
    wf, bf = params["wf"], params["bf"]
    k1, co1 = w1.shape
    co2, co3 = w2.shape[1], w3.shape[1]
    k2 = w2.shape[0] // co1
    k3 = w3.shape[0] // co2

    xr = x.reshape(B, D, S)
    mask = jnp.where(xr == MASKING_VALUE, 0.0, 1.0)
    xm = xr * mask
    d1c = D - k1 + 1
    upd = sum(mask[:, kk:kk + d1c] for kk in range(k1))
    updc = jnp.clip(upd, 0.0, 1.0)
    ratio = (float(k1) / (upd + 1e-8)) * updc
    raw = sum(xm[:, kk:kk + d1c, :, None] * w1[kk] for kk in range(k1))
    y = jnp.maximum((raw * ratio[..., None] + b1[0]) * updc[..., None], 0.0)
    d1 = d1c // 2
    y1 = y[:, :2 * d1].reshape(B, d1, 2, S, co1).max(axis=2)

    d2c = d1 - k2 + 1
    lhs2 = jnp.concatenate([y1[:, kk:kk + d2c] for kk in range(k2)], axis=-1)
    z2 = jnp.maximum(hp(lhs2, w2) + b2[0], 0.0)
    d2 = d2c // 2
    y2 = z2[:, :2 * d2].reshape(B, d2, 2, S, co2).max(axis=2)

    d3c = d2 - k3 + 1
    lhs3 = jnp.concatenate([y2[:, kk:kk + d3c] for kk in range(k3)], axis=-1)
    z3 = jnp.maximum(hp(lhs3, w3) + b3[0], 0.0)
    d3 = d3c // 2
    y3 = z3[:, :2 * d3].reshape(B, d3, 2, S, co3).max(axis=2)

    feats = y3.reshape(B, d3 * S * co3)
    h = jnp.maximum(hp(feats, wl) + bl[0], 0.0)
    return hp(h, wf) + bf[0]


# ----------------------------------------------------------------------------------------- demo
if __name__ == "__main__":
    B, D, H, W = 2, 24, 4, 8
    n_classes = 5
    key = jax.random.PRNGKey(0)
    keys = jax.random.split(key, 11)

    x = jax.random.normal(keys[0], (B, D, H, W), dtype=jnp.float32)
    # Mark trailing time samples as padding so the PartialConv3d mask path is exercised.
    x = x.at[:, D - 6:, :, :].set(MASKING_VALUE)

    k1, k2, k3 = 5, 3, 3
    d1 = (D - k1 + 1) // 2
    d2 = (d1 - k2 + 1) // 2
    d3 = (d2 - k3 + 1) // 2
    feat_in = 256 * d3 * H * W                 # LazyLinear in_features ((C, D, H, W) flatten)

    raw_params = {
        "w1": 0.2 * jax.random.normal(keys[1], (k1, 64), jnp.float32),
        "b1": 0.1 * jax.random.normal(keys[2], (64,), jnp.float32),
        "w2": 0.05 * jax.random.normal(keys[3], (k2, 64, 128), jnp.float32),
        "b2": 0.05 * jax.random.normal(keys[4], (128,), jnp.float32),
        "w3": 0.05 * jax.random.normal(keys[5], (k3, 128, 256), jnp.float32),
        "b3": 0.05 * jax.random.normal(keys[6], (256,), jnp.float32),
        "wl": 0.02 * jax.random.normal(keys[7], (feat_in, 128), jnp.float32),
        "bl": 0.02 * jax.random.normal(keys[8], (128,), jnp.float32),
        "wf": 0.02 * jax.random.normal(keys[9], (128, n_classes), jnp.float32),
        "bf": 0.02 * jax.random.normal(keys[10], (n_classes,), jnp.float32),
    }
    params = prepare_params(raw_params, D, H, W)

    fwd = jax.jit(sat1_topological_forward)
    out = fwd(x, params)
    jax.block_until_ready(out)
    assert out.shape == (B, n_classes) and out.dtype == jnp.float32

    ref = _reference_forward(x, params)
    assert jnp.allclose(out, ref, atol=5e-2, rtol=5e-2), (out, ref)
    print("KERNEL_OK")
</pallas_src>

<mosaic_0001>
module attributes {stable_mosaic.version = 11 : i64} {
  func.func @_sat1_conv_kernel(%arg0: i32, %arg1: memref<1x768x1xf32, #tpu.memory_space<vmem>>, %arg2: memref<5x64xf32, #tpu.memory_space<vmem>>, %arg3: memref<1x64xf32, #tpu.memory_space<vmem>>, %arg4: memref<192x128xf32, #tpu.memory_space<vmem>>, %arg5: memref<1x128xf32, #tpu.memory_space<vmem>>, %arg6: memref<384x256xf32, #tpu.memory_space<vmem>>, %arg7: memref<1x256xf32, #tpu.memory_space<vmem>>, %arg8: memref<1x32x256xf32, #tpu.memory_space<vmem>>) attributes {dimension_semantics = [#tpu.dimension_semantics<parallel>], iteration_bounds = array<i64: 2>, scalar_prefetch = 0 : i64, scratch_operands = 0 : i64, tpu.core_type = #tpu.core_type<tc>, window_params = [{transform_indices = @transform_0, window_bounds = array<i64: 1, 768, 1>}, {pipeline_mode = #tpu.pipeline_mode<synchronous>, transform_indices = @transform_1, window_bounds = array<i64: 5, 64>}, {pipeline_mode = #tpu.pipeline_mode<synchronous>, transform_indices = @transform_2, window_bounds = array<i64: 1, 64>}, {pipeline_mode = #tpu.pipeline_mode<synchronous>, transform_indices = @transform_3, window_bounds = array<i64: 192, 128>}, {pipeline_mode = #tpu.pipeline_mode<synchronous>, transform_indices = @transform_4, window_bounds = array<i64: 1, 128>}, {pipeline_mode = #tpu.pipeline_mode<synchronous>, transform_indices = @transform_5, window_bounds = array<i64: 384, 256>}, {pipeline_mode = #tpu.pipeline_mode<synchronous>, transform_indices = @transform_6, window_bounds = array<i64: 1, 256>}, {transform_indices = @transform_7, window_bounds = array<i64: 1, 32, 256>}]} {
    %c0 = arith.constant 0 : index
    %c0_0 = arith.constant 0 : index
    %c0_1 = arith.constant 0 : index
    %0 = vector.load %arg1[%c0, %c0_0, %c0_1] : memref<1x768x1xf32, #tpu.memory_space<vmem>>, vector<1x768x1xf32>
    %1 = vector.shape_cast %0 : vector<1x768x1xf32> to vector<768x1xf32>
    %cst = arith.constant 9.990000e+02 : f32
    %2 = vector.broadcast %cst : f32 to vector<768x1xf32>
    %3 = arith.cmpf oeq, %1, %2 : vector<768x1xf32>
    %cst_2 = arith.constant 0.000000e+00 : f32
    %cst_3 = arith.constant 1.000000e+00 : f32
    %4 = vector.broadcast %cst_2 : f32 to vector<768x1xf32>
    %5 = vector.broadcast %cst_3 : f32 to vector<768x1xf32>
    %6 = arith.select %3, %4, %5 : vector<768x1xi1>, vector<768x1xf32>
    %7 = arith.mulf %1, %6 : vector<768x1xf32>
    %8 = vector.extract_strided_slice %6 {offsets = [0, 0], sizes = [640, 1], strides = [1, 1]} : vector<768x1xf32> to vector<640x1xf32>
    %9 = vector.extract_strided_slice %6 {offsets = [32, 0], sizes = [640, 1], strides = [1, 1]} : vector<768x1xf32> to vector<640x1xf32>
    %10 = arith.addf %8, %9 : vector<640x1xf32>
    %11 = vector.extract_strided_slice %6 {offsets = [64, 0], sizes = [640, 1], strides = [1, 1]} : vector<768x1xf32> to vector<640x1xf32>
    %12 = arith.addf %10, %11 : vector<640x1xf32>
    %13 = vector.extract_strided_slice %6 {offsets = [96, 0], sizes = [640, 1], strides = [1, 1]} : vector<768x1xf32> to vector<640x1xf32>
    %14 = arith.addf %12, %13 : vector<640x1xf32>
    %15 = vector.extract_strided_slice %6 {offsets = [128, 0], sizes = [640, 1], strides = [1, 1]} : vector<768x1xf32> to vector<640x1xf32>
    %16 = arith.addf %14, %15 : vector<640x1xf32>
    %cst_4 = arith.constant 0.000000e+00 : f32
    %cst_5 = arith.constant 1.000000e+00 : f32
    %17 = vector.broadcast %cst_4 : f32 to vector<640x1xf32>
    %18 = arith.maximumf %17, %16 : vector<640x1xf32>
    %19 = vector.broadcast %cst_5 : f32 to vector<640x1xf32>
    %20 = arith.minimumf %19, %18 : vector<640x1xf32>
    %cst_6 = arith.constant 9.99999993E-9 : f32
    %21 = vector.broadcast %cst_6 : f32 to vector<640x1xf32>
    %22 = arith.addf %16, %21 : vector<640x1xf32>
    %cst_7 = arith.constant 5.000000e+00 : f32
    %23 = vector.broadcast %cst_7 : f32 to vector<640x1xf32>
    %24 = arith.divf %23, %22 : vector<640x1xf32>
    %25 = arith.mulf %24, %20 : vector<640x1xf32>
    %26 = vector.extract_strided_slice %7 {offsets = [0, 0], sizes = [640, 1], strides = [1, 1]} : vector<768x1xf32> to vector<640x1xf32>
    %c0_8 = arith.constant 0 : index
    %c0_9 = arith.constant 0 : index
    %27 = vector.load %arg2[%c0_8, %c0_9] : memref<5x64xf32, #tpu.memory_space<vmem>>, vector<1x64xf32>
    %28 = vector.broadcast %26 : vector<640x1xf32> to vector<640x64xf32>
    %29 = vector.broadcast %27 : vector<1x64xf32> to vector<640x64xf32>
    %30 = arith.mulf %28, %29 : vector<640x64xf32>
    %31 = vector.extract_strided_slice %7 {offsets = [32, 0], sizes = [640, 1], strides = [1, 1]} : vector<768x1xf32> to vector<640x1xf32>
    %c1 = arith.constant 1 : index
    %c0_10 = arith.constant 0 : index
    %32 = vector.load %arg2[%c1, %c0_10] : memref<5x64xf32, #tpu.memory_space<vmem>>, vector<1x64xf32>
    %33 = vector.broadcast %31 : vector<640x1xf32> to vector<640x64xf32>
    %34 = vector.broadcast %32 : vector<1x64xf32> to vector<640x64xf32>
    %35 = arith.mulf %33, %34 : vector<640x64xf32>
    %36 = arith.addf %30, %35 : vector<640x64xf32>
    %37 = vector.extract_strided_slice %7 {offsets = [64, 0], sizes = [640, 1], strides = [1, 1]} : vector<768x1xf32> to vector<640x1xf32>
    %c2 = arith.constant 2 : index
    %c0_11 = arith.constant 0 : index
    %38 = vector.load %arg2[%c2, %c0_11] : memref<5x64xf32, #tpu.memory_space<vmem>>, vector<1x64xf32>
    %39 = vector.broadcast %37 : vector<640x1xf32> to vector<640x64xf32>
    %40 = vector.broadcast %38 : vector<1x64xf32> to vector<640x64xf32>
    %41 = arith.mulf %39, %40 : vector<640x64xf32>
    %42 = arith.addf %36, %41 : vector<640x64xf32>
    %43 = vector.extract_strided_slice %7 {offsets = [96, 0], sizes = [640, 1], strides = [1, 1]} : vector<768x1xf32> to vector<640x1xf32>
    %c3 = arith.constant 3 : index
    %c0_12 = arith.constant 0 : index
    %44 = vector.load %arg2[%c3, %c0_12] : memref<5x64xf32, #tpu.memory_space<vmem>>, vector<1x64xf32>
    %45 = vector.broadcast %43 : vector<640x1xf32> to vector<640x64xf32>
    %46 = vector.broadcast %44 : vector<1x64xf32> to vector<640x64xf32>
    %47 = arith.mulf %45, %46 : vector<640x64xf32>
    %48 = arith.addf %42, %47 : vector<640x64xf32>
    %49 = vector.extract_strided_slice %7 {offsets = [128, 0], sizes = [640, 1], strides = [1, 1]} : vector<768x1xf32> to vector<640x1xf32>
    %c4 = arith.constant 4 : index
    %c0_13 = arith.constant 0 : index
    %50 = vector.load %arg2[%c4, %c0_13] : memref<5x64xf32, #tpu.memory_space<vmem>>, vector<1x64xf32>
    %51 = vector.broadcast %49 : vector<640x1xf32> to vector<640x64xf32>
    %52 = vector.broadcast %50 : vector<1x64xf32> to vector<640x64xf32>
    %53 = arith.mulf %51, %52 : vector<640x64xf32>
    %54 = arith.addf %48, %53 : vector<640x64xf32>
    %55 = vector.broadcast %25 : vector<640x1xf32> to vector<640x64xf32>
    %56 = arith.mulf %54, %55 : vector<640x64xf32>
    %c0_14 = arith.constant 0 : index
    %c0_15 = arith.constant 0 : index
    %57 = vector.load %arg3[%c0_14, %c0_15] : memref<1x64xf32, #tpu.memory_space<vmem>>, vector<1x64xf32>
    %58 = vector.broadcast %57 : vector<1x64xf32> to vector<640x64xf32>
    %59 = arith.addf %56, %58 : vector<640x64xf32>
    %60 = vector.broadcast %20 : vector<640x1xf32> to vector<640x64xf32>
    %61 = arith.mulf %59, %60 : vector<640x64xf32>
    %cst_16 = arith.constant 0.000000e+00 : f32
    %62 = vector.broadcast %cst_16 : f32 to vector<640x64xf32>
    %63 = arith.maximumf %61, %62 : vector<640x64xf32>
    %64 = vector.shape_cast %63 : vector<640x64xf32> to vector<10x2x32x64xf32>
    %cst_17 = arith.constant dense<0xFF800000> : vector<10x32x64xf32>
    %65 = vector.multi_reduction <maximumf>, %64, %cst_17 [1] : vector<10x2x32x64xf32> to vector<10x32x64xf32>
    %66 = vector.extract_strided_slice %65 {offsets = [0, 0, 0], sizes = [8, 32, 64], strides = [1, 1, 1]} : vector<10x32x64xf32> to vector<8x32x64xf32>
    %67 = vector.shape_cast %66 : vector<8x32x64xf32> to vector<256x64xf32>
    %68 = vector.extract_strided_slice %65 {offsets = [1, 0, 0], sizes = [8, 32, 64], strides = [1, 1, 1]} : vector<10x32x64xf32> to vector<8x32x64xf32>
    %69 = vector.shape_cast %68 : vector<8x32x64xf32> to vector<256x64xf32>
    %70 = vector.extract_strided_slice %65 {offsets = [2, 0, 0], sizes = [8, 32, 64], strides = [1, 1, 1]} : vector<10x32x64xf32> to vector<8x32x64xf32>
    %71 = vector.shape_cast %70 : vector<8x32x64xf32> to vector<256x64xf32>
    %72 = tpu.concatenate %67, %69, %71 in 1 : vector<256x64xf32>, vector<256x64xf32>, vector<256x64xf32> -> vector<256x192xf32>
    %c0_18 = arith.constant 0 : index
    %c0_19 = arith.constant 0 : index
    %73 = vector.load %arg4[%c0_18, %c0_19] : memref<192x128xf32, #tpu.memory_space<vmem>>, vector<192x128xf32>
    %cst_20 = arith.constant dense<0.000000e+00> : vector<256x128xf32>
    %74 = tpu.matmul %72, %73, %cst_20 {dimension_numbers = #tpu.dot_dimension_numbers<[1], [0], [0], [1], [0, 0, 1, 1], [], []>} : vector<256x192xf32>, vector<192x128xf32>, vector<256x128xf32> -> vector<256x128xf32>
    %c0_21 = arith.constant 0 : index
    %c0_22 = arith.constant 0 : index
    %75 = vector.load %arg5[%c0_21, %c0_22] : memref<1x128xf32, #tpu.memory_space<vmem>>, vector<1x128xf32>
    %76 = vector.broadcast %75 : vector<1x128xf32> to vector<256x128xf32>
    %77 = arith.addf %74, %76 : vector<256x128xf32>
    %cst_23 = arith.constant 0.000000e+00 : f32
    %78 = vector.broadcast %cst_23 : f32 to vector<256x128xf32>
    %79 = arith.maximumf %77, %78 : vector<256x128xf32>
    %80 = vector.shape_cast %79 : vector<256x128xf32> to vector<8x32x128xf32>
    %81 = vector.shape_cast %80 : vector<8x32x128xf32> to vector<4x2x32x128xf32>
    %cst_24 = arith.constant dense<0xFF800000> : vector<4x32x128xf32>
    %82 = vector.multi_reduction <maximumf>, %81, %cst_24 [1] : vector<4x2x32x128xf32> to vector<4x32x128xf32>
    %83 = vector.extract_strided_slice %82 {offsets = [0, 0, 0], sizes = [2, 32, 128], strides = [1, 1, 1]} : vector<4x32x128xf32> to vector<2x32x128xf32>
    %84 = vector.shape_cast %83 : vector<2x32x128xf32> to vector<64x128xf32>
    %85 = vector.extract_strided_slice %82 {offsets = [1, 0, 0], sizes = [2, 32, 128], strides = [1, 1, 1]} : vector<4x32x128xf32> to vector<2x32x128xf32>
    %86 = vector.shape_cast %85 : vector<2x32x128xf32> to vector<64x128xf32>
    %87 = vector.extract_strided_slice %82 {offsets = [2, 0, 0], sizes = [2, 32, 128], strides = [1, 1, 1]} : vector<4x32x128xf32> to vector<2x32x128xf32>
    %88 = vector.shape_cast %87 : vector<2x32x128xf32> to vector<64x128xf32>
    %89 = tpu.concatenate %84, %86, %88 in 1 : vector<64x128xf32>, vector<64x128xf32>, vector<64x128xf32> -> vector<64x384xf32>
    %c0_25 = arith.constant 0 : index
    %c0_26 = arith.constant 0 : index
    %90 = vector.load %arg6[%c0_25, %c0_26] : memref<384x256xf32, #tpu.memory_space<vmem>>, vector<384x256xf32>
    %cst_27 = arith.constant dense<0.000000e+00> : vector<64x256xf32>
    %91 = tpu.matmul %89, %90, %cst_27 {dimension_numbers = #tpu.dot_dimension_numbers<[1], [0], [0], [1], [0, 0, 1, 1], [], []>} : vector<64x384xf32>, vector<384x256xf32>, vector<64x256xf32> -> vector<64x256xf32>
    %c0_28 = arith.constant 0 : index
    %c0_29 = arith.constant 0 : index
    %92 = vector.load %arg7[%c0_28, %c0_29] : memref<1x256xf32, #tpu.memory_space<vmem>>, vector<1x256xf32>
    %93 = vector.broadcast %92 : vector<1x256xf32> to vector<64x256xf32>
    %94 = arith.addf %91, %93 : vector<64x256xf32>
    %cst_30 = arith.constant 0.000000e+00 : f32
    %95 = vector.broadcast %cst_30 : f32 to vector<64x256xf32>
    %96 = arith.maximumf %94, %95 : vector<64x256xf32>
    %97 = vector.shape_cast %96 : vector<64x256xf32> to vector<2x32x256xf32>
    %98 = vector.shape_cast %97 : vector<2x32x256xf32> to vector<1x2x32x256xf32>
    %cst_31 = arith.constant dense<0xFF800000> : vector<1x32x256xf32>
    %99 = vector.multi_reduction <maximumf>, %98, %cst_31 [1] : vector<1x2x32x256xf32> to vector<1x32x256xf32>
    %100 = vector.shape_cast %99 : vector<1x32x256xf32> to vector<32x256xf32>
    %c0_32 = arith.constant 0 : index
    %c0_33 = arith.constant 0 : index
    %c0_34 = arith.constant 0 : index
    %101 = vector.load %arg8[%c0_32, %c0_33, %c0_34] : memref<1x32x256xf32, #tpu.memory_space<vmem>>, vector<1x32x256xf32>
    %102 = vector.shape_cast %101 : vector<1x32x256xf32> to vector<32x256xf32>
    %103 = vector.shape_cast %100 : vector<32x256xf32> to vector<1x32x256xf32>
    tpu.vector_store %arg8[%c0_32, %c0_33, %c0_34], %103 {strides = array<i32>} : memref<1x32x256xf32, #tpu.memory_space<vmem>>, vector<1x32x256xf32>,
    return
  }
  func.func @transform_0(%arg0: i32) -> (i32, i32, i32) {
    %c0_i32 = arith.constant 0 : i32
    %c0_i32_0 = arith.constant 0 : i32
    %c0_i32_1 = arith.constant 0 : i32
    return %arg0, %c0_i32, %c0_i32_0 : i32, i32, i32
  }
  func.func @transform_1(%arg0: i32) -> (i32, i32) {
    %c0_i32 = arith.constant 0 : i32
    %c0_i32_0 = arith.constant 0 : i32
    %c0_i32_1 = arith.constant 0 : i32
    return %c0_i32, %c0_i32_0 : i32, i32
  }
  func.func @transform_2(%arg0: i32) -> (i32, i32) {
    %c0_i32 = arith.constant 0 : i32
    %c0_i32_0 = arith.constant 0 : i32
    %c0_i32_1 = arith.constant 0 : i32
    return %c0_i32, %c0_i32_0 : i32, i32
  }
  func.func @transform_3(%arg0: i32) -> (i32, i32) {
    %c0_i32 = arith.constant 0 : i32
    %c0_i32_0 = arith.constant 0 : i32
    %c0_i32_1 = arith.constant 0 : i32
    return %c0_i32, %c0_i32_0 : i32, i32
  }
  func.func @transform_4(%arg0: i32) -> (i32, i32) {
    %c0_i32 = arith.constant 0 : i32
    %c0_i32_0 = arith.constant 0 : i32
    %c0_i32_1 = arith.constant 0 : i32
    return %c0_i32, %c0_i32_0 : i32, i32
  }
  func.func @transform_5(%arg0: i32) -> (i32, i32) {
    %c0_i32 = arith.constant 0 : i32
    %c0_i32_0 = arith.constant 0 : i32
    %c0_i32_1 = arith.constant 0 : i32
    return %c0_i32, %c0_i32_0 : i32, i32
  }
  func.func @transform_6(%arg0: i32) -> (i32, i32) {
    %c0_i32 = arith.constant 0 : i32
    %c0_i32_0 = arith.constant 0 : i32
    %c0_i32_1 = arith.constant 0 : i32
    return %c0_i32, %c0_i32_0 : i32, i32
  }
  func.func @transform_7(%arg0: i32) -> (i32, i32, i32) {
    %c0_i32 = arith.constant 0 : i32
    %c0_i32_0 = arith.constant 0 : i32
    %c0_i32_1 = arith.constant 0 : i32
    return %arg0, %c0_i32, %c0_i32_0 : i32, i32, i32
  }
}

module attributes {stable_mosaic.version = 11 : i64} {
  func.func @_sat1_head_kernel(%arg0: memref<2x8192xf32, #tpu.memory_space<vmem>>, %arg1: memref<8192x128xf32, #tpu.memory_space<vmem>>, %arg2: memref<1x128xf32, #tpu.memory_space<vmem>>, %arg3: memref<128x5xf32, #tpu.memory_space<vmem>>, %arg4: memref<1x5xf32, #tpu.memory_space<vmem>>, %arg5: memref<2x5xf32, #tpu.memory_space<vmem>>) attributes {dimension_semantics = [], scalar_prefetch = 0 : i64, scratch_operands = 0 : i64, tpu.core_type = #tpu.core_type<tc>} {
    %c0 = arith.constant 0 : index
    %c0_0 = arith.constant 0 : index
    %0 = vector.load %arg0[%c0, %c0_0] : memref<2x8192xf32, #tpu.memory_space<vmem>>, vector<2x8192xf32>
    %c0_1 = arith.constant 0 : index
    %c0_2 = arith.constant 0 : index
    %1 = vector.load %arg1[%c0_1, %c0_2] : memref<8192x128xf32, #tpu.memory_space<vmem>>, vector<8192x128xf32>
    %cst = arith.constant dense<0.000000e+00> : vector<2x128xf32>
    %2 = tpu.matmul %0, %1, %cst {dimension_numbers = #tpu.dot_dimension_numbers<[1], [0], [0], [1], [0, 0, 1, 1], [], []>} : vector<2x8192xf32>, vector<8192x128xf32>, vector<2x128xf32> -> vector<2x128xf32>
    %c0_3 = arith.constant 0 : index
    %c0_4 = arith.constant 0 : index
    %3 = vector.load %arg2[%c0_3, %c0_4] : memref<1x128xf32, #tpu.memory_space<vmem>>, vector<1x128xf32>
    %4 = vector.broadcast %3 : vector<1x128xf32> to vector<2x128xf32>
    %5 = arith.addf %2, %4 : vector<2x128xf32>
    %cst_5 = arith.constant 0.000000e+00 : f32
    %6 = vector.broadcast %cst_5 : f32 to vector<2x128xf32>
    %7 = arith.maximumf %5, %6 : vector<2x128xf32>
    %c0_6 = arith.constant 0 : index
    %c0_7 = arith.constant 0 : index
    %8 = vector.load %arg3[%c0_6, %c0_7] : memref<128x5xf32, #tpu.memory_space<vmem>>, vector<128x5xf32>
    %cst_8 = arith.constant dense<0.000000e+00> : vector<2x5xf32>
    %9 = tpu.matmul %7, %8, %cst_8 {dimension_numbers = #tpu.dot_dimension_numbers<[1], [0], [0], [1], [0, 0, 1, 1], [], []>} : vector<2x128xf32>, vector<128x5xf32>, vector<2x5xf32> -> vector<2x5xf32>
    %c0_9 = arith.constant 0 : index
    %c0_10 = arith.constant 0 : index
    %10 = vector.load %arg4[%c0_9, %c0_10] : memref<1x5xf32, #tpu.memory_space<vmem>>, vector<1x5xf32>
    %11 = vector.broadcast %10 : vector<1x5xf32> to vector<2x5xf32>
    %12 = arith.addf %9, %11 : vector<2x5xf32>
    %c0_11 = arith.constant 0 : index
    %c0_12 = arith.constant 0 : index
    %13 = vector.load %arg5[%c0_11, %c0_12] : memref<2x5xf32, #tpu.memory_space<vmem>>, vector<2x5xf32>
    tpu.vector_store %arg5[%c0_11, %c0_12], %12 {strides = array<i32>} : memref<2x5xf32, #tpu.memory_space<vmem>>, vector<2x5xf32>,
    return
  }
}

</mosaic_0001>

<bundles_post_ra>
// kernel: sat1_topological_forward.2
= control target key start
LH: loop header
LB: loop body
LE: loop exit
PB: predicated region body
PF: predicated region fallthrough
CT: control target
= control target key end

     0   :  { %12 = vsyncpa [#allocation3], 0  ;;  %s9755_s0 = inlined_call_operand.vmem [shape: f32[2,768,1], index: 0, kind: input, shape index: {}]   ;;  %s9756_s1 = inlined_call_operand.hbm [shape: f32[5,64], index: 1, kind: input, shape index: {}]   ;;  %s9757_s2 = inlined_call_operand.hbm [shape: f32[1,64], index: 2, kind: input, shape index: {}]   ;;  %s9758_s3 = inlined_call_operand.hbm [shape: f32[192,128], index: 3, kind: input, shape index: {}]   ;;  %s9759_s4 = inlined_call_operand.hbm [shape: f32[1,128], index: 4, kind: input, shape index: {}]   ;;  %s9760_s5 = inlined_call_operand.hbm [shape: f32[384,256], index: 5, kind: input, shape index: {}]   ;;  %s9761_s6 = inlined_call_operand.hbm [shape: f32[1,256], index: 6, kind: input, shape index: {}]   ;;  %s9762_s7 = inlined_call_operand.vmem [shape: f32[2,32,256], index: 7, kind: output, shape index: {}]  }
   0x1   :  { %13 = vsyncpa [#allocation5], 0 }
   0x2   :  { %14 = vsyncpa [#allocation8], 0 }
   0x3   :  { %15 = vsyncpa [#allocation11], 0  ;;  %s5653_s24 = smov 0  }
   0x4 LB: > { %s5599_s25 = smov [#allocation4]   ;;  %s5659_s27 = sadd.s32 4294967295, %s5597_s24   ;;  %s5597_s24 = sphi %s5653_s24, %s21_s24  }
   0x5   : > { %s228_s26 = sshll.u32 %s5599_s25, 4  ;;  %p5031_p0 = scmp.ge.s32.totalorder %s5597_s24, 1  ;;  %s229_s26 = int_to_ptr.vmem [resolvable:$true] %s228_s26 }
   0x6   : > { %p204_p1 = scmp.lt.s32.totalorder %s5597_s24, 3  ;;  %p5135_p2 = scmp.eq.s32.totalorder %s5659_s27, 0 }
   0x7   : > { %s5600_s29 = smov [#allocation7]   ;;  %s5601_s8 = smov [#allocation2]  }
   0x8   : > { %p5664_p3 = pnand %p5031_p0, %p204_p1  ;;  %s252_s30 = sshll.u32 %s5600_s29, 4  ;;  %s5670_s30 = int_to_ptr.vmem [resolvable:$true] %s252_s30 }
   0x9   : > { %s217_s9 = sshll.u32 %s5601_s8, 4  ;;  %s5602_s11 = smov [#allocation6]   ;;  %s5678_s9 = int_to_ptr.vmem [resolvable:$true] %s217_s9 }
   0xa   : > { %p5116_p4 = pneg %p5664_p3  ;;  %s238_s12 = sshll.u32 %s5602_s11, 4  ;;  %s5680_s12 = int_to_ptr.vmem [resolvable:$true] %s238_s12 }
   0xb   : > { %s5430_s14 = scalar_lea.vmem %s229_s26, 16  ;;  %s5437_s15 = scalar_lea.vmem %s229_s26, 32 }
   0xc   : > { %p5674_p5 = pnand %p5135_p2, %p5116_p4  ;;  %p5431_p7 = scmp.ne.s32.totalorder %s229_s26, %s5430_s14 }
   0xd   : > { %p5438_p10 = scmp.lt.s32.totalorder %s229_s26, %s229_s26  ;;  %p5439_p11 = scmp.lt.s32.totalorder %s5437_s15, %s5430_s14 }
   0xe   : > { %p5684_p6 = pneg %p5674_p5 }
   0xf   : > { %p5440_p12 = por %p5439_p11, %p5438_p10 }
  0x10   : > { %p5433_p8 = pnand %p5431_p7, %p5684_p6 }
  0x12   : > { %p5434_p9 = pneg %p5433_p8 }
  0x14   : > { %p5441_p13 = pnand %p5440_p12, %p5434_p9 }
  0x16   : > { %5444 = shalt.err (!%p5441_p13)
}
  0x17   : > { %5122 = dma.hbm_to_vmem [thread:$0]  (!%p5674_p5), %s9757_s2, 16, %s229_s26, [#allocation5]  }
  0x18   : > { %s5456_s18 = scalar_lea.vmem %s5670_s30, 16  ;;  %s5463_s19 = scalar_lea.vmem %s5670_s30, 32 }
  0x19   : > { %p5457_p0 = scmp.ne.s32.totalorder %s5670_s30, %s5456_s18  ;;  %p5464_p7 = scmp.lt.s32.totalorder %s5670_s30, %s5670_s30 }
  0x1a   : > { %p5465_p8 = scmp.lt.s32.totalorder %s5463_s19, %s5456_s18 }
  0x1b   : > { %p5459_p1 = pnand %p5457_p0, %p5684_p6 }
  0x1c   : > { %p5466_p9 = por %p5465_p8, %p5464_p7 }
  0x1d   : > { %p5460_p4 = pneg %p5459_p1 }
  0x1f   : > { %p5467_p10 = pnand %p5466_p9, %p5460_p4 }
  0x21   : > { %5470 = shalt.err (!%p5467_p10)
}
  0x22   : > { %5128 = dma.hbm_to_vmem [thread:$0]  (!%p5674_p5), %s9759_s4, 16, %s5670_s30, [#allocation8]  }
  0x23   : > { %s5482_s22 = scalar_lea.vmem %s5678_s9, 128  ;;  %p5490_p0 = scmp.lt.s32.totalorder %s5678_s9, %s5678_s9 }
  0x24   : > { %p5483_p11 = scmp.ne.s32.totalorder %s5678_s9, %s5482_s22  ;;  %p5491_p1 = scmp.lt.s32.totalorder %s5482_s22, %s5482_s22 }
  0x26   : > { %p5485_p12 = pnand %p5483_p11, %p5684_p6  ;;  %p5492_p4 = por %p5491_p1, %p5490_p0 }
  0x28   : > { %p5486_p13 = pneg %p5485_p12 }
  0x2a   : > { %p5493_p7 = pnand %p5492_p4, %p5486_p13 }
  0x2c   : > { %5496 = shalt.err (!%p5493_p7)
}
  0x2d   : > { %5119 = dma.hbm_to_vmem [thread:$0]  (!%p5674_p5), %s9756_s1, 128, %s5678_s9, [#allocation3]  }
  0x2e   : > { %s5508_s26 = scalar_lea.vmem %s5680_s12, 3072  ;;  %p5516_p11 = scmp.lt.s32.totalorder %s5680_s12, %s5680_s12 }
  0x2f   : > { %p5509_p8 = scmp.ne.s32.totalorder %s5680_s12, %s5508_s26  ;;  %p5517_p12 = scmp.lt.s32.totalorder %s5508_s26, %s5508_s26 }
  0x31   : > { %p5511_p9 = pnand %p5509_p8, %p5684_p6  ;;  %p5518_p13 = por %p5517_p12, %p5516_p11 }
  0x33   : > { %p5512_p10 = pneg %p5511_p9 }
  0x35   : > { %p5519_p0 = pnand %p5518_p13, %p5512_p10 }
  0x37   : > { %5522 = shalt.err (!%p5519_p0)
}
  0x38   : > { %s5603_s29 = smov 128   ;;  %s5604_s30 = smov 8  }
  0x39   : > { %5125 = dma.hbm_to_vmem [thread:$0]  (!%p5674_p5), %s9758_s3, 3072, %s5680_s12, [#allocation5], %s5603_s29, %s5603_s29, %s5604_s30  }
  0x3a   : > { %s5605_s9 = smov [#allocation9]  }
  0x3b   : > { %s262_s14 = sshll.u32 %s5605_s9, 4  ;;  %s263_s14 = int_to_ptr.vmem [resolvable:$true] %s262_s14 }
  0x3c   : > { %s5534_s15 = scalar_lea.vmem %s263_s14, 12288  ;;  %p5542_p8 = scmp.lt.s32.totalorder %s263_s14, %s263_s14 }
  0x3d   : > { %p5535_p1 = scmp.ne.s32.totalorder %s263_s14, %s5534_s15  ;;  %p5543_p9 = scmp.lt.s32.totalorder %s5534_s15, %s5534_s15 }
  0x3f   : > { %p5537_p4 = pnand %p5535_p1, %p5684_p6  ;;  %p5544_p10 = por %p5543_p9, %p5542_p8 }
  0x41   : > { %p5538_p7 = pneg %p5537_p4 }
  0x43   : > { %p5545_p11 = pnand %p5544_p10, %p5538_p7 }
  0x45   : > { %5548 = shalt.err (!%p5545_p11)
}
  0x46   : > { %s5606_s16 = smov 256   ;;  %s5607_s17 = smov 16  }
  0x47   : > { %5131 = dma.hbm_to_vmem [thread:$0]  (!%p5674_p5), %s9760_s5, 12288, %s263_s14, [#allocation8], %s5606_s16, %s5606_s16, %s5607_s17  }
  0x48   : > { %s5608_s19 = smov [#allocation10]  }
  0x49   : > { %s276_s20 = sshll.u32 %s5608_s19, 4  ;;  %s277_s20 = int_to_ptr.vmem [resolvable:$true] %s276_s20 }
  0x4a   : > { %s5560_s21 = scalar_lea.vmem %s277_s20, 32  ;;  %p5568_p1 = scmp.lt.s32.totalorder %s277_s20, %s277_s20 }
  0x4b   : > { %p5561_p12 = scmp.ne.s32.totalorder %s277_s20, %s5560_s21  ;;  %p5569_p4 = scmp.lt.s32.totalorder %s5560_s21, %s5560_s21 }
  0x4d   : > { %p5563_p13 = pnand %p5561_p12, %p5684_p6  ;;  %p5570_p7 = por %p5569_p4, %p5568_p1 }
  0x4f   : > { %p5564_p0 = pneg %p5563_p13 }
  0x51   : > { %p5571_p8 = pnand %p5570_p7, %p5564_p0 }
  0x53   : > { %5574 = shalt.err (!%p5571_p8)
}
  0x54   : > { %5134 = dma.hbm_to_vmem [thread:$0]  (!%p5674_p5), %s9761_s6, 32, %s277_s20, [#allocation11]  }
  0x55   : > { %297 = sbr.rel (%p5664_p3) target bundleno = 1265 (0x4f1), region = 48 }
  0x5a   : > { %5580 = dma.done.wait (%p5135_p2), [#allocation3], 128  }
  0x5b   : > { %5582 = vsyncadd (%p5135_p2), [#allocation3], 4294967168 }
  0x5c   : > { %5584 = dma.done.wait (%p5135_p2), [#allocation5], 3088  }
  0x5d   : > { %5586 = vsyncadd (%p5135_p2), [#allocation5], 4294964208 }
  0x5e   : > { %5588 = dma.done.wait (%p5135_p2), [#allocation8], 12304  }
  0x5f   : > { %5590 = vsyncadd (%p5135_p2), [#allocation8], 4294954992 }
  0x60   : > { %5592 = dma.done.wait (%p5135_p2), [#allocation11], 32  }
  0x61   : > { %5594 = vsyncadd (%p5135_p2), [#allocation11], 4294967264  ;;  %p349_p3 = scmp.lt.s32.totalorder %s5659_s27, 1  ;;  %v5609_v0 = vmov 0   ;;  %v9771_v7 = vmov 1.0   ;;  %s5612_s26 = smov 64  }
  0x62   : > { %5170 = vset.pattern.permute.xlu1 %v5609_v0  ;;  %5169 = vset.pattern.permute.xlu0 %v5609_v0 }
  0x63   : > { %s10981_s27 = smov (!%p349_p3, %s5659_s27), 1 }
  0x64   : > { %s5091_s28 = smul.u32 768, %s10981_s27  ;;  %s5090_s29 = sshll.u32 %s10981_s27, 6 }
  0x65   : > { %s9740_s11 = scalar_lea.vmem %s9762_s7, %s5090_s29 }
  0x66   : > { %s5772_s25 = scalar_lea.vmem %s9755_s0, %s5091_s28 }
  0x67   : > { %v361_v1 = vld [vmem:[%s5772_s25 + $0x10] sm:$0xff]  ;;  %v359_v3 = vld [vmem:[%s5772_s25] sm:$0xff]  ;;  %v362_v5 = vld [vmem:[%s5772_s25 + $0x18] sm:$0xff] }
  0x68   : > { %v365_v2 = vld [vmem:[%s5772_s25 + $0x30] sm:$0xff]  ;;  %vm457_vm0 = vcmp.eq.f32.partialorder %v361_v1, 999.0  ;;  %v363_v4 = vld [vmem:[%s5772_s25 + $0x20] sm:$0xff]  ;;  %vm455_vm2 = vcmp.eq.f32.partialorder %v359_v3, 999.0  ;;  %v360_v6 = vld [vmem:[%s5772_s25 + $0x8] sm:$0xff]  ;;  %vm458_vm4 = vcmp.eq.f32.partialorder %v362_v5, 999.0 }
  0x69   : > { %vm461_vm1 = vcmp.eq.f32.partialorder %v365_v2, 999.0  ;;  %v553_v8 = vsel %vm457_vm0, 0.0, %v9771_v7  ;;  %vm459_vm3 = vcmp.eq.f32.partialorder %v363_v4, 999.0  ;;  %v551_v10 = vsel %vm455_vm2, 0.0, %v9771_v7  ;;  %v364_v11 = vld [vmem:[%s5772_s25 + $0x28] sm:$0xff]  ;;  %v366_v17 = vld [vmem:[%s5772_s25 + $0x38] sm:$0xff] }
  0x6a   : > { %v557_v9 = vsel %vm461_vm1, 0.0, %v9771_v7  ;;  %v649_v12 = vmul.f32 %v553_v8, %v361_v1  ;;  %v555_v14 = vsel %vm459_vm3, 0.0, %v9771_v7  ;;  %v647_v15 = vmul.f32 %v551_v10, %v359_v3  ;;  %v368_v18 = vld [vmem:[%s5772_s25 + $0x48] sm:$0xff]  ;;  %v367_v19 = vld [vmem:[%s5772_s25 + $0x40] sm:$0xff]  ;;  %v370_v23 = vld [vmem:[%s5772_s25 + $0x58] sm:$0xff] }
  0x6b   : > { %v745_v13 = vadd.f32 %v557_v9, %v553_v8  ;;  %v743_v16 = vadd.f32 %v555_v14, %v551_v10  ;;  %vm456_vm5 = vcmp.eq.f32.partialorder %v360_v6, 999.0  ;;  %vm460_vm6 = vcmp.eq.f32.partialorder %v364_v11, 999.0  ;;  %v369_v33 = vld [vmem:[%s5772_s25 + $0x50] sm:$0xff]  ;;  %v374_v34 = vld [vmem:[%s5772_s25 + $0x78] sm:$0xff]  ;;  %v372_v48 = vld [vmem:[%s5772_s25 + $0x68] sm:$0xff] }
  0x6c   : > { %1556 = vperm.xlu1 %5170, %v649_v12   ;;  %1546 = vperm.xlu0 %5169, %v647_v15   ;;  %v554_v20 = vsel %vm458_vm4, 0.0, %v9771_v7  ;;  %v552_v21 = vsel %vm456_vm5, 0.0, %v9771_v7  ;;  %v556_v22 = vsel %vm460_vm6, 0.0, %v9771_v7  ;;  %vm462_vm7 = vcmp.eq.f32.partialorder %v366_v17, 999.0  ;;  %v373_v47 = vld [vmem:[%s5772_s25 + $0x70] sm:$0xff]  ;;  %v371_v50 = vld [vmem:[%s5772_s25 + $0x60] sm:$0xff] }
  0x6d   : > { %v650_v24 = vmul.f32 %v554_v20, %v362_v5  ;;  %v648_v25 = vmul.f32 %v552_v21, %v360_v6  ;;  %v744_v26 = vadd.f32 %v556_v22, %v552_v21  ;;  %vm464_vm8 = vcmp.eq.f32.partialorder %v368_v18, 999.0  ;;  %v376_v0 = vld [vmem:[%s5772_s25 + $0x88] sm:$0xff]  ;;  %v375_v1 = vld [vmem:[%s5772_s25 + $0x80] sm:$0xff]  ;;  %v377_v5 = vld [vmem:[%s5772_s25 + $0x90] sm:$0xff] }
  0x6e   : > { %vm463_vm9 = vcmp.eq.f32.partialorder %v367_v19, 999.0  ;;  %v651_v27 = vmul.f32 %v555_v14, %v363_v4  ;;  %v558_v28 = vsel %vm462_vm7, 0.0, %v9771_v7  ;;  %vm466_vm10 = vcmp.eq.f32.partialorder %v370_v23, 999.0  ;;  %v378_v4 = vld [vmem:[%s5772_s25 + $0x98] sm:$0xff]  ;;  %v379_v12 = vld [vmem:[%s5772_s25 + $0xa0] sm:$0xff] }
  0x6f   : > { %v652_v29 = vmul.f32 %v556_v22, %v364_v11  ;;  %v746_v30 = vadd.f32 %v558_v28, %v554_v20  ;;  %v5794_v31 = vsel %vm464_vm8, 0.0, %v9771_v7  ;;  %v5797_v32 = vsel %vm463_vm9, 0.0, %v9771_v7  ;;  %v380_v11 = vld [vmem:[%s5772_s25 + $0xa8] sm:$0xff] }
  0x70   : > { %1561 = vperm.xlu1 %5170, %v650_v24   ;;  %1551 = vperm.xlu0 %5169, %v648_v25   ;;  %v5802_v35 = vadd.f32 %v5794_v31, %v556_v22  ;;  %v5805_v36 = vadd.f32 %v744_v26, %v5794_v31  ;;  %v5808_v37 = vadd.f32 %v5797_v32, %v555_v14  ;;  %v562_v38 = vsel %vm466_vm10, 0.0, %v9771_v7  ;;  %v383_v24 = vld [vmem:[%s5772_s25 + $0xc0] sm:$0xff] }
  0x71   : > { %v5812_v39 = vadd.f32 %v743_v16, %v5797_v32  ;;  %v750_v40 = vadd.f32 %v562_v38, %v558_v28  ;;  %v826_v41 = vadd.f32 %v746_v30, %v562_v38  ;;  %vm465_vm11 = vcmp.eq.f32.partialorder %v369_v33, 999.0  ;;  %v385_v30 = vld [vmem:[%s5772_s25 + $0xd0] sm:$0xff] }
  0x72   : > { %10136 = vst [vmem:[#allocation16_spill] sm:$0xff] %v5805_v36  ;;  %vm470_vm12 = vcmp.eq.f32.partialorder %v374_v34, 999.0  ;;  %v654_v42 = vmul.f32 %v558_v28, %v366_v17  ;;  %v653_v43 = vmul.f32 %v557_v9, %v365_v2  ;;  %v561_v44 = vsel %vm465_vm11, 0.0, %v9771_v7  ;;  %v382_v17 = vld [vmem:[%s5772_s25 + $0xb8] sm:$0xff]  ;;  %v6037_v36 = vld [vmem:[%s5772_s25 + $0x268] sm:$0xff] }
  0x73   : > { %10137 = vst [vmem:[#allocation17_spill] sm:$0xff] %v5812_v39  ;;  %v749_v45 = vadd.f32 %v561_v44, %v557_v9  ;;  %v825_v46 = vadd.f32 %v745_v13, %v561_v44  ;;  %v5818_v49 = vsel %vm470_vm12, 0.0, %v9771_v7  ;;  %v656_v53 = vmul.f32 %v5794_v31, %v368_v18  ;;  %v381_v18 = vld [vmem:[%s5772_s25 + $0xb0] sm:$0xff] }
  0x74   : > { %1571 = vperm.xlu1 %5170, %v652_v29   ;;  %1566 = vperm.xlu0 %5169, %v651_v27   ;;  %v5822_v51 = vadd.f32 %v5818_v49, %v562_v38  ;;  %v5825_v52 = vadd.f32 %v750_v40, %v5818_v49  ;;  %v655_v54 = vmul.f32 %v5797_v32, %v367_v19  ;;  %vm469_vm13 = vcmp.eq.f32.partialorder %v373_v47, 999.0  ;;  %v386_v29 = vld [vmem:[%s5772_s25 + $0xd8] sm:$0xff]  ;;  %v6034_v39 = vld [vmem:[%s5772_s25 + $0x250] sm:$0xff] }
  0x75   : > { %v5830_v55 = vadd.f32 %v826_v41, %v5818_v49  ;;  %vm468_vm14 = vcmp.eq.f32.partialorder %v372_v48, 999.0  ;;  %v5833_v56 = vsel %vm469_vm13, 0.0, %v9771_v7  ;;  %vm467_vm15 = vcmp.eq.f32.partialorder %v371_v50, 999.0  ;;  %v388_v41 = vld [vmem:[%s5772_s25 + $0xe8] sm:$0xff] }
  0x76   : > { %10138 = vst [vmem:[#allocation18_spill] sm:$0xff] %v5822_v51  ;;  %10139 = vst [vmem:[#allocation19_spill] sm:$0xff] %v5825_v52  ;;  %v5836_v57 = vadd.f32 %v5833_v56, %v561_v44  ;;  %v5839_v58 = vadd.f32 %v749_v45, %v5833_v56  ;;  %v5842_v59 = vadd.f32 %v825_v46, %v5833_v56  ;;  %v5845_v62 = vsel %vm468_vm14, 0.0, %v9771_v7 }
  0x77   : > { %10140 = vst [vmem:[#allocation20_spill] sm:$0xff] %v5830_v55  ;;  %v658_v60 = vmul.f32 %v562_v38, %v370_v23  ;;  %v657_v61 = vmul.f32 %v561_v44, %v369_v33  ;;  %v5848_v63 = vsel %vm467_vm15, 0.0, %v9771_v7  ;;  %v660_v2 = vmul.f32 %v5845_v62, %v372_v48  ;;  %v384_v23 = vld [vmem:[%s5772_s25 + $0xc8] sm:$0xff]  ;;  %v389_v48 = vld [vmem:[%s5772_s25 + $0xf0] sm:$0xff]  ;;  %v6031_v55 = vld [vmem:[%s5772_s25 + $0x258] sm:$0xff] }
  0x78   : > { %1581 = vperm.xlu1 %5170, %v654_v42   ;;  %1576 = vperm.xlu0 %5169, %v653_v43   ;;  %10141 = vst [vmem:[#allocation21_spill] sm:$0xff] %v5836_v57  ;;  %10142 = vst [vmem:[#allocation22_spill] sm:$0xff] %v5839_v58  ;;  %v659_v3 = vmul.f32 %v5848_v63, %v371_v50  ;;  %vm472_vm0 = vcmp.eq.f32.partialorder %v376_v0, 999.0  ;;  %vm471_vm1 = vcmp.eq.f32.partialorder %v375_v1, 999.0  ;;  %vm474_vm2 = vcmp.eq.f32.partialorder %v378_v4, 999.0  ;;  %v387_v42 = vld [vmem:[%s5772_s25 + $0xe0] sm:$0xff] }
  0x79   : > { %10143 = vst [vmem:[#allocation23_spill] sm:$0xff] %v5842_v59  ;;  %v662_v6 = vmul.f32 %v5818_v49, %v374_v34  ;;  %v661_v8 = vmul.f32 %v5833_v56, %v373_v47  ;;  %v5859_v9 = vsel %vm472_vm0, 0.0, %v9771_v7  ;;  %v5862_v10 = vsel %vm471_vm1, 0.0, %v9771_v7  ;;  %v390_v47 = vld [vmem:[%s5772_s25 + $0xf8] sm:$0xff] }
  0x7a   : > { %vm473_vm3 = vcmp.eq.f32.partialorder %v377_v5, 999.0  ;;  %v664_v13 = vmul.f32 %v5859_v9, %v376_v0  ;;  %v663_v14 = vmul.f32 %v5862_v10, %v375_v1  ;;  %v5869_v15 = vsel %vm474_vm2, 0.0, %v9771_v7  ;;  %v391_v0 = vld [vmem:[%s5772_s25 + $0x100] sm:$0xff] }
  0x7b   : > { %v5872_v16 = vsel %vm473_vm3, 0.0, %v9771_v7  ;;  %vm476_vm4 = vcmp.eq.f32.partialorder %v380_v11, 999.0  ;;  %vm475_vm5 = vcmp.eq.f32.partialorder %v379_v12, 999.0  ;;  %v666_v19 = vmul.f32 %v5869_v15, %v378_v4 }
  0x7c   : > { %1591 = vperm.xlu1 %5170, %v656_v53   ;;  %1586 = vperm.xlu0 %5169, %v655_v54   ;;  %v665_v20 = vmul.f32 %v5872_v16, %v377_v5  ;;  %v5879_v21 = vsel %vm476_vm4, 0.0, %v9771_v7  ;;  %v5882_v22 = vsel %vm475_vm5, 0.0, %v9771_v7  ;;  %vm478_vm6 = vcmp.eq.f32.partialorder %v382_v17, 999.0  ;;  %v394_v5 = vld [vmem:[%s5772_s25 + $0x118] sm:$0xff] }
  0x7d   : > { %vm477_vm7 = vcmp.eq.f32.partialorder %v381_v18, 999.0  ;;  %v668_v25 = vmul.f32 %v5879_v21, %v380_v11  ;;  %v667_v26 = vmul.f32 %v5882_v22, %v379_v12  ;;  %v5889_v27 = vsel %vm478_vm6, 0.0, %v9771_v7 }
  0x7e   : > { %v5892_v28 = vsel %vm477_vm7, 0.0, %v9771_v7  ;;  %vm480_vm8 = vcmp.eq.f32.partialorder %v384_v23, 999.0  ;;  %vm479_vm9 = vcmp.eq.f32.partialorder %v383_v24, 999.0  ;;  %v670_v33 = vmul.f32 %v5889_v27, %v382_v17  ;;  %v395_v17 = vld [vmem:[%s5772_s25 + $0x120] sm:$0xff] }
  0x7f   : > { %v669_v34 = vmul.f32 %v5892_v28, %v381_v18  ;;  %v5899_v38 = vsel %vm480_vm8, 0.0, %v9771_v7  ;;  %v5902_v40 = vsel %vm479_vm9, 0.0, %v9771_v7  ;;  %vm482_vm10 = vcmp.eq.f32.partialorder %v386_v29, 999.0 }
  0x80   : > { %1601 = vperm.xlu1 %5170, %v658_v60   ;;  %1596 = vperm.xlu0 %5169, %v657_v61   ;;  %vm481_vm11 = vcmp.eq.f32.partialorder %v385_v30, 999.0  ;;  %v672_v43 = vmul.f32 %v5899_v38, %v384_v23  ;;  %v671_v44 = vmul.f32 %v5902_v40, %v383_v24  ;;  %v5909_v45 = vsel %vm482_vm10, 0.0, %v9771_v7  ;;  %v392_v61 = vld [vmem:[%s5772_s25 + $0x108] sm:$0xff]  ;;  %v398_v24 = vld [vmem:[%s5772_s25 + $0x138] sm:$0xff] }
  0x81   : > { %v5912_v46 = vsel %vm481_vm11, 0.0, %v9771_v7  ;;  %vm484_vm12 = vcmp.eq.f32.partialorder %v388_v41, 999.0  ;;  %vm483_vm13 = vcmp.eq.f32.partialorder %v387_v42, 999.0  ;;  %v674_v50 = vmul.f32 %v5909_v45, %v386_v29 }
  0x82   : > { %10144 = vst [vmem:[#allocation24_spill] sm:$0xff] %v5912_v46  ;;  %v673_v53 = vmul.f32 %v5912_v46, %v385_v30  ;;  %v5919_v54 = vsel %vm484_vm12, 0.0, %v9771_v7  ;;  %v5922_v60 = vsel %vm483_vm13, 0.0, %v9771_v7  ;;  %vm486_vm14 = vcmp.eq.f32.partialorder %v390_v47, 999.0 }
  0x83   : > { %10145 = vst [vmem:[#allocation25_spill] sm:$0xff] %v5919_v54  ;;  %10146 = vst [vmem:[#allocation26_spill] sm:$0xff] %v5922_v60  ;;  %vm485_vm15 = vcmp.eq.f32.partialorder %v389_v48, 999.0  ;;  %v676_v1 = vmul.f32 %v5919_v54, %v388_v41  ;;  %vm488_vm0 = vcmp.eq.f32.partialorder %v392_v61, 999.0  ;;  %vm487_vm1 = vcmp.eq.f32.partialorder %v391_v0, 999.0  ;;  %v399_v41 = vld [vmem:[%s5772_s25 + $0x140] sm:$0xff] }
  0x84   : > { %1611 = vperm.xlu1 %5170, %v660_v2   ;;  %1606 = vperm.xlu0 %5169, %v659_v3   ;;  %v675_v2 = vmul.f32 %v5922_v60, %v387_v42  ;;  %v5929_v3 = vsel %vm486_vm14, 0.0, %v9771_v7  ;;  %v5932_v4 = vsel %vm485_vm15, 0.0, %v9771_v7  ;;  %v5939_v12 = vsel %vm488_vm0, 0.0, %v9771_v7  ;;  %v6230_v54 = vld [vmem:[%s5772_s25 + $0x2e8] sm:$0xff] }
  0x85   : > { %10147 = vst [vmem:[#allocation27_spill] sm:$0xff] %v5929_v3  ;;  %10148 = vst [vmem:[#allocation28_spill] sm:$0xff] %v5932_v4  ;;  %v677_v11 = vmul.f32 %v5932_v4, %v389_v48  ;;  %vm490_vm2 = vcmp.eq.f32.partialorder %v394_v5, 999.0  ;;  %v680_v18 = vmul.f32 %v5939_v12, %v392_v61  ;;  %vm491_vm5 = vcmp.eq.f32.partialorder %v395_v17, 999.0  ;;  %v403_v61 = vld [vmem:[%s5772_s25 + $0x160] sm:$0xff] }
  0x86   : > { %10149 = vst [vmem:[#allocation29_spill] sm:$0xff] %v5939_v12  ;;  %vm494_vm6 = vcmp.eq.f32.partialorder %v398_v24, 999.0  ;;  %vm495_vm9 = vcmp.eq.f32.partialorder %v399_v41, 999.0  ;;  %vm499_vm13 = vcmp.eq.f32.partialorder %v403_v61, 999.0  ;;  %10203 = vst [vmem:[#allocation82_spill] sm:$0xff] %v6230_v54 }
  0x88   : > { %1621 = vperm.xlu1 %5170, %v662_v6   ;;  %1616 = vperm.xlu0 %5169, %v661_v8   ;;  %v393_v6 = vld [vmem:[%s5772_s25 + $0x110] sm:$0xff]  ;;  %v678_v8 = vmul.f32 %v5929_v3, %v390_v47  ;;  %v402_v47 = vld [vmem:[%s5772_s25 + $0x158] sm:$0xff] }
  0x89   : > { %vm489_vm3 = vcmp.eq.f32.partialorder %v393_v6, 999.0  ;;  %vm498_vm10 = vcmp.eq.f32.partialorder %v402_v47, 999.0 }
  0x8a   : > { %v5952_v23 = vsel %vm489_vm3, 0.0, %v9771_v7 }
  0x8b   : > { %10152 = vst [vmem:[#allocation32_spill] sm:$0xff] %v5952_v23  ;;  %v681_v29 = vmul.f32 %v5952_v23, %v393_v6  ;;  %v408_v6 = vld [vmem:[%s5772_s25 + $0x188] sm:$0xff] }
  0x8c   : > { %1631 = vperm.xlu1 %5170, %v664_v13   ;;  %1626 = vperm.xlu0 %5169, %v663_v14   ;;  %v5942_v13 = vsel %vm487_vm1, 0.0, %v9771_v7  ;;  %v396_v14 = vld [vmem:[%s5772_s25 + $0x128] sm:$0xff]  ;;  %vm504_vm0 = vcmp.eq.f32.partialorder %v408_v6, 999.0 }
  0x8d   : > { %10150 = vst [vmem:[#allocation30_spill] sm:$0xff] %v5942_v13  ;;  %vm492_vm4 = vcmp.eq.f32.partialorder %v396_v14, 999.0 }
  0x8e   : > { %v5959_v30 = vsel %vm492_vm4, 0.0, %v9771_v7 }
  0x8f   : > { %10153 = vst [vmem:[#allocation33_spill] sm:$0xff] %v5959_v30  ;;  %v684_v42 = vmul.f32 %v5959_v30, %v396_v14  ;;  %v5988_v14 = vsel %vm495_vm9, 0.0, %v9771_v7 }
  0x90   : > { %1641 = vperm.xlu1 %5170, %v666_v19   ;;  %1636 = vperm.xlu0 %5169, %v665_v20   ;;  %v679_v19 = vmul.f32 %v5942_v13, %v391_v0  ;;  %v5949_v20 = vsel %vm490_vm2, 0.0, %v9771_v7  ;;  %v406_v0 = vld [vmem:[%s5772_s25 + $0x178] sm:$0xff]  ;;  %10158 = vst [vmem:[#allocation38_spill] sm:$0xff] %v5988_v14 }
  0x91   : > { %10151 = vst [vmem:[#allocation31_spill] sm:$0xff] %v5949_v20  ;;  %vm502_vm14 = vcmp.eq.f32.partialorder %v406_v0, 999.0 }
  0x94   : > { %1651 = vperm.xlu1 %5170, %v668_v25   ;;  %1646 = vperm.xlu0 %5169, %v667_v26   ;;  %v397_v25 = vld [vmem:[%s5772_s25 + $0x130] sm:$0xff]  ;;  %v682_v26 = vmul.f32 %v5949_v20, %v394_v5 }
  0x95   : > { %vm493_vm7 = vcmp.eq.f32.partialorder %v397_v25, 999.0 }
  0x96   : > { %v5973_v48 = vsel %vm493_vm7, 0.0, %v9771_v7  ;;  %vm529_vm7 = vcmp.eq.f32.partialorder %v6034_v39, 999.0 }
  0x97   : > { %10156 = vst [vmem:[#allocation36_spill] sm:$0xff] %v5973_v48 }
  0x98   : > { %1661 = vperm.xlu1 %5170, %v670_v33   ;;  %1656 = vperm.xlu0 %5169, %v669_v34   ;;  %v5962_v33 = vsel %vm491_vm5, 0.0, %v9771_v7  ;;  %v400_v34 = vld [vmem:[%s5772_s25 + $0x148] sm:$0xff] }
  0x99   : > { %10154 = vst [vmem:[#allocation34_spill] sm:$0xff] %v5962_v33  ;;  %vm496_vm8 = vcmp.eq.f32.partialorder %v400_v34, 999.0 }
  0x9a   : > { %v5982_v5 = vsel %vm496_vm8, 0.0, %v9771_v7  ;;  %vm532_vm8 = vcmp.eq.f32.partialorder %v6037_v36, 999.0 }
  0x9b   : > { %10157 = vst [vmem:[#allocation37_spill] sm:$0xff] %v5982_v5 }
  0x9c   : > { %1671 = vperm.xlu1 %5170, %v672_v43   ;;  %1666 = vperm.xlu0 %5169, %v671_v44   ;;  %v683_v43 = vmul.f32 %v5962_v33, %v395_v17  ;;  %v5969_v44 = vsel %vm494_vm6, 0.0, %v9771_v7  ;;  %v410_v17 = vld [vmem:[%s5772_s25 + $0x198] sm:$0xff]  ;;  %vm530_vm6 = vcmp.eq.f32.partialorder %v6031_v55, 999.0 }
  0x9d   : > { %10155 = vst [vmem:[#allocation35_spill] sm:$0xff] %v5969_v44  ;;  %vm506_vm2 = vcmp.eq.f32.partialorder %v410_v17, 999.0 }
  0x9e   : > { %v6028_v59 = vsel %vm506_vm2, 0.0, %v9771_v7 }
  0x9f   : > { %10167 = vst [vmem:[#allocation47_spill] sm:$0xff] %v6028_v59 }
  0xa0   : > { %1681 = vperm.xlu1 %5170, %v674_v50   ;;  %1676 = vperm.xlu0 %5169, %v673_v53   ;;  %v401_v50 = vld [vmem:[%s5772_s25 + $0x150] sm:$0xff]  ;;  %v404_v53 = vld [vmem:[%s5772_s25 + $0x168] sm:$0xff] }
  0xa1   : > { %vm497_vm11 = vcmp.eq.f32.partialorder %v401_v50, 999.0  ;;  %vm500_vm12 = vcmp.eq.f32.partialorder %v404_v53, 999.0 }
  0xa4   : > { %1691 = vperm.xlu1 %5170, %v676_v1   ;;  %1686 = vperm.xlu0 %5169, %v675_v2   ;;  %v405_v1 = vld [vmem:[%s5772_s25 + $0x170] sm:$0xff]  ;;  %v686_v2 = vmul.f32 %v5969_v44, %v398_v24  ;;  %v5994_v24 = vsel %vm498_vm10, 0.0, %v9771_v7  ;;  %v6152_v44 = vld [vmem:[%s5772_s25 + $0x2c8] sm:$0xff] }
  0xa5   : > { %vm501_vm15 = vcmp.eq.f32.partialorder %v405_v1, 999.0  ;;  %10159 = vst [vmem:[#allocation39_spill] sm:$0xff] %v5994_v24  ;;  %v690_v51 = vmul.f32 %v5994_v24, %v402_v47  ;;  %v6056_v24 = vld [vmem:[%s5772_s25 + $0x270] sm:$0xff]  ;;  %10187 = vst [vmem:[#allocation66_spill] sm:$0xff] %v6152_v44 }
  0xa6   : > { %10170 = vst [vmem:[#allocation50_spill] sm:$0xff] %v6056_v24 }
  0xa8   : > { %1701 = vperm.xlu1 %5170, %v678_v8   ;;  %1696 = vperm.xlu0 %5169, %v677_v11   ;;  %v407_v8 = vld [vmem:[%s5772_s25 + $0x180] sm:$0xff]  ;;  %v685_v11 = vmul.f32 %v5973_v48, %v397_v25  ;;  %v687_v25 = vmul.f32 %v5988_v14, %v399_v41  ;;  %v6010_v41 = vsel %vm501_vm15, 0.0, %v9771_v7 }
  0xa9   : > { %vm503_vm1 = vcmp.eq.f32.partialorder %v407_v8, 999.0  ;;  %10164 = vst [vmem:[#allocation44_spill] sm:$0xff] %v6010_v41 }
  0xaa   : > { %v6016_v57 = vsel %vm503_vm1, 0.0, %v9771_v7 }
  0xab   : > { %10166 = vst [vmem:[#allocation46_spill] sm:$0xff] %v6016_v57 }
  0xac   : > { %1711 = vperm.xlu1 %5170, %v680_v18   ;;  %1706 = vperm.xlu0 %5169, %v679_v19   ;;  %v409_v18 = vld [vmem:[%s5772_s25 + $0x190] sm:$0xff]  ;;  %v688_v19 = vmul.f32 %v5982_v5, %v400_v34  ;;  %v6004_v34 = vsel %vm499_vm13, 0.0, %v9771_v7 }
  0xad   : > { %10162 = vst [vmem:[#allocation42_spill] sm:$0xff] %v6004_v34  ;;  %vm505_vm3 = vcmp.eq.f32.partialorder %v409_v18, 999.0  ;;  %v691_v14 = vmul.f32 %v6004_v34, %v403_v61 }
  0xb0   : > { %1721 = vperm.xlu1 %5170, %v682_v26   ;;  %1716 = vperm.xlu0 %5169, %v681_v29   ;;  %v5998_v26 = vsel %vm497_vm11, 0.0, %v9771_v7  ;;  %v6001_v29 = vsel %vm500_vm12, 0.0, %v9771_v7  ;;  %vm533_vm11 = vcmp.eq.f32.partialorder %v6056_v24, 999.0  ;;  %v6168_v24 = vld [vmem:[%s5772_s25 + $0x2c0] sm:$0xff] }
  0xb1   : > { %10160 = vst [vmem:[#allocation40_spill] sm:$0xff] %v5998_v26  ;;  %10161 = vst [vmem:[#allocation41_spill] sm:$0xff] %v6001_v29  ;;  %v689_v58 = vmul.f32 %v5998_v26, %v401_v50  ;;  %v692_v52 = vmul.f32 %v6001_v29, %v404_v53  ;;  %v6044_v50 = vmul.f32 %v6010_v41, %v405_v1  ;;  %v6047_v53 = vsel %vm505_vm3, 0.0, %v9771_v7  ;;  %v6050_v29 = vld [vmem:[%s5772_s25 + $0x260] sm:$0xff]  ;;  %v6053_v26 = vld [vmem:[%s5772_s25 + $0x278] sm:$0xff] }
  0xb2   : > { %10168 = vst [vmem:[#allocation48_spill] sm:$0xff] %v6047_v53  ;;  %10169 = vst [vmem:[#allocation49_spill] sm:$0xff] %v6053_v26  ;;  %v6065_v1 = vld [vmem:[%s5772_s25 + $0x1a8] sm:$0xff]  ;;  %v6073_v41 = vld [vmem:[%s5772_s25 + $0x280] sm:$0xff]  ;;  %vm531_vm9 = vcmp.eq.f32.partialorder %v6050_v29, 999.0  ;;  %vm534_vm10 = vcmp.eq.f32.partialorder %v6053_v26, 999.0 }
  0xb3   : > { %10172 = vst [vmem:[#allocation52_spill] sm:$0xff] %v6073_v41  ;;  %vm508_vm12 = vcmp.eq.f32.partialorder %v6065_v1, 999.0  ;;  %10190 = vst [vmem:[#allocation69_spill] sm:$0xff] %v6168_v24  ;;  %v6205_v26 = vld [vmem:[%s5772_s25 + $0x2d0] sm:$0xff] }
  0xb4   : > { %1731 = vperm.xlu1 %5170, %v684_v42   ;;  %1726 = vperm.xlu0 %5169, %v683_v43   ;;  %v6007_v42 = vsel %vm502_vm14, 0.0, %v9771_v7  ;;  %v6013_v43 = vsel %vm504_vm0, 0.0, %v9771_v7  ;;  %v6070_v7 = vld [vmem:[%s5772_s25 + $0x288] sm:$0xff]  ;;  %vm535_vm14 = vcmp.eq.f32.partialorder %v6073_v41, 999.0  ;;  %10198 = vst [vmem:[#allocation77_spill] sm:$0xff] %v6205_v26 }
  0xb5   : > { %10163 = vst [vmem:[#allocation43_spill] sm:$0xff] %v6007_v42  ;;  %10165 = vst [vmem:[#allocation45_spill] sm:$0xff] %v6013_v43  ;;  %v6041_v47 = vmul.f32 %v6007_v42, %v406_v0  ;;  %v6059_v61 = vmul.f32 %v6013_v43, %v408_v6  ;;  %v6062_v0 = vmul.f32 %v6016_v57, %v407_v8  ;;  %v6082_v6 = vld [vmem:[%s5772_s25 + $0x298] sm:$0xff]  ;;  %vm536_vm13 = vcmp.eq.f32.partialorder %v6070_v7, 999.0 }
  0xb6   : > { %10171 = vst [vmem:[#allocation51_spill] sm:$0xff] %v6070_v7  ;;  %10173 = vst [vmem:[#allocation53_spill] sm:$0xff] %v6082_v6  ;;  %v6085_v8 = vmul.f32 %v6047_v53, %v409_v18  ;;  %v6110_v53 = vld [vmem:[%s5772_s25 + $0x2a8] sm:$0xff]  ;;  %vm538_vm15 = vcmp.eq.f32.partialorder %v6082_v6, 999.0  ;;  %v6184_v7 = vld [vmem:[%s5772_s25 + $0x2b0] sm:$0xff] }
  0xb7   : > { %10178 = vst [vmem:[#allocation57_spill] sm:$0xff] %v6110_v53  ;;  %vm540_vm2 = vcmp.eq.f32.partialorder %v6110_v53, 999.0  ;;  %10194 = vst [vmem:[#allocation73_spill] sm:$0xff] %v6184_v7 }
  0xb8   : > { %1741 = vperm.xlu1 %5170, %v686_v2   ;;  %1736 = vperm.xlu0 %5169, %v685_v11   ;;  %v6019_v2 = vld [vmem:[%s5772_s25 + $0x248] sm:$0xff]  ;;  %v6022_v11 = vld [vmem:[%s5772_s25 + $0x240] sm:$0xff] }
  0xb9   : > { %vm528_vm4 = vcmp.eq.f32.partialorder %v6019_v2, 999.0  ;;  %vm527_vm5 = vcmp.eq.f32.partialorder %v6022_v11, 999.0 }
  0xbc   : > { %1751 = vperm.xlu1 %5170, %v688_v19   ;;  %1746 = vperm.xlu0 %5169, %v687_v25   ;;  %v6076_v19 = vmul.f32 %v6028_v59, %v410_v17  ;;  %v6088_v25 = vld [vmem:[%s5772_s25 + $0x1a0] sm:$0xff]  ;;  %v6094_v17 = vld [vmem:[%s5772_s25 + $0x290] sm:$0xff]  ;;  %v10175_v59 = vmov 1.0  }
  0xbd   : > { %10174 = vst [vmem:[#allocation54_spill] sm:$0xff] %v6094_v17  ;;  %v6100_v57 = vsel %vm528_vm4, 0.0, %v10175_v59  ;;  %v6105_v18 = vsel %vm527_vm5, 0.0, %v10175_v59  ;;  %v6115_v43 = vsel %vm530_vm6, 0.0, %v10175_v59  ;;  %v6120_v42 = vsel %vm529_vm7, 0.0, %v10175_v59 }
  0xbe   : > { %10176 = vst [vmem:[#allocation55_spill] sm:$0xff] %v6100_v57  ;;  %10177 = vst [vmem:[#allocation56_spill] sm:$0xff] %v6105_v18  ;;  %v6125_v34 = vsel %vm532_vm8, 0.0, %v10175_v59  ;;  %vm507_vm0 = vcmp.eq.f32.partialorder %v6088_v25, 999.0  ;;  %v6138_v5 = vsel %vm531_vm9, 0.0, %v10175_v59  ;;  %v6143_v48 = vsel %vm534_vm10, 0.0, %v10175_v59 }
  0xbf   : > { %10179 = vst [vmem:[#allocation58_spill] sm:$0xff] %v6115_v43  ;;  %10180 = vst [vmem:[#allocation59_spill] sm:$0xff] %v6120_v42  ;;  %v6148_v6 = vsel %vm533_vm11, 0.0, %v10175_v59  ;;  %vm537_vm1 = vcmp.eq.f32.partialorder %v6094_v17, 999.0  ;;  %v6157_v33 = vsel %vm536_vm13, 0.0, %v10175_v59  ;;  %v6162_v30 = vsel %vm535_vm14, 0.0, %v10175_v59 }
  0xc0   : > { %1761 = vperm.xlu1 %5170, %v690_v51   ;;  %1756 = vperm.xlu0 %5169, %v689_v58   ;;  %10181 = vst [vmem:[#allocation60_spill] sm:$0xff] %v6125_v34  ;;  %v6129_v51 = vld [vmem:[%s5772_s25 + $0x2a0] sm:$0xff]  ;;  %v6132_v58 = vld [vmem:[%s5772_s25 + $0x2b8] sm:$0xff]  ;;  %10184 = vst [vmem:[#allocation63_spill] sm:$0xff] %v6138_v5  ;;  %v816_v23 = vadd.f32 %v6125_v34, %v6100_v57  ;;  %v6174_v20 = vsel %vm538_vm15, 0.0, %v10175_v59  ;;  %v815_v41 = vadd.f32 %v6138_v5, %v6105_v18 }
  0xc1   : > { %10182 = vst [vmem:[#allocation61_spill] sm:$0xff] %v6129_v51  ;;  %10183 = vst [vmem:[#allocation62_spill] sm:$0xff] %v6132_v58  ;;  %v6171_v17 = vld [vmem:[%s5772_s25 + $0x2d8] sm:$0xff]  ;;  %vm539_vm3 = vcmp.eq.f32.partialorder %v6129_v51, 999.0  ;;  %vm542_vm4 = vcmp.eq.f32.partialorder %v6132_v58, 999.0  ;;  %v6181_v53 = vsel %vm537_vm1, 0.0, %v10175_v59  ;;  %v818_v51 = vadd.f32 %v6143_v48, %v6115_v43 }
  0xc2   : > { %10185 = vst [vmem:[#allocation64_spill] sm:$0xff] %v6143_v48  ;;  %10186 = vst [vmem:[#allocation65_spill] sm:$0xff] %v6148_v6  ;;  %vm544_vm5 = vcmp.eq.f32.partialorder %v6152_v44, 999.0  ;;  %v896_v13 = vadd.f32 %v816_v23, %v6157_v33  ;;  %v6191_v58 = vsel %vm540_vm2, 0.0, %v10175_v59  ;;  %vm543_vm6 = vcmp.eq.f32.partialorder %v6168_v24, 999.0 }
  0xc3   : > { %10188 = vst [vmem:[#allocation67_spill] sm:$0xff] %v6157_v33  ;;  %10189 = vst [vmem:[#allocation68_spill] sm:$0xff] %v6162_v30  ;;  %vm546_vm7 = vcmp.eq.f32.partialorder %v6171_v17, 999.0  ;;  %v6200_v44 = vsel %vm542_vm4, 0.0, %v10175_v59  ;;  %v898_v12 = vadd.f32 %v818_v51, %v6174_v20  ;;  %vm541_vm8 = vcmp.eq.f32.partialorder %v6184_v7, 999.0  ;;  %v416_v7 = vld [vmem:[%s5772_s25 + $0x1c8] sm:$0xff] }
  0xc4   : > { %10191 = vst [vmem:[#allocation70_spill] sm:$0xff] %v6171_v17  ;;  %10192 = vst [vmem:[#allocation71_spill] sm:$0xff] %v6174_v20  ;;  %1771 = vperm.xlu1 %5170, %v692_v52   ;;  %1766 = vperm.xlu0 %5169, %v691_v14   ;;  %v895_v52 = vadd.f32 %v815_v41, %v6162_v30  ;;  %v6197_v14 = vsel %vm539_vm3, 0.0, %v10175_v59  ;;  %v976_v23 = vadd.f32 %v896_v13, %v6191_v58  ;;  %v414_v13 = vld [vmem:[%s5772_s25 + $0x1b8] sm:$0xff] }
  0xc5   : > { %10193 = vst [vmem:[#allocation72_spill] sm:$0xff] %v6181_v53  ;;  %10195 = vst [vmem:[#allocation74_spill] sm:$0xff] %v6191_v58  ;;  %v6209_v41 = vsel %vm544_vm5, 0.0, %v10175_v59  ;;  %v817_v4 = vadd.f32 %v6148_v6, %v6120_v42  ;;  %v6223_v3 = vsel %vm543_vm6, 0.0, %v10175_v59  ;;  %v6226_v60 = vsel %vm546_vm7, 0.0, %v10175_v59 }
  0xc6   : > { %10196 = vst [vmem:[#allocation75_spill] sm:$0xff] %v6197_v14  ;;  %10197 = vst [vmem:[#allocation76_spill] sm:$0xff] %v6200_v44  ;;  %v975_v17 = vadd.f32 %v895_v52, %v6197_v14  ;;  %v6218_v51 = vadd.f32 %v976_v23, %v6209_v41  ;;  %v978_v52 = vadd.f32 %v898_v12, %v6200_v44  ;;  %vm545_vm9 = vcmp.eq.f32.partialorder %v6205_v26, 999.0  ;;  %v413_v12 = vld [vmem:[%s5772_s25 + $0x1b0] sm:$0xff] }
  0xc7   : > { %10199 = vst [vmem:[#allocation78_spill] sm:$0xff] %v6209_v41  ;;  %10201 = vst [vmem:[#allocation80_spill] sm:$0xff] %v6223_v3  ;;  %v820_v23 = vadd.f32 %v6157_v33, %v6125_v34  ;;  %v6245_v24 = vsel %vm508_vm12, 0.0, %v10175_v59  ;;  %vm510_vm10 = vcmp.eq.f32.partialorder %v414_v13, 999.0  ;;  %vm548_vm11 = vcmp.eq.f32.partialorder %v6230_v54, 999.0 }
  0xc8   : > { %1781 = vperm.xlu1 %5170, %v6041_v47   ;;  %1776 = vperm.xlu0 %5169, %v6044_v50   ;;  %10200 = vst [vmem:[#allocation79_spill] sm:$0xff] %v6218_v51  ;;  %10202 = vst [vmem:[#allocation81_spill] sm:$0xff] %v6226_v60  ;;  %v6233_v47 = vadd.f32 %v975_v17, %v6223_v3  ;;  %v897_v50 = vadd.f32 %v817_v4, %v6181_v53  ;;  %v6240_v51 = vld [vmem:[%s5772_s25 + $0x2e0] sm:$0xff]  ;;  %v6251_v17 = vsel %vm541_vm8, 0.0, %v10175_v59 }
  0xc9   : > { %10205 = vst [vmem:[#allocation84_spill] sm:$0xff] %v6240_v51  ;;  %10206 = vst [vmem:[#allocation85_spill] sm:$0xff] %v6245_v24  ;;  %v819_v4 = vadd.f32 %v6162_v30, %v6138_v5  ;;  %v900_v46 = vadd.f32 %v820_v23, %v6191_v58  ;;  %vm547_vm12 = vcmp.eq.f32.partialorder %v6240_v51, 999.0  ;;  %vm509_vm13 = vcmp.eq.f32.partialorder %v413_v12, 999.0  ;;  %v6280_v23 = vld [vmem:[%s5772_s25 + $0x2f8] sm:$0xff] }
  0xca   : > { %10204 = vst [vmem:[#allocation83_spill] sm:$0xff] %v6233_v47  ;;  %10207 = vst [vmem:[#allocation86_spill] sm:$0xff] %v6251_v17  ;;  %v6254_v47 = vadd.f32 %v978_v52, %v6226_v60  ;;  %v977_v33 = vadd.f32 %v897_v50, %v6251_v17  ;;  %v6266_v52 = vsel %vm507_vm0, 0.0, %v10175_v59  ;;  %v700_v54 = vmul.f32 %v6245_v24, %v6065_v1 }
  0xcb   : > { %v899_v50 = vadd.f32 %v819_v4, %v6197_v14  ;;  %10211 = vst [vmem:[#allocation90_spill] sm:$0xff] %v6280_v23  ;;  %v6286_v26 = vsel %vm548_vm11, 0.0, %v10175_v59  ;;  %v822_v4 = vadd.f32 %v6174_v20, %v6143_v48  ;;  %v6302_v1 = vsel %vm547_vm12, 0.0, %v10175_v59 }
  0xcc   : > { %10208 = vst [vmem:[#allocation87_spill] sm:$0xff] %v6254_v47  ;;  %1791 = vperm.xlu1 %5170, %v6059_v61   ;;  %1786 = vperm.xlu0 %5169, %v6062_v0   ;;  %v6271_v47 = vsel %vm545_vm9, 0.0, %v10175_v59  ;;  %v980_v0 = vadd.f32 %v900_v46, %v6209_v41  ;;  %10212 = vst [vmem:[#allocation91_spill] sm:$0xff] %v6286_v26  ;;  %v6295_v46 = vsel %vm510_vm10, 0.0, %v10175_v59  ;;  %vm550_vm14 = vcmp.eq.f32.partialorder %v6280_v23, 999.0 }
  0xcd   : > { %10209 = vst [vmem:[#allocation88_spill] sm:$0xff] %v6271_v47  ;;  %v6276_v61 = vadd.f32 %v977_v33, %v6271_v47  ;;  %v979_v51 = vadd.f32 %v899_v50, %v6223_v3  ;;  %v699_v33 = vmul.f32 %v6266_v52, %v6088_v25  ;;  %10213 = vst [vmem:[#allocation92_spill] sm:$0xff] %v6295_v46  ;;  %v6305_v50 = vld [vmem:[%s5772_s25 + $0x2f0] sm:$0xff]  ;;  %vm512_vm15 = vcmp.eq.f32.partialorder %v416_v7, 999.0 }
  0xce   : > { %v6299_v41 = vadd.f32 %v980_v0, %v6286_v26  ;;  %10215 = vst [vmem:[#allocation94_spill] sm:$0xff] %v6302_v1  ;;  %10216 = vst [vmem:[#allocation95_spill] sm:$0xff] %v6305_v50  ;;  %v902_v3 = vadd.f32 %v822_v4, %v6200_v44  ;;  %v821_v0 = vadd.f32 %v6181_v53, %v6148_v6  ;;  %vm549_vm1 = vcmp.eq.f32.partialorder %v6305_v50, 999.0  ;;  %v418_v4 = vld [vmem:[%s5772_s25 + $0x1d8] sm:$0xff] }
  0xcf   : > { %10210 = vst [vmem:[#allocation89_spill] sm:$0xff] %v6276_v61  ;;  %v415_v61 = vld [vmem:[%s5772_s25 + $0x1c0] sm:$0xff]  ;;  %v6310_v25 = vadd.f32 %v979_v51, %v6302_v1  ;;  %v702_v51 = vmul.f32 %v6295_v46, %v414_v13  ;;  %v6327_v23 = vsel %vm550_vm14, 0.0, %v10175_v59  ;;  %v6341_v50 = vsel %vm549_vm1, 0.0, %v10175_v59 }
  0xd0   : > { %10214 = vst [vmem:[#allocation93_spill] sm:$0xff] %v6299_v41  ;;  %1801 = vperm.xlu1 %5170, %v6076_v19   ;;  %1796 = vperm.xlu0 %5169, %v6085_v8   ;;  %v6318_v41 = vsel %vm509_vm13, 0.0, %v10175_v59  ;;  %vm511_vm0 = vcmp.eq.f32.partialorder %v415_v61, 999.0  ;;  %v982_v19 = vadd.f32 %v902_v3, %v6226_v60  ;;  %v901_v8 = vadd.f32 %v821_v0, %v6251_v17  ;;  %v426_v60 = vld [vmem:[%s5772_s25 + $0x218] sm:$0xff] }
  0xd1   : > { %10217 = vst [vmem:[#allocation96_spill] sm:$0xff] %v6310_v25  ;;  %10218 = vst [vmem:[#allocation97_spill] sm:$0xff] %v6318_v41  ;;  %v417_v25 = vld [vmem:[%s5772_s25 + $0x1d0] sm:$0xff]  ;;  %v701_v1 = vmul.f32 %v6318_v41, %v413_v12  ;;  %v6335_v0 = vsel %vm512_vm15, 0.0, %v10175_v59  ;;  %v6338_v13 = vsel %vm511_vm0, 0.0, %v10175_v59  ;;  %vm514_vm2 = vcmp.eq.f32.partialorder %v418_v4, 999.0 }
  0xd2   : > { %10219 = vst [vmem:[#allocation98_spill] sm:$0xff] %v6327_v23  ;;  %v6331_v26 = vadd.f32 %v982_v19, %v6327_v23  ;;  %v981_v3 = vadd.f32 %v901_v8, %v6271_v47  ;;  %10221 = vst [vmem:[#allocation100_spill] sm:$0xff] %v6335_v0  ;;  %vm513_vm3 = vcmp.eq.f32.partialorder %v417_v25, 999.0  ;;  %v420_v12 = vld [vmem:[%s5772_s25 + $0x1e8] sm:$0xff]  ;;  %v704_v19 = vmul.f32 %v6335_v0, %v416_v7  ;;  %v423_v47 = vld [vmem:[%s5772_s25 + $0x200] sm:$0xff] }
  0xd3   : > { %10222 = vst [vmem:[#allocation101_spill] sm:$0xff] %v6338_v13  ;;  %10223 = vst [vmem:[#allocation102_spill] sm:$0xff] %v6341_v50  ;;  %v703_v8 = vmul.f32 %v6338_v13, %v415_v61  ;;  %v6354_v23 = vsel %vm513_vm3, 0.0, %v10175_v59  ;;  %vm516_vm4 = vcmp.eq.f32.partialorder %v420_v12, 999.0  ;;  %vm519_vm9 = vcmp.eq.f32.partialorder %v423_v47, 999.0 }
  0xd4   : > { %1811 = vperm.xlu1 %5170, %v700_v54   ;;  %1806 = vperm.xlu0 %5169, %v699_v33   ;;  %10220 = vst [vmem:[#allocation99_spill] sm:$0xff] %v6331_v26  ;;  %v6344_v54 = vadd.f32 %v981_v3, %v6341_v50  ;;  %v419_v33 = vld [vmem:[%s5772_s25 + $0x1e0] sm:$0xff]  ;;  %v6351_v26 = vsel %vm514_vm2, 0.0, %v10175_v59  ;;  %10226 = vst [vmem:[#allocation105_spill] sm:$0xff] %v6354_v23  ;;  %v422_v3 = vld [vmem:[%s5772_s25 + $0x1f8] sm:$0xff]  ;;  %v705_v7 = vmul.f32 %v6354_v23, %v417_v25  ;;  %vm3895_vm0 = vcmask 523264  }
  0xd5   : > { %10225 = vst [vmem:[#allocation104_spill] sm:$0xff] %v6351_v26  ;;  %vm515_vm5 = vcmp.eq.f32.partialorder %v419_v33, 999.0  ;;  %v6361_v61 = vsel %vm516_vm4, 0.0, %v10175_v59  ;;  %vm518_vm6 = vcmp.eq.f32.partialorder %v422_v3, 999.0  ;;  %v424_v50 = vld [vmem:[%s5772_s25 + $0x208] sm:$0xff]  ;;  %v6384_v17 = vsel %vm519_vm9, 0.0, %v10175_v59 }
  0xd6   : > { %10224 = vst [vmem:[#allocation103_spill] sm:$0xff] %v6344_v54  ;;  %v421_v54 = vld [vmem:[%s5772_s25 + $0x1f0] sm:$0xff]  ;;  %10227 = vst [vmem:[#allocation106_spill] sm:$0xff] %v6361_v61  ;;  %vm520_vm8 = vcmp.eq.f32.partialorder %v424_v50, 999.0  ;;  %vm522_vm10 = vcmp.eq.f32.partialorder %v426_v60, 999.0 }
  0xd7   : > { %vm517_vm7 = vcmp.eq.f32.partialorder %v421_v54, 999.0  ;;  %10232 = vst [vmem:[#allocation111_spill] sm:$0xff] %v6384_v17  ;;  %v6395_v58 = vsel %vm522_vm10, 0.0, %v10175_v59 }
  0xd8   : > { %1821 = vperm.xlu1 %5170, %v702_v51   ;;  %1816 = vperm.xlu0 %5169, %v701_v1   ;;  %v706_v1 = vmul.f32 %v6351_v26, %v418_v4  ;;  %v6364_v51 = vsel %vm515_vm5, 0.0, %v10175_v59  ;;  %v6374_v25 = vsel %vm517_vm7, 0.0, %v10175_v59  ;;  %10235 = vst [vmem:[#allocation114_spill] sm:$0xff] %v6395_v58 }
  0xd9   : > { %10228 = vst [vmem:[#allocation107_spill] sm:$0xff] %v6364_v51  ;;  %v707_v4 = vmul.f32 %v6364_v51, %v419_v33  ;;  %10230 = vst [vmem:[#allocation109_spill] sm:$0xff] %v6374_v25  ;;  %v6381_v33 = vsel %vm520_vm8, 0.0, %v10175_v59 }
  0xda   : > { %10231 = vst [vmem:[#allocation110_spill] sm:$0xff] %v6381_v33 }
  0xdc   : > { %1831 = vperm.xlu1 %5170, %v704_v19   ;;  %1826 = vperm.xlu0 %5169, %v703_v8   ;;  %v708_v19 = vmul.f32 %v6361_v61, %v420_v12  ;;  %v6371_v8 = vsel %vm518_vm6, 0.0, %v10175_v59  ;;  %v425_v12 = vld [vmem:[%s5772_s25 + $0x210] sm:$0xff] }
  0xdd   : > { %10229 = vst [vmem:[#allocation108_spill] sm:$0xff] %v6371_v8  ;;  %vm521_vm11 = vcmp.eq.f32.partialorder %v425_v12, 999.0 }
  0xe0   : > { %1841 = vperm.xlu1 %5170, %v706_v1   ;;  %1836 = vperm.xlu0 %5169, %v705_v7   ;;  %v710_v1 = vmul.f32 %v6371_v8, %v422_v3  ;;  %v709_v7 = vmul.f32 %v6374_v25, %v421_v54  ;;  %v712_v54 = vmul.f32 %v6381_v33, %v424_v50  ;;  %v6398_v25 = vsel %vm521_vm11, 0.0, %v10175_v59  ;;  %v430_v8 = vld [vmem:[%s5772_s25 + $0x238] sm:$0xff] }
  0xe1   : > { %v711_v3 = vmul.f32 %v6384_v17, %v423_v47  ;;  %10236 = vst [vmem:[#allocation115_spill] sm:$0xff] %v6398_v25  ;;  %v714_v50 = vmul.f32 %v6395_v58, %v426_v60  ;;  %v713_v47 = vmul.f32 %v6398_v25, %v425_v12  ;;  %vm526_vm14 = vcmp.eq.f32.partialorder %v430_v8, 999.0 }
  0xe2   : > { %v6421_v12 = vsel %vm526_vm14, 0.0, %v10175_v59 }
  0xe3   : > { %10243 = vst [vmem:[#allocation122_spill] sm:$0xff] %v6421_v12 }
  0xe4   : > { %1851 = vperm.xlu1 %5170, %v708_v19   ;;  %1846 = vperm.xlu0 %5169, %v707_v4   ;;  %v428_v19 = vld [vmem:[%s5772_s25 + $0x228] sm:$0xff]  ;;  %v427_v4 = vld [vmem:[%s5772_s25 + $0x220] sm:$0xff] }
  0xe5   : > { %vm524_vm12 = vcmp.eq.f32.partialorder %v428_v19, 999.0  ;;  %vm523_vm13 = vcmp.eq.f32.partialorder %v427_v4, 999.0 }
  0xe6   : > { %v6412_v17 = vsel %vm523_vm13, 0.0, %v10175_v59 }
  0xe7   : > { %v6386_v44 = vpop.permute.xlu1 %1556  ;;  %v6388_v14 = vpop.permute.xlu0 %1546  ;;  %10240 = vst [vmem:[#allocation119_spill] sm:$0xff] %v6412_v17  ;;  %v715_v60 = vmul.f32 %v6412_v17, %v427_v4  ;;  %v720_v4 = vmul.f32 %v6100_v57, %v6019_v2  ;;  %v6454_v2 = vadd.f32 %v5802_v35, %v5845_v62  ;;  %v6474_v35 = vadd.f32 %v5862_v10, %v5848_v63 }
  0xe8   : > { %10233 = vst [vmem:[#allocation112_spill] sm:$0xff] %v6386_v44  ;;  %10234 = vst [vmem:[#allocation113_spill] sm:$0xff] %v6388_v14  ;;  %1861 = vperm.xlu1 %5170, %v710_v1   ;;  %1856 = vperm.xlu0 %5169, %v709_v7   ;;  %v429_v1 = vld [vmem:[%s5772_s25 + $0x230] sm:$0xff]  ;;  %v6409_v7 = vsel %vm524_vm12, 0.0, %v10175_v59 }
  0xe9   : > { %10239 = vst [vmem:[#allocation118_spill] sm:$0xff] %v6409_v7  ;;  %vm525_vm15 = vcmp.eq.f32.partialorder %v429_v1, 999.0 }
  0xeb   : > { %v6400_v44 = vpop.permute.xlu1 %1561  ;;  %v6402_v14 = vpop.permute.xlu0 %1551 }
  0xec   : > { %10237 = vst [vmem:[#allocation116_spill] sm:$0xff] %v6400_v44  ;;  %10238 = vst [vmem:[#allocation117_spill] sm:$0xff] %v6402_v14  ;;  %1871 = vperm.xlu1 %5170, %v712_v54   ;;  %1866 = vperm.xlu0 %5169, %v711_v3   ;;  %v716_v54 = vmul.f32 %v6409_v7, %v428_v19  ;;  %v6424_v3 = vsel %vm525_vm15, 0.0, %v10175_v59  ;;  %v719_v59 = vmul.f32 %v6105_v18, %v6022_v11 }
  0xed   : > { %10244 = vst [vmem:[#allocation123_spill] sm:$0xff] %v6424_v3  ;;  %v6458_v11 = vadd.f32 %v5848_v63, %v5797_v32  ;;  %v724_v32 = vmul.f32 %v6125_v34, %v6037_v36  ;;  %v6498_v36 = vadd.f32 %v5889_v27, %v5869_v15 }
  0xef   : > { %v6414_v33 = vpop.permute.xlu1 %1571  ;;  %v6416_v44 = vpop.permute.xlu0 %1566  ;;  %10257 = vst [vmem:[#allocation136_spill] sm:$0xff] %v6498_v36 }
  0xf0   : > { %10241 = vst [vmem:[#allocation120_spill] sm:$0xff] %v6414_v33  ;;  %10242 = vst [vmem:[#allocation121_spill] sm:$0xff] %v6416_v44  ;;  %1881 = vperm.xlu1 %5170, %v714_v50   ;;  %1876 = vperm.xlu0 %5169, %v713_v47   ;;  %v718_v44 = vmul.f32 %v6421_v12, %v430_v8  ;;  %v717_v50 = vmul.f32 %v6424_v3, %v429_v1 }
  0xf1   : > { %v722_v8 = vmul.f32 %v6115_v43, %v6031_v55  ;;  %v721_v1 = vmul.f32 %v6120_v42, %v6034_v39  ;;  %v6466_v55 = vadd.f32 %v5808_v37, %v5848_v63  ;;  %v6480_v39 = vadd.f32 %v5869_v15, %v5818_v49 }
  0xf2   : > { %v6484_v37 = vadd.f32 %v5872_v16, %v5833_v56  ;;  %v6502_v49 = vadd.f32 %v5892_v28, %v5872_v16  ;;  %v6506_v56 = vadd.f32 %v5899_v38, %v5879_v21 }
  0xf3   : > { %v6426_v14 = vpop.permute.xlu1 %1581  ;;  %v6428_v25 = vpop.permute.xlu0 %1576  ;;  %10253 = vst [vmem:[#allocation132_spill] sm:$0xff] %v6480_v39 }
  0xf4   : > { %10245 = vst [vmem:[#allocation124_spill] sm:$0xff] %v6426_v14  ;;  %10246 = vst [vmem:[#allocation125_spill] sm:$0xff] %v6428_v25  ;;  %1891 = vperm.xlu1 %5170, %v716_v54   ;;  %1886 = vperm.xlu0 %5169, %v715_v60   ;;  %v10270_v25 = vld [vmem:[#allocation27_spill] sm:$0xff] }
  0xf5   : > { %10254 = vst [vmem:[#allocation133_spill] sm:$0xff] %v6484_v37  ;;  %10258 = vst [vmem:[#allocation137_spill] sm:$0xff] %v6502_v49  ;;  %v6534_v33 = vadd.f32 %v10270_v25, %v5909_v45 }
  0xf6   : > { %10259 = vst [vmem:[#allocation138_spill] sm:$0xff] %v6506_v56 }
  0xf7   : > { %v6432_v19 = vpop.permute.xlu1 %1591  ;;  %v6434_v47 = vpop.permute.xlu0 %1586  ;;  %10271 = vst [vmem:[#allocation146_spill] sm:$0xff] %v6534_v33  ;;  %v10281_v33 = vld [vmem:[#allocation50_spill] sm:$0xff] }
  0xf8   : > { %10247 = vst [vmem:[#allocation126_spill] sm:$0xff] %v6432_v19  ;;  %10248 = vst [vmem:[#allocation127_spill] sm:$0xff] %v6434_v47  ;;  %1901 = vperm.xlu1 %5170, %v718_v44   ;;  %1896 = vperm.xlu0 %5169, %v717_v50   ;;  %v6450_v44 = vadd.f32 %v5845_v62, %v5794_v31  ;;  %v6470_v31 = vadd.f32 %v5859_v9, %v5845_v62  ;;  %v10268_v19 = vld [vmem:[#allocation26_spill] sm:$0xff] }
  0xf9   : > { %v6530_v49 = vadd.f32 %v10268_v19, %v5902_v40 }
  0xfb   : > { %v6440_v14 = vpop.permute.xlu1 %1601  ;;  %v6442_v54 = vpop.permute.xlu0 %1596  ;;  %10269 = vst [vmem:[#allocation145_spill] sm:$0xff] %v6530_v49  ;;  %v10279_v49 = vld [vmem:[#allocation31_spill] sm:$0xff] }
  0xfc   : > { %10249 = vst [vmem:[#allocation128_spill] sm:$0xff] %v6440_v14  ;;  %10250 = vst [vmem:[#allocation129_spill] sm:$0xff] %v6442_v54  ;;  %1911 = vperm.xlu1 %5170, %v720_v4   ;;  %1906 = vperm.xlu0 %5169, %v719_v59   ;;  %v6488_v4 = vadd.f32 %v5879_v21, %v5859_v9  ;;  %v723_v59 = vmul.f32 %v6138_v5, %v6050_v29  ;;  %v10264_v54 = vld [vmem:[#allocation25_spill] sm:$0xff] }
  0xfd   : > { %v6514_v29 = vadd.f32 %v5909_v45, %v5889_v27  ;;  %v6522_v14 = vadd.f32 %v10264_v54, %v5899_v38 }
  0xfe   : > { %10255 = vst [vmem:[#allocation134_spill] sm:$0xff] %v6488_v4 }
  0xff   : > { %v6460_v60 = vpop.permute.xlu1 %1611  ;;  %v6462_v50 = vpop.permute.xlu0 %1606  ;;  %10261 = vst [vmem:[#allocation140_spill] sm:$0xff] %v6514_v29  ;;  %10265 = vst [vmem:[#allocation142_spill] sm:$0xff] %v6522_v14  ;;  %v10272_v29 = vld [vmem:[#allocation28_spill] sm:$0xff] }
 0x100   : > { %10251 = vst [vmem:[#allocation130_spill] sm:$0xff] %v6460_v60  ;;  %10252 = vst [vmem:[#allocation131_spill] sm:$0xff] %v6462_v50  ;;  %1921 = vperm.xlu1 %5170, %v722_v8   ;;  %1916 = vperm.xlu0 %5169, %v721_v1   ;;  %v6494_v8 = vadd.f32 %v5882_v22, %v5862_v10  ;;  %v6510_v1 = vadd.f32 %v5902_v40, %v5882_v22  ;;  %v10262_v50 = vld [vmem:[#allocation24_spill] sm:$0xff] }
 0x101   : > { %v6518_v60 = vadd.f32 %v10262_v50, %v5892_v28  ;;  %v6538_v4 = vadd.f32 %v10272_v29, %v10262_v50 }
 0x102   : > { %10256 = vst [vmem:[#allocation135_spill] sm:$0xff] %v6494_v8  ;;  %10260 = vst [vmem:[#allocation139_spill] sm:$0xff] %v6510_v1  ;;  %v6552_v1 = vadd.f32 %v10279_v49, %v10270_v25 }
 0x103   : > { %10263 = vst [vmem:[#allocation141_spill] sm:$0xff] %v6518_v60  ;;  %v6524_v36 = vpop.permute.xlu1 %1621  ;;  %v6526_v47 = vpop.permute.xlu0 %1616  ;;  %10273 = vst [vmem:[#allocation147_spill] sm:$0xff] %v6538_v4  ;;  %v10274_v60 = vld [vmem:[#allocation49_spill] sm:$0xff]  ;;  %v725_v4 = vmul.f32 %v6148_v6, %v10281_v33 }
 0x104   : > { %10266 = vst [vmem:[#allocation143_spill] sm:$0xff] %v6524_v36  ;;  %10267 = vst [vmem:[#allocation144_spill] sm:$0xff] %v6526_v47  ;;  %1931 = vperm.xlu1 %5170, %v724_v32   ;;  %v726_v14 = vmul.f32 %v6143_v48, %v10274_v60  ;;  %v10275_v36 = vld [vmem:[#allocation29_spill] sm:$0xff]  ;;  %v10277_v47 = vld [vmem:[#allocation30_spill] sm:$0xff]  ;;  %1926 = vperm.xlu0 %5169, %v723_v59  }
 0x105   : > { %v6544_v56 = vadd.f32 %v10275_v36, %v10264_v54  ;;  %v6548_v8 = vadd.f32 %v10277_v47, %v10268_v19  ;;  %10280 = vst [vmem:[#allocation149_spill] sm:$0xff] %v6552_v1  ;;  %v10282_v32 = vld [vmem:[#allocation32_spill] sm:$0xff]  ;;  %v10284_v60 = vld [vmem:[#allocation33_spill] sm:$0xff] }
 0x106   : > { %v6558_v39 = vadd.f32 %v10282_v32, %v10272_v29  ;;  %v6562_v37 = vadd.f32 %v10284_v60, %v10275_v36  ;;  %v10290_v59 = vld [vmem:[#allocation36_spill] sm:$0xff]  ;;  %v10292_v33 = vld [vmem:[#allocation37_spill] sm:$0xff] }
 0x107   : > { %10276 = vst [vmem:[#allocation49_spill] sm:$0xff] %v6544_v56  ;;  %10278 = vst [vmem:[#allocation148_spill] sm:$0xff] %v6548_v8  ;;  %v10286_v56 = vld [vmem:[#allocation34_spill] sm:$0xff]  ;;  %v10288_v8 = vld [vmem:[#allocation35_spill] sm:$0xff]  ;;  %v6574_v1 = vadd.f32 %v10290_v59, %v10282_v32  ;;  %v6578_v29 = vadd.f32 %v10292_v33, %v10284_v60 }
 0x108   : > { %10283 = vst [vmem:[#allocation50_spill] sm:$0xff] %v6558_v39  ;;  %10285 = vst [vmem:[#allocation150_spill] sm:$0xff] %v6562_v37  ;;  %v6566_v19 = vadd.f32 %v10286_v56, %v10277_v47  ;;  %v6570_v25 = vadd.f32 %v10288_v8, %v10279_v49  ;;  %v10294_v39 = vld [vmem:[#allocation38_spill] sm:$0xff]  ;;  %v6584_v37 = vpop.permute.xlu1 %1631  ;;  %v6586_v47 = vpop.permute.xlu0 %1626  ;;  %1941 = vperm.xlu1 %5170, %v726_v14   ;;  %v10304_v60 = vld [vmem:[#allocation67_spill] sm:$0xff]  ;;  %1936 = vperm.xlu0 %5169, %v725_v4  }
 0x109   : > { %10291 = vst [vmem:[#allocation153_spill] sm:$0xff] %v6574_v1  ;;  %10293 = vst [vmem:[#allocation154_spill] sm:$0xff] %v6578_v29  ;;  %v6582_v36 = vadd.f32 %v10294_v39, %v10286_v56  ;;  %v10301_v1 = vld [vmem:[#allocation40_spill] sm:$0xff]  ;;  %v10303_v29 = vld [vmem:[#allocation51_spill] sm:$0xff] }
 0x10a   : > { %10287 = vst [vmem:[#allocation151_spill] sm:$0xff] %v6566_v19  ;;  %10289 = vst [vmem:[#allocation152_spill] sm:$0xff] %v6570_v25  ;;  %v10298_v19 = vld [vmem:[#allocation16_spill] sm:$0xff]  ;;  %v10299_v25 = vld [vmem:[#allocation39_spill] sm:$0xff]  ;;  %v6596_v32 = vadd.f32 %v10301_v1, %v10290_v59  ;;  %v728_v56 = vmul.f32 %v10304_v60, %v10303_v29 }
 0x10b   : > { %10295 = vst [vmem:[#allocation38_spill] sm:$0xff] %v6582_v36  ;;  %10296 = vst [vmem:[#allocation155_spill] sm:$0xff] %v6584_v37  ;;  %v904_v49 = vadd.f32 %v10298_v19, %v5845_v62  ;;  %v6592_v54 = vadd.f32 %v10299_v25, %v10288_v8  ;;  %v10305_v36 = vld [vmem:[#allocation17_spill] sm:$0xff]  ;;  %v10308_v62 = vld [vmem:[#allocation42_spill] sm:$0xff] }
 0x10c   : > { %10297 = vst [vmem:[#allocation156_spill] sm:$0xff] %v6586_v47  ;;  %10302 = vst [vmem:[#allocation40_spill] sm:$0xff] %v6596_v32  ;;  %v903_v37 = vadd.f32 %v10305_v36, %v5848_v63  ;;  %v10306_v47 = vld [vmem:[#allocation41_spill] sm:$0xff]  ;;  %v6608_v19 = vadd.f32 %v10308_v62, %v10294_v39  ;;  %v10312_v14 = vld [vmem:[#allocation52_spill] sm:$0xff]  ;;  %2036 = vperm.xlu1 %5170, %v728_v56  }
 0x10d   : > { %10300 = vst [vmem:[#allocation16_spill] sm:$0xff] %v6592_v54  ;;  %v6604_v50 = vadd.f32 %v10306_v47, %v10292_v33  ;;  %v10310_v54 = vld [vmem:[#allocation43_spill] sm:$0xff]  ;;  %v727_v32 = vmul.f32 %v6162_v30, %v10312_v14  ;;  %v10313_v29 = vld [vmem:[#allocation44_spill] sm:$0xff]  ;;  %v10315_v63 = vld [vmem:[#allocation45_spill] sm:$0xff] }
 0x10e   : > { %10309 = vst [vmem:[#allocation17_spill] sm:$0xff] %v6608_v19  ;;  %v6612_v8 = vadd.f32 %v10310_v54, %v10299_v25  ;;  %v6618_v59 = vadd.f32 %v10313_v29, %v10301_v1  ;;  %v6622_v36 = vadd.f32 %v10315_v63, %v10306_v47  ;;  %v10319_v19 = vld [vmem:[#allocation47_spill] sm:$0xff]  ;;  %v10321_v4 = vld [vmem:[#allocation48_spill] sm:$0xff]  ;;  %v6638_v14 = vadd.f32 %v6245_v24, %v10315_v63  ;;  %v6646_v47 = vpop.permute.xlu0 %1636  ;;  %v10333_v56 = vld [vmem:[#allocation54_spill] sm:$0xff] }
 0x10f   : > { %10307 = vst [vmem:[#allocation51_spill] sm:$0xff] %v6604_v50  ;;  %v10317_v50 = vld [vmem:[#allocation46_spill] sm:$0xff]  ;;  %v6630_v25 = vadd.f32 %v10319_v19, %v10310_v54  ;;  %10326 = vst [vmem:[#allocation162_spill] sm:$0xff] %v6646_v47  ;;  %v6666_v47 = vadd.f32 %v6335_v0, %v6245_v24  ;;  %2031 = vperm.xlu0 %5169, %v727_v32   ;;  %v10339_v32 = vld [vmem:[#allocation109_spill] sm:$0xff] }
 0x110   : > { %10311 = vst [vmem:[#allocation42_spill] sm:$0xff] %v6612_v8  ;;  %10314 = vst [vmem:[#allocation43_spill] sm:$0xff] %v6618_v59  ;;  %v6626_v33 = vadd.f32 %v10317_v50, %v10308_v62  ;;  %v6634_v8 = vadd.f32 %v10321_v4, %v10313_v29  ;;  %v6642_v59 = vadd.f32 %v6266_v52, %v10317_v50 }
 0x111   : > { %10316 = vst [vmem:[#allocation52_spill] sm:$0xff] %v6622_v36  ;;  %10320 = vst [vmem:[#allocation157_spill] sm:$0xff] %v6630_v25  ;;  %v6644_v36 = vpop.permute.xlu1 %1641  ;;  %v6653_v25 = vadd.f32 %v6295_v46, %v10319_v19 }
 0x112   : > { %10318 = vst [vmem:[#allocation44_spill] sm:$0xff] %v6626_v33  ;;  %10322 = vst [vmem:[#allocation158_spill] sm:$0xff] %v6634_v8  ;;  %v6649_v33 = vadd.f32 %v904_v49, %v5859_v9  ;;  %v6657_v8 = vadd.f32 %v6318_v41, %v10321_v4  ;;  %v6670_v49 = vadd.f32 %v6338_v13, %v6266_v52 }
 0x113   : > { %10323 = vst [vmem:[#allocation159_spill] sm:$0xff] %v6638_v14  ;;  %10324 = vst [vmem:[#allocation160_spill] sm:$0xff] %v6642_v59  ;;  %v10329_v14 = vld [vmem:[#allocation53_spill] sm:$0xff]  ;;  %v6662_v59 = vadd.f32 %v903_v37, %v5862_v10  ;;  %v6680_v37 = vadd.f32 %v6354_v23, %v6318_v41 }
 0x114   : > { %10325 = vst [vmem:[#allocation161_spill] sm:$0xff] %v6644_v36  ;;  %10327 = vst [vmem:[#allocation163_spill] sm:$0xff] %v6653_v25  ;;  %v730_v63 = vmul.f32 %v6174_v20, %v10329_v14  ;;  %v6674_v25 = vadd.f32 %v6351_v26, %v6295_v46  ;;  %v6684_v14 = vadd.f32 %v6361_v61, %v6335_v0  ;;  %v6704_v0 = vpop.permute.xlu0 %1646 }
 0x115   : > { %10328 = vst [vmem:[#allocation164_spill] sm:$0xff] %v6657_v8  ;;  %10330 = vst [vmem:[#allocation53_spill] sm:$0xff] %v6666_v47  ;;  %v729_v8 = vmul.f32 %v6181_v53, %v10333_v56  ;;  %v6688_v47 = vadd.f32 %v6364_v51, %v6338_v13  ;;  %v10341_v56 = vld [vmem:[#allocation110_spill] sm:$0xff] }
 0x116   : > { %10331 = vst [vmem:[#allocation165_spill] sm:$0xff] %v6670_v49  ;;  %10332 = vst [vmem:[#allocation166_spill] sm:$0xff] %v6674_v25  ;;  %v10337_v49 = vld [vmem:[#allocation108_spill] sm:$0xff]  ;;  %v6696_v25 = vadd.f32 %v10339_v32, %v6354_v23  ;;  %v6700_v19 = vadd.f32 %v10341_v56, %v6361_v61  ;;  %2046 = vperm.xlu1 %5170, %v730_v63   ;;  %v10349_v23 = vld [vmem:[#allocation74_spill] sm:$0xff]  ;;  %v908_v61 = vadd.f32 %v6454_v2, %v5859_v9 }
 0x117   : > { %10334 = vst [vmem:[#allocation54_spill] sm:$0xff] %v6680_v37  ;;  %10335 = vst [vmem:[#allocation167_spill] sm:$0xff] %v6684_v14  ;;  %v6692_v46 = vadd.f32 %v10337_v49, %v6351_v26  ;;  %v6702_v37 = vpop.permute.xlu1 %1651  ;;  %v1224_v14 = vadd.f32 1e-08, %v6649_v33  ;;  %2041 = vperm.xlu0 %5169, %v729_v8   ;;  %v10354_v63 = vld [vmem:[#allocation115_spill] sm:$0xff]  ;;  %v6738_v2 = vadd.f32 %v6409_v7, %v10341_v56  ;;  %v10364_v56 = vld [vmem:[#allocation22_spill] sm:$0xff] }
 0x118   : > { %10336 = vst [vmem:[#allocation168_spill] sm:$0xff] %v6688_v47  ;;  %10340 = vst [vmem:[#allocation170_spill] sm:$0xff] %v6696_v25  ;;  %v10345_v47 = vld [vmem:[#allocation20_spill] sm:$0xff]  ;;  %v10348_v25 = vld [vmem:[#allocation57_spill] sm:$0xff]  ;;  %v6734_v4 = vadd.f32 %v10354_v63, %v10339_v32 }
 0x119   : > { %10338 = vst [vmem:[#allocation169_spill] sm:$0xff] %v6692_v46  ;;  %10342 = vst [vmem:[#allocation171_spill] sm:$0xff] %v6700_v19  ;;  %v6709_v13 = vadd.f32 %v10345_v47, %v5869_v15  ;;  %v10346_v46 = vld [vmem:[#allocation111_spill] sm:$0xff]  ;;  %v732_v36 = vmul.f32 %v10349_v23, %v10348_v25  ;;  %v1223_v19 = vadd.f32 1e-08, %v6662_v59  ;;  %v10351_v47 = vld [vmem:[#allocation61_spill] sm:$0xff]  ;;  %v907_v25 = vadd.f32 %v6466_v55, %v5862_v10 }
 0x11a   : > { %10343 = vst [vmem:[#allocation172_spill] sm:$0xff] %v6702_v37  ;;  %10344 = vst [vmem:[#allocation173_spill] sm:$0xff] %v6704_v0  ;;  %v6713_v26 = vadd.f32 %v10346_v46, %v6364_v51  ;;  %v6722_v0 = vadd.f32 %v6395_v58, %v10337_v49  ;;  %v10352_v37 = vld [vmem:[#allocation75_spill] sm:$0xff]  ;;  %v6742_v8 = vadd.f32 %v6412_v17, %v10346_v46  ;;  %v10361_v55 = vld [vmem:[#allocation62_spill] sm:$0xff]  ;;  %5236 = vrcp.f32 %v1224_v14 }
 0x11b   : > { %v731_v41 = vmul.f32 %v10352_v37, %v10351_v47  ;;  %v10353_v51 = vld [vmem:[#allocation23_spill] sm:$0xff]  ;;  %10355 = vst [vmem:[#allocation74_spill] sm:$0xff] %v6734_v4  ;;  %10356 = vst [vmem:[#allocation61_spill] sm:$0xff] %v6738_v2  ;;  %v6746_v47 = vadd.f32 %v6421_v12, %v6395_v58  ;;  %v10362_v49 = vld [vmem:[#allocation76_spill] sm:$0xff]  ;;  %v1226_v4 = vadd.f32 1e-08, %v6709_v13  ;;  %v832_v2 = vadd.f32 %v6450_v44, %v5859_v9 }
 0x11c   : > { %10347 = vst [vmem:[#allocation20_spill] sm:$0xff] %v6713_v26  ;;  %10350 = vst [vmem:[#allocation57_spill] sm:$0xff] %v6722_v0  ;;  %v6728_v26 = vadd.f32 %v10353_v51, %v5872_v16  ;;  %v6748_v51 = vpop.permute.xlu1 %1661  ;;  %v6750_v0 = vpop.permute.xlu0 %1656  ;;  %v734_v32 = vmul.f32 %v10362_v49, %v10361_v55  ;;  %2221 = vperm.xlu1 %5170, %v732_v36   ;;  %5238 = vrcp.f32 %v1223_v19  ;;  %v10366_v55 = vld [vmem:[#allocation86_spill] sm:$0xff] }
 0x11d   : > { %10357 = vst [vmem:[#allocation75_spill] sm:$0xff] %v6742_v8  ;;  %10358 = vst [vmem:[#allocation23_spill] sm:$0xff] %v6746_v47  ;;  %v6758_v8 = vadd.f32 %v908_v61, %v5879_v21  ;;  %v10363_v47 = vld [vmem:[#allocation19_spill] sm:$0xff]  ;;  %v909_v46 = vadd.f32 %v10364_v56, %v5872_v16  ;;  %2216 = vperm.xlu0 %5169, %v731_v41   ;;  %v6768_v24 = vadd.f32 %v907_v25, %v5882_v22  ;;  %v10370_v56 = vld [vmem:[#allocation66_spill] sm:$0xff] }
 0x11e   : > { %10359 = vst [vmem:[#allocation174_spill] sm:$0xff] %v6748_v51  ;;  %10360 = vst [vmem:[#allocation175_spill] sm:$0xff] %v6750_v0  ;;  %v910_v58 = vadd.f32 %v10363_v47, %v5869_v15  ;;  %v10365_v0 = vld [vmem:[#allocation73_spill] sm:$0xff]  ;;  %v1225_v51 = vadd.f32 1e-08, %v6728_v26  ;;  %v831_v9 = vadd.f32 %v6458_v11, %v5862_v10  ;;  %v6774_v61 = vadd.f32 %v6424_v3, %v10354_v63  ;;  %v10371_v25 = vld [vmem:[#allocation78_spill] sm:$0xff] }
 0x11f   : > { %v733_v14 = vmul.f32 %v10366_v55, %v10365_v0  ;;  %v812_v44 = vadd.f32 %v6100_v57, %v6409_v7  ;;  %v811_v41 = vadd.f32 %v6105_v18, %v6412_v17  ;;  %v814_v0 = vadd.f32 %v6115_v43, %v6421_v12  ;;  %v10372_v11 = vld [vmem:[#allocation69_spill] sm:$0xff]  ;;  %v10373_v47 = vld [vmem:[#allocation80_spill] sm:$0xff]  ;;  %v10374_v57 = vld [vmem:[#allocation18_spill] sm:$0xff] }
 0x120   : > { %10367 = vst [vmem:[#allocation62_spill] sm:$0xff] %v6774_v61  ;;  %v6782_v19 = vpop.permute.xlu1 %1671  ;;  %v6784_v36 = vpop.permute.xlu0 %1666  ;;  %v736_v10 = vmul.f32 %v10371_v25, %v10370_v56  ;;  %v735_v63 = vmul.f32 %v10373_v47, %v10372_v11  ;;  %v912_v61 = vadd.f32 %v832_v2, %v5879_v21  ;;  %v834_v7 = vadd.f32 %v10374_v57, %v5869_v15  ;;  %v10375_v2 = vld [vmem:[#allocation21_spill] sm:$0xff]  ;;  %v10381_v17 = vld [vmem:[#allocation88_spill] sm:$0xff] }
 0x121   : > { %10368 = vst [vmem:[#allocation76_spill] sm:$0xff] %v6782_v19  ;;  %10369 = vst [vmem:[#allocation19_spill] sm:$0xff] %v6784_v36  ;;  %2231 = vperm.xlu1 %5170, %v734_v32   ;;  %5240 = vrcp.f32 %v1226_v4  ;;  %v1228_v18 = vadd.f32 1e-08, %v6758_v8  ;;  %v6795_v43 = vadd.f32 %v910_v58, %v5889_v27  ;;  %v6798_v12 = vadd.f32 %v909_v46, %v5892_v28 }
 0x122   : > { %2226 = vperm.xlu0 %5169, %v733_v14   ;;  %5242 = vrcp.f32 %v1225_v51  ;;  %v1227_v56 = vadd.f32 1e-08, %v6768_v24  ;;  %v911_v25 = vadd.f32 %v831_v9, %v5882_v22  ;;  %v833_v11 = vadd.f32 %v10375_v2, %v5872_v16  ;;  %v10378_v51 = vld [vmem:[#allocation70_spill] sm:$0xff]  ;;  %v10379_v14 = vld [vmem:[#allocation81_spill] sm:$0xff] }
 0x123   : > { %v813_v57 = vadd.f32 %v6120_v42, %v6424_v3  ;;  %v892_v15 = vadd.f32 %v812_v44, %v6125_v34  ;;  %v891_v58 = vadd.f32 %v811_v41, %v6138_v5  ;;  %v894_v4 = vadd.f32 %v814_v0, %v6143_v48  ;;  %v10380_v9 = vld [vmem:[#allocation77_spill] sm:$0xff]  ;;  %v10399_v42 = vld [vmem:[#allocation26_spill] sm:$0xff] }
 0x124   : > { %v6809_v46 = vpop.permute.xlu1 %1681  ;;  %v6811_v32 = vpop.permute.xlu0 %1676  ;;  %v738_v47 = vmul.f32 %v10379_v14, %v10378_v51  ;;  %v737_v36 = vmul.f32 %v10381_v17, %v10380_v9  ;;  %v6818_v16 = vadd.f32 %v912_v61, %v5899_v38  ;;  %v914_v2 = vadd.f32 %v834_v7, %v5889_v27 }
 0x125   : > { %10376 = vst [vmem:[#allocation22_spill] sm:$0xff] %v6809_v46  ;;  %10377 = vst [vmem:[#allocation73_spill] sm:$0xff] %v6811_v32  ;;  %2406 = vperm.xlu1 %5170, %v736_v10   ;;  %5244 = vrcp.f32 %v1228_v18  ;;  %v1230_v44 = vadd.f32 1e-08, %v6795_v43  ;;  %v1229_v41 = vadd.f32 1e-08, %v6798_v12  ;;  %v836_v0 = vadd.f32 %v6470_v31, %v5879_v21 }
 0x126   : > { %2401 = vperm.xlu0 %5169, %v735_v63   ;;  %5246 = vrcp.f32 %v1227_v56  ;;  %v6826_v51 = vadd.f32 %v911_v25, %v5902_v40  ;;  %v913_v17 = vadd.f32 %v833_v11, %v5892_v28  ;;  %v835_v61 = vadd.f32 %v6474_v35, %v5882_v22  ;;  %v10384_v63 = vld [vmem:[#allocation82_spill] sm:$0xff]  ;;  %v10385_v56 = vld [vmem:[#allocation91_spill] sm:$0xff] }
 0x127   : > { %v972_v7 = vadd.f32 %v892_v15, %v10304_v60  ;;  %v971_v18 = vadd.f32 %v891_v58, %v6162_v30  ;;  %v974_v10 = vadd.f32 %v894_v4, %v6174_v20  ;;  %v6835_v14 = vadd.f32 %v813_v57, %v6148_v6  ;;  %v5237_v15 = vpop.eup %5236  ;;  %v10386_v58 = vld [vmem:[#allocation84_spill] sm:$0xff]  ;;  %v10387_v4 = vld [vmem:[#allocation94_spill] sm:$0xff] }
 0x128   : > { %v6837_v21 = vpop.permute.xlu1 %1691  ;;  %v6839_v31 = vpop.permute.xlu0 %1686  ;;  %v740_v25 = vmul.f32 %v10385_v56, %v10384_v63  ;;  %v1064_v11 = vmax.f32 %v6649_v33, 0.0  ;;  %v1232_v22 = vadd.f32 1e-08, %v6818_v16  ;;  %v6846_v35 = vadd.f32 %v914_v2, %v5909_v45  ;;  %v10388_v63 = vld [vmem:[#allocation24_spill] sm:$0xff]  ;;  %v10390_v30 = vld [vmem:[#allocation90_spill] sm:$0xff] }
 0x129   : > { %10382 = vst [vmem:[#allocation86_spill] sm:$0xff] %v6837_v21  ;;  %10383 = vst [vmem:[#allocation66_spill] sm:$0xff] %v6839_v31  ;;  %2416 = vperm.xlu1 %5170, %v738_v47   ;;  %v739_v57 = vmul.f32 %v10387_v4, %v10386_v58  ;;  %v1063_v9 = vmax.f32 %v6662_v59, 0.0  ;;  %5248 = vrcp.f32 %v1230_v44  ;;  %v916_v20 = vadd.f32 %v836_v0, %v5899_v38  ;;  %v5239_v60 = vpop.eup %5238  ;;  %v10391_v58 = vld [vmem:[#allocation98_spill] sm:$0xff] }
 0x12a   : > { %2411 = vperm.xlu0 %5169, %v737_v36   ;;  %5250 = vrcp.f32 %v1229_v41  ;;  %v1231_v33 = vadd.f32 1e-08, %v6826_v51  ;;  %v6854_v56 = vadd.f32 %v913_v17, %v10388_v63  ;;  %v915_v2 = vadd.f32 %v835_v61, %v5902_v40 }
 0x12b   : > { %v6858_v47 = vadd.f32 %v972_v7, %v10349_v23  ;;  %v742_v4 = vmul.f32 %v10391_v58, %v10390_v30  ;;  %v1066_v59 = vmax.f32 %v6709_v13, 0.0  ;;  %v1065_v44 = vmax.f32 %v6728_v26, 0.0  ;;  %v10395_v23 = vld [vmem:[#allocation95_spill] sm:$0xff]  ;;  %v10396_v7 = vld [vmem:[#allocation102_spill] sm:$0xff]  ;;  %v10398_v13 = vld [vmem:[#allocation25_spill] sm:$0xff] }
 0x12c   : > { %v6864_v0 = vpop.permute.xlu1 %1701  ;;  %v6866_v36 = vpop.permute.xlu0 %1696  ;;  %v6868_v41 = vmin.f32 %v1064_v11, 1.0  ;;  %v1306_v17 = vmul.f32 5.0, %v5237_v15  ;;  %5252 = vrcp.f32 %v1232_v22  ;;  %v1234_v61 = vadd.f32 1e-08, %v6846_v35  ;;  %v10400_v22 = vld [vmem:[#allocation133_spill] sm:$0xff] }
 0x12d   : > { %10389 = vst [vmem:[#allocation78_spill] sm:$0xff] %v6858_v47  ;;  %10392 = vst [vmem:[#allocation69_spill] sm:$0xff] %v6864_v0  ;;  %2591 = vperm.xlu1 %5170, %v740_v25   ;;  %v741_v48 = vmul.f32 %v10396_v7, %v10395_v23  ;;  %v6873_v6 = vmin.f32 %v1063_v9, 1.0  ;;  %v1304_v30 = vmul.f32 5.0, %v5239_v60  ;;  %v6876_v58 = vadd.f32 %v916_v20, %v10398_v13 }
 0x12e   : > { %10393 = vst [vmem:[#allocation80_spill] sm:$0xff] %v6866_v36  ;;  %10394 = vst [vmem:[#allocation18_spill] sm:$0xff] %v6868_v41  ;;  %v5241_v26 = vpop.eup %5240  ;;  %2586 = vperm.xlu0 %5169, %v739_v57   ;;  %5254 = vrcp.f32 %v1231_v33  ;;  %v1233_v11 = vadd.f32 1e-08, %v6854_v56  ;;  %v6880_v15 = vadd.f32 %v915_v2, %v10399_v42  ;;  %v837_v25 = vadd.f32 %v10400_v22, %v5892_v28 }
 0x12f   : > { %10397 = vst [vmem:[#allocation21_spill] sm:$0xff] %v6873_v6  ;;  %v5243_v34 = vpop.eup %5242  ;;  %v6885_v23 = vadd.f32 %v971_v18, %v10352_v37  ;;  %v6888_v60 = vadd.f32 %v974_v10, %v10362_v49  ;;  %v6890_v20 = vmin.f32 %v1066_v59, 1.0  ;;  %v6892_v9 = vmin.f32 %v1065_v44, 1.0  ;;  %v10407_v10 = vld [vmem:[#allocation132_spill] sm:$0xff] }
 0x130   : > { %v6894_v57 = vpop.permute.xlu1 %1711  ;;  %v6896_v33 = vpop.permute.xlu0 %1706  ;;  %v1464_v2 = vmul.f32 %v1306_v17, %v6868_v41  ;;  %v1068_v7 = vmax.f32 %v6758_v8, 0.0  ;;  %v1067_v28 = vmax.f32 %v6768_v24, 0.0  ;;  %5256 = vrcp.f32 %v1234_v61 }
 0x131   : > { %10401 = vst [vmem:[#allocation70_spill] sm:$0xff] %v6885_v23  ;;  %10402 = vst [vmem:[#allocation81_spill] sm:$0xff] %v6888_v60  ;;  %2601 = vperm.xlu1 %5170, %v742_v4   ;;  %v1463_v37 = vmul.f32 %v1304_v30, %v6873_v6  ;;  %v1310_v49 = vmul.f32 5.0, %v5241_v26  ;;  %v1236_v18 = vadd.f32 1e-08, %v6876_v58  ;;  %v838_v59 = vadd.f32 %v10407_v10, %v5889_v27  ;;  %v10410_v30 = vld [vmem:[#allocation79_spill] sm:$0xff] }
 0x132   : > { %10403 = vst [vmem:[#allocation77_spill] sm:$0xff] %v6890_v20  ;;  %10404 = vst [vmem:[#allocation88_spill] sm:$0xff] %v6892_v9  ;;  %v5245_v44 = vpop.eup %5244  ;;  %2596 = vperm.xlu0 %5169, %v741_v48   ;;  %v1308_v22 = vmul.f32 5.0, %v5243_v34  ;;  %5258 = vrcp.f32 %v1233_v11  ;;  %v1235_v17 = vadd.f32 1e-08, %v6880_v15  ;;  %v917_v8 = vadd.f32 %v837_v25, %v10388_v63  ;;  %v10450_v6 = vld [vmem:[#allocation117_spill] sm:$0xff] }
 0x133   : > { %10405 = vst [vmem:[#allocation82_spill] sm:$0xff] %v6894_v57  ;;  %10406 = vst [vmem:[#allocation91_spill] sm:$0xff] %v6896_v33  ;;  %v5247_v5 = vpop.eup %5246  ;;  %v6908_v24 = vadd.f32 1e-08, %v6858_v47  ;;  %v6911_v4 = vadd.f32 1e-08, %v6885_v23  ;;  %v973_v61 = vadd.f32 %v6835_v14, %v6181_v53  ;;  %v1466_v47 = vmul.f32 %v1310_v49, %v6890_v20 }
 0x134   : > { %v1296_v27 = vadd.f32 1e-08, %v10410_v30  ;;  %v6916_v26 = vpop.permute.xlu1 %1721  ;;  %v6918_v48 = vpop.permute.xlu0 %1716  ;;  %v6920_v34 = vmin.f32 %v1068_v7, 1.0  ;;  %v6922_v11 = vmin.f32 %v1067_v28, 1.0  ;;  %v1070_v25 = vmax.f32 %v6795_v43, 0.0  ;;  %v10415_v7 = vld [vmem:[#allocation28_spill] sm:$0xff] }
 0x135   : > { %10408 = vst [vmem:[#allocation84_spill] sm:$0xff] %v6908_v24  ;;  %10409 = vst [vmem:[#allocation94_spill] sm:$0xff] %v6911_v4  ;;  %v1069_v10 = vmax.f32 %v6798_v12, 0.0  ;;  %2775 = vperm.xlu1 %5170, %v1464_v2   ;;  %v1314_v23 = vmul.f32 5.0, %v5245_v44  ;;  %5260 = vrcp.f32 %v1236_v18  ;;  %v918_v14 = vadd.f32 %v838_v59, %v5909_v45  ;;  %v10417_v12 = vld [vmem:[#allocation83_spill] sm:$0xff]  ;;  %v10474_v33 = vld [vmem:[#allocation148_spill] sm:$0xff] }
 0x136   : > { %10411 = vst [vmem:[#allocation24_spill] sm:$0xff] %v6916_v26  ;;  %10412 = vst [vmem:[#allocation90_spill] sm:$0xff] %v6918_v48  ;;  %v5249_v30 = vpop.eup %5248  ;;  %2770 = vperm.xlu0 %5169, %v1463_v37   ;;  %v1465_v53 = vmul.f32 %v1308_v22, %v6892_v9  ;;  %v1312_v24 = vmul.f32 5.0, %v5247_v5  ;;  %5262 = vrcp.f32 %v1235_v17  ;;  %v6930_v28 = vadd.f32 %v917_v8, %v10415_v7  ;;  %v10418_v49 = vld [vmem:[#allocation87_spill] sm:$0xff]  ;;  %v10459_v48 = vld [vmem:[#allocation33_spill] sm:$0xff] }
 0x137   : > { %10413 = vst [vmem:[#allocation98_spill] sm:$0xff] %v6920_v34  ;;  %10414 = vst [vmem:[#allocation95_spill] sm:$0xff] %v6922_v11  ;;  %v5251_v4 = vpop.eup %5250  ;;  %v6933_v43 = vadd.f32 1e-08, %v6888_v60  ;;  %5264 = vrcp.f32 %v1296_v27  ;;  %v1295_v2 = vadd.f32 1e-08, %v10417_v12  ;;  %v1468_v27 = vmul.f32 %v1314_v23, %v6920_v34 }
 0x138   : > { %v1298_v18 = vadd.f32 1e-08, %v10418_v49  ;;  %v6937_v44 = vpop.permute.xlu1 %1731  ;;  %v6939_v59 = vpop.permute.xlu0 %1726  ;;  %v6941_v37 = vmin.f32 %v1070_v25, 1.0  ;;  %v6943_v5 = vmin.f32 %v1069_v10, 1.0  ;;  %v1072_v22 = vmax.f32 %v6818_v16, 0.0  ;;  %v10423_v12 = vld [vmem:[#allocation27_spill] sm:$0xff] }
 0x139   : > { %10416 = vst [vmem:[#allocation102_spill] sm:$0xff] %v6933_v43  ;;  %10419 = vst [vmem:[#allocation25_spill] sm:$0xff] %v6937_v44  ;;  %v1071_v17 = vmax.f32 %v6826_v51, 0.0  ;;  %v5253_v8 = vpop.eup %5252  ;;  %2785 = vperm.xlu1 %5170, %v1466_v47   ;;  %v1318_v60 = vmul.f32 5.0, %v5249_v30  ;;  %v6949_v43 = vadd.f32 %v918_v14, %v10423_v12  ;;  %v10424_v49 = vld [vmem:[#allocation139_spill] sm:$0xff]  ;;  %v1467_v25 = vmul.f32 %v1312_v24, %v6922_v11  ;;  %v10427_v23 = vld [vmem:[#allocation89_spill] sm:$0xff] }
 0x13a   : > { %10420 = vst [vmem:[#allocation26_spill] sm:$0xff] %v6939_v59  ;;  %10421 = vst [vmem:[#allocation133_spill] sm:$0xff] %v6941_v37  ;;  %v843_v20 = vadd.f32 %v10424_v49, %v10399_v42  ;;  %2780 = vperm.xlu0 %5169, %v1465_v53   ;;  %v1316_v10 = vmul.f32 5.0, %v5251_v4  ;;  %v1237_v9 = vadd.f32 1e-08, %v6930_v28  ;;  %v10425_v16 = vld [vmem:[#allocation135_spill] sm:$0xff]  ;;  %v6958_v47 = vadd.f32 %v973_v61, %v10366_v55 }
 0x13b   : > { %10422 = vst [vmem:[#allocation132_spill] sm:$0xff] %v6943_v5  ;;  %v839_v51 = vadd.f32 %v10425_v16, %v5902_v40  ;;  %v5255_v3 = vpop.eup %5254  ;;  %5266 = vrcp.f32 %v1295_v2  ;;  %v1297_v30 = vadd.f32 1e-08, %v10427_v23  ;;  %v1074_v14 = vmax.f32 %v6846_v35, 0.0  ;;  %v10430_v16 = vld [vmem:[#allocation30_spill] sm:$0xff]  ;;  %v10452_v11 = vld [vmem:[#allocation121_spill] sm:$0xff] }
 0x13c   : > { %10426 = vst [vmem:[#allocation28_spill] sm:$0xff] %v6958_v47  ;;  %5268 = vrcp.f32 %v1298_v18  ;;  %v6962_v49 = vpop.permute.xlu1 %1741  ;;  %v6964_v53 = vpop.permute.xlu0 %1736  ;;  %v6966_v24 = vmin.f32 %v1072_v22, 1.0  ;;  %v1322_v4 = vmul.f32 5.0, %v5253_v8  ;;  %v1073_v41 = vmax.f32 %v6854_v56, 0.0  ;;  %v10460_v44 = vld [vmem:[#allocation141_spill] sm:$0xff] }
 0x13d   : > { %10428 = vst [vmem:[#allocation27_spill] sm:$0xff] %v6962_v49  ;;  %10429 = vst [vmem:[#allocation139_spill] sm:$0xff] %v6964_v53  ;;  %v5257_v40 = vpop.eup %5256  ;;  %2795 = vperm.xlu1 %5170, %v1468_v27   ;;  %v1470_v55 = vmul.f32 %v1318_v60, %v6941_v37  ;;  %v6970_v61 = vmin.f32 %v1071_v17, 1.0  ;;  %v1238_v2 = vadd.f32 1e-08, %v6949_v43  ;;  %v923_v35 = vadd.f32 %v843_v20, %v10430_v16  ;;  %v10432_v27 = vld [vmem:[#allocation93_spill] sm:$0xff] }
 0x13e   : > { %2790 = vperm.xlu0 %5169, %v1467_v25   ;;  %v1469_v18 = vmul.f32 %v1316_v10, %v6943_v5  ;;  %v1320_v23 = vmul.f32 5.0, %v5255_v3  ;;  %5270 = vrcp.f32 %v1237_v9  ;;  %v919_v22 = vadd.f32 %v839_v51, %v10399_v42  ;;  %v6991_v9 = vld [vmem:[#allocation2] ss:$0 sm:$0xff] }
 0x13f   : > { %v5259_v8 = vpop.eup %5258  ;;  %v6977_v56 = vadd.f32 1e-08, %v6958_v47  ;;  %5272 = vrcp.f32 %v1297_v30  ;;  %v1140_v60 = vmax.f32 %v10432_v27, 0.0  ;;  %v6980_v17 = vmin.f32 %v1074_v14, 1.0  ;;  %v10435_v51 = vld [vmem:[#allocation34_spill] sm:$0xff] }
 0x140   : > { %v6982_v37 = vpop.permute.xlu1 %1751  ;;  %v6984_v34 = vpop.permute.xlu0 %1746  ;;  %v1472_v20 = vmul.f32 %v1322_v4, %v6966_v24  ;;  %v6987_v25 = vmin.f32 %v1073_v41, 1.0  ;;  %v1076_v3 = vmax.f32 %v6876_v58, 0.0  ;;  %v1075_v42 = vmax.f32 %v6880_v15, 0.0  ;;  %v10436_v14 = vld [vmem:[#allocation138_spill] sm:$0xff] }
 0x141   : > { %10431 = vst [vmem:[#allocation135_spill] sm:$0xff] %v6977_v56  ;;  %10433 = vst [vmem:[#allocation30_spill] sm:$0xff] %v6982_v37  ;;  %2805 = vperm.xlu1 %5170, %v1470_v55   ;;  %v1326_v10 = vmul.f32 5.0, %v5257_v40  ;;  %5274 = vrcp.f32 %v1238_v2  ;;  %v6994_v30 = vadd.f32 %v923_v35, %v10435_v51  ;;  %v844_v47 = vadd.f32 %v10436_v14, %v10398_v13  ;;  %v10437_v15 = vld [vmem:[#allocation134_spill] sm:$0xff]  ;;  %v10440_v35 = vld [vmem:[#allocation96_spill] sm:$0xff] }
 0x142   : > { %10434 = vst [vmem:[#allocation93_spill] sm:$0xff] %v6984_v34  ;;  %v5261_v56 = vpop.eup %5260  ;;  %2800 = vperm.xlu0 %5169, %v1469_v18   ;;  %v1471_v41 = vmul.f32 %v1320_v23, %v6970_v61  ;;  %v1324_v4 = vmul.f32 5.0, %v5259_v8  ;;  %v7000_v58 = vadd.f32 %v919_v22, %v10430_v16  ;;  %v840_v5 = vadd.f32 %v10437_v15, %v5899_v38  ;;  %v10443_v23 = vld [vmem:[#allocation112_spill] sm:$0xff]  ;;  %v10444_v8 = vld [vmem:[#allocation113_spill] sm:$0xff]  ;;  %v7019_v38 = vld [vmem:[#allocation2 + $0x1] ss:$0 sm:$0xff] }
 0x143   : > { %v5263_v55 = vpop.eup %5262  ;;  %v7004_v40 = vmin.f32 %v1140_v60, 1.0  ;;  %v7007_v2 = vadd.f32 1e-08, %v10432_v27  ;;  %v7011_v14 = vadd.f32 1e-08, %v10440_v35  ;;  %v1950_v22 = vmul.f32 %v6991_v9, %v10443_v23  ;;  %10445 = vst [vmem:[#allocation112_spill] sm:$0xff] %v7019_v38 }
 0x144   : > { %v7013_v18 = vpop.eup %5264  ;;  %v1948_v34 = vmul.f32 %v6991_v9, %v10444_v8  ;;  %v7021_v60 = vpop.permute.xlu1 %1761  ;;  %v7025_v27 = vmin.f32 %v1076_v3, 1.0  ;;  %v7027_v37 = vmin.f32 %v1075_v42, 1.0  ;;  %v1243_v35 = vadd.f32 1e-08, %v6994_v30  ;;  %v10448_v23 = vld [vmem:[#allocation29_spill] sm:$0xff]  ;;  %v10449_v3 = vld [vmem:[#allocation116_spill] sm:$0xff] }
 0x145   : > { %10438 = vst [vmem:[#allocation34_spill] sm:$0xff] %v7004_v40  ;;  %10439 = vst [vmem:[#allocation138_spill] sm:$0xff] %v7007_v2  ;;  %v7023_v15 = vpop.permute.xlu0 %1756  ;;  %2815 = vperm.xlu1 %5170, %v1472_v20   ;;  %v1474_v40 = vmul.f32 %v1326_v10, %v6980_v17  ;;  %v1473_v8 = vmul.f32 %v1324_v4, %v6987_v25  ;;  %v1328_v2 = vmul.f32 5.0, %v5263_v55  ;;  %v10451_v10 = vld [vmem:[#allocation120_spill] sm:$0xff]  ;;  %v1077_v26 = vmax.f32 %v6930_v28, 0.0  ;;  %v10461_v28 = vld [vmem:[#allocation137_spill] sm:$0xff] }
 0x146   : > { %10441 = vst [vmem:[#allocation134_spill] sm:$0xff] %v7011_v14  ;;  %10442 = vst [vmem:[#allocation176_spill] sm:$0xff] %v7013_v18  ;;  %v1330_v18 = vmul.f32 5.0, %v5261_v56  ;;  %v924_v14 = vadd.f32 %v844_v47, %v10448_v23  ;;  %2810 = vperm.xlu0 %5169, %v1471_v41   ;;  %v1951_v42 = vmul.f32 %v6991_v9, %v10449_v3  ;;  %v10454_v55 = vld [vmem:[#allocation124_spill] sm:$0xff]  ;;  %5276 = vrcp.f32 %v1243_v35 }
 0x147   : > { %10446 = vst [vmem:[#allocation113_spill] sm:$0xff] %v7021_v60  ;;  %10447 = vst [vmem:[#allocation177_spill] sm:$0xff] %v7023_v15  ;;  %v1239_v60 = vadd.f32 1e-08, %v7000_v58  ;;  %v920_v15 = vadd.f32 %v840_v5, %v10398_v13  ;;  %v1949_v20 = vmul.f32 %v6991_v9, %v10450_v6  ;;  %v2054_v56 = vmul.f32 %v7019_v38, %v10451_v10  ;;  %v10455_v5 = vld [vmem:[#allocation125_spill] sm:$0xff] }
 0x148   : > { %v2053_v47 = vmul.f32 %v7019_v38, %v10452_v11  ;;  %v7043_v41 = vpop.eup %5266  ;;  %v1953_v4 = vmul.f32 %v6991_v9, %v10451_v10  ;;  %v2056_v13 = vmul.f32 %v7019_v38, %v10454_v55  ;;  %v2055_v3 = vmul.f32 %v7019_v38, %v10455_v5  ;;  %v7051_v49 = vpop.permute.xlu1 %1771 }
 0x149   : > { %10453 = vst [vmem:[#allocation29_spill] sm:$0xff] %v7043_v41  ;;  %10456 = vst [vmem:[#allocation116_spill] sm:$0xff] %v7051_v49  ;;  %v7053_v6 = vpop.permute.xlu0 %1766  ;;  %v7056_v53 = vpop.eup %5268  ;;  %2825 = vperm.xlu1 %5170, %v1474_v40   ;;  %v1476_v41 = vmul.f32 %v1330_v18, %v7025_v27  ;;  %v7060_v10 = vadd.f32 %v924_v14, %v10459_v48  ;;  %v845_v57 = vadd.f32 %v10460_v44, %v10415_v7 }
 0x14a   : > { %10457 = vst [vmem:[#allocation117_spill] sm:$0xff] %v7053_v6  ;;  %10458 = vst [vmem:[#allocation120_spill] sm:$0xff] %v7056_v53  ;;  %2820 = vperm.xlu0 %5169, %v1473_v8   ;;  %v1475_v59 = vmul.f32 %v1328_v2, %v7027_v37  ;;  %5278 = vrcp.f32 %v1239_v60  ;;  %v7066_v49 = vadd.f32 %v920_v15, %v10448_v23  ;;  %v7088_v15 = vld [vmem:[#allocation2 + $0x2] ss:$0 sm:$0xff] }
 0x14b   : > { %v841_v53 = vadd.f32 %v10461_v28, %v10388_v63  ;;  %v5271_v40 = vpop.eup %5270  ;;  %v7070_v6 = vadd.f32 %v2054_v56, %v1949_v20  ;;  %v1952_v35 = vmul.f32 %v6991_v9, %v10452_v11  ;;  %v7074_v14 = vadd.f32 %v2053_v47, %v1948_v34  ;;  %v10463_v8 = vld [vmem:[#allocation126_spill] sm:$0xff] }
 0x14c   : > { %v1955_v44 = vmul.f32 %v6991_v9, %v10454_v55  ;;  %v7078_v18 = vpop.eup %5272  ;;  %v7080_v2 = vadd.f32 %v2056_v13, %v1951_v42  ;;  %v7084_v60 = vmul.f32 %v6991_v9, %v10455_v5  ;;  %v7086_v63 = vadd.f32 %v2055_v3, %v1950_v22  ;;  %v7092_v34 = vpop.permute.xlu1 %1781  ;;  %v10466_v55 = vld [vmem:[#allocation32_spill] sm:$0xff] }
 0x14d   : > { %10462 = vst [vmem:[#allocation121_spill] sm:$0xff] %v7078_v18  ;;  %v2058_v11 = vmul.f32 %v7019_v38, %v10463_v8  ;;  %10464 = vst [vmem:[#allocation124_spill] sm:$0xff] %v7092_v34  ;;  %v7094_v20 = vpop.permute.xlu0 %1776  ;;  %2835 = vperm.xlu1 %5170, %v1476_v41   ;;  %v7096_v56 = vmin.f32 %v1077_v26, 1.0  ;;  %v1078_v42 = vmax.f32 %v6949_v43, 0.0  ;;  %v1244_v47 = vadd.f32 1e-08, %v7060_v10 }
 0x14e   : > { %10465 = vst [vmem:[#allocation125_spill] sm:$0xff] %v7094_v20  ;;  %v925_v13 = vadd.f32 %v845_v57, %v10466_v55  ;;  %v5275_v22 = vpop.eup %5274  ;;  %2830 = vperm.xlu0 %5169, %v1475_v59   ;;  %v1332_v5 = vmul.f32 5.0, %v5271_v40  ;;  %v1240_v3 = vadd.f32 1e-08, %v7066_v49  ;;  %v921_v28 = vadd.f32 %v841_v53, %v10415_v7  ;;  %v10467_v18 = vld [vmem:[#allocation140_spill] sm:$0xff]  ;;  %v10469_v41 = vld [vmem:[#allocation127_spill] sm:$0xff] }
 0x14f   : > { %v846_v34 = vadd.f32 %v10467_v18, %v10423_v12  ;;  %v7107_v26 = vmul.f32 %v6991_v9, %v10463_v8  ;;  %v7111_v43 = vmul.f32 %v7088_v15, %v10463_v8  ;;  %v2057_v57 = vmul.f32 %v7019_v38, %v10469_v41  ;;  %v10470_v59 = vld [vmem:[#allocation136_spill] sm:$0xff] }
 0x150   : > { %v842_v40 = vadd.f32 %v10470_v59, %v5909_v45  ;;  %v7117_v20 = vadd.f32 %v2058_v11, %v1953_v4  ;;  %v7121_v7 = vmul.f32 %v6991_v9, %v10469_v41  ;;  %v7125_v53 = vmul.f32 %v7088_v15, %v10469_v41  ;;  %v7127_v18 = vpop.permute.xlu1 %1791  ;;  %v10475_v11 = vld [vmem:[#allocation36_spill] sm:$0xff] }
 0x151   : > { %10468 = vst [vmem:[#allocation33_spill] sm:$0xff] %v7107_v26  ;;  %10472 = vst [vmem:[#allocation137_spill] sm:$0xff] %v7127_v18  ;;  %v7129_v8 = vpop.permute.xlu0 %1786  ;;  %v851_v0 = vadd.f32 %v10474_v33, %v10435_v51  ;;  %3397 = vperm.xlu1 %5170, %v7027_v37   ;;  %v7134_v45 = vmin.f32 %v1078_v42, 1.0  ;;  %v1334_v4 = vmul.f32 5.0, %v5275_v22  ;;  %5280 = vrcp.f32 %v1244_v47  ;;  %v10477_v37 = vld [vmem:[#allocation128_spill] sm:$0xff] }
 0x152   : > { %10471 = vst [vmem:[#allocation141_spill] sm:$0xff] %v7121_v7  ;;  %10473 = vst [vmem:[#allocation126_spill] sm:$0xff] %v7129_v8  ;;  %v7137_v59 = vadd.f32 %v925_v13, %v10475_v11  ;;  %3377 = vperm.xlu0 %5169, %v6970_v61   ;;  %v1477_v41 = vmul.f32 %v1332_v5, %v7096_v56  ;;  %5282 = vrcp.f32 %v1240_v3  ;;  %v10476_v8 = vld [vmem:[#allocation31_spill] sm:$0xff]  ;;  %v10479_v61 = vld [vmem:[#allocation129_spill] sm:$0xff] }
 0x153   : > { %v7142_v18 = vadd.f32 %v921_v28, %v10466_v55  ;;  %v926_v36 = vadd.f32 %v846_v34, %v10476_v8  ;;  %v7145_v33 = vadd.f32 %v2057_v57, %v1952_v35  ;;  %v7149_v42 = vmul.f32 %v6991_v9, %v10477_v37 }
 0x154   : > { %v2060_v47 = vmul.f32 %v7019_v38, %v10477_v37  ;;  %v922_v13 = vadd.f32 %v842_v40, %v10423_v12  ;;  %v2059_v22 = vmul.f32 %v7019_v38, %v10479_v61  ;;  %v7156_v5 = vpop.permute.xlu1 %1801  ;;  %v1083_v34 = vmax.f32 %v6994_v30, 0.0 }
 0x155   : > { %10478 = vst [vmem:[#allocation32_spill] sm:$0xff] %v7149_v42  ;;  %10480 = vst [vmem:[#allocation140_spill] sm:$0xff] %v7156_v5  ;;  %v7158_v3 = vpop.permute.xlu0 %1796  ;;  %v1079_v35 = vmax.f32 %v7000_v58, 0.0  ;;  %v931_v28 = vadd.f32 %v851_v0, %v10294_v39  ;;  %v7165_v57 = vmul.f32 %v7088_v15, %v10477_v37  ;;  %3382 = vperm.xlu1 %5170, %v6966_v24   ;;  %v1245_v40 = vadd.f32 1e-08, %v7137_v59  ;;  %v10482_v5 = vld [vmem:[#allocation145_spill] sm:$0xff] }
 0x156   : > { %10481 = vst [vmem:[#allocation127_spill] sm:$0xff] %v7158_v3  ;;  %v1478_v12 = vmul.f32 %v1334_v4, %v7134_v45  ;;  %v847_v31 = vadd.f32 %v10482_v5, %v10430_v16  ;;  %v5277_v3 = vpop.eup %5276  ;;  %v7174_v30 = vmul.f32 %v6991_v9, %v10479_v61  ;;  %2840 = vperm.xlu0 %5169, %v1477_v41   ;;  %v1241_v0 = vadd.f32 1e-08, %v7142_v18  ;;  %v10484_v58 = vld [vmem:[#allocation35_spill] sm:$0xff]  ;;  %v10485_v24 = vld [vmem:[#allocation49_spill] sm:$0xff]  ;;  %v10486_v41 = vld [vmem:[#allocation142_spill] sm:$0xff] }
 0x157   : > { %v7178_v37 = vadd.f32 %v926_v36, %v10484_v58  ;;  %v852_v21 = vadd.f32 %v10485_v24, %v10459_v48  ;;  %v5279_v4 = vpop.eup %5278  ;;  %v7182_v32 = vadd.f32 %v2060_v47, %v1955_v44  ;;  %v7186_v16 = vmul.f32 %v7088_v15, %v10479_v61 }
 0x158   : > { %10483 = vst [vmem:[#allocation136_spill] sm:$0xff] %v7174_v30  ;;  %v7189_v5 = vadd.f32 %v922_v13, %v10476_v8  ;;  %v848_v30 = vadd.f32 %v10486_v41, %v10448_v23  ;;  %v7194_v46 = vadd.f32 %v2059_v22, %v7084_v60  ;;  %v7196_v36 = vpop.permute.xlu1 %1811  ;;  %v7200_v24 = vmin.f32 %v1083_v34, 1.0  ;;  %v10490_v23 = vld [vmem:[#allocation50_spill] sm:$0xff]  ;;  %v10491_v41 = vld [vmem:[#allocation37_spill] sm:$0xff] }
 0x159   : > { %10488 = vst [vmem:[#allocation36_spill] sm:$0xff] %v7196_v36  ;;  %v7198_v42 = vpop.permute.xlu0 %1806  ;;  %v7202_v44 = vmin.f32 %v1079_v35, 1.0  ;;  %v7205_v47 = vadd.f32 %v931_v28, %v10308_v62  ;;  %2845 = vperm.xlu1 %5170, %v1478_v12   ;;  %v1344_v13 = vmul.f32 5.0, %v5277_v3  ;;  %5284 = vrcp.f32 %v1245_v40  ;;  %v10492_v36 = vld [vmem:[#allocation130_spill] sm:$0xff] }
 0x15a   : > { %10487 = vst [vmem:[#allocation148_spill] sm:$0xff] %v7194_v46  ;;  %10489 = vst [vmem:[#allocation31_spill] sm:$0xff] %v7198_v42  ;;  %v927_v61 = vadd.f32 %v847_v31, %v10435_v51  ;;  %v853_v60 = vadd.f32 %v10490_v23, %v10475_v11  ;;  %3402 = vperm.xlu0 %5169, %v7025_v27   ;;  %v1336_v22 = vmul.f32 5.0, %v5279_v4  ;;  %5286 = vrcp.f32 %v1241_v0  ;;  %v10497_v23 = vld [vmem:[#allocation131_spill] sm:$0xff] }
 0x15b   : > { %v1246_v34 = vadd.f32 1e-08, %v7178_v37  ;;  %v932_v35 = vadd.f32 %v852_v21, %v10491_v41  ;;  %v7215_v28 = vmul.f32 %v6991_v9, %v10492_v36  ;;  %v7219_v3 = vmul.f32 %v7019_v38, %v10492_v36 }
 0x15c   : > { %v1242_v31 = vadd.f32 1e-08, %v7189_v5  ;;  %v928_v51 = vadd.f32 %v848_v30, %v10459_v48  ;;  %v7225_v27 = vmul.f32 %v7088_v15, %v10492_v36  ;;  %v7227_v12 = vpop.permute.xlu1 %1821  ;;  %v1084_v21 = vmax.f32 %v7060_v10, 0.0  ;;  %v10499_v10 = vld [vmem:[#allocation41_spill] sm:$0xff] }
 0x15d   : > { %10493 = vst [vmem:[#allocation128_spill] sm:$0xff] %v7215_v28  ;;  %10494 = vst [vmem:[#allocation129_spill] sm:$0xff] %v7219_v3  ;;  %v7229_v40 = vpop.permute.xlu0 %1816  ;;  %v1080_v0 = vmax.f32 %v7066_v49, 0.0  ;;  %v1251_v4 = vadd.f32 1e-08, %v7205_v47  ;;  %v7236_v42 = vmul.f32 %v6991_v9, %v10497_v23  ;;  %3407 = vperm.xlu1 %5170, %v7096_v56   ;;  %v1483_v48 = vmul.f32 %v1344_v13, %v7200_v24 }
 0x15e   : > { %10495 = vst [vmem:[#allocation145_spill] sm:$0xff] %v7227_v12  ;;  %10496 = vst [vmem:[#allocation35_spill] sm:$0xff] %v7229_v40  ;;  %v7241_v30 = vadd.f32 %v927_v61, %v10294_v39  ;;  %v933_v12 = vadd.f32 %v853_v60, %v10301_v1  ;;  %v5281_v40 = vpop.eup %5280  ;;  %3387 = vperm.xlu0 %5169, %v6987_v25   ;;  %v1479_v49 = vmul.f32 %v1336_v22, %v7202_v44 }
 0x15f   : > { %10498 = vst [vmem:[#allocation49_spill] sm:$0xff] %v7236_v42  ;;  %5288 = vrcp.f32 %v1246_v34  ;;  %v7247_v28 = vadd.f32 %v932_v35, %v10499_v10  ;;  %v10500_v42 = vld [vmem:[#allocation147_spill] sm:$0xff]  ;;  %v5283_v56 = vpop.eup %5282  ;;  %v7253_v13 = vmul.f32 %v7019_v38, %v10497_v23  ;;  %v7257_v61 = vmul.f32 %v7088_v15, %v10497_v23 }
 0x160   : > { %v849_v7 = vadd.f32 %v10500_v42, %v10466_v55  ;;  %5290 = vrcp.f32 %v1242_v31  ;;  %v7260_v25 = vadd.f32 %v928_v51, %v10491_v41  ;;  %v7262_v60 = vpop.permute.xlu1 %1831  ;;  %v7266_v34 = vmin.f32 %v1084_v21, 1.0  ;;  %v10504_v42 = vld [vmem:[#allocation149_spill] sm:$0xff]  ;;  %v10505_v51 = vld [vmem:[#allocation146_spill] sm:$0xff] }
 0x161   : > { %10501 = vst [vmem:[#allocation142_spill] sm:$0xff] %v7253_v13  ;;  %10502 = vst [vmem:[#allocation50_spill] sm:$0xff] %v7262_v60  ;;  %v7264_v22 = vpop.permute.xlu0 %1826  ;;  %v7268_v55 = vmin.f32 %v1080_v0, 1.0  ;;  %5292 = vrcp.f32 %v1251_v4  ;;  %v854_v35 = vadd.f32 %v10504_v42, %v10484_v58  ;;  %2870 = vperm.xlu1 %5170, %v1483_v48   ;;  %v1346_v13 = vmul.f32 5.0, %v5281_v40  ;;  %v10506_v4 = vld [vmem:[#allocation38_spill] sm:$0xff]  ;;  %v10507_v42 = vld [vmem:[#allocation143_spill] sm:$0xff] }
 0x162   : > { %10503 = vst [vmem:[#allocation37_spill] sm:$0xff] %v7264_v22  ;;  %v1247_v19 = vadd.f32 1e-08, %v7241_v30  ;;  %v7274_v31 = vadd.f32 %v933_v12, %v10313_v29  ;;  %v850_v60 = vadd.f32 %v10505_v51, %v10476_v8  ;;  %2850 = vperm.xlu0 %5169, %v1479_v49   ;;  %v1338_v22 = vmul.f32 5.0, %v5283_v56 }
 0x163   : > { %v1252_v21 = vadd.f32 1e-08, %v7247_v28  ;;  %v929_v0 = vadd.f32 %v849_v7, %v10475_v11  ;;  %v859_v3 = vadd.f32 %v10506_v4, %v10308_v62  ;;  %v7284_v40 = vmul.f32 %v6991_v9, %v10507_v42  ;;  %v10511_v7 = vld [vmem:[#allocation144_spill] sm:$0xff] }
 0x164   : > { %v7288_v12 = vmul.f32 %v7019_v38, %v10507_v42  ;;  %v1085_v48 = vmax.f32 %v7137_v59, 0.0  ;;  %v1248_v8 = vadd.f32 1e-08, %v7260_v25  ;;  %v7294_v49 = vmul.f32 %v7088_v15, %v10507_v42  ;;  %v7300_v56 = vpop.permute.xlu1 %1841 }
 0x165   : > { %10508 = vst [vmem:[#allocation130_spill] sm:$0xff] %v7284_v40  ;;  %v7298_v11 = vmul.f32 %v6991_v9, %v10511_v7  ;;  %10513 = vst [vmem:[#allocation149_spill] sm:$0xff] %v7300_v56  ;;  %v7302_v51 = vpop.permute.xlu0 %1836  ;;  %v1081_v4 = vmax.f32 %v7142_v18, 0.0  ;;  %v10515_v40 = vld [vmem:[#allocation39_spill] sm:$0xff]  ;;  %3412 = vperm.xlu1 %5170, %v7134_v45   ;;  %v1484_v59 = vmul.f32 %v1346_v13, %v7266_v34  ;;  %5294 = vrcp.f32 %v1247_v19 }
 0x166   : > { %10509 = vst [vmem:[#allocation131_spill] sm:$0xff] %v7288_v12  ;;  %10510 = vst [vmem:[#allocation41_spill] sm:$0xff] %v7294_v49  ;;  %v934_v12 = vadd.f32 %v854_v35, %v10515_v40  ;;  %v1253_v26 = vadd.f32 1e-08, %v7274_v31  ;;  %v930_v46 = vadd.f32 %v850_v60, %v10484_v58  ;;  %v5285_v49 = vpop.eup %5284  ;;  %3392 = vperm.xlu0 %5169, %v6980_v17   ;;  %5296 = vrcp.f32 %v1252_v21  ;;  %v10516_v13 = vld [vmem:[#allocation151_spill] sm:$0xff] }
 0x167   : > { %10512 = vst [vmem:[#allocation147_spill] sm:$0xff] %v7298_v11  ;;  %10514 = vst [vmem:[#allocation146_spill] sm:$0xff] %v7302_v51  ;;  %v1480_v9 = vmul.f32 %v1338_v22, %v7268_v55  ;;  %v7313_v56 = vadd.f32 %v929_v0, %v10301_v1  ;;  %v939_v18 = vadd.f32 %v859_v3, %v10317_v50  ;;  %v5287_v35 = vpop.eup %5286  ;;  %v7316_v45 = vmin.f32 %v1085_v48, 1.0  ;;  %v10519_v3 = vld [vmem:[#allocation154_spill] sm:$0xff] }
 0x168   : > { %v1086_v19 = vmax.f32 %v7178_v37, 0.0  ;;  %5298 = vrcp.f32 %v1248_v8  ;;  %v855_v58 = vadd.f32 %v10516_v13, %v10294_v39  ;;  %v7321_v60 = vpop.permute.xlu1 %1851  ;;  %v7325_v22 = vmin.f32 %v1081_v4, 1.0  ;;  %v10520_v39 = vld [vmem:[#allocation150_spill] sm:$0xff] }
 0x169   : > { %10517 = vst [vmem:[#allocation38_spill] sm:$0xff] %v7321_v60  ;;  %v7323_v17 = vpop.permute.xlu0 %1846  ;;  %v1082_v21 = vmax.f32 %v7189_v5, 0.0  ;;  %v7329_v0 = vadd.f32 %v934_v12, %v10310_v54  ;;  %v860_v48 = vadd.f32 %v10519_v3, %v10499_v10  ;;  %2875 = vperm.xlu1 %5170, %v1484_v59   ;;  %v1348_v37 = vmul.f32 5.0, %v5285_v49 }
 0x16a   : > { %10518 = vst [vmem:[#allocation143_spill] sm:$0xff] %v7323_v17  ;;  %5300 = vrcp.f32 %v1253_v26  ;;  %v7334_v8 = vadd.f32 %v930_v46, %v10515_v40  ;;  %v856_v13 = vadd.f32 %v10520_v39, %v10491_v41  ;;  %2855 = vperm.xlu0 %5169, %v1480_v9   ;;  %v1340_v4 = vmul.f32 5.0, %v5287_v35  ;;  %v10524_v39 = vld [vmem:[#allocation45_spill] sm:$0xff] }
 0x16b   : > { %v1091_v51 = vmax.f32 %v7205_v47, 0.0  ;;  %v1249_v5 = vadd.f32 1e-08, %v7313_v56  ;;  %v7341_v12 = vadd.f32 %v939_v18, %v6266_v52  ;;  %v7345_v49 = vmul.f32 %v7019_v38, %v10511_v7 }
 0x16c   : > { %v5289_v60 = vpop.eup %5288  ;;  %v7349_v46 = vmul.f32 %v7088_v15, %v10511_v7  ;;  %v7351_v26 = vmin.f32 %v1086_v19, 1.0  ;;  %v935_v41 = vadd.f32 %v855_v58, %v10308_v62  ;;  %v7354_v47 = vpop.permute.xlu1 %1861  ;;  %v7358_v18 = vmin.f32 %v1082_v21, 1.0 }
 0x16d   : > { %10521 = vst [vmem:[#allocation144_spill] sm:$0xff] %v7345_v49  ;;  %v5291_v59 = vpop.eup %5290  ;;  %10522 = vst [vmem:[#allocation39_spill] sm:$0xff] %v7354_v47  ;;  %v7356_v9 = vpop.permute.xlu0 %1856  ;;  %v1087_v35 = vmax.f32 %v7241_v30, 0.0  ;;  %v1254_v3 = vadd.f32 1e-08, %v7329_v0  ;;  %v940_v17 = vadd.f32 %v860_v48, %v10524_v39  ;;  %3437 = vperm.xlu1 %5170, %v7200_v24   ;;  %v1485_v19 = vmul.f32 %v1348_v37, %v7316_v45 }
 0x16e   : > { %10523 = vst [vmem:[#allocation151_spill] sm:$0xff] %v7356_v9  ;;  %v5293_v11 = vpop.eup %5292  ;;  %v1092_v62 = vmax.f32 %v7247_v28, 0.0  ;;  %v1250_v58 = vadd.f32 1e-08, %v7334_v8  ;;  %v936_v47 = vadd.f32 %v856_v13, %v10499_v10  ;;  %3417 = vperm.xlu0 %5169, %v7202_v44   ;;  %v1481_v21 = vmul.f32 %v1340_v4, %v7325_v22  ;;  %v10527_v13 = vld [vmem:[#allocation85_spill] sm:$0xff] }
 0x16f   : > { %v7370_v30 = vmin.f32 %v1091_v51, 1.0  ;;  %5302 = vrcp.f32 %v1249_v5  ;;  %v1259_v48 = vadd.f32 1e-08, %v7341_v12  ;;  %v1350_v9 = vmul.f32 5.0, %v5289_v60 }
 0x170   : > { %v1088_v24 = vmax.f32 %v7260_v25, 0.0  ;;  %v1093_v37 = vmax.f32 %v7274_v31, 0.0  ;;  %v7376_v28 = vadd.f32 %v935_v41, %v10317_v50  ;;  %v7378_v38 = vpop.permute.xlu1 %1871  ;;  %v7382_v44 = vmin.f32 %v1087_v35, 1.0 }
 0x171   : > { %10525 = vst [vmem:[#allocation154_spill] sm:$0xff] %v7378_v38  ;;  %v7380_v10 = vpop.permute.xlu0 %1866  ;;  %v1089_v51 = vmax.f32 %v7313_v56, 0.0  ;;  %5304 = vrcp.f32 %v1254_v3  ;;  %v7386_v4 = vadd.f32 %v940_v17, %v10527_v13  ;;  %2880 = vperm.xlu1 %5170, %v1485_v19   ;;  %v1342_v60 = vmul.f32 5.0, %v5291_v59  ;;  %v7393_v38 = vld [vmem:[#allocation2 + $0x3] ss:$0 sm:$0xff]  ;;  %v10528_v56 = vld [vmem:[#allocation40_spill] sm:$0xff] }
 0x172   : > { %10526 = vst [vmem:[#allocation150_spill] sm:$0xff] %v7380_v10  ;;  %v7388_v25 = vmin.f32 %v1092_v62, 1.0  ;;  %5306 = vrcp.f32 %v1250_v58  ;;  %v7391_v31 = vadd.f32 %v936_v47, %v10524_v39  ;;  %v5295_v5 = vpop.eup %5294  ;;  %2860 = vperm.xlu0 %5169, %v1481_v21   ;;  %v1360_v41 = vmul.f32 5.0, %v5293_v11 }
 0x173   : > { %v1094_v35 = vmax.f32 %v7329_v0, 0.0  ;;  %5308 = vrcp.f32 %v1259_v48  ;;  %v861_v17 = vadd.f32 %v10528_v56, %v10313_v29  ;;  %v5297_v3 = vpop.eup %5296  ;;  %v1486_v59 = vmul.f32 %v1350_v9, %v7351_v26  ;;  %v10530_v56 = vld [vmem:[#allocation153_spill] sm:$0xff] }
 0x174   : > { %v7399_v19 = vmin.f32 %v1088_v24, 1.0  ;;  %v7401_v62 = vmin.f32 %v1093_v37, 1.0  ;;  %v1255_v47 = vadd.f32 1e-08, %v7376_v28  ;;  %v7404_v21 = vpop.permute.xlu1 %1881  ;;  %v7406_v11 = vmin.f32 %v1089_v51, 1.0 }
 0x175   : > { %v5299_v58 = vpop.eup %5298  ;;  %10529 = vst [vmem:[#allocation40_spill] sm:$0xff] %v7404_v21  ;;  %v1090_v0 = vmax.f32 %v7334_v8, 0.0  ;;  %v1260_v48 = vadd.f32 1e-08, %v7386_v4  ;;  %v857_v10 = vadd.f32 %v10530_v56, %v10301_v1  ;;  %v7412_v39 = vpop.permute.xlu0 %1876  ;;  %3442 = vperm.xlu1 %5170, %v7266_v34   ;;  %v1482_v9 = vmul.f32 %v1342_v60, %v7358_v18  ;;  %v10532_v56 = vld [vmem:[#allocation48_spill] sm:$0xff] }
 0x176   : > { %10531 = vst [vmem:[#allocation153_spill] sm:$0xff] %v7412_v39  ;;  %v1099_v24 = vmax.f32 %v7341_v12, 0.0  ;;  %v1256_v37 = vadd.f32 1e-08, %v7391_v31  ;;  %v2424_v51 = vmul.f32 %v7393_v38, %v10492_v36  ;;  %3422 = vperm.xlu0 %5169, %v7268_v55   ;;  %v1491_v8 = vmul.f32 %v1360_v41, %v7370_v30  ;;  %v7425_v60 = vld [vmem:[#allocation2 + $0x4] ss:$0 sm:$0xff] }
 0x177   : > { %v5301_v21 = vpop.eup %5300  ;;  %v1352_v13 = vmul.f32 5.0, %v5295_v5  ;;  %v7422_v1 = vmin.f32 %v1094_v35, 1.0  ;;  %v941_v39 = vadd.f32 %v861_v17, %v10532_v56  ;;  %v1362_v34 = vmul.f32 5.0, %v5297_v3 }
 0x178   : > { %v1354_v49 = vmul.f32 5.0, %v5299_v58  ;;  %v1095_v12 = vmax.f32 %v7376_v28, 0.0  ;;  %5310 = vrcp.f32 %v1255_v47  ;;  %v7428_v50 = vpop.permute.xlu1 %1891  ;;  %v7430_v36 = vmin.f32 %v1090_v0, 1.0  ;;  %v10535_v47 = vld [vmem:[#allocation155_spill] sm:$0xff]  ;;  %v10536_v0 = vld [vmem:[#allocation97_spill] sm:$0xff] }
 0x179   : > { %10533 = vst [vmem:[#allocation48_spill] sm:$0xff] %v7428_v50  ;;  %v1100_v55 = vmax.f32 %v7386_v4, 0.0  ;;  %5312 = vrcp.f32 %v1260_v48  ;;  %v937_v5 = vadd.f32 %v857_v10, %v10313_v29  ;;  %v7434_v41 = vpop.permute.xlu0 %1886  ;;  %2885 = vperm.xlu1 %5170, %v1486_v59   ;;  %v1364_v35 = vmul.f32 5.0, %v5301_v21 }
 0x17a   : > { %10534 = vst [vmem:[#allocation178_spill] sm:$0xff] %v7434_v41  ;;  %v7436_v17 = vmin.f32 %v1099_v24, 1.0  ;;  %v1096_v3 = vmax.f32 %v7391_v31, 0.0  ;;  %5314 = vrcp.f32 %v1256_v37  ;;  %2865 = vperm.xlu0 %5169, %v1482_v9   ;;  %v1487_v28 = vmul.f32 %v1352_v13, %v7382_v44 }
 0x17b   : > { %v2609_v58 = vmul.f32 %v7425_v60, %v10535_v47  ;;  %v2319_v4 = vadd.f32 %v7111_v43, %v7070_v6  ;;  %v7445_v29 = vadd.f32 %v941_v39, %v10536_v0  ;;  %v7448_v59 = vmul.f32 %v1362_v34, %v7388_v25 }
 0x17c   : > { %v5303_v10 = vpop.eup %5302  ;;  %v7451_v21 = vmul.f32 %v1354_v49, %v7399_v19  ;;  %v7453_v31 = vmin.f32 %v1095_v12, 1.0  ;;  %v2423_v13 = vmul.f32 %v7393_v38, %v10497_v23  ;;  %v7457_v48 = vpop.permute.xlu1 %1901  ;;  %v7459_v9 = vmin.f32 %v1100_v55, 1.0 }
 0x17d   : > { %10538 = vst [vmem:[#allocation179_spill] sm:$0xff] %v7457_v48  ;;  %v2504_v6 = vadd.f32 %v2424_v51, %v2319_v4  ;;  %v7462_v43 = vadd.f32 %v937_v5, %v10532_v56  ;;  %v2426_v39 = vmul.f32 %v7393_v38, %v10507_v42  ;;  %v7466_v37 = vpop.permute.xlu0 %1896  ;;  %3447 = vperm.xlu1 %5170, %v7316_v45   ;;  %v7472_v23 = vmin.f32 %v1096_v3, 1.0  ;;  %v10542_v51 = vld [vmem:[#allocation16_spill] sm:$0xff] }
 0x17e   : > { %10537 = vst [vmem:[#allocation97_spill] sm:$0xff] %v7453_v31  ;;  %10539 = vst [vmem:[#allocation180_spill] sm:$0xff] %v7459_v9  ;;  %v5305_v24 = vpop.eup %5304  ;;  %v7470_v49 = vmul.f32 %v1364_v35, %v7401_v62  ;;  %v2318_v34 = vadd.f32 %v7125_v53, %v7074_v14  ;;  %v862_v12 = vadd.f32 %v10542_v51, %v10310_v54  ;;  %3427 = vperm.xlu0 %5169, %v7325_v22   ;;  %v10543_v35 = vld [vmem:[#allocation152_spill] sm:$0xff]  ;;  %v10546_v51 = vld [vmem:[#allocation161_spill] sm:$0xff] }
 0x17f   : > { %10540 = vst [vmem:[#allocation181_spill] sm:$0xff] %v7466_v37  ;;  %10541 = vst [vmem:[#allocation182_spill] sm:$0xff] %v7472_v23  ;;  %v5307_v55 = vpop.eup %5306  ;;  %v1356_v42 = vmul.f32 5.0, %v5303_v10  ;;  %v1261_v5 = vadd.f32 1e-08, %v7445_v29  ;;  %v2321_v45 = vadd.f32 %v7165_v57, %v7080_v2  ;;  %v858_v4 = vadd.f32 %v10543_v35, %v10515_v40  ;;  %v10545_v14 = vld [vmem:[#allocation156_spill] sm:$0xff] }
 0x180   : > { %v5309_v3 = vpop.eup %5308  ;;  %v7484_v48 = vadd.f32 %v2609_v58, %v2504_v6  ;;  %v2503_v37 = vadd.f32 %v2423_v13, %v2318_v34  ;;  %v2608_v53 = vmul.f32 %v7425_v60, %v10545_v14  ;;  %v2611_v50 = vmul.f32 %v7425_v60, %v10546_v51  ;;  %v7490_v22 = vpop.permute.xlu1 %1911  ;;  %v10549_v34 = vld [vmem:[#allocation47_spill] sm:$0xff] }
 0x181   : > { %10547 = vst [vmem:[#allocation152_spill] sm:$0xff] %v7490_v22  ;;  %v1257_v10 = vadd.f32 1e-08, %v7462_v43  ;;  %v2506_v41 = vadd.f32 %v2426_v39, %v2321_v45  ;;  %v2320_v2 = vadd.f32 %v7186_v16, %v7086_v63  ;;  %v2425_v57 = vmul.f32 %v7393_v38, %v10511_v7  ;;  %v7497_v40 = vpop.permute.xlu0 %1906  ;;  %2910 = vperm.xlu1 %5170, %v1491_v8   ;;  %v10550_v39 = vld [vmem:[#allocation162_spill] sm:$0xff] }
 0x182   : > { %10544 = vst [vmem:[#allocation16_spill] sm:$0xff] %v7484_v48  ;;  %10548 = vst [vmem:[#allocation156_spill] sm:$0xff] %v7497_v40  ;;  %v1366_v58 = vmul.f32 5.0, %v5305_v24  ;;  %v1358_v13 = vmul.f32 5.0, %v5307_v55  ;;  %v2428_v6 = vmul.f32 %v7393_v38, %v10535_v47  ;;  %v942_v35 = vadd.f32 %v862_v12, %v10549_v34  ;;  %2890 = vperm.xlu0 %5169, %v1487_v28  }
 0x183   : > { %v1376_v22 = vmul.f32 5.0, %v5309_v3  ;;  %5316 = vrcp.f32 %v1261_v5  ;;  %v2610_v45 = vmul.f32 %v7425_v60, %v10550_v39  ;;  %v938_v63 = vadd.f32 %v858_v4, %v10310_v54  ;;  %v10554_v3 = vld [vmem:[#allocation172_spill] sm:$0xff] }
 0x184   : > { %v7506_v16 = vmul.f32 %v1356_v42, %v7406_v11  ;;  %v7508_v7 = vadd.f32 %v2608_v53, %v2503_v37  ;;  %v1101_v8 = vmax.f32 %v7445_v29, 0.0  ;;  %v2323_v24 = vadd.f32 %v7225_v27, %v7117_v20  ;;  %v7513_v12 = vpop.permute.xlu1 %1921  ;;  %v10556_v37 = vld [vmem:[#allocation92_spill] sm:$0xff] }
 0x185   : > { %v5311_v55 = vpop.eup %5310  ;;  %10552 = vst [vmem:[#allocation47_spill] sm:$0xff] %v7513_v12  ;;  %5318 = vrcp.f32 %v1257_v10  ;;  %v7515_v28 = vadd.f32 %v2611_v50, %v2506_v41  ;;  %v2505_v5 = vadd.f32 %v2425_v57, %v2320_v2  ;;  %v2613_v54 = vmul.f32 %v7425_v60, %v10554_v3  ;;  %v7519_v42 = vpop.permute.xlu0 %1916  ;;  %3452 = vperm.xlu1 %5170, %v7351_v26   ;;  %v10563_v12 = vld [vmem:[#allocation41_spill] sm:$0xff] }
 0x186   : > { %10551 = vst [vmem:[#allocation161_spill] sm:$0xff] %v7508_v7  ;;  %v5313_v4 = vpop.eup %5312  ;;  %10555 = vst [vmem:[#allocation172_spill] sm:$0xff] %v7519_v42  ;;  %v7523_v29 = vmul.f32 %v1366_v58, %v7422_v1  ;;  %v7526_v20 = vmul.f32 %v1358_v13, %v7430_v36  ;;  %v2508_v27 = vadd.f32 %v2428_v6, %v2323_v24  ;;  %3432 = vperm.xlu0 %5169, %v7358_v18   ;;  %v10562_v24 = vld [vmem:[#allocation173_spill] sm:$0xff] }
 0x187   : > { %10553 = vst [vmem:[#allocation162_spill] sm:$0xff] %v7515_v28  ;;  %v1022_v53 = vadd.f32 %v942_v35, %v10556_v37  ;;  %v5315_v50 = vpop.eup %5314  ;;  %v7531_v41 = vmul.f32 %v1376_v22, %v7436_v17  ;;  %v1097_v10 = vmax.f32 %v7462_v43, 0.0  ;;  %v7534_v2 = vadd.f32 %v2610_v45, %v2505_v5 }
 0x188   : > { %v1018_v26 = vadd.f32 %v938_v63, %v10549_v34  ;;  %v1368_v57 = vmul.f32 5.0, %v5311_v55  ;;  %v7537_v58 = vmin.f32 %v1101_v8, 1.0  ;;  %v2427_v13 = vmul.f32 %v7393_v38, %v10545_v14  ;;  %v7543_v35 = vpop.permute.xlu1 %1931 }
 0x189   : > { %10557 = vst [vmem:[#allocation92_spill] sm:$0xff] %v7534_v2  ;;  %v2430_v6 = vmul.f32 %v7393_v38, %v10546_v51  ;;  %10559 = vst [vmem:[#allocation184_spill] sm:$0xff] %v7543_v35  ;;  %v1378_v18 = vmul.f32 5.0, %v5313_v4  ;;  %v7545_v22 = vadd.f32 %v2613_v54, %v2508_v27  ;;  %v2322_v43 = vadd.f32 %v7257_v61, %v7145_v33  ;;  %v7551_v63 = vpop.permute.xlu0 %1926  ;;  %v10564_v27 = vld [vmem:[#allocation174_spill] sm:$0xff]  ;;  %v10565_v61 = vld [vmem:[#allocation148_spill] sm:$0xff] }
 0x18a   : > { %10558 = vst [vmem:[#allocation183_spill] sm:$0xff] %v7537_v58  ;;  %v2429_v45 = vmul.f32 %v7393_v38, %v10550_v39  ;;  %10561 = vst [vmem:[#allocation186_spill] sm:$0xff] %v7551_v63  ;;  %2915 = vperm.xlu1 %5170, %v7448_v59   ;;  %v1370_v8 = vmul.f32 5.0, %v5315_v50  ;;  %v2612_v55 = vmul.f32 %v7425_v60, %v10562_v24  ;;  %v1262_v5 = vadd.f32 1e-08, %v1022_v53  ;;  %v10566_v35 = vld [vmem:[#allocation175_spill] sm:$0xff] }
 0x18b   : > { %10560 = vst [vmem:[#allocation185_spill] sm:$0xff] %v7545_v22  ;;  %v2325_v4 = vadd.f32 %v10563_v12, %v7182_v32  ;;  %2895 = vperm.xlu0 %5169, %v7451_v21   ;;  %v1258_v54 = vadd.f32 1e-08, %v1018_v26  ;;  %v2615_v33 = vmul.f32 %v7425_v60, %v10564_v27  ;;  %v2324_v42 = vadd.f32 %v7349_v46, %v10565_v61 }
 0x18c   : > { %v2614_v59 = vmul.f32 %v7425_v60, %v10566_v35  ;;  %v7566_v50 = vmul.f32 %v1368_v57, %v7453_v31  ;;  %v7568_v63 = vmin.f32 %v1097_v10, 1.0  ;;  %v2507_v40 = vadd.f32 %v2427_v13, %v2322_v43  ;;  %v7570_v32 = vpop.permute.xlu1 %1941 }
 0x18d   : > { %v2510_v22 = vadd.f32 %v2430_v6, %v2325_v4  ;;  %10568 = vst [vmem:[#allocation41_spill] sm:$0xff] %v7570_v32  ;;  %v7573_v21 = vmul.f32 %v1378_v18, %v7459_v9  ;;  %v1102_v12 = vmax.f32 %v1022_v53, 0.0  ;;  %v1098_v2 = vmax.f32 %v1018_v26, 0.0  ;;  %v7575_v7 = vpop.permute.xlu0 %1936  ;;  %v10574_v6 = vld [vmem:[#allocation33_spill] sm:$0xff]  ;;  %v10581_v4 = vld [vmem:[#allocation76_spill] sm:$0xff] }
 0x18e   : > { %10567 = vst [vmem:[#allocation173_spill] sm:$0xff] %v7568_v63  ;;  %v2509_v28 = vadd.f32 %v2429_v45, %v2324_v42  ;;  %10569 = vst [vmem:[#allocation174_spill] sm:$0xff] %v7575_v7  ;;  %3477 = vperm.xlu1 %5170, %v7370_v30   ;;  %v7579_v46 = vmul.f32 %v1370_v8, %v7472_v23  ;;  %v7581_v57 = vadd.f32 %v2612_v55, %v2507_v40  ;;  %v10573_v42 = vld [vmem:[#allocation44_spill] sm:$0xff]  ;;  %v10575_v18 = vld [vmem:[#allocation129_spill] sm:$0xff] }
 0x18f   : > { %5320 = vrcp.f32 %v1262_v5  ;;  %v2247_v10 = vmul.f32 %v7088_v15, %v10535_v47  ;;  %3457 = vperm.xlu0 %5169, %v7382_v44   ;;  %v7586_v13 = vadd.f32 %v2615_v33, %v2510_v22  ;;  %v867_v26 = vadd.f32 %v10573_v42, %v6266_v52  ;;  %v10576_v8 = vld [vmem:[#allocation46_spill] sm:$0xff]  ;;  %v10577_v44 = vld [vmem:[#allocation17_spill] sm:$0xff]  ;;  %v10586_v32 = vld [vmem:[#allocation32_spill] sm:$0xff] }
 0x190   : > { %10570 = vst [vmem:[#allocation148_spill] sm:$0xff] %v7581_v57  ;;  %5322 = vrcp.f32 %v1258_v54  ;;  %v7588_v53 = vadd.f32 %v2614_v59, %v2509_v28  ;;  %v5317_v30 = vpop.eup %5316  ;;  %v2142_v43 = vadd.f32 %v10575_v18, %v10574_v6  ;;  %v2432_v40 = vmul.f32 %v7393_v38, %v10554_v3  ;;  %v7600_v22 = vpop.permute.xlu1 %2036  ;;  %v10583_v6 = vld [vmem:[#allocation141_spill] sm:$0xff]  ;;  %v10584_v18 = vld [vmem:[#allocation142_spill] sm:$0xff]  ;;  %v10587_v7 = vld [vmem:[#allocation131_spill] sm:$0xff] }
 0x191   : > { %10571 = vst [vmem:[#allocation175_spill] sm:$0xff] %v7586_v13  ;;  %v2246_v45 = vmul.f32 %v7088_v15, %v10545_v14  ;;  %v863_v55 = vadd.f32 %v10577_v44, %v10576_v8  ;;  %10578 = vst [vmem:[#allocation44_spill] sm:$0xff] %v7600_v22  ;;  %v7602_v28 = vmin.f32 %v1102_v12, 1.0  ;;  %v7604_v5 = vmin.f32 %v1098_v2, 1.0  ;;  %v7610_v59 = vpop.permute.xlu0 %2031  ;;  %v10585_v2 = vld [vmem:[#allocation19_spill] sm:$0xff] }
 0x192   : > { %10572 = vst [vmem:[#allocation187_spill] sm:$0xff] %v7588_v53  ;;  %v2617_v54 = vmul.f32 %v7425_v60, %v10581_v4  ;;  %v2249_v33 = vmul.f32 %v7088_v15, %v10546_v51  ;;  %v5319_v61 = vpop.eup %5318  ;;  %10582 = vst [vmem:[#allocation46_spill] sm:$0xff] %v7610_v59  ;;  %2920 = vperm.xlu1 %5170, %v7470_v49   ;;  %v2327_v42 = vadd.f32 %v2247_v10, %v2142_v43  ;;  %v10588_v49 = vld [vmem:[#allocation101_spill] sm:$0xff] }
 0x193   : > { %10579 = vst [vmem:[#allocation33_spill] sm:$0xff] %v7602_v28  ;;  %10580 = vst [vmem:[#allocation129_spill] sm:$0xff] %v7604_v5  ;;  %v2141_v8 = vadd.f32 %v10584_v18, %v10583_v6  ;;  %v2431_v12 = vmul.f32 %v7393_v38, %v10562_v24  ;;  %v2616_v44 = vmul.f32 %v7425_v60, %v10585_v2  ;;  %2900 = vperm.xlu0 %5169, %v7506_v16  }
 0x194   : > { %v1380_v22 = vmul.f32 5.0, %v5317_v30  ;;  %v2144_v53 = vadd.f32 %v10587_v7, %v10586_v32  ;;  %v2434_v59 = vmul.f32 %v7393_v38, %v10564_v27  ;;  %v947_v10 = vadd.f32 %v867_v26, %v10588_v49  ;;  %v7628_v57 = vpop.permute.xlu1 %2046  ;;  %v10590_v30 = vld [vmem:[#allocation22_spill] sm:$0xff]  ;;  %v10591_v7 = vld [vmem:[#allocation136_spill] sm:$0xff] }
 0x195   : > { %v2512_v43 = vadd.f32 %v2432_v40, %v2327_v42  ;;  %v2326_v13 = vadd.f32 %v2246_v45, %v2141_v8  ;;  %v2248_v6 = vmul.f32 %v7088_v15, %v10550_v39  ;;  %v943_v18 = vadd.f32 %v863_v55, %v6266_v52  ;;  %10589 = vst [vmem:[#allocation17_spill] sm:$0xff] %v7628_v57  ;;  %v10592_v32 = vld [vmem:[#allocation144_spill] sm:$0xff]  ;;  %v7634_v31 = vpop.permute.xlu0 %2041  ;;  %v10597_v8 = vld [vmem:[#allocation85_spill] sm:$0xff] }
 0x196   : > { %v1372_v48 = vmul.f32 5.0, %v5319_v61  ;;  %v2329_v16 = vadd.f32 %v2249_v33, %v2144_v53  ;;  %v2619_v23 = vmul.f32 %v7425_v60, %v10590_v30  ;;  %v2143_v9 = vadd.f32 %v10592_v32, %v10591_v7  ;;  %10593 = vst [vmem:[#allocation76_spill] sm:$0xff] %v7634_v31  ;;  %3482 = vperm.xlu1 %5170, %v7388_v25   ;;  %v10595_v45 = vld [vmem:[#allocation112_spill] sm:$0xff]  ;;  %v10596_v61 = vld [vmem:[#allocation107_spill] sm:$0xff] }
 0x197   : > { %v7637_v26 = vadd.f32 %v2617_v54, %v2512_v43  ;;  %v2511_v40 = vadd.f32 %v2431_v12, %v2326_v13  ;;  %v2433_v52 = vmul.f32 %v7393_v38, %v10566_v35  ;;  %v2066_v55 = vmul.f32 %v10595_v45, %v10535_v47  ;;  %3462 = vperm.xlu0 %5169, %v7399_v19   ;;  %v10598_v7 = vld [vmem:[#allocation52_spill] sm:$0xff]  ;;  %v10599_v43 = vld [vmem:[#allocation45_spill] sm:$0xff]  ;;  %v10600_v32 = vld [vmem:[#allocation51_spill] sm:$0xff] }
 0x198   : > { %v7645_v53 = vmul.f32 %v1380_v22, %v7537_v58  ;;  %v2514_v33 = vadd.f32 %v2434_v59, %v2329_v16  ;;  %v1027_v42 = vadd.f32 %v947_v10, %v10596_v61  ;;  %v868_v25 = vadd.f32 %v10598_v7, %v10597_v8  ;;  %v7655_v31 = vpop.permute.xlu1 %2221  ;;  %v10603_v59 = vld [vmem:[#allocation73_spill] sm:$0xff]  ;;  %v10606_v7 = vld [vmem:[#allocation128_spill] sm:$0xff] }
 0x199   : > { %10594 = vst [vmem:[#allocation141_spill] sm:$0xff] %v7637_v26  ;;  %v2328_v54 = vadd.f32 %v2248_v6, %v2143_v9  ;;  %v1023_v13 = vadd.f32 %v943_v18, %v10588_v49  ;;  %v2251_v12 = vmul.f32 %v7088_v15, %v10554_v3  ;;  %v864_v57 = vadd.f32 %v10600_v32, %v10599_v43  ;;  %v7666_v6 = vpop.permute.xlu0 %2216  ;;  %v10607_v32 = vld [vmem:[#allocation86_spill] sm:$0xff] }
 0x19a   : > { %10601 = vst [vmem:[#allocation142_spill] sm:$0xff] %v7655_v31  ;;  %v7658_v19 = vmul.f32 %v1372_v48, %v7568_v63  ;;  %v7660_v22 = vadd.f32 %v2616_v44, %v2511_v40  ;;  %v2618_v10 = vmul.f32 %v7425_v60, %v10603_v59  ;;  %v2065_v9 = vmul.f32 %v10595_v45, %v10545_v14  ;;  %v10611_v63 = vld [vmem:[#allocation49_spill] sm:$0xff] }
 0x19b   : > { %10604 = vst [vmem:[#allocation32_spill] sm:$0xff] %v7666_v6  ;;  %2925 = vperm.xlu1 %5170, %v7523_v29   ;;  %v7669_v18 = vadd.f32 %v2619_v23, %v2514_v33  ;;  %v2513_v16 = vadd.f32 %v2433_v52, %v2328_v54  ;;  %v2146_v43 = vadd.f32 %v2066_v55, %v10606_v7  ;;  %v1267_v40 = vadd.f32 1e-08, %v1027_v42 }
 0x19c   : > { %10602 = vst [vmem:[#allocation19_spill] sm:$0xff] %v7660_v22  ;;  %v2436_v48 = vmul.f32 %v7393_v38, %v10581_v4  ;;  %v5321_v44 = vpop.eup %5320  ;;  %2905 = vperm.xlu0 %5169, %v7526_v20   ;;  %v2621_v31 = vmul.f32 %v7425_v60, %v10607_v32  ;;  %v2250_v6 = vmul.f32 %v7088_v15, %v10562_v24  ;;  %v10608_v22 = vld [vmem:[#allocation100_spill] sm:$0xff]  ;;  %v1263_v33 = vadd.f32 1e-08, %v1023_v13  ;;  %v7683_v7 = vpop.permute.xlu1 %2231 }
 0x19d   : > { %10605 = vst [vmem:[#allocation131_spill] sm:$0xff] %v7669_v18  ;;  %v948_v29 = vadd.f32 %v868_v25, %v10608_v22  ;;  %v5323_v23 = vpop.eup %5322  ;;  %v2331_v52 = vadd.f32 %v2251_v12, %v2146_v43  ;;  %v2067_v55 = vmul.f32 %v10595_v45, %v10550_v39  ;;  %v944_v54 = vadd.f32 %v864_v57, %v10597_v8  ;;  %v7688_v61 = vpop.permute.xlu0 %2226  ;;  %v10613_v43 = vld [vmem:[#allocation66_spill] sm:$0xff] }
 0x19e   : > { %10609 = vst [vmem:[#allocation101_spill] sm:$0xff] %v7683_v7  ;;  %v7685_v20 = vadd.f32 %v2618_v10, %v2513_v16  ;;  %v1107_v18 = vmax.f32 %v1027_v42, 0.0  ;;  %v1103_v26 = vmax.f32 %v1023_v13, 0.0  ;;  %v2145_v58 = vadd.f32 %v2065_v9, %v10611_v63  ;;  %10612 = vst [vmem:[#allocation144_spill] sm:$0xff] %v7688_v61  ;;  %v10614_v13 = vld [vmem:[#allocation106_spill] sm:$0xff]  ;;  %v10615_v63 = vld [vmem:[#allocation147_spill] sm:$0xff] }
 0x19f   : > { %3487 = vperm.xlu1 %5170, %v7401_v62   ;;  %v1382_v25 = vmul.f32 5.0, %v5321_v44  ;;  %v2516_v47 = vadd.f32 %v2436_v48, %v2331_v52  ;;  %v2435_v12 = vmul.f32 %v7393_v38, %v10585_v2  ;;  %v2620_v57 = vmul.f32 %v7425_v60, %v10613_v43  ;;  %v7749_v61 = vld [vmem:[#allocation2] ss:$0 sm:$0xff] }
 0x1a0   : > { %10610 = vst [vmem:[#allocation136_spill] sm:$0xff] %v7685_v20  ;;  %3467 = vperm.xlu0 %5169, %v7406_v11   ;;  %v1374_v8 = vmul.f32 5.0, %v5323_v23  ;;  %5324 = vrcp.f32 %v1267_v40  ;;  %v2330_v42 = vadd.f32 %v2250_v6, %v2145_v58  ;;  %v7697_v10 = vadd.f32 %v948_v29, %v10614_v13  ;;  %v7703_v48 = vpop.permute.xlu1 %2406  ;;  %v10617_v58 = vld [vmem:[#allocation158_spill] sm:$0xff] }
 0x1a1   : > { %5326 = vrcp.f32 %v1263_v33  ;;  %v2147_v9 = vadd.f32 %v2067_v55, %v10615_v63  ;;  %v2252_v62 = vmul.f32 %v7088_v15, %v10566_v35  ;;  %v1024_v16 = vadd.f32 %v944_v54, %v10608_v22  ;;  %10616 = vst [vmem:[#allocation112_spill] sm:$0xff] %v7703_v48  ;;  %v7713_v40 = vpop.permute.xlu0 %2401 }
 0x1a2   : > { %v7705_v44 = vmin.f32 %v1107_v18, 1.0  ;;  %v7707_v52 = vmin.f32 %v1103_v26, 1.0  ;;  %v2068_v11 = vmul.f32 %v10595_v45, %v10546_v51  ;;  %v869_v6 = vadd.f32 %v10617_v58, %v10536_v0  ;;  %10618 = vst [vmem:[#allocation85_spill] sm:$0xff] %v7713_v40  ;;  %v10620_v26 = vld [vmem:[#allocation43_spill] sm:$0xff] }
 0x1a3   : > { %2950 = vperm.xlu1 %5170, %v7531_v41   ;;  %v7717_v29 = vmul.f32 %v1382_v25, %v7602_v28  ;;  %v7719_v23 = vadd.f32 %v2621_v31, %v2516_v47  ;;  %v2437_v18 = vmul.f32 %v7393_v38, %v10603_v59  ;;  %v865_v33 = vadd.f32 %v10620_v26, %v10532_v56  ;;  %v10621_v47 = vld [vmem:[#allocation80_spill] sm:$0xff] }
 0x1a4   : > { %2930 = vperm.xlu0 %5169, %v7566_v50   ;;  %v7727_v45 = vmul.f32 %v1374_v8, %v7604_v5  ;;  %v2515_v55 = vadd.f32 %v2435_v12, %v2330_v42  ;;  %v1268_v54 = vadd.f32 1e-08, %v7697_v10  ;;  %v2253_v41 = vmul.f32 %v7088_v15, %v10564_v27  ;;  %v7736_v56 = vpop.permute.xlu1 %2416  ;;  %v10623_v50 = vld [vmem:[#allocation130_spill] sm:$0xff]  ;;  %v10624_v8 = vld [vmem:[#allocation69_spill] sm:$0xff] }
 0x1a5   : > { %10619 = vst [vmem:[#allocation52_spill] sm:$0xff] %v7719_v23  ;;  %v2332_v25 = vadd.f32 %v2252_v62, %v2147_v9  ;;  %v2622_v31 = vmul.f32 %v7425_v60, %v10621_v47  ;;  %v1264_v63 = vadd.f32 1e-08, %v1024_v16  ;;  %v2438_v58 = vmul.f32 %v7393_v38, %v10590_v30  ;;  %10622 = vst [vmem:[#allocation45_spill] sm:$0xff] %v7736_v56  ;;  %v7741_v42 = vld [vmem:[#allocation2 + $0x1] ss:$0 sm:$0xff]  ;;  %v7746_v40 = vpop.permute.xlu0 %2411 }
 0x1a6   : > { %v2148_v26 = vadd.f32 %v2068_v11, %v10623_v50  ;;  %v2623_v12 = vmul.f32 %v7425_v60, %v10624_v8  ;;  %v2073_v48 = vmul.f32 %v7741_v42, %v10585_v2  ;;  %v10625_v9 = vld [vmem:[#allocation105_spill] sm:$0xff]  ;;  %10626 = vst [vmem:[#allocation51_spill] sm:$0xff] %v7746_v40  ;;  %v1968_v11 = vmul.f32 %v7749_v61, %v10562_v24  ;;  %v10628_v23 = vld [vmem:[#allocation42_spill] sm:$0xff] }
 0x1a7   : > { %v949_v62 = vadd.f32 %v869_v6, %v10625_v9  ;;  %3492 = vperm.xlu1 %5170, %v7422_v1   ;;  %v2517_v7 = vadd.f32 %v2437_v18, %v2332_v25  ;;  %v2258_v50 = vmul.f32 %v7088_v15, %v10613_v43  ;;  %v945_v56 = vadd.f32 %v865_v33, %v10536_v0  ;;  %v10627_v6 = vld [vmem:[#allocation91_spill] sm:$0xff] }
 0x1a8   : > { %3472 = vperm.xlu0 %5169, %v7430_v36   ;;  %5328 = vrcp.f32 %v1268_v54  ;;  %v2333_v20 = vadd.f32 %v2253_v41, %v2148_v26  ;;  %v2443_v40 = vmul.f32 %v7393_v38, %v10627_v6  ;;  %v2069_v1 = vmul.f32 %v7741_v42, %v10562_v24  ;;  %v7764_v28 = vpop.permute.xlu1 %2591  ;;  %v10630_v54 = vld [vmem:[#allocation109_spill] sm:$0xff] }
 0x1a9   : > { %v1108_v18 = vmax.f32 %v7697_v10, 0.0  ;;  %v1104_v25 = vmax.f32 %v1024_v16, 0.0  ;;  %5330 = vrcp.f32 %v1264_v63  ;;  %v866_v5 = vadd.f32 %v10628_v23, %v10549_v34  ;;  %10629 = vst [vmem:[#allocation73_spill] sm:$0xff] %v7764_v28  ;;  %v7771_v26 = vpop.permute.xlu0 %2586  ;;  %v10633_v34 = vld [vmem:[#allocation26_spill] sm:$0xff]  ;;  %v10642_v28 = vld [vmem:[#allocation104_spill] sm:$0xff] }
 0x1aa   : > { %v2153_v0 = vadd.f32 %v2073_v48, %v1968_v11  ;;  %v1964_v36 = vmul.f32 %v7749_v61, %v10545_v14  ;;  %v2254_v33 = vmul.f32 %v7088_v15, %v10585_v2  ;;  %v1029_v41 = vadd.f32 %v949_v62, %v10630_v54  ;;  %10631 = vst [vmem:[#allocation128_spill] sm:$0xff] %v7771_v26 }
 0x1ab   : > { %2955 = vperm.xlu1 %5170, %v7573_v21   ;;  %v7774_v24 = vadd.f32 %v2620_v57, %v2515_v55  ;;  %v7776_v10 = vadd.f32 %v2622_v31, %v2517_v7  ;;  %v2628_v16 = vmul.f32 %v7425_v60, %v10633_v34  ;;  %v1025_v48 = vadd.f32 %v945_v56, %v10625_v9 }
 0x1ac   : > { %2935 = vperm.xlu0 %5169, %v7579_v46   ;;  %v2518_v14 = vadd.f32 %v2438_v58, %v2333_v20  ;;  %v2338_v23 = vadd.f32 %v2258_v50, %v2153_v0  ;;  %v2149_v15 = vadd.f32 %v2069_v1, %v1964_v36  ;;  %v2439_v63 = vmul.f32 %v7393_v38, %v10613_v43  ;;  %v7791_v31 = vpop.permute.xlu1 %2601  ;;  %v10638_v0 = vld [vmem:[#allocation97_spill] sm:$0xff] }
 0x1ad   : > { %10632 = vst [vmem:[#allocation86_spill] sm:$0xff] %v7776_v10  ;;  %v5325_v62 = vpop.eup %5324  ;;  %v7784_v11 = vmin.f32 %v1108_v18, 1.0  ;;  %v7786_v21 = vmin.f32 %v1104_v25, 1.0  ;;  %v2074_v7 = vmul.f32 %v7741_v42, %v10581_v4  ;;  %v946_v57 = vadd.f32 %v866_v5, %v10556_v37  ;;  %10635 = vst [vmem:[#allocation49_spill] sm:$0xff] %v7791_v31  ;;  %v7795_v50 = vpop.permute.xlu0 %2596  ;;  %v7802_v5 = vld [vmem:[#allocation2 + $0x2] ss:$0 sm:$0xff] }
 0x1ae   : > { %v5327_v55 = vpop.eup %5326  ;;  %v7793_v46 = vadd.f32 %v2623_v12, %v2518_v14  ;;  %v2523_v20 = vadd.f32 %v2443_v40, %v2338_v23  ;;  %v2334_v58 = vadd.f32 %v2254_v33, %v2149_v15  ;;  %v1269_v56 = vadd.f32 1e-08, %v1029_v41  ;;  %10637 = vst [vmem:[#allocation106_spill] sm:$0xff] %v7795_v50  ;;  %v10641_v31 = vld [vmem:[#allocation82_spill] sm:$0xff] }
 0x1af   : > { %10634 = vst [vmem:[#allocation100_spill] sm:$0xff] %v7786_v21  ;;  %3517 = vperm.xlu1 %5170, %v7436_v17   ;;  %v2624_v1 = vmul.f32 %v7425_v60, %v10627_v6  ;;  %v1265_v18 = vadd.f32 1e-08, %v1025_v48  ;;  %v1969_v25 = vmul.f32 %v7749_v61, %v10554_v3  ;;  %v2259_v12 = vmul.f32 %v7802_v5, %v10607_v32  ;;  %v10640_v17 = vld [vmem:[#allocation157_spill] sm:$0xff] }
 0x1b0   : > { %10636 = vst [vmem:[#allocation66_spill] sm:$0xff] %v7793_v46  ;;  %3497 = vperm.xlu0 %5169, %v10638_v0   ;;  %v1392_v40 = vmul.f32 5.0, %v5325_v62  ;;  %v7807_v36 = vadd.f32 %v2628_v16, %v2523_v20  ;;  %v2519_v33 = vadd.f32 %v2439_v63, %v2334_v58  ;;  %v870_v14 = vadd.f32 %v10640_v17, %v10556_v37  ;;  %v7816_v10 = vpop.permute.xlu1 %2775  ;;  %v10644_v0 = vld [vmem:[#allocation25_spill] sm:$0xff]  ;;  %v10647_v20 = vld [vmem:[#allocation155_spill] sm:$0xff] }
 0x1b1   : > { %v1384_v23 = vmul.f32 5.0, %v5327_v55  ;;  %v2154_v15 = vadd.f32 %v2074_v7, %v1969_v25  ;;  %v2444_v50 = vmul.f32 %v7393_v38, %v10641_v31  ;;  %v7814_v26 = vadd.f32 %v946_v57, %v10642_v28  ;;  %10643 = vst [vmem:[#allocation158_spill] sm:$0xff] %v7816_v10  ;;  %v7822_v62 = vpop.permute.xlu0 %2770  ;;  %v10646_v57 = vld [vmem:[#allocation160_spill] sm:$0xff]  ;;  %v10662_v10 = vld [vmem:[#allocation111_spill] sm:$0xff] }
 0x1b2   : > { %10639 = vst [vmem:[#allocation147_spill] sm:$0xff] %v7807_v36  ;;  %v1109_v46 = vmax.f32 %v1029_v41, 0.0  ;;  %5332 = vrcp.f32 %v1269_v56  ;;  %v2629_v16 = vmul.f32 %v7425_v60, %v10644_v0  ;;  %v2070_v63 = vmul.f32 %v7741_v42, %v10554_v3  ;;  %10645 = vst [vmem:[#allocation43_spill] sm:$0xff] %v7822_v62 }
 0x1b3   : > { %2960 = vperm.xlu1 %5170, %v7645_v53   ;;  %v1105_v37 = vmax.f32 %v1025_v48, 0.0  ;;  %5334 = vrcp.f32 %v1265_v18  ;;  %v2339_v7 = vadd.f32 %v2259_v12, %v2154_v15  ;;  %v871_v55 = vadd.f32 %v10646_v57, %v10588_v49 }
 0x1b4   : > { %2940 = vperm.xlu0 %5169, %v7658_v19   ;;  %v7829_v41 = vmul.f32 %v1392_v40, %v7705_v44  ;;  %v1965_v58 = vmul.f32 %v7749_v61, %v10647_v20  ;;  %v2255_v3 = vmul.f32 %v7802_v5, %v10581_v4  ;;  %v950_v56 = vadd.f32 %v870_v14, %v10642_v28  ;;  %v7842_v12 = vpop.permute.xlu1 %2785 }
 0x1b5   : > { %v5329_v53 = vpop.eup %5328  ;;  %v7837_v48 = vmul.f32 %v1384_v23, %v7707_v52  ;;  %v7839_v18 = vadd.f32 %v2624_v1, %v2519_v33  ;;  %v2524_v49 = vadd.f32 %v2444_v50, %v2339_v7  ;;  %v1266_v19 = vadd.f32 1e-08, %v7814_v26  ;;  %10649 = vst [vmem:[#allocation130_spill] sm:$0xff] %v7842_v12  ;;  %v7850_v57 = vpop.permute.xlu0 %2780  ;;  %v10652_v23 = vld [vmem:[#allocation180_spill] sm:$0xff] }
 0x1b6   : > { %v5331_v25 = vpop.eup %5330  ;;  %v7844_v40 = vmin.f32 %v1109_v46, 1.0  ;;  %v2150_v17 = vadd.f32 %v2070_v63, %v1965_v58  ;;  %v2440_v15 = vmul.f32 %v7393_v38, %v10607_v32  ;;  %v2625_v14 = vmul.f32 %v7425_v60, %v10641_v31  ;;  %10651 = vst [vmem:[#allocation105_spill] sm:$0xff] %v7850_v57  ;;  %v10655_v46 = vld [vmem:[#allocation107_spill] sm:$0xff]  ;;  %v10656_v63 = vld [vmem:[#allocation182_spill] sm:$0xff]  ;;  %v10657_v12 = vld [vmem:[#allocation108_spill] sm:$0xff] }
 0x1b7   : > { %10648 = vst [vmem:[#allocation80_spill] sm:$0xff] %v7839_v18  ;;  %3522 = vperm.xlu1 %5170, %v10652_v23   ;;  %v7853_v1 = vmin.f32 %v1105_v37, 1.0  ;;  %v7855_v50 = vadd.f32 %v2629_v16, %v2524_v49  ;;  %v2075_v33 = vmul.f32 %v7741_v42, %v10603_v59  ;;  %v951_v7 = vadd.f32 %v871_v55, %v10655_v46 }
 0x1b8   : > { %10650 = vst [vmem:[#allocation69_spill] sm:$0xff] %v7844_v40  ;;  %3502 = vperm.xlu0 %5169, %v10656_v63   ;;  %v2335_v20 = vadd.f32 %v2255_v3, %v2150_v17  ;;  %v1970_v58 = vmul.f32 %v7749_v61, %v10566_v35  ;;  %v2071_v57 = vmul.f32 %v7741_v42, %v10566_v35  ;;  %v1394_v37 = vmul.f32 5.0, %v5329_v53  ;;  %v7870_v62 = vpop.permute.xlu1 %2795  ;;  %v10659_v3 = vld [vmem:[#allocation90_spill] sm:$0xff] }
 0x1b9   : > { %10653 = vst [vmem:[#allocation42_spill] sm:$0xff] %v7853_v1  ;;  %10654 = vst [vmem:[#allocation109_spill] sm:$0xff] %v7855_v50  ;;  %v7866_v23 = vadd.f32 %v950_v56, %v10657_v12  ;;  %v1386_v16 = vmul.f32 5.0, %v5331_v25  ;;  %5336 = vrcp.f32 %v1266_v19  ;;  %v2260_v49 = vmul.f32 %v7802_v5, %v10621_v47  ;;  %v7879_v56 = vpop.permute.xlu0 %2790  ;;  %v10661_v25 = vld [vmem:[#allocation139_spill] sm:$0xff] }
 0x1ba   : > { %10658 = vst [vmem:[#allocation97_spill] sm:$0xff] %v7870_v62  ;;  %v1106_v55 = vmax.f32 %v7814_v26, 0.0  ;;  %v2445_v17 = vmul.f32 %v7393_v38, %v10659_v3  ;;  %v1966_v63 = vmul.f32 %v7749_v61, %v10550_v39  ;;  %v2256_v35 = vmul.f32 %v7802_v5, %v10603_v59  ;;  %10660 = vst [vmem:[#allocation157_spill] sm:$0xff] %v7879_v56  ;;  %v10663_v56 = vld [vmem:[#allocation165_spill] sm:$0xff] }
 0x1bb   : > { %2965 = vperm.xlu1 %5170, %v7717_v29   ;;  %v2520_v53 = vadd.f32 %v2440_v15, %v2335_v20  ;;  %v2155_v19 = vadd.f32 %v2075_v33, %v1970_v58  ;;  %v2630_v62 = vmul.f32 %v7425_v60, %v10661_v25  ;;  %v7885_v26 = vadd.f32 %v951_v7, %v10662_v10 }
 0x1bc   : > { %2945 = vperm.xlu0 %5169, %v7727_v45   ;;  %v2151_v50 = vadd.f32 %v2071_v57, %v1966_v63  ;;  %v2441_v39 = vmul.f32 %v7393_v38, %v10621_v47  ;;  %v1270_v18 = vadd.f32 1e-08, %v7866_v23  ;;  %v875_v36 = vadd.f32 %v10663_v56, %v10655_v46  ;;  %v7901_v20 = vpop.permute.xlu1 %2805  ;;  %v10668_v56 = vld [vmem:[#allocation183_spill] sm:$0xff] }
 0x1bd   : > { %v7894_v29 = vmul.f32 %v1394_v37, %v7784_v11  ;;  %v7897_v15 = vmul.f32 %v1386_v16, %v7786_v21  ;;  %v7899_v33 = vadd.f32 %v2625_v14, %v2520_v53  ;;  %v2340_v7 = vadd.f32 %v2260_v49, %v2155_v19  ;;  %10665 = vst [vmem:[#allocation25_spill] sm:$0xff] %v7901_v20  ;;  %v7909_v37 = vpop.permute.xlu0 %2800 }
 0x1be   : > { %v7903_v45 = vmin.f32 %v1106_v55, 1.0  ;;  %v2336_v57 = vadd.f32 %v2256_v35, %v2151_v50  ;;  %v2626_v58 = vmul.f32 %v7425_v60, %v10659_v3  ;;  %v2076_v46 = vmul.f32 %v7741_v42, %v10590_v30  ;;  %10667 = vst [vmem:[#allocation155_spill] sm:$0xff] %v7909_v37  ;;  %v10669_v35 = vld [vmem:[#allocation173_spill] sm:$0xff] }
 0x1bf   : > { %10664 = vst [vmem:[#allocation104_spill] sm:$0xff] %v7899_v33  ;;  %v5333_v63 = vpop.eup %5332  ;;  %3527 = vperm.xlu1 %5170, %v10668_v56   ;;  %v2525_v16 = vadd.f32 %v2445_v17, %v2340_v7  ;;  %v1271_v14 = vadd.f32 1e-08, %v7885_v26  ;;  %v1971_v49 = vmul.f32 %v7749_v61, %v10564_v27  ;;  %v2072_v50 = vmul.f32 %v7741_v42, %v10564_v27  ;;  %v10672_v33 = vld [vmem:[#allocation27_spill] sm:$0xff] }
 0x1c0   : > { %10666 = vst [vmem:[#allocation160_spill] sm:$0xff] %v7903_v45  ;;  %v5335_v55 = vpop.eup %5334  ;;  %3507 = vperm.xlu0 %5169, %v10669_v35   ;;  %v2521_v53 = vadd.f32 %v2441_v39, %v2336_v57  ;;  %5338 = vrcp.f32 %v1270_v18  ;;  %v2261_v19 = vmul.f32 %v7802_v5, %v10624_v8  ;;  %v955_v37 = vadd.f32 %v875_v36, %v10662_v10  ;;  %v7928_v20 = vpop.permute.xlu1 %2815  ;;  %v10671_v18 = vld [vmem:[#allocation24_spill] sm:$0xff]  ;;  %v10674_v10 = vld [vmem:[#allocation21_spill] sm:$0xff] }
 0x1c1   : > { %v7921_v56 = vadd.f32 %v2630_v62, %v2525_v16  ;;  %v1110_v17 = vmax.f32 %v7866_v23, 0.0  ;;  %v1967_v7 = vmul.f32 %v7749_v61, %v10546_v51  ;;  %v2257_v27 = vmul.f32 %v7802_v5, %v10590_v30  ;;  %v7934_v62 = vpop.permute.xlu0 %2810  ;;  %v10673_v16 = vld [vmem:[#allocation95_spill] sm:$0xff] }
 0x1c2   : > { %v1396_v35 = vmul.f32 5.0, %v5333_v63  ;;  %v2156_v39 = vadd.f32 %v2076_v46, %v1971_v49  ;;  %v2446_v57 = vmul.f32 %v7393_v38, %v10671_v18  ;;  %v2631_v36 = vmul.f32 %v7425_v60, %v10672_v33  ;;  %v10676_v49 = vld [vmem:[#allocation119_spill] sm:$0xff] }
 0x1c3   : > { %10670 = vst [vmem:[#allocation180_spill] sm:$0xff] %v7921_v56  ;;  %3357 = vperm.xlu1 %5170, %v10673_v16   ;;  %v1388_v23 = vmul.f32 5.0, %v5335_v55  ;;  %5340 = vrcp.f32 %v1271_v14  ;;  %v2152_v51 = vadd.f32 %v2072_v50, %v1967_v7  ;;  %v2442_v56 = vmul.f32 %v7393_v38, %v10624_v8 }
 0x1c4   : > { %3337 = vperm.xlu0 %5169, %v10674_v10   ;;  %v7940_v63 = vadd.f32 %v2626_v58, %v2521_v53  ;;  %v2341_v46 = vadd.f32 %v2261_v19, %v2156_v39  ;;  %v1035_v30 = vadd.f32 %v955_v37, %v10676_v49  ;;  %v2081_v33 = vmul.f32 %v7741_v42, %v10627_v6  ;;  %v7950_v7 = vpop.permute.xlu1 %2825  ;;  %v10677_v53 = vld [vmem:[#allocation159_spill] sm:$0xff]  ;;  %v10678_v49 = vld [vmem:[#allocation93_spill] sm:$0xff] }
 0x1c5   : > { %v7945_v21 = vmin.f32 %v1110_v17, 1.0  ;;  %v1111_v16 = vmax.f32 %v7885_v26, 0.0  ;;  %v2337_v55 = vadd.f32 %v2257_v27, %v2152_v51  ;;  %v2627_v14 = vmul.f32 %v7425_v60, %v10671_v18  ;;  %v7961_v26 = vpop.permute.xlu0 %2820 }
 0x1c6   : > { %10675 = vst [vmem:[#allocation107_spill] sm:$0xff] %v7940_v63  ;;  %v5337_v50 = vpop.eup %5336  ;;  %v7953_v10 = vmul.f32 %v1396_v35, %v7844_v40  ;;  %v1976_v58 = vmul.f32 %v7749_v61, %v10613_v43  ;;  %v2266_v37 = vmul.f32 %v7802_v5, %v10633_v34  ;;  %v872_v19 = vadd.f32 %v10677_v53, %v10608_v22  ;;  %v10679_v22 = vld [vmem:[#allocation53_spill] sm:$0xff] }
 0x1c7   : > { %2990 = vperm.xlu1 %5170, %v7829_v41   ;;  %v7965_v17 = vmul.f32 %v1388_v23, %v7853_v1  ;;  %v2526_v27 = vadd.f32 %v2446_v57, %v2341_v46  ;;  %v2522_v39 = vadd.f32 %v2442_v56, %v2337_v55  ;;  %v2077_v35 = vmul.f32 %v7741_v42, %v10613_v43  ;;  %v10684_v1 = vld [vmem:[#allocation129_spill] sm:$0xff] }
 0x1c8   : > { %2970 = vperm.xlu0 %5169, %v7837_v48   ;;  %v1275_v51 = vadd.f32 1e-08, %v1035_v30  ;;  %v2161_v63 = vadd.f32 %v2081_v33, %v1976_v58  ;;  %v2451_v40 = vmul.f32 %v7393_v38, %v10678_v49  ;;  %v876_v53 = vadd.f32 %v10679_v22, %v10614_v13  ;;  %v7978_v57 = vpop.permute.xlu1 %2835  ;;  %v10680_v33 = vld [vmem:[#allocation117_spill] sm:$0xff] }
 0x1c9   : > { %v1390_v18 = vmul.f32 5.0, %v5337_v50  ;;  %v1115_v41 = vmax.f32 %v1035_v30, 0.0  ;;  %v1972_v23 = vmul.f32 %v7749_v61, %v10585_v2  ;;  %v2262_v56 = vmul.f32 %v7802_v5, %v10627_v6  ;;  %v2831_v58 = vpop.permute.xlu0 %2830  ;;  %v10681_v22 = vld [vmem:[#allocation33_spill] sm:$0xff] }
 0x1ca   : > { %v7980_v43 = vmin.f32 %v1111_v16, 1.0  ;;  %v2346_v48 = vadd.f32 %v2266_v37, %v2161_v63  ;;  %v2636_v46 = vmul.f32 %v7425_v60, %v10680_v33  ;;  %v952_v55 = vadd.f32 %v872_v19, %v10614_v13  ;;  %v10685_v16 = vld [vmem:[#allocation110_spill] sm:$0xff] }
 0x1cb   : > { %3532 = vperm.xlu1 %5170, %v10681_v22   ;;  %v7986_v30 = vadd.f32 %v2631_v36, %v2526_v27  ;;  %v7988_v50 = vadd.f32 %v2627_v14, %v2522_v39  ;;  %v2157_v2 = vadd.f32 %v2077_v35, %v1972_v23  ;;  %v2447_v6 = vmul.f32 %v7393_v38, %v10633_v34  ;;  %v10688_v23 = vld [vmem:[#allocation30_spill] sm:$0xff] }
 0x1cc   : > { %3512 = vperm.xlu0 %5169, %v10684_v1   ;;  %5342 = vrcp.f32 %v1275_v51  ;;  %v2531_v63 = vadd.f32 %v2451_v40, %v2346_v48  ;;  %v956_v37 = vadd.f32 %v876_v53, %v10685_v16  ;;  %v2082_v13 = vmul.f32 %v7741_v42, %v10641_v31  ;;  %v8003_v39 = vpop.permute.xlu1 %3397  ;;  %v10687_v53 = vld [vmem:[#allocation98_spill] sm:$0xff]  ;;  %v10689_v48 = vld [vmem:[#allocation116_spill] sm:$0xff] }
 0x1cd   : > { %10682 = vst [vmem:[#allocation182_spill] sm:$0xff] %v7986_v30  ;;  %10683 = vst [vmem:[#allocation108_spill] sm:$0xff] %v7988_v50  ;;  %v5339_v19 = vpop.eup %5338  ;;  %v7997_v22 = vmul.f32 %v1390_v18, %v7903_v45  ;;  %v7999_v36 = vmin.f32 %v1115_v41, 1.0  ;;  %v2342_v14 = vadd.f32 %v2262_v56, %v2157_v2  ;;  %v2632_v27 = vmul.f32 %v7425_v60, %v10678_v49  ;;  %v8012_v18 = vpop.permute.xlu0 %3377  ;;  %v4191_v2 = vld [vmem:[#allocation6 + $0x78] sm:$0xff] }
 0x1ce   : > { %v8005_v1 = vadd.f32 %v2636_v46, %v2531_v63  ;;  %v1032_v40 = vadd.f32 %v952_v55, %v10685_v16  ;;  %v1977_v35 = vmul.f32 %v7749_v61, %v10607_v32  ;;  %v2267_v51 = vmul.f32 %v7802_v5, %v10644_v0  ;;  %v10691_v30 = vld [vmem:[#allocation118_spill] sm:$0xff] }
 0x1cf   : > { %3362 = vperm.xlu1 %5170, %v10687_v53   ;;  %v2527_v41 = vadd.f32 %v2447_v6, %v2342_v14  ;;  %v2452_v56 = vmul.f32 %v7393_v38, %v10688_v23  ;;  %v8019_v46 = vmul.f32 %v7425_v60, %v10689_v48  ;;  %v2078_v55 = vmul.f32 %v7741_v42, %v10607_v32  ;;  %v10693_v48 = vld [vmem:[#allocation164_spill] sm:$0xff] }
 0x1d0   : > { %10686 = vst [vmem:[#allocation165_spill] sm:$0xff] %v8005_v1  ;;  %v5341_v63 = vpop.eup %5340  ;;  %v10690_v1 = vld [vmem:[#allocation18_spill] sm:$0xff]  ;;  %v1398_v50 = vmul.f32 5.0, %v5339_v19  ;;  %v1036_v16 = vadd.f32 %v956_v37, %v10691_v30  ;;  %v2162_v33 = vadd.f32 %v2082_v13, %v1977_v35  ;;  %v1112_v6 = vmax.f32 %v1032_v40, 0.0  ;;  %v8032_v32 = vpop.permute.xlu1 %3382 }
 0x1d1   : > { %3342 = vperm.xlu0 %5169, %v10690_v1   ;;  %v8025_v53 = vadd.f32 %v2632_v27, %v2527_v41  ;;  %v1973_v14 = vmul.f32 %v7749_v61, %v10581_v4  ;;  %v873_v45 = vadd.f32 %v10693_v48, %v10625_v9  ;;  %v10066_v49 = vmov 0.0   ;;  %v10694_v13 = vld [vmem:[#allocation54_spill] sm:$0xff]  ;;  %v8040_v1 = vpop.permute.xlu0 %2840 }
 0x1d2   : > { %4275 = vmatprep.subr.mxu0 %v10066_v49  ;;  %v1272_v34 = vadd.f32 1e-08, %v1032_v40  ;;  %v2263_v19 = vmul.f32 %v7802_v5, %v10641_v31  ;;  %v2448_v37 = vmul.f32 %v7393_v38, %v10644_v0  ;;  %v877_v27 = vadd.f32 %v10694_v13, %v10630_v54  ;;  %v4190_v4 = vld [vmem:[#allocation6 + $0x70] sm:$0xff]  ;;  %v10696_v31 = vld [vmem:[#allocation52_spill] sm:$0xff] }
 0x1d3   : > { %10692 = vst [vmem:[#allocation183_spill] sm:$0xff] %v8025_v53  ;;  %4276 = vmatpush1.msra.mxu0 %v4191_v2  ;;  %2995 = vperm.xlu1 %5170, %v7894_v29   ;;  %v1400_v9 = vmul.f32 5.0, %v5341_v63  ;;  %v1116_v35 = vmax.f32 %v1036_v16, 0.0  ;;  %v2347_v41 = vadd.f32 %v2267_v51, %v2162_v33  ;;  %v2158_v48 = vadd.f32 %v2078_v55, %v1973_v14  ;;  %v4189_v53 = vld [vmem:[#allocation6 + $0x68] sm:$0xff] }
 0x1d4   : > { %v3180_v40 = vmul.f32 %v2831_v58, %v7774_v24  ;;  %v8046_v49 = vmul.f32 %v1398_v50, %v7945_v21  ;;  %v1276_v38 = vadd.f32 1e-08, %v1036_v16  ;;  %v2633_v2 = vmul.f32 %v7425_v60, %v10688_v23  ;;  %v10697_v16 = vld [vmem:[#allocation115_spill] sm:$0xff] }
 0x1d5   : > { %2975 = vperm.xlu0 %5169, %v7897_v15   ;;  %v10695_v13 = vmov 0.0   ;;  %v3181_v29 = vmul.f32 %v7978_v57, %v10696_v31  ;;  %v8053_v63 = vmin.f32 %v1112_v6, 1.0  ;;  %v953_v33 = vadd.f32 %v873_v45, %v10630_v54  ;;  %v8058_v15 = vpop.permute.xlu1 %2845  ;;  %v4188_v31 = vld [vmem:[#allocation6 + $0x60] sm:$0xff]  ;;  %v10698_v57 = vld [vmem:[#allocation141_spill] sm:$0xff]  ;;  %v8068_v6 = vld [vmem:[#allocation4] ss:$0 sm:$0xff]  ;;  %v3403_v14 = vpop.permute.xlu0 %3402 }
 0x1d6   : > { %4277 = vmatprep.subr.mxu0 %v10695_v13  ;;  %v2083_v24 = vmul.f32 %v7741_v42, %v10659_v3  ;;  %v2532_v58 = vadd.f32 %v2452_v56, %v2347_v41  ;;  %v2343_v50 = vadd.f32 %v2263_v19, %v2158_v48  ;;  %v957_v60 = vadd.f32 %v877_v27, %v10697_v16  ;;  %v10699_v54 = vld [vmem:[#allocation19_spill] sm:$0xff] }
 0x1d7   : > { %4278 = vmatpush1.msra.mxu0 %v4190_v4  ;;  %v1978_v51 = vmul.f32 %v7749_v61, %v10621_v47  ;;  %v3177_v55 = vmul.f32 %v7928_v20, %v10698_v57  ;;  %v3176_v45 = vmul.f32 %v7934_v62, %v10699_v54  ;;  %3557 = vperm.xlu1 %5170, %v7705_v44   ;;  %5344 = vrcp.f32 %v1272_v34  ;;  %v4187_v4 = vld [vmem:[#allocation6 + $0x58] sm:$0xff]  ;;  %v10706_v54 = vld [vmem:[#allocation88_spill] sm:$0xff] }
 0x1d8   : > { %4279 = vmatprep.subr.mxu0 %v10695_v13  ;;  %v8072_v56 = vmul.f32 %v1400_v9, %v7980_v43  ;;  %v3267_v19 = vadd.f32 %v8068_v6, %v3180_v40  ;;  %v8076_v27 = vmin.f32 %v1116_v35, 1.0  ;;  %v2528_v20 = vadd.f32 %v2448_v37, %v2343_v50  ;;  %v10702_v35 = vld [vmem:[#allocation123_spill] sm:$0xff]  ;;  %v8093_v40 = vld [vmem:[#allocation2 + $0x3] ss:$0 sm:$0xff]  ;;  %v10703_v50 = vld [vmem:[#allocation177_spill] sm:$0xff] }
 0x1d9   : > { %4280 = vmatpush1.msra.mxu0 %v4189_v53  ;;  %3537 = vperm.xlu0 %5169, %v7707_v52   ;;  %v2268_v62 = vmul.f32 %v7802_v5, %v10661_v25  ;;  %v5343_v41 = vpop.eup %5342  ;;  %v3268_v44 = vadd.f32 %v8068_v6, %v3181_v29  ;;  %v8083_v34 = vadd.f32 %v8019_v46, %v2532_v58  ;;  %v8086_v52 = vpop.permute.xlu1 %3407  ;;  %v10704_v29 = vld [vmem:[#allocation163_spill] sm:$0xff]  ;;  %5346 = vrcp.f32 %v1276_v38 }
 0x1da   : > { %4281 = vmatprep.subr.mxu0 %v10695_v13  ;;  %v1033_v53 = vadd.f32 %v953_v33, %v10697_v16  ;;  %v2163_v9 = vadd.f32 %v2083_v24, %v1978_v51  ;;  %v8088_v37 = vadd.f32 %v2633_v2, %v2528_v20  ;;  %v8091_v48 = vadd.f32 %v957_v60, %v10702_v35  ;;  %v4186_v33 = vld [vmem:[#allocation6 + $0x50] sm:$0xff]  ;;  %v8102_v51 = vpop.permute.xlu0 %3387  ;;  %v10705_v60 = vld [vmem:[#allocation132_spill] sm:$0xff] }
 0x1db   : > { %10700 = vst [vmem:[#allocation173_spill] sm:$0xff] %v8083_v34  ;;  %4282 = vmatpush1.msra.mxu0 %v4188_v31  ;;  %v2453_v57 = vmul.f32 %v8093_v40, %v10703_v50  ;;  %v874_v46 = vadd.f32 %v10704_v29, %v10642_v28  ;;  %v3263_v24 = vadd.f32 %v8068_v6, %v3176_v45  ;;  %v1408_v20 = vmul.f32 5.0, %v5343_v41  ;;  %v8107_v29 = vld [vmem:[#allocation2 + $0x4] ss:$0 sm:$0xff] }
 0x1dc   : > { %10701 = vst [vmem:[#allocation95_spill] sm:$0xff] %v8088_v37  ;;  %4283 = vmatprep.subr.mxu0 %v10695_v13  ;;  %v3264_v58 = vadd.f32 %v8068_v6, %v3177_v55  ;;  %v3748_v2 = vmul.f32 %v3403_v14, %v3268_v44  ;;  %3367 = vperm.xlu1 %5170, %v10705_v60   ;;  %v10707_v37 = vld [vmem:[#allocation125_spill] sm:$0xff]  ;;  %v1273_v38 = vadd.f32 1e-08, %v1033_v53 }
 0x1dd   : > { %4284 = vmatpush1.msra.mxu0 %v4187_v4  ;;  %v3747_v31 = vmul.f32 %v8003_v39, %v3267_v19  ;;  %3347 = vperm.xlu0 %5169, %v10706_v54   ;;  %v2348_v28 = vadd.f32 %v2268_v62, %v2163_v9  ;;  %v2638_v45 = vmul.f32 %v8107_v29, %v10707_v37  ;;  %v4185_v55 = vld [vmem:[#allocation6 + $0x48] sm:$0xff]  ;;  %v2871_v19 = vpop.permute.xlu1 %2870  ;;  %v1113_v4 = vmax.f32 %v1033_v53, 0.0 }
 0x1de   : > { %4285 = vmatprep.subr.mxu0 %v10695_v13  ;;  %v3743_v14 = vmul.f32 %v8012_v18, %v3263_v24  ;;  %v3744_v44 = vmul.f32 %v8032_v32, %v3264_v58  ;;  %v2079_v39 = vmul.f32 %v7741_v42, %v10621_v47  ;;  %v1277_v62 = vadd.f32 1e-08, %v8091_v48  ;;  %v4184_v18 = vld [vmem:[#allocation6 + $0x40] sm:$0xff]  ;;  %v2851_v32 = vpop.permute.xlu0 %2850 }
 0x1df   : > { %4286 = vmatpush1.msra.mxu0 %v4186_v33  ;;  %v1974_v41 = vmul.f32 %v7749_v61, %v10603_v59  ;;  %v2264_v9 = vmul.f32 %v7802_v5, %v10659_v3  ;;  %v3828_v24 = vmax.f32 %v3748_v2, 0.0  ;;  %v2449_v47 = vmul.f32 %v8093_v40, %v10661_v25  ;;  %v10708_v33 = vld [vmem:[#allocation166_spill] sm:$0xff] }
 0x1e0   : > { %4287 = vmatprep.subr.mxu0 %v10695_v13  ;;  %3000 = vperm.xlu1 %5170, %v7953_v10   ;;  %v954_v53 = vadd.f32 %v874_v46, %v10657_v12  ;;  %v878_v58 = vadd.f32 %v10708_v33, %v10657_v12  ;;  %v3827_v59 = vmax.f32 %v3747_v31, 0.0  ;;  %v8130_v60 = vmul.f32 %v1408_v20, %v7999_v36  ;;  %v4183_v10 = vld [vmem:[#allocation6 + $0x38] sm:$0xff] }
 0x1e1   : > { %4288 = vmatpush1.msra.mxu0 %v4185_v55  ;;  %2980 = vperm.xlu0 %5169, %v7965_v17   ;;  %v2533_v54 = vadd.f32 %v2453_v57, %v2348_v28  ;;  %v3823_v34 = vmax.f32 %v3743_v14, 0.0  ;;  %v3824_v3 = vmax.f32 %v3744_v44, 0.0  ;;  %5348 = vrcp.f32 %v1273_v38  ;;  %v3413_v37 = vpop.permute.xlu1 %3412  ;;  %v10710_v55 = vld [vmem:[#allocation114_spill] sm:$0xff] }
 0x1e2   : > { %4289 = vmatprep.subr.mxu0 %v10695_v13  ;;  %v2159_v46 = vadd.f32 %v2079_v39, %v1974_v41  ;;  %v8134_v12 = vmin.f32 %v1113_v4, 1.0  ;;  %5350 = vrcp.f32 %v1277_v62  ;;  %v2634_v17 = vmul.f32 %v8107_v29, %v10703_v50  ;;  %v3393_v20 = vpop.permute.xlu0 %3392  ;;  %v4182_v38 = vld [vmem:[#allocation6 + $0x30] sm:$0xff]  ;;  %v10711_v39 = vld [vmem:[#allocation131_spill] sm:$0xff]  ;;  %v10712_v62 = vld [vmem:[#allocation136_spill] sm:$0xff] }
 0x1e3   : > { %4290 = vmatpush1.msra.mxu0 %v4184_v18  ;;  %v8136_v31 = vadd.f32 %v2638_v45, %v2533_v54  ;;  %v3912_v57 = vsel %vm3895_vm0, %v3828_v24, -inf  ;;  %v8144_v14 = vadd.f32 %v954_v53, %v10710_v55  ;;  %v958_v44 = vadd.f32 %v878_v58, %v10710_v55  ;;  %v10713_v24 = vld [vmem:[#allocation66_spill] sm:$0xff] }
 0x1e4   : > { %4291 = vmatprep.subr.mxu0 %v10695_v13  ;;  %3562 = vperm.xlu1 %5170, %v7784_v11   ;;  %v2344_v28 = vadd.f32 %v2264_v9, %v2159_v46  ;;  %v5345_v45 = vpop.eup %5344  ;;  %v3179_v4 = vmul.f32 %v7950_v7, %v10711_v39  ;;  %v3178_v41 = vmul.f32 %v7961_v26, %v10712_v62  ;;  %v3909_v18 = vsel %vm3895_vm0, %v3827_v59, -inf  ;;  %v10714_v9 = vld [vmem:[#allocation100_spill] sm:$0xff]  ;;  %v10715_v58 = vld [vmem:[#allocation86_spill] sm:$0xff] }
 0x1e5   : > { %10709 = vst [vmem:[#allocation21_spill] sm:$0xff] %v8136_v31  ;;  %4292 = vmatpush1.msra.mxu0 %v4183_v10  ;;  %v3183_v11 = vmul.f32 %v8058_v15, %v10713_v24  ;;  %3542 = vperm.xlu0 %5169, %v10714_v9   ;;  %v3908_v53 = vsel %vm3895_vm0, %v3823_v34, -inf  ;;  %v3911_v33 = vsel %vm3895_vm0, %v3824_v3, -inf  ;;  %v3182_v54 = vmul.f32 %v8040_v1, %v10715_v58  ;;  %v10716_v10 = vld [vmem:[#allocation147_spill] sm:$0xff]  ;;  %v4181_v7 = vld [vmem:[#allocation6 + $0x28] sm:$0xff]  ;;  %v8164_v62 = vpop.permute.xlu1 %2875  ;;  %v10725_v25 = vld [vmem:[#allocation122_spill] sm:$0xff] }
 0x1e6   : > { %v3188_v46 = vmul.f32 %v2871_v19, %v10716_v10  ;;  %4293 = vmatprep.subr.mxu0 %v10695_v13  ;;  %v8161_v26 = vmax.f32 %v3911_v33, %v3912_v57  ;;  %v10718_v59 = vld [vmem:[#allocation80_spill] sm:$0xff]  ;;  %v2529_v15 = vadd.f32 %v2449_v47, %v2344_v28  ;;  %v1979_v34 = vmul.f32 %v7749_v61, %v10624_v8  ;;  %v8168_v3 = vpop.permute.xlu0 %2855  ;;  %v10719_v24 = vld [vmem:[#allocation133_spill] sm:$0xff]  ;;  %v10721_v58 = vld [vmem:[#allocation27_spill] sm:$0xff]  ;;  %v5347_v28 = vpop.eup %5346 }
 0x1e7   : > { %v3184_v39 = vmul.f32 %v2851_v32, %v10718_v59  ;;  %4294 = vmatpush1.msra.mxu0 %v4182_v38  ;;  %v1402_v1 = vmul.f32 5.0, %v5345_v45  ;;  %v10720_v19 = vld [vmem:[#allocation24_spill] sm:$0xff]  ;;  %v8175_v57 = vmul.f32 %v7802_v5, %v10721_v58  ;;  %v10722_v32 = vld [vmem:[#allocation113_spill] sm:$0xff]  ;;  %v8182_v38 = vmax.f32 %v3908_v53, %v3909_v18  ;;  %v4179_v18 = vld [vmem:[#allocation6 + $0x18] sm:$0xff] }
 0x1e8   : > { %10717 = vst [vmem:[#allocation159_spill] sm:$0xff] %v8161_v26  ;;  %3372 = vperm.xlu1 %5170, %v10719_v24   ;;  %v2084_v9 = vmul.f32 %v7741_v42, %v10720_v19  ;;  %v8179_v33 = vmul.f32 %v8093_v40, %v10722_v32  ;;  %4295 = vmatprep.subr.mxu0 %v10695_v13  ;;  %v4180_v47 = vld [vmem:[#allocation6 + $0x20] sm:$0xff]  ;;  %v10724_v59 = vld [vmem:[#allocation77_spill] sm:$0xff]  ;;  %v1274_v24 = vadd.f32 1e-08, %v8144_v14 }
 0x1e9   : > { %10723 = vst [vmem:[#allocation53_spill] sm:$0xff] %v8182_v38  ;;  %v3270_v10 = vadd.f32 %v8068_v6, %v3183_v11  ;;  %v3266_v45 = vadd.f32 %v8068_v6, %v3179_v4  ;;  %3352 = vperm.xlu0 %5169, %v10724_v59   ;;  %4296 = vmatpush1.msra.mxu0 %v4181_v7  ;;  %v3438_v59 = vpop.permute.xlu1 %3437 }
 0x1ea   : > { %v3269_v2 = vadd.f32 %v8068_v6, %v3182_v54  ;;  %v3265_v31 = vadd.f32 %v8068_v6, %v3178_v41  ;;  %v3275_v50 = vadd.f32 %v8068_v6, %v3188_v46  ;;  %v8192_v55 = vadd.f32 %v958_v44, %v10725_v25  ;;  %4297 = vmatprep.subr.mxu0 %v10695_v13  ;;  %v3418_v16 = vpop.permute.xlu0 %3417 }
 0x1eb   : > { %v5171_v4 = vpack.i.bf16 %v8161_v26, %v8182_v38  ;;  %v3750_v11 = vmul.f32 %v3413_v37, %v3270_v10  ;;  %v3746_v53 = vmul.f32 %v3393_v20, %v3266_v45  ;;  %v3271_v7 = vadd.f32 %v8068_v6, %v3184_v39  ;;  %4298 = vmatpush1.msra.mxu0 %v4180_v47  ;;  %v4178_v37 = vld [vmem:[#allocation6 + $0x10] sm:$0xff]  ;;  %v10746_v38 = vld [vmem:[#allocation104_spill] sm:$0xff] }
 0x1ec   : > { %v3755_v54 = vmul.f32 %v3438_v59, %v3275_v50  ;;  %2985 = vperm.xlu1 %5170, %v7997_v22   ;;  %v8200_v41 = vmul.f32 %v1402_v1, %v8053_v63  ;;  %v10726_v44 = vmax.f32 %v8091_v48, 0.0  ;;  %v8206_v25 = vadd.f32 %v2634_v17, %v2529_v15  ;;  %4299 = vmatprep.subr.mxu0 %v10695_v13  ;;  %v4177_v15 = vld [vmem:[#allocation6 + $0x8] sm:$0xff] }
 0x1ed   : > { %v3749_v20 = vmul.f32 %v8086_v52, %v3269_v2  ;;  %v3745_v39 = vmul.f32 %v8102_v51, %v3265_v31  ;;  %v3751_v50 = vmul.f32 %v3418_v16, %v3271_v7  ;;  %5172 = vrot.lane.b32.xlu0 %v5171_v4, %s5612_s26  ;;  %v1410_v22 = vmul.f32 5.0, %v5347_v28  ;;  %4300 = vmatpush1.msra.mxu0 %v4179_v18  ;;  %v8216_v16 = vpop.permute.xlu1 %2880  ;;  %v10730_v18 = vld [vmem:[#allocation22_spill] sm:$0xff] }
 0x1ee   : > { %v8204_v46 = vmin.f32 %v10726_v44, 1.0  ;;  %10727 = vst [vmem:[#allocation33_spill] sm:$0xff] %v8206_v25  ;;  %v3835_v1 = vmax.f32 %v3755_v54, 0.0  ;;  %v1278_v48 = vadd.f32 1e-08, %v8192_v55  ;;  %v2164_v47 = vadd.f32 %v2084_v9, %v1979_v34  ;;  %4301 = vmatprep.subr.mxu0 %v10695_v13  ;;  %v5349_v10 = vpop.eup %5348  ;;  %v8219_v45 = vpop.permute.xlu0 %2860  ;;  %v10728_v34 = vld [vmem:[#allocation42_spill] sm:$0xff] }
 0x1ef   : > { %v2080_v17 = vmul.f32 %v7741_v42, %v10624_v8  ;;  %v3830_v52 = vmax.f32 %v3750_v11, 0.0  ;;  %v3826_v2 = vmax.f32 %v3746_v53, 0.0  ;;  %v3831_v51 = vmax.f32 %v3751_v50, 0.0  ;;  %4302 = vmatpush1.msra.mxu0 %v4178_v37  ;;  %v5351_v31 = vpop.eup %5350  ;;  %v10729_v9 = vld [vmem:[#allocation124_spill] sm:$0xff]  ;;  %v10731_v54 = vld [vmem:[#allocation111_spill] sm:$0xff] }
 0x1f0   : > { %5352 = vrcp.f32 %v1274_v24  ;;  %v3921_v28 = vsel %vm3895_vm0, %v3835_v1, -inf  ;;  %3547 = vperm.xlu1 %5170, %v10728_v34   ;;  %v2639_v8 = vmul.f32 %v8107_v29, %v10729_v9  ;;  %v1975_v4 = vmul.f32 %v7749_v61, %v10730_v18  ;;  %4303 = vmatprep.subr.mxu0 %v10695_v13  ;;  %v4176_v24 = vld [vmem:[#allocation6] sm:$0xff] }
 0x1f1   : > { %v2265_v11 = vmul.f32 %v7802_v5, %v10720_v19  ;;  %v3829_v53 = vmax.f32 %v3749_v20, 0.0  ;;  %v3825_v59 = vmax.f32 %v3745_v39, 0.0  ;;  %v3920_v7 = vsel %vm3895_vm0, %v3831_v51, -inf  ;;  %3005 = vperm.xlu0 %5169, %v8046_v49   ;;  %v10732_v44 = vld [vmem:[#allocation168_spill] sm:$0xff]  ;;  %4304 = vmatpush1.msra.mxu0 %v4177_v15  ;;  %v8239_v39 = vpop.permute.xlu1 %3442  ;;  %v10748_v25 = vld [vmem:[#allocation167_spill] sm:$0xff] }
 0x1f2   : > { %v879_v37 = vadd.f32 %v10732_v44, %v10731_v54  ;;  %v8233_v50 = vmax.f32 %v3920_v7, %v3921_v28  ;;  %5354 = vrcp.f32 %v1278_v48  ;;  %v2349_v1 = vadd.f32 %v8175_v57, %v2164_v47  ;;  %4305 = vmatprep.subr.mxu0 %v10695_v13  ;;  %v8245_v48 = vpop.permute.xlu0 %3422  ;;  %v10734_v28 = vld [vmem:[#allocation69_spill] sm:$0xff]  ;;  %v4195_v19 = vld [vmem:[#allocation6 + $0x98] sm:$0xff]  ;;  %v4192_v9 = vld [vmem:[#allocation6 + $0x80] sm:$0xff] }
 0x1f3   : > { %v2160_v34 = vadd.f32 %v2080_v17, %v1975_v4  ;;  %v3918_v18 = vsel %vm3895_vm0, %v3830_v52, -inf  ;;  %v3917_v20 = vsel %vm3895_vm0, %v3826_v2, -inf  ;;  %v1404_v51 = vmul.f32 5.0, %v5349_v10  ;;  %4306 = vmatpush1.msra.mxu0 %v4176_v24  ;;  %v4199_v52 = vld [vmem:[#allocation6 + $0xb8] sm:$0xff] }
 0x1f4   : > { %10733 = vst [vmem:[#allocation129_spill] sm:$0xff] %v8233_v50  ;;  %v2450_v49 = vmul.f32 %v8093_v40, %v10721_v58  ;;  %5056 = vmatprep.mubr.msk.f32.mxu0 %vm3895_vm0, %v8233_v50  ;;  %3010 = vperm.xlu1 %5170, %v8072_v56   ;;  %v1412_v57 = vmul.f32 5.0, %v5351_v31  ;;  %v1114_v47 = vmax.f32 %v8144_v14, 0.0  ;;  %v1118_v17 = vmax.f32 %v8192_v55, 0.0  ;;  %v10735_v24 = vld [vmem:[#allocation119_spill] sm:$0xff]  ;;  %v10737_v14 = vld [vmem:[#allocation26_spill] sm:$0xff] }
 0x1f5   : > { %v2534_v15 = vadd.f32 %v8179_v33, %v2349_v1  ;;  %v3915_v10 = vsel %vm3895_vm0, %v3829_v53, -inf  ;;  %v3914_v2 = vsel %vm3895_vm0, %v3825_v59, -inf  ;;  %3567 = vperm.xlu0 %5169, %v10734_v28   ;;  %v2345_v4 = vadd.f32 %v2265_v11, %v2160_v34  ;;  %4323 = vmatprep.subr.mxu0 %v10695_v13  ;;  %v4198_v31 = vld [vmem:[#allocation6 + $0xb0] sm:$0xff]  ;;  %v8265_v53 = vpop.permute.xlu1 %2885 }
 0x1f6   : > { %v959_v7 = vadd.f32 %v879_v37, %v10735_v24  ;;  %v8255_v54 = vmax.f32 %v3917_v20, %v3918_v18  ;;  %v8258_v56 = vmul.f32 %v1410_v22, %v8076_v27  ;;  %v2635_v55 = vmul.f32 %v8107_v29, %v10722_v32  ;;  %v10739_v37 = vld [vmem:[#allocation93_spill] sm:$0xff]  ;;  %4324 = vmatpush2.msra.mxu0 %v4199_v52  ;;  %v8276_v34 = vpop.permute.xlu0 %2865  ;;  %v10741_v18 = vld [vmem:[#allocation160_spill] sm:$0xff]  ;;  %v10770_v32 = vld [vmem:[#allocation162_spill] sm:$0xff] }
 0x1f7   : > { %v1984_v33 = vmul.f32 %v7749_v61, %v10737_v14  ;;  %v8268_v11 = vmul.f32 %v1404_v51, %v8134_v12  ;;  %v8270_v59 = vadd.f32 %v2639_v8, %v2534_v15  ;;  %v2530_v44 = vadd.f32 %v2450_v49, %v2345_v4  ;;  %v10742_v51 = vld [vmem:[#allocation117_spill] sm:$0xff]  ;;  %4325 = vmatprep.subr.mxu0 %v10695_v13  ;;  %v10743_v52 = vld [vmem:[#allocation56_spill] sm:$0xff] }
 0x1f8   : > { %10736 = vst [vmem:[#allocation98_spill] sm:$0xff] %v8255_v54  ;;  %v2089_v22 = vmul.f32 %v7741_v42, %v10739_v37  ;;  %v8274_v1 = vmax.f32 %v3914_v2, %v3915_v10  ;;  %3552 = vperm.xlu1 %5170, %v10741_v18   ;;  %v8280_v20 = vmul.f32 %v1412_v57, %v8204_v46  ;;  %v8282_v28 = vmin.f32 %v1114_v47, 1.0  ;;  %v4197_v49 = vld [vmem:[#allocation6 + $0xa8] sm:$0xff] }
 0x1f9   : > { %10738 = vst [vmem:[#allocation18_spill] sm:$0xff] %v8270_v59  ;;  %v2274_v8 = vmul.f32 %v7802_v5, %v10742_v51  ;;  %3030 = vperm.xlu0 %5169, %v8130_v60   ;;  %v8288_v15 = vmin.f32 %v1118_v17, 1.0  ;;  %v1039_v10 = vadd.f32 %v959_v7, %v10743_v52  ;;  %v2085_v2 = vmul.f32 %v7741_v42, %v10737_v14  ;;  %v10744_v57 = vld [vmem:[#allocation20_spill] sm:$0xff]  ;;  %v10745_v18 = vld [vmem:[#allocation109_spill] sm:$0xff]  ;;  %v10747_v17 = vld [vmem:[#allocation110_spill] sm:$0xff]  ;;  %v8304_v7 = vpop.permute.xlu1 %3447 }
 0x1fa   : > { %10740 = vst [vmem:[#allocation118_spill] sm:$0xff] %v8274_v1  ;;  %v883_v4 = vadd.f32 %v10744_v57, %v10735_v24  ;;  %4326 = vmatpush2.msra.mxu0 %v4198_v31  ;;  %v5176_v47 = vpack.i.bf16 %v8255_v54, %v8274_v1  ;;  %v3189_v26 = vmul.f32 %v8164_v62, %v10745_v18  ;;  %v10749_v14 = vld [vmem:[#allocation126_spill] sm:$0xff]  ;;  %v10750_v31 = vld [vmem:[#allocation91_spill] sm:$0xff] }
 0x1fb   : > { %v3185_v60 = vmul.f32 %v8168_v3, %v10746_v38  ;;  %v880_v59 = vadd.f32 %v10748_v25, %v10747_v17  ;;  %4327 = vmatprep.subr.mxu0 %v10695_v13  ;;  %v2169_v42 = vadd.f32 %v2089_v22, %v1984_v33  ;;  %v2459_v24 = vmul.f32 %v8093_v40, %v10749_v14  ;;  %v4196_v18 = vld [vmem:[#allocation6 + $0xa0] sm:$0xff]  ;;  %v8312_v38 = vpop.permute.xlu0 %3427 }
 0x1fc   : > { %v1980_v57 = vmul.f32 %v7749_v61, %v10750_v31  ;;  %v2270_v62 = vmul.f32 %v7802_v5, %v10739_v37  ;;  %4328 = vmatpush2.msra.mxu0 %v4197_v49  ;;  %5177 = vrot.lane.b32.xlu1 %v5176_v47, %s5612_s26  ;;  %v8315_v25 = vadd.f32 %v2635_v55, %v2530_v44  ;;  %v1119_v17 = vmax.f32 %v1039_v10, 0.0  ;;  %v10752_v33 = vld [vmem:[#allocation31_spill] sm:$0xff] }
 0x1fd   : > { %v5353_v3 = vpop.eup %5352  ;;  %v2644_v22 = vmul.f32 %v8107_v29, %v10752_v33  ;;  %v10753_v54 = vld [vmem:[#allocation171_spill] sm:$0xff]  ;;  %4329 = vmatprep.subr.mxu0 %v10695_v13  ;;  %3572 = vperm.xlu0 %5169, %v7945_v21   ;;  %v1279_v61 = vadd.f32 1e-08, %v1039_v10  ;;  %v2354_v49 = vadd.f32 %v2274_v8, %v2169_v42  ;;  %v963_v37 = vadd.f32 %v883_v4, %v10743_v52 }
 0x1fe   : > { %10751 = vst [vmem:[#allocation164_spill] sm:$0xff] %v8315_v25  ;;  %v884_v1 = vadd.f32 %v10753_v54, %v10691_v30  ;;  %v2165_v31 = vadd.f32 %v2085_v2, %v1980_v57  ;;  %v3276_v55 = vadd.f32 %v8068_v6, %v3189_v26  ;;  %v3272_v44 = vadd.f32 %v8068_v6, %v3185_v60  ;;  %v8329_v25 = vpop.permute.xlu1 %2910  ;;  %v4194_v26 = vld [vmem:[#allocation6 + $0x90] sm:$0xff] }
 0x1ff   : > { %v2455_v47 = vmul.f32 %v8093_v40, %v10742_v51  ;;  %v960_v33 = vadd.f32 %v880_v59, %v10691_v30  ;;  %4330 = vmatpush2.msra.mxu0 %v4196_v18  ;;  %v5355_v54 = vpop.eup %5354  ;;  %v1406_v21 = vmul.f32 5.0, %v5353_v3  ;;  %v2539_v10 = vadd.f32 %v2459_v24, %v2354_v49  ;;  %v8336_v42 = vpop.permute.xlu0 %2890  ;;  %v10754_v59 = vld [vmem:[#allocation55_spill] sm:$0xff]  ;;  %v8346_v3 = vld [vmem:[#allocation2] ss:$0 sm:$0xff] }
 0x200   : > { %v2350_v8 = vadd.f32 %v2270_v62, %v2165_v31  ;;  %v2640_v2 = vmul.f32 %v8107_v29, %v10749_v14  ;;  %4331 = vmatprep.subr.mxu0 %v10695_v13  ;;  %v3756_v4 = vmul.f32 %v8239_v39, %v3276_v55  ;;  %v3752_v60 = vmul.f32 %v8245_v48, %v3272_v44  ;;  %v10756_v62 = vld [vmem:[#allocation63_spill] sm:$0xff]  ;;  %v8363_v55 = vld [vmem:[#allocation2 + $0x1] ss:$0 sm:$0xff] }
 0x201   : > { %3035 = vperm.xlu1 %5170, %v8258_v56   ;;  %v8339_v30 = vmin.f32 %v1119_v17, 1.0  ;;  %v964_v57 = vadd.f32 %v884_v1, %v10754_v59  ;;  %4332 = vmatpush2.msra.mxu0 %v4195_v19  ;;  %5356 = vrcp.f32 %v1279_v61  ;;  %v8343_v24 = vadd.f32 %v2644_v22, %v2539_v10  ;;  %v10757_v19 = vld [vmem:[#allocation74_spill] sm:$0xff]  ;;  %v10767_v14 = vld [vmem:[#allocation115_spill] sm:$0xff] }
 0x202   : > { %3015 = vperm.xlu0 %5169, %v8200_v41   ;;  %v1043_v18 = vadd.f32 %v963_v37, %v10756_v62  ;;  %v1985_v39 = vmul.f32 %v8346_v3, %v10644_v0  ;;  %4333 = vmatprep.subr.mxu0 %v10695_v13  ;;  %v1414_v48 = vmul.f32 5.0, %v5355_v54  ;;  %v2535_v56 = vadd.f32 %v2455_v47, %v2350_v8  ;;  %v10758_v41 = vld [vmem:[#allocation16_spill] sm:$0xff]  ;;  %v10759_v22 = vld [vmem:[#allocation158_spill] sm:$0xff]  ;;  %v8358_v37 = vpop.permute.xlu1 %3452 }
 0x203   : > { %10755 = vst [vmem:[#allocation54_spill] sm:$0xff] %v8343_v24  ;;  %v1040_v17 = vadd.f32 %v960_v33, %v10754_v59  ;;  %v885_v1 = vadd.f32 %v10757_v19, %v10702_v35  ;;  %4334 = vmatpush2.msra.mxu0 %v4194_v26  ;;  %v8356_v61 = vmul.f32 %v10759_v22, %v10758_v41  ;;  %v4193_v33 = vld [vmem:[#allocation6 + $0x88] sm:$0xff]  ;;  %v3836_v47 = vmax.f32 %v3756_v4, 0.0  ;;  %v3433_v10 = vpop.permute.xlu0 %3432  ;;  %v10764_v22 = vld [vmem:[#allocation43_spill] sm:$0xff]  ;;  %v10768_v4 = vld [vmem:[#allocation170_spill] sm:$0xff] }
 0x204   : > { %v8361_v49 = vmul.f32 %v1406_v21, %v8282_v28  ;;  %v1123_v31 = vmax.f32 %v1043_v18, 0.0  ;;  %v2090_v44 = vmul.f32 %v8363_v55, %v10688_v23  ;;  %4335 = vmatprep.subr.mxu0 %v10695_v13  ;;  %v3832_v54 = vmax.f32 %v3752_v60, 0.0  ;;  %v10761_v8 = vld [vmem:[#allocation60_spill] sm:$0xff]  ;;  %v10763_v41 = vld [vmem:[#allocation161_spill] sm:$0xff] }
 0x205   : > { %10760 = vst [vmem:[#allocation52_spill] sm:$0xff] %v8356_v61  ;;  %3597 = vperm.xlu1 %5170, %v7999_v36   ;;  %v1044_v26 = vadd.f32 %v964_v57, %v10761_v8  ;;  %v10762_v19 = vld [vmem:[#allocation116_spill] sm:$0xff]  ;;  %v8374_v61 = vmul.f32 %v10764_v22, %v10763_v41  ;;  %v8377_v24 = vadd.f32 %v2640_v2, %v2535_v56  ;;  %v1283_v51 = vadd.f32 1e-08, %v1043_v18  ;;  %v10769_v8 = vld [vmem:[#allocation59_spill] sm:$0xff]  ;;  %v10771_v41 = vld [vmem:[#allocation130_spill] sm:$0xff] }
 0x206   : > { %v2275_v21 = vmul.f32 %v7802_v5, %v10762_v19  ;;  %3577 = vperm.xlu0 %5169, %v7980_v43   ;;  %v881_v60 = vadd.f32 %v10768_v4, %v10767_v14  ;;  %v8382_v36 = vmul.f32 %v1414_v48, %v8288_v15  ;;  %v1120_v57 = vmax.f32 %v1040_v17, 0.0  ;;  %4336 = vmatpush2.msra.mxu0 %v4193_v33  ;;  %v8389_v43 = vpop.permute.xlu1 %2915  ;;  %v10773_v56 = vld [vmem:[#allocation137_spill] sm:$0xff]  ;;  %v10774_v4 = vld [vmem:[#allocation182_spill] sm:$0xff] }
 0x207   : > { %10765 = vst [vmem:[#allocation141_spill] sm:$0xff] %v8374_v61  ;;  %10766 = vst [vmem:[#allocation19_spill] sm:$0xff] %v8377_v24  ;;  %v1280_v58 = vadd.f32 1e-08, %v1040_v17  ;;  %v965_v5 = vadd.f32 %v885_v1, %v10769_v8  ;;  %v8387_v22 = vmul.f32 %v10771_v41, %v10770_v32  ;;  %v8391_v2 = vmin.f32 %v1123_v31, 1.0  ;;  %4337 = vmatprep.subr.mxu0 %v10695_v13  ;;  %v8398_v1 = vpop.permute.xlu0 %2895  ;;  %v10776_v41 = vld [vmem:[#allocation92_spill] sm:$0xff] }
 0x208   : > { %v2170_v18 = vadd.f32 %v2090_v44, %v1985_v39  ;;  %v2460_v14 = vmul.f32 %v8093_v40, %v10773_v56  ;;  %v3924_v48 = vsel %vm3895_vm0, %v3836_v47, -inf  ;;  %v3923_v17 = vsel %vm3895_vm0, %v3832_v54, -inf  ;;  %4338 = vmatpush2.msra.mxu0 %v4192_v9  ;;  %v10775_v39 = vld [vmem:[#allocation108_spill] sm:$0xff]  ;;  %v10777_v54 = vld [vmem:[#allocation105_spill] sm:$0xff] }
 0x209   : > { %10772 = vst [vmem:[#allocation123_spill] sm:$0xff] %v8387_v22  ;;  %3040 = vperm.xlu1 %5170, %v8280_v20   ;;  %v1124_v32 = vmax.f32 %v1044_v26, 0.0  ;;  %v1284_v33 = vadd.f32 1e-08, %v1044_v26  ;;  %v3191_v31 = vmul.f32 %v8265_v53, %v10774_v4  ;;  %v3187_v44 = vmul.f32 %v8276_v34, %v10775_v39  ;;  %v10779_v22 = vld [vmem:[#allocation180_spill] sm:$0xff]  ;;  %v10780_v9 = vld [vmem:[#allocation65_spill] sm:$0xff] }
 0x20a   : > { %3020 = vperm.xlu0 %5169, %v8268_v11   ;;  %5358 = vrcp.f32 %v1283_v51  ;;  %v961_v47 = vadd.f32 %v881_v60, %v10702_v35  ;;  %v8409_v13 = vmul.f32 %v10777_v54, %v10776_v41  ;;  %v3190_v20 = vmul.f32 %v8216_v16, %v10779_v22  ;;  %v10781_v53 = vld [vmem:[#allocation107_spill] sm:$0xff]  ;;  %v8422_v11 = vpop.permute.xlu1 %3477  ;;  %v10783_v16 = vld [vmem:[#allocation36_spill] sm:$0xff]  ;;  %v10785_v22 = vld [vmem:[#allocation169_spill] sm:$0xff] }
 0x20b   : > { %v8413_v26 = vmin.f32 %v1120_v57, 1.0  ;;  %v8416_v24 = vadd.f32 %v965_v5, %v10780_v9  ;;  %v3186_v34 = vmul.f32 %v8219_v45, %v10781_v53  ;;  %v8420_v4 = vmax.f32 %v3923_v17, %v3924_v48  ;;  %v8424_v51 = vpop.permute.xlu0 %3457  ;;  %v10784_v5 = vld [vmem:[#allocation114_spill] sm:$0xff] }
 0x20c   : > { %10778 = vst [vmem:[#allocation163_spill] sm:$0xff] %v8409_v13  ;;  %5360 = vrcp.f32 %v1280_v58  ;;  %v2355_v35 = vadd.f32 %v2275_v21, %v2170_v18  ;;  %v8427_v60 = vmin.f32 %v1124_v32, 1.0  ;;  %v2645_v57 = vmul.f32 %v8107_v29, %v10783_v16  ;;  %v10786_v58 = vld [vmem:[#allocation82_spill] sm:$0xff] }
 0x20d   : > { %10782 = vst [vmem:[#allocation132_spill] sm:$0xff] %v8420_v4  ;;  %3602 = vperm.xlu1 %5170, %v8076_v27   ;;  %5362 = vrcp.f32 %v1284_v33  ;;  %v882_v39 = vadd.f32 %v10785_v22, %v10784_v5  ;;  %v3278_v45 = vadd.f32 %v8068_v6, %v3191_v31  ;;  %v3274_v48 = vadd.f32 %v8068_v6, %v3187_v44  ;;  %v10789_v5 = vld [vmem:[#allocation185_spill] sm:$0xff] }
 0x20e   : > { %3582 = vperm.xlu0 %5169, %v8053_v63   ;;  %v1981_v21 = vmul.f32 %v8346_v3, %v10786_v58  ;;  %v8439_v27 = vadd.f32 %v961_v47, %v10769_v8  ;;  %v5357_v18 = vpop.eup %5356  ;;  %v3277_v17 = vadd.f32 %v8068_v6, %v3190_v20  ;;  %v2540_v32 = vadd.f32 %v2460_v14, %v2355_v35  ;;  %v8447_v54 = vpop.permute.xlu1 %2920  ;;  %v8454_v14 = vld [vmem:[#allocation2 + $0x2] ss:$0 sm:$0xff]  ;;  %v10790_v22 = vld [vmem:[#allocation97_spill] sm:$0xff] }
 0x20f   : > { %v2086_v33 = vmul.f32 %v8363_v55, %v10644_v0  ;;  %v1285_v41 = vadd.f32 1e-08, %v8416_v24  ;;  %v3273_v31 = vadd.f32 %v8068_v6, %v3186_v34  ;;  %v3758_v44 = vmul.f32 %v8358_v37, %v3278_v45  ;;  %v8451_v53 = vpop.permute.xlu0 %2900  ;;  %v10787_v34 = vld [vmem:[#allocation122_spill] sm:$0xff] }
 0x210   : > { %v3754_v63 = vmul.f32 %v3433_v10, %v3274_v48  ;;  %v5181_v47 = vpack.i.bf16 %v8420_v4, %v8233_v50  ;;  %v2271_v0 = vmul.f32 %v8454_v14, %v10688_v23  ;;  %v2456_v20 = vmul.f32 %v8093_v40, %v10762_v19  ;;  %v10788_v10 = vld [vmem:[#allocation57_spill] sm:$0xff]  ;;  %v10792_v50 = vld [vmem:[#allocation148_spill] sm:$0xff] }
 0x211   : > { %3025 = vperm.xlu1 %5170, %v8361_v49   ;;  %v962_v37 = vadd.f32 %v882_v39, %v10787_v34  ;;  %v886_v35 = vadd.f32 %v10788_v10, %v10787_v34  ;;  %v8465_v45 = vmul.f32 %v10790_v22, %v10789_v5  ;;  %v3757_v48 = vmul.f32 %v8304_v7, %v3277_v17  ;;  %v10793_v4 = vld [vmem:[#allocation157_spill] sm:$0xff]  ;;  %v10796_v7 = vld [vmem:[#allocation75_spill] sm:$0xff] }
 0x212   : > { %v3753_v49 = vmul.f32 %v8312_v38, %v3273_v31  ;;  %5182 = vrot.lane.b32.xlu0 %v5181_v47, %s5612_s26  ;;  %v1281_v58 = vadd.f32 1e-08, %v8439_v27  ;;  %v8473_v13 = vmul.f32 %v10793_v4, %v10792_v50  ;;  %v8475_v39 = vadd.f32 %v2645_v57, %v2540_v32  ;;  %v8479_v22 = vpop.permute.xlu1 %3482  ;;  %v10797_v4 = vld [vmem:[#allocation139_spill] sm:$0xff] }
 0x213   : > { %10791 = vst [vmem:[#allocation88_spill] sm:$0xff] %v8465_v45  ;;  %v2166_v23 = vadd.f32 %v2086_v33, %v1981_v21  ;;  %v2641_v34 = vmul.f32 %v8107_v29, %v10773_v56  ;;  %v3838_v10 = vmax.f32 %v3758_v44, 0.0  ;;  %v3834_v5 = vmax.f32 %v3754_v63, 0.0  ;;  %v8483_v17 = vpop.permute.xlu0 %3462  ;;  %v10798_v21 = vld [vmem:[#allocation58_spill] sm:$0xff]  ;;  %v10799_v63 = vld [vmem:[#allocation177_spill] sm:$0xff] }
 0x214   : > { %10794 = vst [vmem:[#allocation166_spill] sm:$0xff] %v8473_v13  ;;  %10795 = vst [vmem:[#allocation131_spill] sm:$0xff] %v8475_v39  ;;  %5364 = vrcp.f32 %v1285_v41  ;;  %v887_v38 = vadd.f32 %v10796_v7, %v10743_v52  ;;  %v1416_v50 = vmul.f32 5.0, %v5357_v18  ;;  %v1986_v57 = vmul.f32 %v8346_v3, %v10797_v4  ;;  %v10801_v7 = vld [vmem:[#allocation127_spill] sm:$0xff] }
 0x215   : > { %3587 = vperm.xlu1 %5170, %v8134_v12   ;;  %v8489_v32 = vadd.f32 %v962_v37, %v10798_v21  ;;  %v966_v33 = vadd.f32 %v886_v35, %v10798_v21  ;;  %v3837_v31 = vmax.f32 %v3757_v48, 0.0  ;;  %v3833_v44 = vmax.f32 %v3753_v49, 0.0  ;;  %v10800_v12 = vld [vmem:[#allocation125_spill] sm:$0xff]  ;;  %v10802_v37 = vld [vmem:[#allocation35_spill] sm:$0xff] }
 0x216   : > { %3045 = vperm.xlu0 %5169, %v8382_v36   ;;  %v2351_v41 = vadd.f32 %v2271_v0, %v2166_v23  ;;  %5366 = vrcp.f32 %v1281_v58  ;;  %v2091_v47 = vmul.f32 %v8363_v55, %v10799_v63  ;;  %v2276_v18 = vmul.f32 %v8454_v14, %v10800_v12  ;;  %v10803_v48 = vld [vmem:[#allocation175_spill] sm:$0xff]  ;;  %v10804_v49 = vld [vmem:[#allocation25_spill] sm:$0xff]  ;;  %v8511_v58 = vpop.permute.xlu1 %2925 }
 0x217   : > { %v5359_v52 = vpop.eup %5358  ;;  %v8499_v45 = vmul.f32 %v8093_v40, %v10801_v7  ;;  %v8503_v35 = vmul.f32 %v8107_v29, %v10802_v37  ;;  %v8507_v36 = vmul.f32 %v10804_v49, %v10803_v48  ;;  %v3930_v23 = vsel %vm3895_vm0, %v3838_v10, -inf  ;;  %v8514_v19 = vpop.permute.xlu0 %2905  ;;  %v10806_v48 = vld [vmem:[#allocation64_spill] sm:$0xff]  ;;  %v10808_v13 = vld [vmem:[#allocation155_spill] sm:$0xff] }
 0x218   : > { %v3929_v0 = vsel %vm3895_vm0, %v3834_v5, -inf  ;;  %v967_v39 = vadd.f32 %v887_v38, %v10756_v62  ;;  %v1519_v37 = vmul.f32 %v1416_v50, %v8339_v30  ;;  %v2536_v56 = vadd.f32 %v2456_v20, %v2351_v41 }
 0x219   : > { %10805 = vst [vmem:[#allocation136_spill] sm:$0xff] %v8507_v36  ;;  %v5361_v16 = vpop.eup %5360  ;;  %3592 = vperm.xlu1 %5170, %v8282_v28   ;;  %v1282_v61 = vadd.f32 1e-08, %v8489_v32  ;;  %v8520_v49 = vadd.f32 %v966_v33, %v10806_v48  ;;  %v3927_v5 = vsel %vm3895_vm0, %v3837_v31, -inf  ;;  %v3926_v36 = vsel %vm3895_vm0, %v3833_v44, -inf  ;;  %v10807_v28 = vld [vmem:[#allocation187_spill] sm:$0xff] }
 0x21a   : > { %v5363_v10 = vpop.eup %5362  ;;  %3607 = vperm.xlu0 %5169, %v8204_v46   ;;  %v1424_v62 = vmul.f32 5.0, %v5359_v52  ;;  %v2087_v38 = vmul.f32 %v8363_v55, %v10797_v4  ;;  %v8529_v50 = vmul.f32 %v10808_v13, %v10807_v28  ;;  %v8531_v20 = vmax.f32 %v3929_v0, %v3930_v23  ;;  %v10810_v33 = vld [vmem:[#allocation90_spill] sm:$0xff]  ;;  %v8535_v21 = vpop.permute.xlu1 %3487  ;;  %v10811_v4 = vld [vmem:[#allocation68_spill] sm:$0xff]  ;;  %v10813_v28 = vld [vmem:[#allocation173_spill] sm:$0xff] }
 0x21b   : > { %v2171_v41 = vadd.f32 %v2091_v47, %v1986_v57  ;;  %v1982_v48 = vmul.f32 %v8346_v3, %v10810_v33  ;;  %v8537_v31 = vadd.f32 %v2641_v34, %v2536_v56  ;;  %v1121_v46 = vmax.f32 %v8439_v27, 0.0  ;;  %v8547_v23 = vpop.permute.xlu0 %3467 }
 0x21c   : > { %10809 = vst [vmem:[#allocation66_spill] sm:$0xff] %v8531_v20  ;;  %v2272_v44 = vmul.f32 %v8454_v14, %v10799_v63  ;;  %v8543_v52 = vadd.f32 %v967_v39, %v10811_v4  ;;  %v8545_v13 = vmax.f32 %v3926_v36, %v3927_v5  ;;  %v1426_v57 = vmul.f32 5.0, %v5363_v10  ;;  %v10814_v36 = vld [vmem:[#allocation95_spill] sm:$0xff] }
 0x21d   : > { %3050 = vperm.xlu1 %5170, %v1519_v37   ;;  %5368 = vrcp.f32 %v1282_v61  ;;  %v1286_v47 = vadd.f32 1e-08, %v8520_v49  ;;  %v1523_v56 = vmul.f32 %v1424_v62, %v8391_v2  ;;  %v1418_v27 = vmul.f32 5.0, %v5361_v16 }
 0x21e   : > { %10812 = vst [vmem:[#allocation100_spill] sm:$0xff] %v8545_v13  ;;  %3612 = vperm.xlu0 %5169, %v8288_v15   ;;  %v1125_v34 = vmax.f32 %v8416_v24, 0.0  ;;  %v2167_v0 = vadd.f32 %v2087_v38, %v1982_v48  ;;  %v3197_v39 = vmul.f32 %v8389_v43, %v10813_v28  ;;  %v3193_v5 = vmul.f32 %v8398_v1, %v10814_v36  ;;  %v8561_v10 = vpop.permute.xlu1 %2950  ;;  %v10815_v24 = vld [vmem:[#allocation61_spill] sm:$0xff]  ;;  %v10817_v1 = vld [vmem:[#allocation183_spill] sm:$0xff] }
 0x21f   : > { %v5186_v37 = vpack.i.bf16 %v8531_v20, %v8545_v13  ;;  %v2457_v61 = vmul.f32 %v8093_v40, %v10800_v12  ;;  %v2356_v15 = vadd.f32 %v2276_v18, %v2171_v41  ;;  %v1287_v16 = vadd.f32 1e-08, %v8543_v52  ;;  %v10816_v43 = vld [vmem:[#allocation165_spill] sm:$0xff]  ;;  %v8570_v28 = vpop.permute.xlu0 %2930  ;;  %v10828_v13 = vld [vmem:[#allocation18_spill] sm:$0xff] }
 0x220   : > { %v2352_v62 = vadd.f32 %v2272_v44, %v2167_v0  ;;  %v888_v48 = vadd.f32 %v10815_v24, %v10754_v59  ;;  %v3196_v33 = vmul.f32 %v8329_v25, %v10816_v43  ;;  %v3192_v4 = vmul.f32 %v8336_v42, %v10817_v1 }
 0x221   : > { %v5365_v38 = vpop.eup %5364  ;;  %5187 = vrot.lane.b32.xlu1 %v5186_v37, %s5612_s26  ;;  %v1524_v36 = vmul.f32 %v1426_v57, %v8427_v60  ;;  %5370 = vrcp.f32 %v1286_v47  ;;  %v1520_v18 = vmul.f32 %v1418_v27, %v8413_v26  ;;  %v8575_v41 = vmin.f32 %v1121_v46, 1.0  ;;  %v10819_v27 = vld [vmem:[#allocation60_spill] sm:$0xff] }
 0x222   : > { %3070 = vperm.xlu0 %5169, %v1523_v56   ;;  %v8577_v59 = vmin.f32 %v1125_v34, 1.0  ;;  %v2642_v25 = vmul.f32 %v8107_v29, %v10801_v7  ;;  %v3284_v42 = vadd.f32 %v8068_v6, %v3197_v39  ;;  %v3280_v0 = vadd.f32 %v8068_v6, %v3193_v5  ;;  %v8584_v57 = vpop.permute.xlu1 %3492  ;;  %v10818_v56 = vld [vmem:[#allocation113_spill] sm:$0xff] }
 0x223   : > { %v5367_v44 = vpop.eup %5366  ;;  %v2541_v37 = vadd.f32 %v8499_v45, %v2356_v15  ;;  %v2537_v24 = vadd.f32 %v2457_v61, %v2352_v62  ;;  %v1428_v47 = vmul.f32 5.0, %v5365_v38  ;;  %v2092_v46 = vmul.f32 %v8363_v55, %v10818_v56  ;;  %v8593_v20 = vpop.permute.xlu0 %3472  ;;  %v10820_v62 = vld [vmem:[#allocation27_spill] sm:$0xff]  ;;  %v10822_v38 = vld [vmem:[#allocation140_spill] sm:$0xff] }
 0x224   : > { %5372 = vrcp.f32 %v1287_v16  ;;  %v968_v34 = vadd.f32 %v888_v48, %v10819_v27  ;;  %v3283_v43 = vadd.f32 %v8068_v6, %v3196_v33  ;;  %v3279_v1 = vadd.f32 %v8068_v6, %v3192_v4  ;;  %v10825_v27 = vld [vmem:[#allocation24_spill] sm:$0xff] }
 0x225   : > { %v3764_v39 = vmul.f32 %v8479_v22, %v3284_v42  ;;  %v3760_v5 = vmul.f32 %v8483_v17, %v3280_v0  ;;  %3075 = vperm.xlu1 %5170, %v1524_v36   ;;  %v1420_v45 = vmul.f32 5.0, %v5367_v44  ;;  %v8596_v61 = vadd.f32 %v8503_v35, %v2541_v37  ;;  %v10821_v22 = vld [vmem:[#allocation124_spill] sm:$0xff]  ;;  %v10824_v37 = vld [vmem:[#allocation67_spill] sm:$0xff] }
 0x226   : > { %3055 = vperm.xlu0 %5169, %v1520_v18   ;;  %v8598_v15 = vadd.f32 %v2642_v25, %v2537_v24  ;;  %v1987_v16 = vmul.f32 %v8346_v3, %v10820_v62  ;;  %v3763_v48 = vmul.f32 %v8422_v11, %v3283_v43  ;;  %v3759_v6 = vmul.f32 %v8424_v51, %v3279_v1  ;;  %v8608_v4 = vpop.permute.xlu1 %2955  ;;  %v10823_v18 = vld [vmem:[#allocation145_spill] sm:$0xff]  ;;  %v10826_v1 = vld [vmem:[#allocation94_spill] sm:$0xff] }
 0x227   : > { %v2277_v17 = vmul.f32 %v8454_v14, %v10821_v22  ;;  %v2462_v33 = vmul.f32 %v8093_v40, %v10822_v38  ;;  %v1122_v35 = vmax.f32 %v8489_v32, 0.0  ;;  %v8613_v25 = vmul.f32 %v8107_v29, %v10823_v18  ;;  %v8617_v42 = vpop.permute.xlu0 %2935  ;;  %v10829_v18 = vld [vmem:[#allocation164_spill] sm:$0xff] }
 0x228   : > { %v2172_v36 = vadd.f32 %v2092_v46, %v1987_v16  ;;  %v2088_v11 = vmul.f32 %v8363_v55, %v10820_v62  ;;  %v3844_v44 = vmax.f32 %v3764_v39, 0.0  ;;  %v3840_v51 = vmax.f32 %v3760_v5, 0.0  ;;  %v10827_v39 = vld [vmem:[#allocation62_spill] sm:$0xff] }
 0x229   : > { %3637 = vperm.xlu1 %5170, %v8391_v2   ;;  %v1525_v0 = vmul.f32 %v1428_v47, %v8577_v59  ;;  %v8622_v24 = vadd.f32 %v968_v34, %v10824_v37  ;;  %v1521_v46 = vmul.f32 %v1420_v45, %v8575_v41  ;;  %v1983_v43 = vmul.f32 %v8346_v3, %v10825_v27 }
 0x22a   : > { %v5369_v32 = vpop.eup %5368  ;;  %3617 = vperm.xlu0 %5169, %v8339_v30   ;;  %5374 = vrcp.f32 %v10826_v1  ;;  %v889_v5 = vadd.f32 %v10827_v39, %v10769_v8  ;;  %v3843_v62 = vmax.f32 %v3763_v48, 0.0  ;;  %v3839_v2 = vmax.f32 %v3759_v6, 0.0  ;;  %v8634_v16 = vpop.permute.xlu1 %3517 }
 0x22b   : > { %v2273_v47 = vmul.f32 %v8454_v14, %v10818_v56  ;;  %v1126_v34 = vmax.f32 %v8520_v49, 0.0  ;;  %v8636_v30 = vmin.f32 %v1122_v35, 1.0  ;;  %v2357_v45 = vadd.f32 %v2277_v17, %v2172_v36  ;;  %v8642_v48 = vpop.permute.xlu0 %3497 }
 0x22c   : > { %v2168_v37 = vadd.f32 %v2088_v11, %v1983_v43  ;;  %v2458_v27 = vmul.f32 %v8093_v40, %v10821_v22  ;;  %v3936_v1 = vsel %vm3895_vm0, %v3844_v44, -inf  ;;  %v3935_v8 = vsel %vm3895_vm0, %v3840_v51, -inf  ;;  %v10830_v51 = vld [vmem:[#allocation21_spill] sm:$0xff] }
 0x22d   : > { %3080 = vperm.xlu1 %5170, %v1525_v0   ;;  %v1422_v6 = vmul.f32 5.0, %v5369_v32  ;;  %v1288_v39 = vadd.f32 1e-08, %v8622_v24  ;;  %v3199_v35 = vmul.f32 %v8511_v58, %v10828_v13  ;;  %v3195_v17 = vmul.f32 %v8514_v19, %v10829_v18  ;;  %v10831_v58 = vld [vmem:[#allocation33_spill] sm:$0xff] }
 0x22e   : > { %v5371_v49 = vpop.eup %5370  ;;  %3060 = vperm.xlu0 %5169, %v1521_v46   ;;  %v8651_v40 = vmul.f32 %v8107_v29, %v10822_v38  ;;  %v969_v36 = vadd.f32 %v889_v5, %v10780_v9  ;;  %v3933_v11 = vsel %vm3895_vm0, %v3843_v62, -inf  ;;  %v3932_v44 = vsel %vm3895_vm0, %v3839_v2, -inf  ;;  %v8664_v18 = vpop.permute.xlu1 %2960  ;;  %v10833_v46 = vld [vmem:[#allocation84_spill] sm:$0xff]  ;;  %v10834_v62 = vld [vmem:[#allocation58_spill] sm:$0xff]  ;;  %v10835_v2 = vld [vmem:[#allocation23_spill] sm:$0xff] }
 0x22f   : > { %v3198_v0 = vmul.f32 %v8447_v54, %v10830_v51  ;;  %v8658_v32 = vmin.f32 %v1126_v34, 1.0  ;;  %v3194_v13 = vmul.f32 %v8451_v53, %v10831_v58  ;;  %v8662_v19 = vmax.f32 %v3935_v8, %v3936_v1  ;;  %v8668_v43 = vpop.permute.xlu0 %2940  ;;  %v8676_v1 = vld [vmem:[#allocation4] ss:$0 sm:$0xff]  ;;  %v10837_v51 = vld [vmem:[#allocation72_spill] sm:$0xff]  ;;  %v10846_v38 = vld [vmem:[#allocation166_spill] sm:$0xff] }
 0x230   : > { %v1127_v29 = vmax.f32 %v8543_v52, 0.0  ;;  %5376 = vrcp.f32 %v10833_v46  ;;  %v1522_v54 = vmul.f32 %v1422_v6, %v8636_v30  ;;  %v1430_v5 = vmul.f32 5.0, %v5371_v49  ;;  %v10838_v49 = vld [vmem:[#allocation70_spill] sm:$0xff] }
 0x231   : > { %10832 = vst [vmem:[#allocation86_spill] sm:$0xff] %v8662_v19  ;;  %v5373_v9 = vpop.eup %5372  ;;  %3642 = vperm.xlu1 %5170, %v8427_v60   ;;  %5378 = vrcp.f32 %v1288_v39  ;;  %v890_v53 = vadd.f32 %v10835_v2, %v10834_v62  ;;  %v8674_v34 = vmax.f32 %v3932_v44, %v3933_v11  ;;  %v3286_v52 = vadd.f32 %v8676_v1, %v3199_v35 }
 0x232   : > { %v3282_v8 = vadd.f32 %v8676_v1, %v3195_v17  ;;  %3622 = vperm.xlu0 %5169, %v8413_v26   ;;  %v8682_v58 = vadd.f32 %v969_v36, %v10837_v51  ;;  %v3285_v60 = vadd.f32 %v8676_v1, %v3198_v0  ;;  %v2542_v6 = vadd.f32 %v2462_v33, %v2357_v45  ;;  %v8689_v35 = vpop.permute.xlu1 %3522  ;;  %v10842_v51 = vld [vmem:[#allocation31_spill] sm:$0xff] }
 0x233   : > { %10836 = vst [vmem:[#allocation147_spill] sm:$0xff] %v8674_v34  ;;  %v2353_v39 = vadd.f32 %v2273_v47, %v2168_v37  ;;  %v1131_v46 = vmax.f32 %v10838_v49, 0.0  ;;  %v3281_v11 = vadd.f32 %v8676_v1, %v3194_v13  ;;  %v3766_v44 = vmul.f32 %v8584_v57, %v3286_v52  ;;  %v8693_v17 = vpop.permute.xlu0 %3502  ;;  %v10839_v47 = vld [vmem:[#allocation126_spill] sm:$0xff]  ;;  %v10840_v37 = vld [vmem:[#allocation64_spill] sm:$0xff] }
 0x234   : > { %v3762_v62 = vmul.f32 %v8593_v20, %v3282_v8  ;;  %v5191_v26 = vpack.i.bf16 %v8662_v19, %v8674_v34  ;;  %v8695_v36 = vmin.f32 %v1127_v29, 1.0  ;;  %v1432_v33 = vmul.f32 5.0, %v5373_v9 }
 0x235   : > { %3065 = vperm.xlu1 %5170, %v1522_v54   ;;  %v2097_v45 = vmul.f32 %v8363_v55, %v10839_v47  ;;  %v970_v0 = vadd.f32 %v890_v53, %v10840_v37  ;;  %v3765_v57 = vmul.f32 %v8535_v21, %v3285_v60  ;;  %v3761_v20 = vmul.f32 %v8547_v23, %v3281_v11  ;;  %v10841_v54 = vld [vmem:[#allocation117_spill] sm:$0xff] }
 0x236   : > { %5192 = vrot.lane.b32.xlu0 %v5191_v26, %s5612_s26  ;;  %v1526_v13 = vmul.f32 %v1430_v5, %v8658_v32  ;;  %v1289_v2 = vadd.f32 1e-08, %v8682_v58  ;;  %v8706_v29 = vadd.f32 %v8613_v25, %v2542_v6  ;;  %v2538_v9 = vadd.f32 %v2458_v27, %v2353_v39  ;;  %v8712_v23 = vpop.permute.xlu1 %2965  ;;  %v8716_v5 = vld [vmem:[#allocation2 + $0x3] ss:$0 sm:$0xff]  ;;  %v10843_v11 = vld [vmem:[#allocation37_spill] sm:$0xff]  ;;  %v10844_v39 = vld [vmem:[#allocation135_spill] sm:$0xff] }
 0x237   : > { %v5375_v52 = vpop.eup %5374  ;;  %v1992_v8 = vmul.f32 %v8346_v3, %v10841_v54  ;;  %v2282_v53 = vmul.f32 %v8454_v14, %v10842_v51  ;;  %v3846_v21 = vmax.f32 %v3766_v44, 0.0  ;;  %v3842_v60 = vmax.f32 %v3762_v62, 0.0  ;;  %v8720_v25 = vpop.permute.xlu0 %2945  ;;  %v10845_v44 = vld [vmem:[#allocation71_spill] sm:$0xff] }
 0x238   : > { %v8714_v49 = vmin.f32 %v1131_v46, 1.0  ;;  %v2467_v26 = vmul.f32 %v8716_v5, %v10843_v11  ;;  %v1527_v27 = vmul.f32 %v1432_v33, %v8695_v36  ;;  %5380 = vrcp.f32 %v10844_v39 }
 0x239   : > { %3627 = vperm.xlu1 %5170, %v8575_v41   ;;  %v2177_v6 = vadd.f32 %v2097_v45, %v1992_v8  ;;  %v8726_v62 = vadd.f32 %v970_v0, %v10845_v44  ;;  %v3845_v37 = vmax.f32 %v3765_v57, 0.0  ;;  %v3841_v46 = vmax.f32 %v3761_v20, 0.0  ;;  %v8741_v20 = vld [vmem:[#allocation2 + $0x4] ss:$0 sm:$0xff] }
 0x23a   : > { %3085 = vperm.xlu0 %5169, %v1526_v13   ;;  %v1440_v19 = vmul.f32 5.0, %v5375_v52  ;;  %5382 = vrcp.f32 %v1289_v2  ;;  %v8729_v34 = vadd.f32 %v8651_v40, %v2538_v9  ;;  %v8733_v56 = vadd.f32 %v8676_v1, %v10846_v38  ;;  %v8739_v57 = vpop.permute.xlu1 %3527  ;;  %v10848_v13 = vld [vmem:[#allocation143_spill] sm:$0xff]  ;;  %v10849_v2 = vld [vmem:[#allocation78_spill] sm:$0xff] }
 0x23b   : > { %v2362_v41 = vadd.f32 %v2282_v53, %v2177_v6  ;;  %v2093_v33 = vmul.f32 %v8363_v55, %v10841_v54  ;;  %v3942_v45 = vsel %vm3895_vm0, %v3846_v21, -inf  ;;  %v3941_v0 = vsel %vm3895_vm0, %v3842_v60, -inf  ;;  %v8746_v38 = vpop.permute.xlu0 %3507  ;;  %v10850_v53 = vld [vmem:[#allocation93_spill] sm:$0xff] }
 0x23c   : > { %10847 = vst [vmem:[#allocation80_spill] sm:$0xff] %v8733_v56  ;;  %v2652_v40 = vmul.f32 %v8741_v20, %v10848_v13  ;;  %v1132_v52 = vmax.f32 %v10849_v2, 0.0  ;;  %v1988_v54 = vmul.f32 %v8346_v3, %v10850_v53  ;;  %v2278_v21 = vmul.f32 %v8454_v14, %v10839_v47  ;;  %v10854_v47 = vld [vmem:[#allocation137_spill] sm:$0xff] }
 0x23d   : > { %v5377_v9 = vpop.eup %5376  ;;  %3090 = vperm.xlu1 %5170, %v1527_v27   ;;  %v2547_v8 = vadd.f32 %v2467_v26, %v2362_v41  ;;  %v1290_v60 = vadd.f32 1e-08, %v8726_v62  ;;  %v3939_v39 = vsel %vm3895_vm0, %v3845_v37, -inf  ;;  %v3938_v44 = vsel %vm3895_vm0, %v3841_v46, -inf  ;;  %v10852_v41 = vld [vmem:[#allocation141_spill] sm:$0xff] }
 0x23e   : > { %v5379_v6 = vpop.eup %5378  ;;  %3647 = vperm.xlu0 %5169, %v8577_v59   ;;  %v1531_v2 = vmul.f32 %v1440_v19, %v8714_v49  ;;  %v1128_v27 = vmax.f32 %v8622_v24, 0.0  ;;  %v8758_v26 = vmax.f32 %v3941_v0, %v3942_v45  ;;  %v8762_v53 = vadd.f32 %v8676_v1, %v10852_v41  ;;  %v8766_v22 = vpop.permute.xlu1 %3357  ;;  %v10858_v0 = vld [vmem:[#allocation116_spill] sm:$0xff] }
 0x23f   : > { %v2173_v13 = vadd.f32 %v2093_v33, %v1988_v54  ;;  %v2098_v56 = vmul.f32 %v8363_v55, %v10854_v47  ;;  %10855 = vst [vmem:[#allocation42_spill] sm:$0xff] %v8766_v22  ;;  %v8768_v37 = vadd.f32 %v2652_v40, %v2547_v8  ;;  %v2463_v59 = vmul.f32 %v8716_v5, %v10842_v51  ;;  %v8778_v45 = vpop.permute.xlu0 %3337  ;;  %v10859_v51 = vld [vmem:[#allocation36_spill] sm:$0xff] }
 0x240   : > { %10851 = vst [vmem:[#allocation133_spill] sm:$0xff] %v8758_v26  ;;  %10853 = vst [vmem:[#allocation77_spill] sm:$0xff] %v8762_v53  ;;  %v2648_v24 = vmul.f32 %v8741_v20, %v10843_v11  ;;  %v8774_v19 = vmin.f32 %v1132_v52, 1.0  ;;  %v8776_v46 = vmax.f32 %v3938_v44, %v3939_v39  ;;  %v1442_v33 = vmul.f32 5.0, %v5377_v9  ;;  %v10860_v11 = vld [vmem:[#allocation131_spill] sm:$0xff] }
 0x241   : > { %10857 = vst [vmem:[#allocation111_spill] sm:$0xff] %v8778_v45  ;;  %3632 = vperm.xlu1 %5170, %v8636_v30   ;;  %v1993_v54 = vmul.f32 %v8346_v3, %v10858_v0  ;;  %5384 = vrcp.f32 %v1290_v60  ;;  %v2358_v40 = vadd.f32 %v2278_v21, %v2173_v13  ;;  %v8783_v8 = vmin.f32 %v1128_v27, 1.0  ;;  %v10861_v45 = vld [vmem:[#allocation54_spill] sm:$0xff]  ;;  %v10862_v13 = vld [vmem:[#allocation19_spill] sm:$0xff] }
 0x242   : > { %10856 = vst [vmem:[#allocation22_spill] sm:$0xff] %v8776_v46  ;;  %3110 = vperm.xlu0 %5169, %v1531_v2   ;;  %v1434_v41 = vmul.f32 5.0, %v5379_v6  ;;  %v2283_v52 = vmul.f32 %v8454_v14, %v10859_v51  ;;  %v3205_v39 = vmul.f32 %v8608_v4, %v10860_v11  ;;  %v3201_v44 = vmul.f32 %v8617_v42, %v8537_v31  ;;  %v8797_v6 = vpop.permute.xlu1 %2990  ;;  %v10863_v2 = vld [vmem:[#allocation50_spill] sm:$0xff]  ;;  %v10864_v42 = vld [vmem:[#allocation28_spill] sm:$0xff] }
 0x243   : > { %v5196_v30 = vpack.i.bf16 %v8758_v26, %v8776_v46  ;;  %v2178_v9 = vadd.f32 %v2098_v56, %v1993_v54  ;;  %v3204_v60 = vmul.f32 %v8561_v10, %v10861_v45  ;;  %v3200_v21 = vmul.f32 %v8570_v28, %v10862_v13  ;;  %v8803_v31 = vpop.permute.xlu0 %2970  ;;  %v10865_v45 = vld [vmem:[#allocation102_spill] sm:$0xff] }
 0x244   : > { %v2468_v27 = vmul.f32 %v8716_v5, %v10863_v2  ;;  %v2094_v4 = vmul.f32 %v8363_v55, %v10858_v0  ;;  %v2543_v11 = vadd.f32 %v2463_v59, %v2358_v40  ;;  %v1532_v56 = vmul.f32 %v1442_v33, %v8774_v19  ;;  %v10866_v26 = vld [vmem:[#allocation30_spill] sm:$0xff] }
 0x245   : > { %5197 = vrot.lane.b32.xlu1 %v5196_v30, %s5612_s26  ;;  %v1133_v10 = vmax.f32 %v10864_v42, 0.0  ;;  %5386 = vrcp.f32 %v10865_v45  ;;  %v5381_v28 = vpop.eup %5380  ;;  %v1528_v54 = vmul.f32 %v1434_v41, %v8783_v8  ;;  %v2363_v13 = vadd.f32 %v2283_v52, %v2178_v9  ;;  %v10867_v46 = vld [vmem:[#allocation38_spill] sm:$0xff] }
 0x246   : > { %3652 = vperm.xlu0 %5169, %v8658_v32   ;;  %v1989_v0 = vmul.f32 %v8346_v3, %v10866_v26  ;;  %v1129_v59 = vmax.f32 %v8682_v58, 0.0  ;;  %v3292_v30 = vadd.f32 %v8676_v1, %v3205_v39  ;;  %v3288_v33 = vadd.f32 %v8676_v1, %v3201_v44  ;;  %v3533_v52 = vpop.permute.xlu1 %3532 }
 0x247   : > { %v5383_v40 = vpop.eup %5382  ;;  %v2653_v42 = vmul.f32 %v8741_v20, %v10867_v46  ;;  %v2279_v45 = vmul.f32 %v8454_v14, %v10854_v47  ;;  %v3291_v32 = vadd.f32 %v8676_v1, %v3204_v60  ;;  %v3287_v41 = vadd.f32 %v8676_v1, %v3200_v21  ;;  %v3513_v39 = vpop.permute.xlu0 %3512 }
 0x248   : > { %v2548_v9 = vadd.f32 %v2468_v27, %v2363_v13  ;;  %v2174_v26 = vadd.f32 %v2094_v4, %v1989_v0  ;;  %v3772_v58 = vmul.f32 %v8689_v35, %v3292_v30  ;;  %v3768_v53 = vmul.f32 %v8693_v17, %v3288_v33  ;;  %v10868_v27 = vld [vmem:[#allocation88_spill] sm:$0xff] }
 0x249   : > { %3115 = vperm.xlu1 %5170, %v1532_v56   ;;  %v8824_v44 = vmin.f32 %v1133_v10, 1.0  ;;  %v1444_v22 = vmul.f32 5.0, %v5381_v28  ;;  %v3771_v46 = vmul.f32 %v8634_v16, %v3291_v32  ;;  %v3767_v47 = vmul.f32 %v8642_v48, %v3287_v41  ;;  %v10869_v35 = vld [vmem:[#allocation52_spill] sm:$0xff] }
 0x24a   : > { %3095 = vperm.xlu0 %5169, %v1528_v54   ;;  %v8828_v60 = vmin.f32 %v1129_v59, 1.0  ;;  %v1436_v21 = vmul.f32 5.0, %v5383_v40  ;;  %v2728_v63 = vadd.f32 %v2648_v24, %v2543_v11  ;;  %v8832_v4 = vadd.f32 %v8676_v1, %v10868_v27  ;;  %v8840_v10 = vpop.permute.xlu1 %3362 }
 0x24b   : > { %v8836_v17 = vadd.f32 %v8676_v1, %v10869_v35  ;;  %v2464_v56 = vmul.f32 %v8716_v5, %v10859_v51  ;;  %v8842_v16 = vadd.f32 %v2653_v42, %v2548_v9  ;;  %v2359_v48 = vadd.f32 %v2279_v45, %v2174_v26  ;;  %v10872_v35 = vld [vmem:[#allocation35_spill] sm:$0xff] }
 0x24c   : > { %v2649_v28 = vmul.f32 %v8741_v20, %v10863_v2  ;;  %v1130_v24 = vmax.f32 %v8726_v62, 0.0  ;;  %v3852_v11 = vmax.f32 %v3772_v58, 0.0  ;;  %v3848_v54 = vmax.f32 %v3768_v53, 0.0  ;;  %v8849_v0 = vpop.permute.xlu0 %3342 }
 0x24d   : > { %v3207_v13 = vmul.f32 %v8712_v23, %v8706_v29  ;;  %3677 = vperm.xlu1 %5170, %v8714_v49   ;;  %v1533_v59 = vmul.f32 %v1444_v22, %v8824_v44  ;;  %v3851_v30 = vmax.f32 %v3771_v46, 0.0  ;;  %v3847_v33 = vmax.f32 %v3767_v47, 0.0  ;;  %v10870_v49 = vld [vmem:[#allocation81_spill] sm:$0xff] }
 0x24e   : > { %v5385_v40 = vpop.eup %5384  ;;  %v3203_v42 = vmul.f32 %v8720_v25, %v8729_v34  ;;  %3657 = vperm.xlu0 %5169, %v8695_v36   ;;  %v1529_v62 = vmul.f32 %v1436_v21, %v8828_v60  ;;  %v2544_v53 = vadd.f32 %v2464_v56, %v2359_v48  ;;  %v8859_v29 = vadd.f32 %v8676_v1, %v8529_v50  ;;  %v2996_v25 = vpop.permute.xlu1 %2995 }
 0x24f   : > { %v2099_v23 = vmul.f32 %v8363_v55, %v10801_v7  ;;  %v1134_v22 = vmax.f32 %v10870_v49, 0.0  ;;  %v3206_v47 = vmul.f32 %v8664_v18, %v8596_v61  ;;  %v3202_v34 = vmul.f32 %v8668_v43, %v8598_v15  ;;  %v10871_v43 = vld [vmem:[#allocation163_spill] sm:$0xff] }
 0x250   : > { %v8868_v36 = vmin.f32 %v1130_v24, 1.0  ;;  %v1994_v46 = vmul.f32 %v8346_v3, %v10800_v12  ;;  %v3948_v50 = vsel %vm3895_vm0, %v3852_v11, -inf  ;;  %v3947_v45 = vsel %vm3895_vm0, %v3848_v54, -inf  ;;  %v2976_v41 = vpop.permute.xlu0 %2975 }
 0x251   : > { %v3294_v32 = vadd.f32 %v8676_v1, %v3207_v13  ;;  %3120 = vperm.xlu1 %5170, %v1533_v59   ;;  %v1438_v9 = vmul.f32 5.0, %v5385_v40  ;;  %v3945_v61 = vsel %vm3895_vm0, %v3851_v30, -inf  ;;  %v3944_v15 = vsel %vm3895_vm0, %v3847_v33, -inf }
 0x252   : > { %v5387_v26 = vpop.eup %5386  ;;  %v3290_v18 = vadd.f32 %v8676_v1, %v3203_v42  ;;  %3100 = vperm.xlu0 %5169, %v1529_v62   ;;  %v8880_v58 = vadd.f32 %v8676_v1, %v10871_v43  ;;  %v2179_v27 = vadd.f32 %v2099_v23, %v1994_v46  ;;  %v2284_v56 = vmul.f32 %v8454_v14, %v10872_v35  ;;  %v3558_v59 = vpop.permute.xlu1 %3557 }
 0x253   : > { %v3774_v21 = vmul.f32 %v3533_v52, %v3294_v32  ;;  %v2095_v48 = vmul.f32 %v8363_v55, %v10800_v12  ;;  %v8886_v24 = vmax.f32 %v3947_v45, %v3948_v50  ;;  %v3293_v11 = vadd.f32 %v8676_v1, %v3206_v47  ;;  %v10874_v47 = vld [vmem:[#allocation146_spill] sm:$0xff] }
 0x254   : > { %v3289_v54 = vadd.f32 %v8676_v1, %v3202_v34  ;;  %v3770_v13 = vmul.f32 %v3513_v39, %v3290_v18  ;;  %v8890_v40 = vmax.f32 %v3944_v15, %v3945_v61  ;;  %v3538_v30 = vpop.permute.xlu0 %3537  ;;  %v1530_v52 = vmul.f32 %v1438_v9, %v8868_v36  ;;  %v10875_v34 = vld [vmem:[#allocation177_spill] sm:$0xff] }
 0x255   : > { %3682 = vperm.xlu1 %5170, %v8774_v19   ;;  %v8894_v33 = vmin.f32 %v1134_v22, 1.0  ;;  %v1446_v42 = vmul.f32 5.0, %v5387_v26  ;;  %v3773_v12 = vmul.f32 %v8739_v57, %v3293_v11  ;;  %v3212_v23 = vmul.f32 %v8797_v6, %v8768_v37 }
 0x256   : > { %10873 = vst [vmem:[#allocation168_spill] sm:$0xff] %v8890_v40  ;;  %v3769_v62 = vmul.f32 %v8746_v38, %v3289_v54  ;;  %v3208_v39 = vmul.f32 %v8803_v31, %v2728_v63  ;;  %3662 = vperm.xlu0 %5169, %v8783_v8   ;;  %v3854_v49 = vmax.f32 %v3774_v21, 0.0  ;;  %v2469_v19 = vmul.f32 %v8716_v5, %v10874_v47  ;;  %v10876_v63 = vld [vmem:[#allocation151_spill] sm:$0xff] }
 0x257   : > { %v1990_v22 = vmul.f32 %v8346_v3, %v10875_v34  ;;  %v2280_v46 = vmul.f32 %v8454_v14, %v10801_v7  ;;  %v3850_v57 = vmax.f32 %v3770_v13, 0.0  ;;  %v2729_v50 = vadd.f32 %v2649_v28, %v2544_v53  ;;  %v8908_v38 = vpop.permute.xlu1 %3367 }
 0x258   : > { %v5201_v37 = vpack.i.bf16 %v8886_v24, %v8890_v40  ;;  %v2654_v8 = vmul.f32 %v8741_v20, %v10876_v63  ;;  %v8914_v6 = vpop.permute.xlu0 %3347  ;;  %v2364_v31 = vadd.f32 %v2284_v56, %v2179_v27  ;;  %v2465_v32 = vmul.f32 %v8716_v5, %v10872_v35 }
 0x259   : > { %3105 = vperm.xlu1 %5170, %v1530_v52   ;;  %v2175_v45 = vadd.f32 %v2095_v48, %v1990_v22  ;;  %v1534_v9 = vmul.f32 %v1446_v42, %v8894_v33  ;;  %v3853_v26 = vmax.f32 %v3773_v12, 0.0  ;;  %v3849_v28 = vmax.f32 %v3769_v62, 0.0 }
 0x25a   : > { %v3299_v53 = vadd.f32 %v8676_v1, %v3212_v23  ;;  %v3295_v61 = vadd.f32 %v8676_v1, %v3208_v39  ;;  %5202 = vrot.lane.b32.xlu0 %v5201_v37, %s5612_s26  ;;  %v3954_v15 = vsel %vm3895_vm0, %v3854_v49, -inf  ;;  %v3213_v18 = vmul.f32 %v2996_v25, %v8842_v16  ;;  %v10877_v16 = vld [vmem:[#allocation124_spill] sm:$0xff]  ;;  %v10880_v39 = vld [vmem:[#allocation77_spill] sm:$0xff]  ;;  %v10881_v49 = vld [vmem:[#allocation111_spill] sm:$0xff] }
 0x25b   : > { %v2549_v43 = vadd.f32 %v2469_v19, %v2364_v31  ;;  %v2360_v21 = vadd.f32 %v2280_v46, %v2175_v45  ;;  %v3953_v27 = vsel %vm3895_vm0, %v3850_v57, -inf  ;;  %v3209_v56 = vmul.f32 %v2976_v41, %v2729_v50  ;;  %v8925_v54 = vpop.permute.xlu1 %3000  ;;  %v10882_v46 = vld [vmem:[#allocation113_spill] sm:$0xff]  ;;  %v10883_v57 = vld [vmem:[#allocation140_spill] sm:$0xff] }
 0x25c   : > { %v3779_v48 = vmul.f32 %v3558_v59, %v3299_v53  ;;  %v3775_v11 = vmul.f32 %v3538_v30, %v3295_v61  ;;  %v2650_v42 = vmul.f32 %v8741_v20, %v10874_v47  ;;  %v8931_v12 = vpop.permute.xlu0 %2980  ;;  %v2096_v25 = vmul.f32 %v8363_v55, %v10877_v16  ;;  %v10878_v59 = vld [vmem:[#allocation80_spill] sm:$0xff]  ;;  %v10879_v30 = vld [vmem:[#allocation42_spill] sm:$0xff] }
 0x25d   : > { %v8927_v13 = vadd.f32 %v2654_v8, %v2549_v43  ;;  %v2545_v52 = vadd.f32 %v2465_v32, %v2360_v21  ;;  %3667 = vperm.xlu1 %5170, %v8828_v60   ;;  %v3951_v62 = vsel %vm3895_vm0, %v3853_v26, -inf  ;;  %v3950_v41 = vsel %vm3895_vm0, %v3849_v28, -inf  ;;  %v10884_v32 = vld [vmem:[#allocation145_spill] sm:$0xff] }
 0x25e   : > { %v3739_v23 = vmul.f32 %v10879_v30, %v10878_v59  ;;  %v3735_v19 = vmul.f32 %v10881_v49, %v10880_v39  ;;  %3125 = vperm.xlu0 %5169, %v1534_v9   ;;  %v8942_v34 = vmax.f32 %v3953_v27, %v3954_v15  ;;  %v3300_v22 = vadd.f32 %v8676_v1, %v3213_v18  ;;  %v8982_v39 = vld [vmem:[#allocation2 + $0x1] ss:$0 sm:$0xff]  ;;  %v10886_v49 = vld [vmem:[#allocation31_spill] sm:$0xff] }
 0x25f   : > { %v1991_v60 = vmul.f32 %v8346_v3, %v10882_v46  ;;  %v2281_v50 = vmul.f32 %v8454_v14, %v10883_v57  ;;  %v3859_v37 = vmax.f32 %v3779_v48, 0.0  ;;  %v3855_v8 = vmax.f32 %v3775_v11, 0.0  ;;  %v3563_v31 = vpop.permute.xlu1 %3562 }
 0x260   : > { %v3296_v45 = vadd.f32 %v8676_v1, %v3209_v56  ;;  %v2466_v26 = vmul.f32 %v8716_v5, %v10884_v32  ;;  %v8952_v28 = vmax.f32 %v3950_v41, %v3951_v62  ;;  %v3780_v9 = vmul.f32 %v3563_v31, %v3300_v22  ;;  %v3543_v53 = vpop.permute.xlu0 %3542  ;;  %v10885_v41 = vld [vmem:[#allocation149_spill] sm:$0xff] }
 0x261   : > { %3672 = vperm.xlu1 %5170, %v8868_v36   ;;  %v1995_v61 = vmul.f32 %v8346_v3, %v10877_v16  ;;  %v2100_v15 = vmul.f32 %v8363_v55, %v10883_v57  ;;  %v3819_v18 = vmax.f32 %v3739_v23, 0.0  ;;  %v3815_v43 = vmax.f32 %v3735_v19, 0.0 }
 0x262   : > { %v3776_v21 = vmul.f32 %v3543_v53, %v3296_v45  ;;  %3687 = vperm.xlu0 %5169, %v8824_v44   ;;  %v2176_v27 = vadd.f32 %v2096_v25, %v1991_v60  ;;  %v3740_v56 = vmul.f32 %v8840_v10, %v8832_v4  ;;  %v3736_v48 = vmul.f32 %v8849_v0, %v8836_v17  ;;  %v8992_v45 = vld [vmem:[#allocation2] ss:$0 sm:$0xff]  ;;  %v10890_v53 = vld [vmem:[#allocation37_spill] sm:$0xff] }
 0x263   : > { %v3860_v11 = vmax.f32 %v3780_v9, 0.0  ;;  %v5206_v36 = vpack.i.bf16 %v8942_v34, %v8952_v28  ;;  %v3957_v3 = vsel %vm3895_vm0, %v3859_v37, -inf  ;;  %v3956_v55 = vsel %vm3895_vm0, %v3855_v8, -inf  ;;  %v8968_v62 = vpop.permute.xlu1 %3372  ;;  %v10889_v9 = vld [vmem:[#allocation126_spill] sm:$0xff] }
 0x264   : > { %v3856_v16 = vmax.f32 %v3776_v21, 0.0  ;;  %v2651_v44 = vmul.f32 %v8741_v20, %v10885_v41  ;;  %v8973_v4 = vpop.permute.xlu0 %3352  ;;  %v2361_v17 = vadd.f32 %v2281_v50, %v2176_v27  ;;  %v2180_v10 = vadd.f32 %v2100_v15, %v1995_v61  ;;  %v10891_v27 = vld [vmem:[#allocation39_spill] sm:$0xff] }
 0x265   : > { %v3960_v25 = vsel %vm3895_vm0, %v3860_v11, -inf  ;;  %5207 = vrot.lane.b32.xlu1 %v5206_v36, %s5612_s26  ;;  %v2285_v0 = vmul.f32 %v8454_v14, %v10884_v32  ;;  %v3897_v59 = vsel %vm3895_vm0, %v3819_v18, -inf  ;;  %v3896_v30 = vsel %vm3895_vm0, %v3815_v43, -inf  ;;  %v10892_v11 = vld [vmem:[#allocation143_spill] sm:$0xff] }
 0x266   : > { %v3959_v23 = vsel %vm3895_vm0, %v3856_v16, -inf  ;;  %3692 = vperm.xlu0 %5169, %v8894_v33   ;;  %v2101_v19 = vmul.f32 %v8982_v39, %v10886_v49  ;;  %v3820_v22 = vmax.f32 %v3740_v56, 0.0  ;;  %v3816_v46 = vmax.f32 %v3736_v48, 0.0 }
 0x267   : > { %v8986_v60 = vmax.f32 %v3956_v55, %v3957_v3  ;;  %v8988_v50 = vmax.f32 %v3959_v23, %v3960_v25  ;;  %v2730_v37 = vadd.f32 %v2650_v42, %v2545_v52  ;;  %v2986_v8 = vpop.permute.xlu1 %2985  ;;  %v2470_v31 = vmul.f32 %v8716_v5, %v10885_v41 }
 0x268   : > { %v1996_v33 = vmul.f32 %v8992_v45, %v10889_v9  ;;  %v2286_v61 = vmul.f32 %v8454_v14, %v10890_v53  ;;  %v2546_v15 = vadd.f32 %v2466_v26, %v2361_v17  ;;  %v5173_v18 = vpop.permute.xlu0 %5172  ;;  %v2365_v21 = vadd.f32 %v2285_v0, %v2180_v10 }
 0x269   : > { %10887 = vst [vmem:[#allocation69_spill] sm:$0xff] %v8986_v60  ;;  %10888 = vst [vmem:[#allocation119_spill] sm:$0xff] %v8988_v50  ;;  %v5211_v43 = vpack.i.bf16 %v8988_v50, %v8986_v60  ;;  %v2655_v52 = vmul.f32 %v8741_v20, %v10891_v27  ;;  %v3898_v42 = vmax.f32 %v3896_v30, %v3897_v59  ;;  %v5174_v56 = vunpack.i.l.bf16 %v5173_v18  ;;  %v10893_v59 = vld [vmem:[#allocation150_spill] sm:$0xff] }
 0x26a   : > { %v2181_v48 = vadd.f32 %v2101_v19, %v1996_v33  ;;  %v2471_v36 = vmul.f32 %v8716_v5, %v10892_v11  ;;  %v3900_v3 = vsel %vm3895_vm0, %v3820_v22, -inf  ;;  %v3899_v55 = vsel %vm3895_vm0, %v3816_v46, -inf }
 0x26b   : > { %v2731_v16 = vadd.f32 %v2651_v44, %v2546_v15  ;;  %5212 = vrot.lane.b32.xlu0 %v5211_v43, %s5612_s26  ;;  %v2105_v26 = vmul.f32 %v8982_v39, %v10890_v53  ;;  %v5175_v25 = vunpack.i.h.bf16 %v5173_v18  ;;  %v3548_v17 = vpop.permute.xlu1 %3547  ;;  %v4144_v10 = vsel %vm3895_vm0, %v3898_v42, %v5174_v56  ;;  %v10894_v15 = vld [vmem:[#allocation132_spill] sm:$0xff] }
 0x26c   : > { %v2366_v0 = vadd.f32 %v2286_v61, %v2181_v48  ;;  %v2656_v30 = vmul.f32 %v8741_v20, %v10893_v59  ;;  %v3741_v23 = vmul.f32 %v8908_v38, %v8859_v29  ;;  %v2550_v19 = vadd.f32 %v2470_v31, %v2365_v21  ;;  %v3006_v22 = vpop.permute.xlu0 %3005  ;;  %4340 = vmatmul.mubr.f32.vlgmr.msra.gmra.mxu0 %v4144_v10  ;;  %v10895_v31 = vld [vmem:[#allocation136_spill] sm:$0xff] }
 0x26d   : > { %v2000_v44 = vmul.f32 %v8992_v45, %v10886_v49  ;;  %v2290_v46 = vmul.f32 %v8454_v14, %v10892_v11  ;;  %v3901_v9 = vmax.f32 %v3899_v55, %v3900_v3  ;;  %v3737_v33 = vmul.f32 %v8914_v6, %v8880_v58  ;;  %5057 = vmatprep.mubr.msk.f32.mxu0 %vm3895_vm0, %v10894_v15  ;;  %v10896_v49 = vld [vmem:[#allocation123_spill] sm:$0xff] }
 0x26e   : > { %v3214_v61 = vmul.f32 %v8925_v54, %v8927_v13  ;;  %v2551_v29 = vadd.f32 %v2471_v36, %v2366_v0  ;;  %v3210_v38 = vmul.f32 %v8931_v12, %v2730_v37  ;;  %v3262_v18 = vadd.f32 %v8676_v1, %v10895_v31  ;;  %v10897_v37 = vld [vmem:[#allocation178_spill] sm:$0xff]  ;;  %v10901_v31 = vld [vmem:[#allocation48_spill] sm:$0xff] }
 0x26f   : > { %v3258_v43 = vadd.f32 %v8676_v1, %v10896_v49  ;;  %v2185_v21 = vadd.f32 %v2105_v26, %v2000_v44  ;;  %v3211_v42 = vmul.f32 %v2986_v8, %v2731_v16  ;;  %v2735_v56 = vadd.f32 %v2655_v52, %v2550_v19  ;;  %v9029_v48 = vpop.permute.xlu1 %3010  ;;  %v10898_v26 = vld [vmem:[#allocation100_spill] sm:$0xff] }
 0x270   : > { %v9031_v58 = vadd.f32 %v2656_v30, %v2551_v29  ;;  %v4145_v6 = vsel %vm3895_vm0, %v3901_v9, %v5175_v25  ;;  %v3821_v54 = vmax.f32 %v3741_v23, 0.0  ;;  %v3568_v13 = vpop.permute.xlu0 %3567  ;;  %v2475_v12 = vmul.f32 %v8716_v5, %v10893_v59  ;;  %v10899_v30 = vld [vmem:[#allocation38_spill] sm:$0xff] }
 0x271   : > { %4345 = vmatmul.mubr.f32.gmra.mxu0 %v4145_v6  ;;  %v2370_v36 = vadd.f32 %v2290_v46, %v2185_v21  ;;  %v2660_v3 = vmul.f32 %v8741_v20, %v10897_v37  ;;  %v3817_v55 = vmax.f32 %v3737_v33, 0.0  ;;  %v3742_v8 = vmul.f32 %v8968_v62, %v3262_v18  ;;  %v10900_v46 = vld [vmem:[#allocation154_spill] sm:$0xff] }
 0x272   : > { %v3738_v52 = vmul.f32 %v8973_v4, %v3258_v43  ;;  %v3301_v16 = vadd.f32 %v8676_v1, %v3214_v61  ;;  %5058 = vmatprep.mubr.msk.f32.mxu0 %vm3895_vm0, %v10898_v26  ;;  %v3297_v25 = vadd.f32 %v8676_v1, %v3210_v38  ;;  %v2001_v10 = vmul.f32 %v8992_v45, %v10859_v51 }
 0x273   : > { %v2106_v0 = vmul.f32 %v8982_v39, %v10863_v2  ;;  %v2291_v23 = vmul.f32 %v8454_v14, %v10899_v30  ;;  %v3215_v19 = vmul.f32 %v3006_v22, %v2735_v56  ;;  %v3298_v4 = vadd.f32 %v8676_v1, %v3211_v42  ;;  %v3553_v44 = vpop.permute.xlu1 %3552  ;;  %v10902_v56 = vld [vmem:[#allocation137_spill] sm:$0xff] }
 0x274   : > { %v3781_v62 = vmul.f32 %v3568_v13, %v3301_v16  ;;  %v2476_v9 = vmul.f32 %v8716_v5, %v10900_v46  ;;  %v3903_v33 = vsel %vm3895_vm0, %v3821_v54, -inf  ;;  %v3777_v61 = vmul.f32 %v3548_v17, %v3297_v25  ;;  %v3031_v38 = vpop.permute.xlu0 %3030  ;;  %v9061_v13 = vld [vmem:[#allocation2 + $0x2] ss:$0 sm:$0xff] }
 0x275   : > { %v2555_v29 = vadd.f32 %v2475_v12, %v2370_v36  ;;  %v2661_v18 = vmul.f32 %v8741_v20, %v10901_v31  ;;  %v3902_v49 = vsel %vm3895_vm0, %v3817_v55, -inf  ;;  %v3822_v43 = vmax.f32 %v3742_v8, 0.0 }
 0x276   : > { %v3818_v14 = vmax.f32 %v3738_v52, 0.0  ;;  %v3778_v22 = vmul.f32 %v3553_v44, %v3298_v4  ;;  %v2186_v21 = vadd.f32 %v2106_v0, %v2001_v10  ;;  %v1997_v42 = vmul.f32 %v8992_v45, %v10902_v56 }
 0x277   : > { %v2102_v6 = vmul.f32 %v8982_v39, %v10859_v51  ;;  %v2287_v17 = vmul.f32 %v9061_v13, %v10863_v2  ;;  %v3861_v54 = vmax.f32 %v3781_v62, 0.0  ;;  %v2740_v36 = vadd.f32 %v2660_v3, %v2555_v29  ;;  %v5178_v12 = vpop.permute.xlu1 %5177 }
 0x278   : > { %v3302_v55 = vadd.f32 %v8676_v1, %v3215_v19  ;;  %v2472_v8 = vmul.f32 %v8716_v5, %v10899_v30  ;;  %v3904_v52 = vmax.f32 %v3902_v49, %v3903_v33  ;;  %v3857_v16 = vmax.f32 %v3777_v61, 0.0  ;;  %v3573_v10 = vpop.permute.xlu0 %3572 }
 0x279   : > { %v5179_v25 = vunpack.i.l.bf16 %v5178_v12  ;;  %v2371_v0 = vadd.f32 %v2291_v23, %v2186_v21  ;;  %v3906_v51 = vsel %vm3895_vm0, %v3822_v43, -inf  ;;  %v3905_v4 = vsel %vm3895_vm0, %v3818_v14, -inf }
 0x27a   : > { %v3858_v44 = vmax.f32 %v3778_v22, 0.0  ;;  %v3782_v56 = vmul.f32 %v3573_v10, %v3302_v55  ;;  %v5180_v50 = vunpack.i.h.bf16 %v5178_v12  ;;  %v2182_v62 = vadd.f32 %v2102_v6, %v1997_v42  ;;  %v10903_v42 = vld [vmem:[#allocation66_spill] sm:$0xff] }
 0x27b   : > { %v2657_v3 = vmul.f32 %v8741_v20, %v10900_v46  ;;  %v4146_v19 = vsel %vm3895_vm0, %v3904_v52, %v5179_v25  ;;  %v3963_v29 = vsel %vm3895_vm0, %v3861_v54, -inf  ;;  %v2556_v61 = vadd.f32 %v2476_v9, %v2371_v0  ;;  %v10906_v10 = vld [vmem:[#allocation138_spill] sm:$0xff] }
 0x27c   : > { %v3862_v33 = vmax.f32 %v3782_v56, 0.0  ;;  %v3036_v49 = vpop.permute.xlu1 %3035  ;;  %4350 = vmatmul.mubr.f32.gmra.mxu0 %v4146_v19  ;;  %v2002_v23 = vmul.f32 %v8992_v45, %v10872_v35  ;;  %v3907_v43 = vmax.f32 %v3905_v4, %v3906_v51  ;;  %v3962_v14 = vsel %vm3895_vm0, %v3857_v16, -inf }
 0x27d   : > { %v2367_v22 = vadd.f32 %v2287_v17, %v2182_v62  ;;  %v3016_v21 = vpop.permute.xlu0 %3015  ;;  %5059 = vmatprep.mubr.msk.f32.mxu0 %vm3895_vm0, %v10903_v42  ;;  %v2107_v6 = vmul.f32 %v8982_v39, %v10874_v47  ;;  %v3216_v54 = vmul.f32 %v9029_v48, %v9031_v58  ;;  %v3965_v9 = vsel %vm3895_vm0, %v3858_v44, -inf  ;;  %v10907_v48 = vld [vmem:[#allocation153_spill] sm:$0xff]  ;;  %v10908_v44 = vld [vmem:[#allocation147_spill] sm:$0xff] }
 0x27e   : > { %v3220_v12 = vmul.f32 %v3031_v38, %v2740_v36  ;;  %v3966_v55 = vsel %vm3895_vm0, %v3862_v33, -inf  ;;  %v9085_v52 = vmax.f32 %v3962_v14, %v3963_v29  ;;  %v4147_v17 = vsel %vm3895_vm0, %v3907_v43, %v5180_v50 }
 0x27f   : > { %v9087_v25 = vmax.f32 %v3965_v9, %v3966_v55  ;;  %v2292_v16 = vmul.f32 %v9061_v13, %v10876_v63  ;;  %5388 = vrcp.f32 %v10906_v10  ;;  %v2552_v0 = vadd.f32 %v2472_v8, %v2367_v22 }
 0x280   : > { %10904 = vst [vmem:[#allocation26_spill] sm:$0xff] %v9085_v52  ;;  %v3598_v51 = vpop.permute.xlu1 %3597  ;;  %4355 = vmatmul.mubr.f32.gmra.mxu0 %v4147_v17  ;;  %v2477_v58 = vmul.f32 %v8716_v5, %v10907_v48  ;;  %v2103_v38 = vmul.f32 %v8982_v39, %v10872_v35  ;;  %v2741_v36 = vadd.f32 %v2661_v18, %v2556_v61  ;;  %v10909_v18 = vld [vmem:[#allocation134_spill] sm:$0xff] }
 0x281   : > { %10905 = vst [vmem:[#allocation160_spill] sm:$0xff] %v9087_v25  ;;  %v3578_v4 = vpop.permute.xlu0 %3577  ;;  %5060 = vmatprep.mubr.msk.f32.mxu0 %vm3895_vm0, %v10908_v44  ;;  %v5216_v50 = vpack.i.bf16 %v9087_v25, %v9085_v52  ;;  %v2187_v56 = vadd.f32 %v2107_v6, %v2002_v23  ;;  %v1998_v8 = vmul.f32 %v8992_v45, %v10801_v7  ;;  %5390 = vrcp.f32 %v10909_v18  ;;  %v10910_v6 = vld [vmem:[#allocation181_spill] sm:$0xff]  ;;  %v10931_v44 = vld [vmem:[#allocation118_spill] sm:$0xff] }
 0x282   : > { %v2737_v62 = vadd.f32 %v2657_v3, %v2552_v0  ;;  %v3307_v19 = vadd.f32 %v8676_v1, %v3220_v12  ;;  %v3303_v29 = vadd.f32 %v8676_v1, %v3216_v54  ;;  %v2288_v35 = vmul.f32 %v9061_v13, %v10874_v47 }
 0x283   : > { %v3221_v33 = vmul.f32 %v3036_v49, %v2741_v36  ;;  %5217 = vrot.lane.b32.xlu1 %v5216_v50, %s5612_s26  ;;  %v2372_v61 = vadd.f32 %v2292_v16, %v2187_v56  ;;  %v2104_v23 = vmul.f32 %v8982_v39, %v10884_v32  ;;  %v2183_v22 = vadd.f32 %v2103_v38, %v1998_v8 }
 0x284   : > { %v3217_v43 = vmul.f32 %v3016_v21, %v2737_v62  ;;  %v3787_v14 = vmul.f32 %v3598_v51, %v3307_v19  ;;  %v3783_v7 = vmul.f32 %v3578_v4, %v3303_v29  ;;  %v3041_v3 = vpop.permute.xlu1 %3040  ;;  %v2662_v54 = vmul.f32 %v8741_v20, %v10910_v6 }
 0x285   : > { %v2473_v9 = vmul.f32 %v8716_v5, %v10876_v63  ;;  %v3021_v12 = vpop.permute.xlu0 %3020  ;;  %v1999_v49 = vmul.f32 %v8992_v45, %v10883_v57  ;;  %v2289_v55 = vmul.f32 %v9061_v13, %v10885_v41  ;;  %v2557_v17 = vadd.f32 %v2477_v58, %v2372_v61  ;;  %v10912_v61 = vld [vmem:[#allocation40_spill] sm:$0xff] }
 0x286   : > { %v2368_v16 = vadd.f32 %v2288_v35, %v2183_v22  ;;  %v2658_v21 = vmul.f32 %v8741_v20, %v10907_v48  ;;  %v2108_v10 = vmul.f32 %v8982_v39, %v10885_v41  ;;  %v3308_v0 = vadd.f32 %v8676_v1, %v3221_v33  ;;  %v10911_v35 = vld [vmem:[#allocation83_spill] sm:$0xff] }
 0x287   : > { %v2184_v51 = vadd.f32 %v2104_v23, %v1999_v49  ;;  %v2474_v38 = vmul.f32 %v8716_v5, %v10891_v27  ;;  %v2003_v57 = vmul.f32 %v8992_v45, %v10884_v32  ;;  %v3867_v36 = vmax.f32 %v3787_v14, 0.0 }
 0x288   : > { %v3863_v4 = vmax.f32 %v3783_v7, 0.0  ;;  %v3603_v50 = vpop.permute.xlu1 %3602  ;;  %v3304_v58 = vadd.f32 %v8676_v1, %v3217_v43  ;;  %v2293_v56 = vmul.f32 %v9061_v13, %v10891_v27  ;;  %v2553_v8 = vadd.f32 %v2473_v9, %v2368_v16 }
 0x289   : > { %v3788_v62 = vmul.f32 %v3603_v50, %v3308_v0  ;;  %v3583_v19 = vpop.permute.xlu0 %3582  ;;  %v2369_v29 = vadd.f32 %v2289_v55, %v2184_v51  ;;  %v1135_v18 = vmax.f32 %v10911_v35, 0.0  ;;  %v2659_v23 = vmul.f32 %v8741_v20, %v10912_v61 }
 0x28a   : > { %v3784_v33 = vmul.f32 %v3583_v19, %v3304_v58  ;;  %v2188_v22 = vadd.f32 %v2108_v10, %v2003_v57  ;;  %v2478_v32 = vmul.f32 %v8716_v5, %v10912_v61  ;;  %v2742_v14 = vadd.f32 %v2662_v54, %v2557_v17  ;;  %v10913_v10 = vld [vmem:[#allocation179_spill] sm:$0xff]  ;;  %v10914_v54 = vld [vmem:[#allocation29_spill] sm:$0xff] }
 0x28b   : > { %v2738_v7 = vadd.f32 %v2658_v21, %v2553_v8  ;;  %v3868_v43 = vmax.f32 %v3788_v62, 0.0  ;;  %v2554_v49 = vadd.f32 %v2474_v38, %v2369_v29  ;;  %v3969_v25 = vsel %vm3895_vm0, %v3867_v36, -inf }
 0x28c   : > { %v3968_v9 = vsel %vm3895_vm0, %v3863_v4, -inf  ;;  %v3864_v16 = vmax.f32 %v3784_v33, 0.0  ;;  %v3026_v55 = vpop.permute.xlu1 %3025  ;;  %v2373_v0 = vadd.f32 %v2293_v56, %v2188_v22  ;;  %v9138_v51 = vpop.eup %5388  ;;  %v2663_v57 = vmul.f32 %v8741_v20, %v10913_v10 }
 0x28d   : > { %v3972_v50 = vsel %vm3895_vm0, %v3868_v43, -inf  ;;  %v5183_v58 = vpop.permute.xlu0 %5182  ;;  %v9143_v19 = vmin.f32 %v1135_v18, 1.0  ;;  %v1448_v17 = vmul.f32 5.0, %v10914_v54  ;;  %v2739_v38 = vadd.f32 %v2659_v23, %v2554_v49  ;;  %v10917_v54 = vld [vmem:[#allocation53_spill] sm:$0xff]  ;;  %v10918_v23 = vld [vmem:[#allocation96_spill] sm:$0xff] }
 0x28e   : > { %v3971_v21 = vsel %vm3895_vm0, %v3864_v16, -inf  ;;  %v5184_v36 = vunpack.i.l.bf16 %v5183_v58  ;;  %v2558_v4 = vadd.f32 %v2478_v32, %v2373_v0  ;;  %v9147_v8 = vmax.f32 %v3968_v9, %v3969_v25  ;;  %v9153_v35 = vpop.eup %5390 }
 0x28f   : > { %v3222_v56 = vmul.f32 %v3041_v3, %v2742_v14  ;;  %v9149_v62 = vmax.f32 %v3971_v21, %v3972_v50  ;;  %v2109_v29 = vmul.f32 %v8982_v39, %v10892_v11  ;;  %v3218_v33 = vmul.f32 %v3021_v12, %v2738_v7  ;;  %v10920_v7 = vld [vmem:[#allocation99_spill] sm:$0xff]  ;;  %v10921_v50 = vld [vmem:[#allocation86_spill] sm:$0xff] }
 0x290   : > { %10915 = vst [vmem:[#allocation56_spill] sm:$0xff] %v9147_v8  ;;  %v3219_v18 = vmul.f32 %v3026_v55, %v2739_v38  ;;  %v5185_v22 = vunpack.i.h.bf16 %v5183_v58  ;;  %v3588_v43 = vpop.permute.xlu1 %3587  ;;  %v4148_v16 = vsel %vm3895_vm0, %v10917_v54, %v5184_v36  ;;  %v10919_v49 = vmax.f32 %v10918_v23, 0.0  ;;  %v10922_v23 = vld [vmem:[#allocation159_spill] sm:$0xff] }
 0x291   : > { %10916 = vst [vmem:[#allocation20_spill] sm:$0xff] %v9149_v62  ;;  %v3046_v25 = vpop.permute.xlu0 %3045  ;;  %4360 = vmatmul.mubr.f32.gmra.mxu0 %v4148_v16  ;;  %v5221_v3 = vpack.i.bf16 %v9149_v62, %v9147_v8  ;;  %v2004_v14 = vmul.f32 %v8992_v45, %v10890_v53  ;;  %v2294_v12 = vmul.f32 %v9061_v13, %v10893_v59  ;;  %v1142_v9 = vmax.f32 %v10920_v7, 0.0 }
 0x292   : > { %v9159_v32 = vmin.f32 %v10919_v49, 1.0  ;;  %v9169_v55 = vadd.f32 1e-08, %v10920_v7  ;;  %v2743_v0 = vadd.f32 %v2663_v57, %v2558_v4  ;;  %5061 = vmatprep.mubr.msk.f32.mxu0 %vm3895_vm0, %v10921_v50  ;;  %v1535_v58 = vmul.f32 %v1448_v17, %v9143_v19 }
 0x293   : > { %5222 = vrot.lane.b32.xlu0 %v5221_v3, %s5612_s26  ;;  %v3309_v21 = vadd.f32 %v8676_v1, %v3222_v56  ;;  %v2189_v38 = vadd.f32 %v2109_v29, %v2004_v14  ;;  %v2479_v53 = vmul.f32 %v8716_v5, %v10897_v37  ;;  %v2113_v36 = vmul.f32 %v8982_v39, %v10893_v59  ;;  %v10923_v56 = vld [vmem:[#allocation156_spill] sm:$0xff] }
 0x294   : > { %v3305_v54 = vadd.f32 %v8676_v1, %v3218_v33  ;;  %v3223_v16 = vmul.f32 %v3046_v25, %v2743_v0  ;;  %v3306_v57 = vadd.f32 %v8676_v1, %v3219_v18  ;;  %v3593_v4 = vpop.permute.xlu1 %3592  ;;  %v4149_v17 = vsel %vm3895_vm0, %v10922_v23, %v5185_v22  ;;  %v10924_v18 = vld [vmem:[#allocation22_spill] sm:$0xff] }
 0x295   : > { %v3608_v49 = vpop.permute.xlu0 %3607  ;;  %4365 = vmatmul.mubr.f32.gmra.mxu0 %v4149_v17  ;;  %v2374_v3 = vadd.f32 %v2294_v12, %v2189_v38  ;;  %v2664_v29 = vmul.f32 %v8741_v20, %v10923_v56  ;;  %v2008_v14 = vmul.f32 %v8992_v45, %v10892_v11  ;;  %v2298_v7 = vmul.f32 %v9061_v13, %v10897_v37 }
 0x296   : > { %v3785_v33 = vmul.f32 %v3588_v43, %v3305_v54  ;;  %v3786_v25 = vmul.f32 %v3593_v4, %v3306_v57  ;;  %v3789_v0 = vmul.f32 %v3608_v49, %v3309_v21  ;;  %5062 = vmatprep.mubr.msk.f32.mxu0 %vm3895_vm0, %v10924_v18  ;;  %v2114_v22 = vmul.f32 %v8982_v39, %v10900_v46  ;;  %v10925_v49 = vld [vmem:[#allocation186_spill] sm:$0xff]  ;;  %v10927_v18 = vld [vmem:[#allocation184_spill] sm:$0xff] }
 0x297   : > { %v9194_v23 = vmin.f32 %v1142_v9, 1.0  ;;  %3130 = vperm.xlu0 %5169, %v1535_v58   ;;  %v2559_v12 = vadd.f32 %v2479_v53, %v2374_v3  ;;  %v2193_v38 = vadd.f32 %v2113_v36, %v2008_v14  ;;  %v2483_v11 = vmul.f32 %v8716_v5, %v10923_v56 }
 0x298   : > { %v3869_v17 = vmax.f32 %v3789_v0, 0.0  ;;  %v3051_v62 = vpop.permute.xlu1 %3050  ;;  %v3310_v43 = vadd.f32 %v8676_v1, %v3223_v16  ;;  %v2009_v21 = vmul.f32 %v8992_v45, %v10899_v30  ;;  %v2299_v54 = vmul.f32 %v9061_v13, %v10901_v31  ;;  %v10926_v16 = vld [vmem:[#allocation152_spill] sm:$0xff] }
 0x299   : > { %v2744_v57 = vadd.f32 %v2664_v29, %v2559_v12  ;;  %v3613_v4 = vpop.permute.xlu0 %3612  ;;  %v2378_v9 = vadd.f32 %v2298_v7, %v2193_v38  ;;  %v2668_v58 = vmul.f32 %v8741_v20, %v10925_v49  ;;  %v2110_v53 = vmul.f32 %v8982_v39, %v10899_v30 }
 0x29a   : > { %v3865_v36 = vmax.f32 %v3785_v33, 0.0  ;;  %v3866_v3 = vmax.f32 %v3786_v25, 0.0  ;;  %v3790_v14 = vmul.f32 %v3613_v4, %v3310_v43  ;;  %v2194_v0 = vadd.f32 %v2114_v22, %v2009_v21  ;;  %v10928_v4 = vld [vmem:[#allocation79_spill] sm:$0xff] }
 0x29b   : > { %v2563_v1 = vadd.f32 %v2483_v11, %v2378_v9  ;;  %v2484_v8 = vmul.f32 %v8716_v5, %v10926_v16  ;;  %v2669_v52 = vmul.f32 %v8741_v20, %v10927_v18  ;;  %v2005_v29 = vmul.f32 %v8992_v45, %v10863_v2 }
 0x29c   : > { %v3975_v7 = vsel %vm3895_vm0, %v3869_v17, -inf  ;;  %v3870_v12 = vmax.f32 %v3790_v14, 0.0  ;;  %v5188_v38 = vpop.permute.xlu1 %5187  ;;  %v2379_v50 = vadd.f32 %v2299_v54, %v2194_v0  ;;  %v2295_v30 = vmul.f32 %v9061_v13, %v10900_v46 }
 0x29d   : > { %v5189_v33 = vunpack.i.l.bf16 %v5188_v38  ;;  %v3071_v25 = vpop.permute.xlu0 %3070  ;;  %v2190_v22 = vadd.f32 %v2110_v53, %v2005_v29  ;;  %v2480_v11 = vmul.f32 %v8716_v5, %v10901_v31  ;;  %v1456_v43 = vmul.f32 5.0, %v9153_v35 }
 0x29e   : > { %v3974_v21 = vsel %vm3895_vm0, %v3865_v36, -inf  ;;  %v3977_v2 = vsel %vm3895_vm0, %v3866_v3, -inf  ;;  %v3978_v17 = vsel %vm3895_vm0, %v3870_v12, -inf  ;;  %v1136_v9 = vmax.f32 %v10928_v4, 0.0 }
 0x29f   : > { %v9223_v54 = vmax.f32 %v3974_v21, %v3975_v7  ;;  %v9225_v14 = vmax.f32 %v3977_v2, %v3978_v17  ;;  %v5190_v0 = vunpack.i.h.bf16 %v5188_v38  ;;  %v4150_v53 = vsel %vm3895_vm0, %v10931_v44, %v5189_v33  ;;  %v10932_v7 = vld [vmem:[#allocation133_spill] sm:$0xff] }
 0x2a0   : > { %v2748_v29 = vadd.f32 %v2668_v58, %v2563_v1  ;;  %v3076_v5 = vpop.permute.xlu1 %3075  ;;  %v2375_v60 = vadd.f32 %v2295_v30, %v2190_v22  ;;  %v2665_v35 = vmul.f32 %v8741_v20, %v10926_v16  ;;  %4370 = vmatmul.mubr.f32.gmra.mxu0 %v4150_v53  ;;  %v2115_v36 = vmul.f32 %v8982_v39, %v10907_v48 }
 0x2a1   : > { %10929 = vst [vmem:[#allocation109_spill] sm:$0xff] %v9223_v54  ;;  %10930 = vst [vmem:[#allocation104_spill] sm:$0xff] %v9225_v14  ;;  %v2564_v3 = vadd.f32 %v2484_v8, %v2379_v50  ;;  %v3056_v12 = vpop.permute.xlu0 %3055  ;;  %5063 = vmatprep.mubr.msk.f32.mxu0 %vm3895_vm0, %v10932_v7  ;;  %v5226_v38 = vpack.i.bf16 %v9225_v14, %v9223_v54  ;;  %v1539_v44 = vmul.f32 %v1456_v43, %v9159_v32  ;;  %v10933_v8 = vld [vmem:[#allocation98_spill] sm:$0xff]  ;;  %v10934_v43 = vld [vmem:[#allocation176_spill] sm:$0xff] }
 0x2a2   : > { %v2010_v58 = vmul.f32 %v8992_v45, %v10876_v63  ;;  %v3224_v1 = vmul.f32 %v3051_v62, %v2744_v57  ;;  %v3228_v30 = vmul.f32 %v3071_v25, %v2748_v29  ;;  %v2560_v20 = vadd.f32 %v2480_v11, %v2375_v60  ;;  %v10935_v62 = vld [vmem:[#allocation103_spill] sm:$0xff] }
 0x2a3   : > { %v2300_v33 = vmul.f32 %v9061_v13, %v10910_v6  ;;  %5227 = vrot.lane.b32.xlu1 %v5226_v38, %s5612_s26  ;;  %v4151_v50 = vsel %vm3895_vm0, %v10933_v8, %v5190_v0  ;;  %v2111_v22 = vmul.f32 %v8982_v39, %v10876_v63  ;;  %v9247_v21 = vmin.f32 %v1136_v9, 1.0  ;;  %v9254_v0 = vld [vmem:[#allocation2 + $0x3] ss:$0 sm:$0xff]  ;;  %v10936_v63 = vld [vmem:[#allocation172_spill] sm:$0xff]  ;;  %v10937_v8 = vld [vmem:[#allocation89_spill] sm:$0xff] }
 0x2a4   : > { %v1450_v2 = vmul.f32 5.0, %v10934_v43  ;;  %5392 = vrcp.f32 %v9169_v55  ;;  %v1301_v57 = vadd.f32 1e-08, %v10935_v62  ;;  %v2749_v60 = vadd.f32 %v2669_v52, %v2564_v3  ;;  %v3638_v25 = vpop.permute.xlu1 %3637  ;;  %4375 = vmatmul.mubr.f32.gmra.mxu0 %v4151_v50  ;;  %v9262_v52 = vld [vmem:[#allocation4] ss:$0 sm:$0xff] }
 0x2a5   : > { %v2195_v11 = vadd.f32 %v2115_v36, %v2010_v58  ;;  %v2745_v17 = vadd.f32 %v2665_v35, %v2560_v20  ;;  %v3618_v4 = vpop.permute.xlu0 %3617  ;;  %5064 = vmatprep.mubr.msk.f32.mxu0 %vm3895_vm0, %v8890_v40  ;;  %v2485_v9 = vmul.f32 %v9254_v0, %v10936_v63  ;;  %v2006_v53 = vmul.f32 %v8992_v45, %v10874_v47 }
 0x2a6   : > { %v2296_v55 = vmul.f32 %v9061_v13, %v10907_v48  ;;  %v3315_v29 = vadd.f32 %v9262_v52, %v3228_v30  ;;  %v3311_v35 = vadd.f32 %v9262_v52, %v3224_v1  ;;  %v2481_v3 = vmul.f32 %v9254_v0, %v10910_v6 }
 0x2a7   : > { %v2380_v36 = vadd.f32 %v2300_v33, %v2195_v11  ;;  %v3229_v38 = vmul.f32 %v3076_v5, %v2749_v60  ;;  %3150 = vperm.xlu1 %5170, %v1539_v44   ;;  %v2191_v58 = vadd.f32 %v2111_v22, %v2006_v53  ;;  %v1536_v20 = vmul.f32 %v1450_v2, %v9247_v21  ;;  %v9273_v33 = vld [vmem:[#allocation2 + $0x4] ss:$0 sm:$0xff]  ;;  %v10939_v53 = vld [vmem:[#allocation121_spill] sm:$0xff] }
 0x2a8   : > { %v1137_v47 = vmax.f32 %v10937_v8, 0.0  ;;  %v3225_v50 = vmul.f32 %v3056_v12, %v2745_v17  ;;  %v3795_v43 = vmul.f32 %v3638_v25, %v3315_v29  ;;  %v3791_v14 = vmul.f32 %v3618_v4, %v3311_v35  ;;  %v3081_v54 = vpop.permute.xlu1 %3080  ;;  %v10938_v11 = vld [vmem:[#allocation174_spill] sm:$0xff] }
 0x2a9   : > { %v2112_v30 = vmul.f32 %v8982_v39, %v10891_v27  ;;  %5394 = vrcp.f32 %v1301_v57  ;;  %v2670_v5 = vmul.f32 %v9273_v33, %v10938_v11  ;;  %v2376_v44 = vadd.f32 %v2296_v55, %v2191_v58  ;;  %v3061_v22 = vpop.permute.xlu0 %3060 }
 0x2aa   : > { %v2565_v2 = vadd.f32 %v2485_v9, %v2380_v36  ;;  %v2666_v12 = vmul.f32 %v9273_v33, %v10936_v63  ;;  %v2007_v60 = vmul.f32 %v8992_v45, %v10885_v41  ;;  %v2297_v25 = vmul.f32 %v9061_v13, %v10912_v61 }
 0x2ab   : > { %v2561_v17 = vadd.f32 %v2481_v3, %v2376_v44  ;;  %3135 = vperm.xlu1 %5170, %v1536_v20   ;;  %v3316_v57 = vadd.f32 %v9262_v52, %v3229_v38  ;;  %v9284_v4 = vmin.f32 %v1137_v47, 1.0  ;;  %v1452_v29 = vmul.f32 5.0, %v10939_v53  ;;  %v10940_v44 = vld [vmem:[#allocation47_spill] sm:$0xff] }
 0x2ac   : > { %v3875_v55 = vmax.f32 %v3795_v43, 0.0  ;;  %v3871_v35 = vmax.f32 %v3791_v14, 0.0  ;;  %v3643_v9 = vpop.permute.xlu1 %3642  ;;  %v3312_v36 = vadd.f32 %v9262_v52, %v3225_v50  ;;  %v2192_v58 = vadd.f32 %v2112_v30, %v2007_v60 }
 0x2ad   : > { %v2750_v8 = vadd.f32 %v2670_v5, %v2565_v2  ;;  %v3796_v1 = vmul.f32 %v3643_v9, %v3316_v57  ;;  %v3623_v41 = vpop.permute.xlu0 %3622  ;;  %v2482_v40 = vmul.f32 %v9254_v0, %v10913_v10  ;;  %v2116_v3 = vmul.f32 %v8982_v39, %v10912_v61 }
 0x2ae   : > { %v2746_v38 = vadd.f32 %v2666_v12, %v2561_v17  ;;  %v3792_v20 = vmul.f32 %v3623_v41, %v3312_v36  ;;  %v2377_v47 = vadd.f32 %v2297_v25, %v2192_v58  ;;  %v2667_v43 = vmul.f32 %v9273_v33, %v10940_v44 }
 0x2af   : > { %v3876_v14 = vmax.f32 %v3796_v1, 0.0  ;;  %3697 = vperm.xlu1 %5170, %v9143_v19   ;;  %v1537_v50 = vmul.f32 %v1452_v29, %v9284_v4  ;;  %v2011_v30 = vmul.f32 %v8992_v45, %v10891_v27  ;;  %v2301_v5 = vmul.f32 %v9061_v13, %v10913_v10 }
 0x2b0   : > { %v3981_v2 = vsel %vm3895_vm0, %v3875_v55, -inf  ;;  %v3980_v12 = vsel %vm3895_vm0, %v3871_v35, -inf  ;;  %v3226_v60 = vmul.f32 %v3061_v22, %v2746_v38  ;;  %v3872_v25 = vmax.f32 %v3792_v20, 0.0  ;;  %v9302_v17 = vpop.permute.xlu1 %3065 }
 0x2b1   : > { %v9304_v57 = vpop.eup %5392  ;;  %v3984_v19 = vsel %vm3895_vm0, %v3876_v14, -inf  ;;  %v2562_v1 = vadd.f32 %v2482_v40, %v2377_v47  ;;  %v5193_v53 = vpop.permute.xlu0 %5192  ;;  %v2196_v29 = vadd.f32 %v2116_v3, %v2011_v30  ;;  %v2486_v27 = vmul.f32 %v9254_v0, %v10940_v44  ;;  %v10942_v14 = vld [vmem:[#allocation129_spill] sm:$0xff] }
 0x2b2   : > { %v3983_v9 = vsel %vm3895_vm0, %v3872_v25, -inf  ;;  %v5194_v36 = vunpack.i.l.bf16 %v5193_v53  ;;  %v2012_v55 = vmul.f32 %v8992_v45, %v10893_v59  ;;  %v2117_v22 = vmul.f32 %v8982_v39, %v10897_v37  ;;  %v10943_v25 = vld [vmem:[#allocation41_spill] sm:$0xff] }
 0x2b3   : > { %v9314_v35 = vmax.f32 %v3980_v12, %v3981_v2  ;;  %v9316_v58 = vmax.f32 %v3983_v9, %v3984_v19  ;;  %3140 = vperm.xlu1 %5170, %v1537_v50   ;;  %v2302_v40 = vmul.f32 %v9061_v13, %v10923_v56  ;;  %v1458_v41 = vmul.f32 5.0, %v9138_v51  ;;  %v10944_v19 = vld [vmem:[#allocation46_spill] sm:$0xff] }
 0x2b4   : > { %v3230_v3 = vmul.f32 %v3081_v54, %v2750_v8  ;;  %v5195_v38 = vunpack.i.h.bf16 %v5193_v53  ;;  %v3628_v20 = vpop.permute.xlu1 %3627  ;;  %v3313_v47 = vadd.f32 %v9262_v52, %v3226_v60  ;;  %v4152_v59 = vsel %vm3895_vm0, %v10942_v14, %v5194_v36  ;;  %v10946_v36 = vld [vmem:[#allocation34_spill] sm:$0xff] }
 0x2b5   : > { %10941 = vst [vmem:[#allocation110_spill] sm:$0xff] %v9316_v58  ;;  %v2381_v30 = vadd.f32 %v2301_v5, %v2196_v29  ;;  %v2671_v2 = vmul.f32 %v9273_v33, %v10943_v25  ;;  %v3086_v12 = vpop.permute.xlu0 %3085  ;;  %4380 = vmatmul.mubr.f32.gmra.mxu0 %v4152_v59  ;;  %v5231_v50 = vpack.i.bf16 %v9316_v58, %v9314_v35  ;;  %v10945_v29 = vmax.f32 %v10935_v62, 0.0 }
 0x2b6   : > { %v2121_v51 = vmul.f32 %v8982_v39, %v10923_v56  ;;  %v5395_v54 = vpop.eup %5394  ;;  %v3793_v8 = vmul.f32 %v3628_v20, %v3313_v47  ;;  %5065 = vmatprep.mubr.msk.f32.mxu0 %vm3895_vm0, %v8886_v24  ;;  %v2197_v60 = vadd.f32 %v2117_v22, %v2012_v55  ;;  %v2487_v5 = vmul.f32 %v9254_v0, %v10925_v49 }
 0x2b7   : > { %v2672_v53 = vmul.f32 %v9273_v33, %v10944_v19  ;;  %v9338_v9 = vmin.f32 %v10945_v29, 1.0  ;;  %3702 = vperm.xlu1 %5170, %v9247_v21   ;;  %5232 = vrot.lane.b32.xlu0 %v5231_v50, %s5612_s26  ;;  %v1540_v20 = vmul.f32 %v1458_v41, %v10946_v36  ;;  %v2016_v47 = vmul.f32 %v8992_v45, %v10897_v37 }
 0x2b8   : > { %v2306_v55 = vmul.f32 %v9061_v13, %v10925_v49  ;;  %v2566_v22 = vadd.f32 %v2486_v27, %v2381_v30  ;;  %v2382_v14 = vadd.f32 %v2302_v40, %v2197_v60  ;;  %v3091_v59 = vpop.permute.xlu1 %3090  ;;  %v3317_v56 = vadd.f32 %v9262_v52, %v3230_v3  ;;  %v10947_v60 = vld [vmem:[#allocation32_spill] sm:$0xff] }
 0x2b9   : > { %v4153_v62 = vsel %vm3895_vm0, %v10894_v15, %v5195_v38  ;;  %v2747_v29 = vadd.f32 %v2667_v43, %v2562_v1  ;;  %v3648_v21 = vpop.permute.xlu0 %3647  ;;  %v2201_v50 = vadd.f32 %v2121_v51, %v2016_v47  ;;  %v2491_v41 = vmul.f32 %v9254_v0, %v10944_v19  ;;  %v10948_v47 = vld [vmem:[#allocation44_spill] sm:$0xff] }
 0x2ba   : > { %4385 = vmatmul.mubr.f32.gmra.mxu0 %v4153_v62  ;;  %v2122_v37 = vmul.f32 %v8982_v39, %v10926_v16  ;;  %v3873_v58 = vmax.f32 %v3793_v8, 0.0  ;;  %v2751_v49 = vadd.f32 %v2671_v2, %v2566_v22  ;;  %v2567_v27 = vadd.f32 %v2487_v5, %v2382_v14 }
 0x2bb   : > { %v3797_v40 = vmul.f32 %v3648_v21, %v3317_v56  ;;  %5066 = vmatprep.mubr.msk.f32.mxu0 %vm3895_vm0, %v8952_v28  ;;  %3155 = vperm.xlu0 %5169, %v1540_v20   ;;  %v2386_v3 = vadd.f32 %v2306_v55, %v2201_v50  ;;  %v1460_v15 = vmul.f32 5.0, %v5395_v54  ;;  %v2017_v43 = vmul.f32 %v8992_v45, %v10901_v31 }
 0x2bc   : > { %v2307_v1 = vmul.f32 %v9061_v13, %v10927_v18  ;;  %v2752_v38 = vadd.f32 %v2672_v53, %v2567_v27  ;;  %v3633_v51 = vpop.permute.xlu1 %3632  ;;  %v2676_v2 = vmul.f32 %v9273_v33, %v10947_v60  ;;  %v2118_v56 = vmul.f32 %v8982_v39, %v10901_v31 }
 0x2bd   : > { %v3877_v30 = vmax.f32 %v3797_v40, 0.0  ;;  %v2571_v8 = vadd.f32 %v2491_v41, %v2386_v3  ;;  %v3111_v5 = vpop.permute.xlu0 %3110  ;;  %v2202_v20 = vadd.f32 %v2122_v37, %v2017_v43  ;;  %v2492_v54 = vmul.f32 %v9254_v0, %v10948_v47  ;;  %v10949_v41 = vld [vmem:[#allocation87_spill] sm:$0xff]  ;;  %v10950_v40 = vld [vmem:[#allocation142_spill] sm:$0xff] }
 0x2be   : > { %v1462_v55 = vmul.f32 5.0, %v9304_v57  ;;  %v3986_v22 = vsel %vm3895_vm0, %v3873_v58, -inf  ;;  %v2013_v14 = vmul.f32 %v8992_v45, %v10900_v46  ;;  %v2303_v62 = vmul.f32 %v9061_v13, %v10926_v16 }
 0x2bf   : > { %v3987_v53 = vsel %vm3895_vm0, %v3877_v30, -inf  ;;  %3717 = vperm.xlu0 %5169, %v9159_v32   ;;  %v1541_v31 = vmul.f32 %v1460_v15, %v9338_v9  ;;  %v2387_v50 = vadd.f32 %v2307_v1, %v2202_v20  ;;  %v1138_v37 = vmax.f32 %v10949_v41, 0.0 }
 0x2c0   : > { %v9373_v21 = vmax.f32 %v3986_v22, %v3987_v53  ;;  %v3231_v57 = vmul.f32 %v3086_v12, %v2751_v49  ;;  %v2756_v27 = vadd.f32 %v2676_v2, %v2571_v8  ;;  %v5198_v58 = vpop.permute.xlu1 %5197  ;;  %v2677_v3 = vmul.f32 %v9273_v33, %v10950_v40  ;;  %v10951_v2 = vld [vmem:[#allocation120_spill] sm:$0xff] }
 0x2c1   : > { %v2198_v43 = vadd.f32 %v2118_v56, %v2013_v14  ;;  %v5199_v46 = vunpack.i.l.bf16 %v5198_v58  ;;  %v3653_v30 = vpop.permute.xlu0 %3652  ;;  %v2572_v22 = vadd.f32 %v2492_v54, %v2387_v50  ;;  %v1542_v32 = vmul.f32 %v1462_v55, %v9194_v23 }
 0x2c2   : > { %4100 = vrot.lane.b32.xlu1 %v9373_v21, %s5612_s26  ;;  %v2488_v15 = vmul.f32 %v9254_v0, %v10927_v18  ;;  %v3227_v1 = vmul.f32 %v9302_v17, %v2747_v29  ;;  %v2673_v12 = vmul.f32 %v9273_v33, %v10948_v47  ;;  %v1454_v8 = vmul.f32 5.0, %v10951_v2 }
 0x2c3   : > { %v2383_v49 = vadd.f32 %v2303_v62, %v2198_v43  ;;  %v3236_v56 = vmul.f32 %v3111_v5, %v2756_v27  ;;  %v5200_v20 = vunpack.i.h.bf16 %v5198_v58  ;;  %3160 = vperm.xlu0 %5169, %v1541_v31   ;;  %v4154_v53 = vsel %vm3895_vm0, %v10898_v26, %v5199_v46  ;;  %v10952_v46 = vld [vmem:[#allocation76_spill] sm:$0xff] }
 0x2c4   : > { %v1218_v54 = vmin.f32 %v1138_v37, 1.0  ;;  %v3232_v14 = vmul.f32 %v3091_v59, %v2752_v38  ;;  %v3318_v55 = vadd.f32 %v9262_v52, %v3231_v57  ;;  %v3116_v50 = vpop.permute.xlu1 %3115  ;;  %4390 = vmatmul.mubr.f32.gmra.mxu0 %v4154_v53  ;;  %v2757_v41 = vadd.f32 %v2677_v3, %v2572_v22 }
 0x2c5   : > { %v2568_v17 = vadd.f32 %v2488_v15, %v2383_v49  ;;  %v3096_v29 = vpop.permute.xlu0 %3095  ;;  %5067 = vmatprep.mubr.msk.f32.mxu0 %vm3895_vm0, %v8942_v34  ;;  %v2123_v5 = vmul.f32 %v8982_v39, %v10936_v63  ;;  %v3314_v62 = vadd.f32 %v9262_v52, %v3227_v1  ;;  %v2018_v26 = vmul.f32 %v8992_v45, %v10910_v6  ;;  %v10953_v15 = vld [vmem:[#allocation69_spill] sm:$0xff]  ;;  %v10954_v1 = vld [vmem:[#allocation144_spill] sm:$0xff] }
 0x2c6   : > { %3165 = vperm.xlu1 %5170, %v1542_v32   ;;  %v3798_v31 = vmul.f32 %v3653_v30, %v3318_v55  ;;  %v2308_v59 = vmul.f32 %v9061_v13, %v10938_v11  ;;  %v3323_v37 = vadd.f32 %v9262_v52, %v3236_v56  ;;  %v4155_v57 = vsel %vm3895_vm0, %v10903_v42, %v5200_v20 }
 0x2c7   : > { %v2753_v38 = vadd.f32 %v2673_v12, %v2568_v17  ;;  %3722 = vperm.xlu0 %5169, %v10946_v36   ;;  %v1538_v27 = vmul.f32 %v1454_v8, %v1218_v54  ;;  %v3794_v58 = vmul.f32 %v3633_v51, %v3314_v62  ;;  %v3319_v43 = vadd.f32 %v9262_v52, %v3232_v14 }
 0x2c8   : > { %v3678_v3 = vpop.permute.xlu1 %3677  ;;  %4395 = vmatmul.mubr.f32.gmra.mxu0 %v4155_v57  ;;  %v2493_v30 = vmul.f32 %v9254_v0, %v10952_v46  ;;  %v2119_v22 = vmul.f32 %v8982_v39, %v10910_v6  ;;  %v2203_v42 = vadd.f32 %v2123_v5, %v2018_v26  ;;  %v2678_v51 = vmul.f32 %v9273_v33, %v10954_v1  ;;  %v9436_v57 = vld [vmem:[#allocation2 + $0x1] ss:$0 sm:$0xff] }
 0x2c9   : > { %v3803_v32 = vmul.f32 %v3678_v3, %v3323_v37  ;;  %v3658_v36 = vpop.permute.xlu0 %3657  ;;  %5068 = vmatprep.mubr.msk.f32.mxu0 %vm3895_vm0, %v10953_v15  ;;  %v3878_v49 = vmax.f32 %v3798_v31, 0.0  ;;  %v2014_v2 = vmul.f32 %v8992_v45, %v10907_v48  ;;  %v2304_v8 = vmul.f32 %v9061_v13, %v10936_v63 }
 0x2ca   : > { %3727 = vperm.xlu1 %5170, %v9338_v9   ;;  %v3799_v12 = vmul.f32 %v3658_v36, %v3319_v43  ;;  %v3237_v6 = vmul.f32 %v3116_v50, %v2757_v41  ;;  %v2489_v9 = vmul.f32 %v9254_v0, %v10938_v11  ;;  %v2120_v20 = vmul.f32 %v8982_v39, %v10913_v10  ;;  %v9448_v36 = vld [vmem:[#allocation2] ss:$0 sm:$0xff] }
 0x2cb   : > { %v3883_v56 = vmax.f32 %v3803_v32, 0.0  ;;  %3145 = vperm.xlu0 %5169, %v1538_v27   ;;  %v3874_v53 = vmax.f32 %v3794_v58, 0.0  ;;  %v3233_v14 = vmul.f32 %v3096_v29, %v2753_v38  ;;  %v2199_v5 = vadd.f32 %v2119_v22, %v2014_v2 }
 0x2cc   : > { %v3879_v55 = vmax.f32 %v3799_v12, 0.0  ;;  %v3121_v17 = vpop.permute.xlu1 %3120  ;;  %v2388_v48 = vadd.f32 %v2308_v59, %v2203_v42  ;;  %v2674_v50 = vmul.f32 %v9273_v33, %v10952_v46  ;;  %v2015_v31 = vmul.f32 %v8992_v45, %v10912_v61 }
 0x2cd   : > { %v3993_v62 = vsel %vm3895_vm0, %v3883_v56, -inf  ;;  %v3101_v41 = vpop.permute.xlu0 %3100  ;;  %v3990_v26 = vsel %vm3895_vm0, %v3878_v49, -inf  ;;  %v2384_v37 = vadd.f32 %v2304_v8, %v2199_v5  ;;  %v2305_v29 = vmul.f32 %v9061_v13, %v10940_v44 }
 0x2ce   : > { %3712 = vperm.xlu1 %5170, %v1218_v54   ;;  %v3992_v39 = vsel %vm3895_vm0, %v3879_v55, -inf  ;;  %v3324_v54 = vadd.f32 %v9262_v52, %v3237_v6  ;;  %v2200_v59 = vadd.f32 %v2120_v20, %v2015_v31  ;;  %v2124_v45 = vmul.f32 %v9436_v57, %v10940_v44  ;;  %v10955_v6 = vld [vmem:[#allocation17_spill] sm:$0xff] }
 0x2cf   : > { %v9432_v38 = vmax.f32 %v3992_v39, %v3993_v62  ;;  %3707 = vperm.xlu0 %5169, %v9284_v4   ;;  %v3989_v61 = vsel %vm3895_vm0, %v3874_v53, -inf  ;;  %v2569_v27 = vadd.f32 %v2489_v9, %v2384_v37  ;;  %v3320_v3 = vadd.f32 %v9262_v52, %v3233_v14 }
 0x2d0   : > { %v3683_v58 = vpop.permute.xlu1 %3682  ;;  %v2490_v43 = vmul.f32 %v9254_v0, %v10943_v25  ;;  %v9444_v22 = vmax.f32 %v3989_v61, %v3990_v26  ;;  %v2019_v42 = vmul.f32 %v9448_v36, %v10913_v10  ;;  %v2309_v49 = vmul.f32 %v9061_v13, %v10943_v25  ;;  %v10956_v26 = vld [vmem:[#allocation101_spill] sm:$0xff] }
 0x2d1   : > { %v3804_v4 = vmul.f32 %v3683_v58, %v3324_v54  ;;  %v3663_v32 = vpop.permute.xlu0 %3662  ;;  %v2754_v12 = vadd.f32 %v2674_v50, %v2569_v27  ;;  %v2385_v8 = vadd.f32 %v2305_v29, %v2200_v59  ;;  %v2675_v56 = vmul.f32 %v9273_v33, %v10955_v6  ;;  %v10957_v27 = vld [vmem:[#allocation147_spill] sm:$0xff] }
 0x2d2   : > { %4104 = vrot.lane.b32.xlu1 %v9432_v38, %s5612_s26  ;;  %v3800_v2 = vmul.f32 %v3663_v32, %v3320_v3  ;;  %v2573_v9 = vadd.f32 %v2493_v30, %v2388_v48  ;;  %v2204_v53 = vadd.f32 %v2124_v45, %v2019_v42  ;;  %v2494_v14 = vmul.f32 %v9254_v0, %v10955_v6  ;;  %v10958_v42 = vld [vmem:[#allocation119_spill] sm:$0xff] }
 0x2d3   : > { %v3884_v20 = vmax.f32 %v3804_v4, 0.0  ;;  %4102 = vrot.lane.b32.xlu0 %v9444_v22, %s5612_s26  ;;  %v3234_v55 = vmul.f32 %v3101_v41, %v2754_v12  ;;  %v2570_v5 = vadd.f32 %v2490_v43, %v2385_v8  ;;  %v2679_v39 = vmul.f32 %v9273_v33, %v10956_v26 }
 0x2d4   : > { %v3880_v10 = vmax.f32 %v3800_v2, 0.0  ;;  %v3106_v62 = vpop.permute.xlu1 %3105  ;;  %v2758_v13 = vadd.f32 %v2678_v51, %v2573_v9  ;;  %v2389_v31 = vadd.f32 %v2309_v49, %v2204_v53  ;;  %v10959_v2 = vld [vmem:[#allocation86_spill] sm:$0xff] }
 0x2d5   : > { %v5203_v50 = vpop.permute.xlu0 %5202  ;;  %v3996_v30 = vsel %vm3895_vm0, %v3884_v20, -inf  ;;  %v2755_v37 = vadd.f32 %v2675_v56, %v2570_v5  ;;  %v3321_v51 = vadd.f32 %v9262_v52, %v3234_v55 }
 0x2d6   : > { %v3995_v48 = vsel %vm3895_vm0, %v3880_v10, -inf  ;;  %v5204_v29 = vunpack.i.l.bf16 %v5203_v50  ;;  %v3238_v54 = vmul.f32 %v3121_v17, %v2758_v13  ;;  %v2574_v59 = vadd.f32 %v2494_v14, %v2389_v31  ;;  %v10960_v14 = vld [vmem:[#allocation26_spill] sm:$0xff] }
 0x2d7   : > { %3732 = vperm.xlu0 %5169, %v9194_v23   ;;  %v3235_v41 = vmul.f32 %v3106_v62, %v2755_v37  ;;  %v5205_v45 = vunpack.i.h.bf16 %v5203_v50  ;;  %v9468_v3 = vmax.f32 %v3995_v48, %v3996_v30 }
 0x2d8   : > { %v3668_v61 = vpop.permute.xlu1 %3667  ;;  %v4156_v58 = vsel %vm3895_vm0, %v10957_v27, %v5204_v29  ;;  %v2759_v32 = vadd.f32 %v2679_v39, %v2574_v59  ;;  %v3325_v12 = vadd.f32 %v9262_v52, %v3238_v54  ;;  %v10961_v29 = vld [vmem:[#allocation22_spill] sm:$0xff] }
 0x2d9   : > { %v3126_v43 = vpop.permute.xlu0 %3125  ;;  %4400 = vmatmul.mubr.f32.gmra.mxu0 %v4156_v58  ;;  %v3801_v4 = vmul.f32 %v3668_v61, %v3321_v51  ;;  %v3322_v17 = vadd.f32 %v9262_v52, %v3235_v41  ;;  %v4157_v8 = vsel %vm3895_vm0, %v10959_v2, %v5205_v45  ;;  %v10962_v41 = vld [vmem:[#allocation160_spill] sm:$0xff]  ;;  %v4579_v45 = vld [vmem:[#allocation9 + $0xf8] sm:$0xff]  ;;  %v4578_v61 = vld [vmem:[#allocation9 + $0xf0] sm:$0xff] }
 0x2da   : > { %5069 = vmatprep.mubr.msk.f32.mxu0 %vm3895_vm0, %v10958_v42  ;;  %v3239_v23 = vmul.f32 %v3126_v43, %v2759_v32  ;;  %v4577_v51 = vld [vmem:[#allocation9 + $0xe8] sm:$0xff]  ;;  %4656 = vmatprep.subr.mxu1 %v4579_v45 }
 0x2db   : > { %4106 = vrot.lane.b32.xlu0 %v9468_v3, %s5612_s26  ;;  %v3881_v9 = vmax.f32 %v3801_v4, 0.0  ;;  %4657 = vmatpush1.msra.mxu1 %v4578_v61  ;;  %v4573_v2 = vld [vmem:[#allocation9 + $0xc8] sm:$0xff] }
 0x2dc   : > { %v3673_v49 = vpop.permute.xlu1 %3672  ;;  %v3326_v5 = vadd.f32 %v9262_v52, %v3239_v23  ;;  %v4576_v23 = vld [vmem:[#allocation9 + $0xe0] sm:$0xff]  ;;  %4658 = vmatprep.subr.mxu1 %v4577_v51  ;;  %v4559_v51 = vld [vmem:[#allocation9 + $0x58] sm:$0xff] }
 0x2dd   : > { %v3688_v56 = vpop.permute.xlu0 %3687  ;;  %4405 = vmatmul.mubr.f32.gmra.mxu0 %v4157_v8  ;;  %v3802_v20 = vmul.f32 %v3673_v49, %v3322_v17  ;;  %v3998_v50 = vsel %vm3895_vm0, %v3881_v9, -inf  ;;  %v10963_v17 = vld [vmem:[#allocation56_spill] sm:$0xff]  ;;  %v4575_v49 = vld [vmem:[#allocation9 + $0xd8] sm:$0xff]  ;;  %4659 = vmatpush1.msra.mxu1 %v4576_v23 }
 0x2de   : > { %v3805_v53 = vmul.f32 %v3688_v56, %v3325_v12  ;;  %5070 = vmatprep.mubr.msk.f32.mxu0 %vm3895_vm0, %v10960_v14  ;;  %v4574_v12 = vld [vmem:[#allocation9 + $0xd0] sm:$0xff]  ;;  %v10964_v56 = vld [vmem:[#allocation168_spill] sm:$0xff]  ;;  %4660 = vmatprep.subr.mxu1 %v4575_v49  ;;  %v4555_v49 = vld [vmem:[#allocation9 + $0x38] sm:$0xff] }
 0x2df   : > { %v3882_v31 = vmax.f32 %v3802_v20, 0.0  ;;  %4661 = vmatpush1.msra.mxu1 %v4574_v12  ;;  %v4571_v20 = vld [vmem:[#allocation9 + $0xb8] sm:$0xff]  ;;  %v4553_v12 = vld [vmem:[#allocation9 + $0x28] sm:$0xff] }
 0x2e0   : > { %v3885_v55 = vmax.f32 %v3805_v53, 0.0  ;;  %v5208_v10 = vpop.permute.xlu1 %5207  ;;  %v10965_v53 = vld [vmem:[#allocation20_spill] sm:$0xff]  ;;  %4662 = vmatprep.subr.mxu1 %v4573_v2 }
 0x2e1   : > { %v5209_v62 = vunpack.i.l.bf16 %v5208_v10  ;;  %v3693_v13 = vpop.permute.xlu0 %3692  ;;  %v5210_v37 = vunpack.i.h.bf16 %v5208_v10  ;;  %v4001_v27 = vsel %vm3895_vm0, %v3882_v31, -inf  ;;  %v4569_v10 = vld [vmem:[#allocation9 + $0xa8] sm:$0xff]  ;;  %v4566_v31 = vld [vmem:[#allocation9 + $0x90] sm:$0xff]  ;;  %v4552_v2 = vld [vmem:[#allocation9 + $0x20] sm:$0xff] }
 0x2e2   : > { %v3999_v39 = vsel %vm3895_vm0, %v3885_v55, -inf  ;;  %v3806_v30 = vmul.f32 %v3693_v13, %v3326_v5  ;;  %v4570_v55 = vld [vmem:[#allocation9 + $0xb0] sm:$0xff]  ;;  %v4567_v13 = vld [vmem:[#allocation9 + $0x98] sm:$0xff] }
 0x2e3   : > { %v9483_v48 = vmax.f32 %v3998_v50, %v3999_v39  ;;  %v4158_v54 = vsel %vm3895_vm0, %v10961_v29, %v5209_v62  ;;  %v4159_v32 = vsel %vm3895_vm0, %v10932_v7, %v5210_v37  ;;  %v4572_v7 = vld [vmem:[#allocation9 + $0xc0] sm:$0xff]  ;;  %v10966_v50 = vld [vmem:[#allocation109_spill] sm:$0xff]  ;;  %v4563_v37 = vld [vmem:[#allocation9 + $0x78] sm:$0xff] }
 0x2e4   : > { %v3886_v59 = vmax.f32 %v3806_v30, 0.0  ;;  %4410 = vmatmul.mubr.f32.gmra.mxu0 %v4158_v54  ;;  %4663 = vmatpush1.msra.mxu1 %v4572_v7  ;;  %v4568_v62 = vld [vmem:[#allocation9 + $0xa0] sm:$0xff]  ;;  %v4565_v39 = vld [vmem:[#allocation9 + $0x88] sm:$0xff]  ;;  %v4562_v54 = vld [vmem:[#allocation9 + $0x70] sm:$0xff] }
 0x2e5   : > { %4108 = vrot.lane.b32.xlu1 %v9483_v48, %s5612_s26  ;;  %v5213_v52 = vpop.permute.xlu0 %5212  ;;  %5071 = vmatprep.mubr.msk.f32.mxu0 %vm3895_vm0, %v10962_v41  ;;  %v4564_v30 = vld [vmem:[#allocation9 + $0x80] sm:$0xff]  ;;  %v4611_v7 = vld [vmem:[#allocation9 + $0x1f8] sm:$0xff] }
 0x2e6   : > { %v4002_v58 = vsel %vm3895_vm0, %v3886_v59, -inf  ;;  %v5214_v4 = vunpack.i.l.bf16 %v5213_v52  ;;  %v5215_v8 = vunpack.i.h.bf16 %v5213_v52  ;;  %4664 = vmatprep.subr.mxu1 %v4571_v20  ;;  %v4561_v59 = vld [vmem:[#allocation9 + $0x68] sm:$0xff]  ;;  %v4560_v52 = vld [vmem:[#allocation9 + $0x60] sm:$0xff] }
 0x2e7   : > { %v9493_v43 = vmax.f32 %v4001_v27, %v4002_v58  ;;  %4665 = vmatpush1.msra.mxu1 %v4570_v55  ;;  %v4558_v27 = vld [vmem:[#allocation9 + $0x50] sm:$0xff]  ;;  %v10967_v58 = vld [vmem:[#allocation104_spill] sm:$0xff] }
 0x2e8   : > { %4415 = vmatmul.mubr.f32.gmra.mxu0 %v4159_v32  ;;  %v4160_v9 = vsel %vm3895_vm0, %v10964_v56, %v5214_v4  ;;  %v4161_v5 = vsel %vm3895_vm0, %v8886_v24, %v5215_v8  ;;  %4666 = vmatprep.subr.mxu1 %v4569_v10  ;;  %v4557_v4 = vld [vmem:[#allocation9 + $0x48] sm:$0xff]  ;;  %v4556_v32 = vld [vmem:[#allocation9 + $0x40] sm:$0xff]  ;;  %v4551_v8 = vld [vmem:[#allocation9 + $0x18] sm:$0xff] }
 0x2e9   : > { %4110 = vrot.lane.b32.xlu0 %v9493_v43, %s5612_s26  ;;  %5072 = vmatprep.mubr.msk.f32.mxu0 %vm3895_vm0, %v10963_v17  ;;  %v4550_v56 = vld [vmem:[#allocation9 + $0x10] sm:$0xff] }
 0x2ea   : > { %4667 = vmatpush1.msra.mxu1 %v4568_v62  ;;  %v4610_v55 = vld [vmem:[#allocation9 + $0x1f0] sm:$0xff]  ;;  %v4608_v62 = vld [vmem:[#allocation9 + $0x1e0] sm:$0xff] }
 0x2eb   : > { %4668 = vmatprep.subr.mxu1 %v4567_v13 }
 0x2ec   : > { %4420 = vmatmul.mubr.f32.gmra.mxu0 %v4160_v9  ;;  %4669 = vmatpush1.msra.mxu1 %v4566_v31  ;;  %v4549_v9 = vld [vmem:[#allocation9 + $0x8] sm:$0xff] }
 0x2ed   : > { %5073 = vmatprep.mubr.msk.f32.mxu0 %vm3895_vm0, %v10965_v53  ;;  %4670 = vmatprep.subr.mxu1 %v4565_v39  ;;  %v4607_v39 = vld [vmem:[#allocation9 + $0x1d8] sm:$0xff] }
 0x2ee   : > { %4671 = vmatpush1.msra.mxu1 %v4564_v30  ;;  %v4606_v30 = vld [vmem:[#allocation9 + $0x1d0] sm:$0xff] }
 0x2ef   : > { %4672 = vmatprep.subr.mxu1 %v4563_v37  ;;  %v10968_v37 = vld [vmem:[#allocation110_spill] sm:$0xff] }
 0x2f0   : > { %4425 = vmatmul.mubr.f32.gmra.mxu0 %v4161_v5  ;;  %4673 = vmatpush1.msra.mxu1 %v4562_v54  ;;  %v4609_v5 = vld [vmem:[#allocation9 + $0x1e8] sm:$0xff]  ;;  %v4604_v54 = vld [vmem:[#allocation9 + $0x1c0] sm:$0xff] }
 0x2f1   : > { %5074 = vmatprep.mubr.msk.f32.mxu0 %vm3895_vm0, %v10966_v50  ;;  %4674 = vmatprep.subr.mxu1 %v4561_v59  ;;  %v4603_v59 = vld [vmem:[#allocation9 + $0x1b8] sm:$0xff] }
 0x2f2   : > { %4675 = vmatpush1.msra.mxu1 %v4560_v52  ;;  %v4601_v52 = vld [vmem:[#allocation9 + $0x1a8] sm:$0xff] }
 0x2f3   : > { %4676 = vmatprep.subr.mxu1 %v4559_v51  ;;  %v4598_v51 = vld [vmem:[#allocation9 + $0x190] sm:$0xff] }
 0x2f4   : > { %4677 = vmatpush1.msra.mxu1 %v4558_v27  ;;  %v4597_v27 = vld [vmem:[#allocation9 + $0x188] sm:$0xff] }
 0x2f5   : > { %v5218_v29 = vpop.permute.xlu1 %5217  ;;  %4678 = vmatprep.subr.mxu1 %v4557_v4  ;;  %v4595_v4 = vld [vmem:[#allocation9 + $0x178] sm:$0xff] }
 0x2f6   : > { %v5219_v24 = vunpack.i.l.bf16 %v5218_v29  ;;  %v5220_v45 = vunpack.i.h.bf16 %v5218_v29  ;;  %4679 = vmatpush1.msra.mxu1 %v4556_v32  ;;  %v4605_v29 = vld [vmem:[#allocation9 + $0x1c8] sm:$0xff] }
 0x2f7   : > { %4680 = vmatprep.subr.mxu1 %v4555_v49 }
 0x2f8   : > { %v4162_v61 = vsel %vm3895_vm0, %v8952_v28, %v5219_v24  ;;  %v4163_v23 = vsel %vm3895_vm0, %v8942_v34, %v5220_v45  ;;  %v4554_v28 = vld [vmem:[#allocation9 + $0x30] sm:$0xff]  ;;  %v4548_v34 = vld [vmem:[#allocation9] sm:$0xff] }
 0x2f9   : > { %4430 = vmatmul.mubr.f32.gmra.mxu0 %v4162_v61  ;;  %4681 = vmatpush1.msra.mxu1 %v4554_v28  ;;  %v4600_v45 = vld [vmem:[#allocation9 + $0x1a0] sm:$0xff]  ;;  %v4599_v61 = vld [vmem:[#allocation9 + $0x198] sm:$0xff]  ;;  %v4593_v28 = vld [vmem:[#allocation9 + $0x168] sm:$0xff] }
 0x2fa   : > { %5075 = vmatprep.mubr.msk.f32.mxu0 %vm3895_vm0, %v10967_v58  ;;  %4682 = vmatprep.subr.mxu1 %v4553_v12  ;;  %v4592_v12 = vld [vmem:[#allocation9 + $0x160] sm:$0xff] }
 0x2fb   : > { %4683 = vmatpush1.msra.mxu1 %v4552_v2 }
 0x2fc   : > { %4684 = vmatprep.subr.mxu1 %v4551_v8 }
 0x2fd   : > { %4435 = vmatmul.mubr.f32.gmra.mxu0 %v4163_v23  ;;  %4685 = vmatpush1.msra.mxu1 %v4550_v56  ;;  %v4594_v23 = vld [vmem:[#allocation9 + $0x170] sm:$0xff]  ;;  %v4591_v56 = vld [vmem:[#allocation9 + $0x158] sm:$0xff] }
 0x2fe   : > { %5076 = vmatprep.mubr.msk.f32.mxu0 %vm3895_vm0, %v9314_v35  ;;  %4686 = vmatprep.subr.mxu1 %v4549_v9  ;;  %v4590_v9 = vld [vmem:[#allocation9 + $0x150] sm:$0xff] }
 0x2ff   : > { %4687 = vmatpush1.msra.mxu1 %v4548_v34  ;;  %v4589_v34 = vld [vmem:[#allocation9 + $0x148] sm:$0xff] }
 0x300   : > { %4688 = vmatprep.subr.mxu1 %v4611_v7  ;;  %v4588_v7 = vld [vmem:[#allocation9 + $0x140] sm:$0xff] }
 0x301   : > { %4689 = vmatpush2.msra.mxu1 %v4610_v55  ;;  %v4587_v55 = vld [vmem:[#allocation9 + $0x138] sm:$0xff] }
 0x302   : > { %4690 = vmatprep.subr.mxu1 %v4609_v5  ;;  %v4584_v5 = vld [vmem:[#allocation9 + $0x120] sm:$0xff] }
 0x303   : > { %4691 = vmatpush2.msra.mxu1 %v4608_v62 }
 0x304   : > { %4692 = vmatprep.subr.mxu1 %v4607_v39  ;;  %v4580_v39 = vld [vmem:[#allocation9 + $0x100] sm:$0xff] }
 0x305   : > { %v5223_v20 = vpop.permute.xlu0 %5222  ;;  %4693 = vmatpush2.msra.mxu1 %v4606_v30 }
 0x306   : > { %v5224_v10 = vunpack.i.l.bf16 %v5223_v20  ;;  %v5225_v13 = vunpack.i.h.bf16 %v5223_v20  ;;  %4694 = vmatprep.subr.mxu1 %v4605_v29 }
 0x307   : > { %4695 = vmatpush2.msra.mxu1 %v4604_v54 }
 0x308   : > { %v4164_v31 = vsel %vm3895_vm0, %v10953_v15, %v5224_v10  ;;  %v4165_v24 = vsel %vm3895_vm0, %v10958_v42, %v5225_v13  ;;  %v4602_v15 = vld [vmem:[#allocation9 + $0x1b0] sm:$0xff]  ;;  %4696 = vmatprep.subr.mxu1 %v4603_v59  ;;  %v4596_v42 = vld [vmem:[#allocation9 + $0x180] sm:$0xff]  ;;  %v4585_v10 = vld [vmem:[#allocation9 + $0x128] sm:$0xff] }
 0x309   : > { %4440 = vmatmul.mubr.f32.gmra.mxu0 %v4164_v31  ;;  %4697 = vmatpush2.msra.mxu1 %v4602_v15  ;;  %v4583_v13 = vld [vmem:[#allocation9 + $0x118] sm:$0xff]  ;;  %v4582_v31 = vld [vmem:[#allocation9 + $0x110] sm:$0xff] }
 0x30a   : > { %5077 = vmatprep.mubr.msk.f32.mxu0 %vm3895_vm0, %v10968_v37  ;;  %4698 = vmatprep.subr.mxu1 %v4601_v52 }
 0x30b   : > { %4699 = vmatpush2.msra.mxu1 %v4600_v45 }
 0x30c   : > { %4700 = vmatprep.subr.mxu1 %v4599_v61 }
 0x30d   : > { %4445 = vmatmul.mubr.f32.gmra.mxu0 %v4165_v24  ;;  %4701 = vmatpush2.msra.mxu1 %v4598_v51 }
 0x30e   : > { %5078 = vmatprep.mubr.msk.f32.mxu0 %vm3895_vm0, %v9373_v21  ;;  %4702 = vmatprep.subr.mxu1 %v4597_v27 }
 0x30f   : > { %4703 = vmatpush2.msra.mxu1 %v4596_v42  ;;  %v2129_v42 = vmul.f32 %v9436_v57, %v10944_v19 }
 0x310   : > { %4704 = vmatprep.subr.mxu1 %v4595_v4 }
 0x311   : > { %4705 = vmatpush2.msra.mxu1 %v4594_v23  ;;  %v5415_v23 = vld [vmem:[#allocation2 + $0x2] ss:$0 sm:$0xff] }
 0x312   : > { %4706 = vmatprep.subr.mxu1 %v4593_v28  ;;  %v9535_v30 = vpop.permute.xlu0 %3130  ;;  %v10969_v28 = vld [vmem:[#allocation186_spill] sm:$0xff] }
 0x313   : > { %4707 = vmatpush2.msra.mxu1 %v4592_v12  ;;  %v2125_v12 = vmul.f32 %v9436_v57, %v10969_v28 }
 0x314   : > { %4708 = vmatprep.subr.mxu1 %v4591_v56  ;;  %v2495_v56 = vmul.f32 %v9254_v0, %v10947_v60 }
 0x315   : > { %v5228_v32 = vpop.permute.xlu1 %5227  ;;  %4709 = vmatpush2.msra.mxu1 %v4590_v9  ;;  %v9578_v9 = vmul.f32 %v5415_v23, %v10956_v26 }
 0x316   : > { %v5229_v49 = vunpack.i.l.bf16 %v5228_v32  ;;  %v5230_v2 = vunpack.i.h.bf16 %v5228_v32  ;;  %4710 = vmatprep.subr.mxu1 %v4589_v34  ;;  %v10970_v34 = vld [vmem:[#allocation85_spill] sm:$0xff] }
 0x317   : > { %4711 = vmatpush2.msra.mxu1 %v4588_v7  ;;  %v2499_v7 = vmul.f32 %v9254_v0, %v10970_v34 }
 0x318   : > { %v4166_v8 = vsel %vm3895_vm0, %v10960_v14, %v5229_v49  ;;  %v4167_v20 = vsel %vm3895_vm0, %v10962_v41, %v5230_v2  ;;  %v4586_v14 = vld [vmem:[#allocation9 + $0x130] sm:$0xff]  ;;  %4712 = vmatprep.subr.mxu1 %v4587_v55  ;;  %v4581_v41 = vld [vmem:[#allocation9 + $0x108] sm:$0xff]  ;;  %v2314_v49 = vmul.f32 %v5415_v23, %v10947_v60  ;;  %v2315_v2 = vmul.f32 %v5415_v23, %v10950_v40 }
 0x319   : > { %4450 = vmatmul.mubr.f32.gmra.mxu0 %v4166_v8  ;;  %4713 = vmatpush2.msra.mxu1 %v4586_v14  ;;  %v2496_v8 = vmul.f32 %v9254_v0, %v10950_v40  ;;  %v2310_v14 = vmul.f32 %v5415_v23, %v10944_v19  ;;  %v2497_v40 = vmul.f32 %v9254_v0, %v10954_v1 }
 0x31a   : > { %5079 = vmatprep.mubr.msk.f32.mxu0 %vm3895_vm0, %v9444_v22  ;;  %4714 = vmatprep.subr.mxu1 %v4585_v10  ;;  %v2126_v60 = vmul.f32 %v9436_v57, %v10927_v18  ;;  %v2025_v19 = vmul.f32 %v9448_v36, %v10927_v18 }
 0x31b   : > { %4715 = vmatpush2.msra.mxu1 %v4584_v5 }
 0x31c   : > { %4716 = vmatprep.subr.mxu1 %v4583_v13 }
 0x31d   : > { %4455 = vmatmul.mubr.f32.gmra.mxu0 %v4167_v20  ;;  %4717 = vmatpush2.msra.mxu1 %v4582_v31  ;;  %v10971_v20 = vld [vmem:[#allocation156_spill] sm:$0xff]  ;;  %v2316_v31 = vmul.f32 %v5415_v23, %v10954_v1  ;;  %v2021_v1 = vmul.f32 %v9448_v36, %v10926_v16  ;;  %v2022_v16 = vmul.f32 %v9448_v36, %v10936_v63 }
 0x31e   : > { %5080 = vmatprep.mubr.msk.f32.mxu0 %vm3895_vm0, %v9432_v38  ;;  %4718 = vmatprep.subr.mxu1 %v4581_v41  ;;  %v2020_v55 = vmul.f32 %v9448_v36, %v10971_v20 }
 0x31f   : > { %4719 = vmatpush2.msra.mxu1 %v4580_v39  ;;  %v10972_v39 = vld [vmem:[#allocation128_spill] sm:$0xff] }
 0x322   : > { %v9533_v62 = vpop.permute.xlu1 %3150 }
 0x326   : > { %v9537_v29 = vpop.permute.xlu1 %3135 }
 0x329   : > { %v5233_v38 = vpop.permute.xlu0 %5232 }
 0x32a   : > { %v5234_v54 = vunpack.i.l.bf16 %v5233_v38  ;;  %v9539_v24 = vpop.permute.xlu1 %3697  ;;  %v5235_v59 = vunpack.i.h.bf16 %v5233_v38  ;;  %v2684_v38 = vmul.f32 %v9273_v33, %v10972_v39 }
 0x32c   : > { %v4168_v15 = vsel %vm3895_vm0, %v10963_v17, %v5234_v54  ;;  %v9543_v52 = vpop.f32.mrf.mxu0  ;;  %v4169_v51 = vsel %vm3895_vm0, %v10965_v53, %v5235_v59  ;;  %v2130_v17 = vmul.f32 %v9436_v57, %v10948_v47  ;;  %v2131_v53 = vmul.f32 %v9436_v57, %v10952_v46 }
 0x32d   : > { %4460 = vmatmul.mubr.f32.gmra.mxu0 %v4168_v15  ;;  %v2205_v54 = vadd.f32 %v2125_v12, %v2020_v55  ;;  %v10973_v15 = vld [vmem:[#allocation112_spill] sm:$0xff]  ;;  %v2206_v12 = vadd.f32 %v2126_v60, %v2021_v1  ;;  %v2128_v60 = vmul.f32 %v9436_v57, %v10943_v25 }
 0x32e   : > { %v9545_v45 = vpop.permute.xlu1 %3140  ;;  %5081 = vmatprep.mubr.msk.f32.mxu0 %vm3895_vm0, %v9468_v3  ;;  %v4343_v61 = vpop.f32.mrf.mxu0  ;;  %v9563_v3 = vmul.f32 %v9436_v57, %v10955_v6 }
 0x32f   : > { %v2500_v61 = vmul.f32 %v9254_v0, %v10973_v15  ;;  %v2681_v0 = vmul.f32 %v9273_v33, %v10973_v15  ;;  %v2313_v15 = vmul.f32 %v5415_v23, %v10955_v6 }
 0x331   : > { %v9551_v27 = vpop.f32.mrf.mxu0  ;;  %4465 = vmatmul.mubr.f32.gmra.mxu0 %v4169_v51  ;;  %v2311_v51 = vmul.f32 %v5415_v23, %v10948_v47  ;;  %v2312_v47 = vmul.f32 %v5415_v23, %v10952_v46 }
 0x332   : > { %v9555_v4 = vpop.permute.xlu1 %3702  ;;  %5082 = vmatprep.mubr.msk.f32.mxu0 %vm3895_vm0, %v9483_v48  ;;  %v2024_v48 = vmul.f32 %v9448_v36, %v10969_v28 }
 0x333   : > { %v4348_v32 = vpop.f32.mrf.mxu0 }
 0x334   : > { %v2209_v10 = vadd.f32 %v2129_v42, %v2024_v48  ;;  %v2680_v42 = vmul.f32 %v9273_v33, %v10970_v34  ;;  %v2390_v32 = vadd.f32 %v2310_v14, %v2205_v54  ;;  %v10974_v48 = vld [vmem:[#allocation73_spill] sm:$0xff] }
 0x335   : > { %v2685_v20 = vmul.f32 %v9273_v33, %v10974_v48  ;;  %v2026_v33 = vmul.f32 %v9448_v36, %v10938_v11 }
 0x336   : > { %v4101_v5 = vpop.permute.xlu1 %4100  ;;  %v3156_v13 = vpop.permute.xlu0 %3155  ;;  %v2394_v59 = vadd.f32 %v2314_v49, %v2209_v10  ;;  %v2210_v49 = vadd.f32 %v2130_v17, %v2025_v19  ;;  %v10975_v17 = vld [vmem:[#allocation51_spill] sm:$0xff]  ;;  %v2023_v19 = vmul.f32 %v9448_v36, %v10940_v44 }
 0x337   : > { %v4170_v41 = vsel %vm3895_vm0, %v10966_v50, %v4101_v5  ;;  %v2127_v50 = vmul.f32 %v9436_v57, %v10938_v11  ;;  %v2391_v5 = vadd.f32 %v2311_v51, %v2206_v12 }
 0x338   : > { %4470 = vmatmul.mubr.f32.gmra.mxu0 %v4170_v41  ;;  %v2579_v18 = vadd.f32 %v2499_v7, %v2394_v59  ;;  %v2395_v10 = vadd.f32 %v2315_v2, %v2210_v49  ;;  %v5416_v7 = vld [vmem:[#allocation2 + $0x3] ss:$0 sm:$0xff]  ;;  %v5417_v2 = vld [vmem:[#allocation2 + $0x4] ss:$0 sm:$0xff]  ;;  %v2208_v49 = vadd.f32 %v2128_v60, %v2023_v19 }
 0x339   : > { %5083 = vmatprep.mubr.msk.f32.mxu0 %vm3895_vm0, %v9493_v43  ;;  %v2575_v43 = vadd.f32 %v2495_v56, %v2390_v32  ;;  %v2501_v14 = vmul.f32 %v5416_v7, %v10975_v17  ;;  %v2207_v41 = vadd.f32 %v2127_v50, %v2022_v16  ;;  %v2682_v54 = vmul.f32 %v5417_v2, %v10975_v17 }
 0x33a   : > { %v3718_v28 = vpop.permute.xlu0 %3717  ;;  %v2764_v55 = vadd.f32 %v2684_v38, %v2579_v18  ;;  %v2580_v46 = vadd.f32 %v2500_v61, %v2395_v10  ;;  %v2576_v1 = vadd.f32 %v2496_v8, %v2391_v5  ;;  %v2498_v11 = vmul.f32 %v5416_v7, %v10956_v26 }
 0x33b   : > { %v2760_v39 = vadd.f32 %v2680_v42, %v2575_v43  ;;  %v2392_v59 = vadd.f32 %v2312_v47, %v2207_v41  ;;  %v10976_v42 = vld [vmem:[#allocation106_spill] sm:$0xff]  ;;  %v5418_v47 = vld [vmem:[#allocation4] ss:$0 sm:$0xff]  ;;  %v2393_v43 = vadd.f32 %v2313_v15, %v2208_v49 }
 0x33c   : > { %v9614_v34 = vpop.f32.mrf.mxu0  ;;  %v3244_v63 = vmul.f32 %v9533_v62, %v2764_v55  ;;  %v2765_v51 = vadd.f32 %v2685_v20, %v2580_v46  ;;  %v2211_v62 = vadd.f32 %v2131_v53, %v2026_v33  ;;  %v2686_v32 = vmul.f32 %v5417_v2, %v10976_v42 }
 0x33d   : > { %v3240_v57 = vmul.f32 %v9535_v30, %v2760_v39  ;;  %v2577_v18 = vadd.f32 %v2497_v40, %v2392_v59  ;;  %v2761_v12 = vadd.f32 %v2681_v0, %v2576_v1  ;;  %v10977_v30 = vld [vmem:[#allocation45_spill] sm:$0xff]  ;;  %v2027_v53 = vmul.f32 %v9448_v36, %v10943_v25 }
 0x33e   : > { %v3161_v56 = vpop.permute.xlu0 %3160  ;;  %v4353_v38 = vpop.f32.mrf.mxu0  ;;  %v3245_v16 = vmul.f32 %v3156_v13, %v2765_v51  ;;  %v3331_v44 = vadd.f32 %v5418_v47, %v3244_v63  ;;  %v2396_v48 = vadd.f32 %v2316_v31, %v2211_v62  ;;  %v2683_v8 = vmul.f32 %v5417_v2, %v10977_v30  ;;  %v10978_v25 = vld [vmem:[#allocation49_spill] sm:$0xff] }
 0x33f   : > { %v2762_v20 = vadd.f32 %v2682_v54, %v2577_v18  ;;  %v3241_v26 = vmul.f32 %v9537_v29, %v2761_v12  ;;  %v3327_v55 = vadd.f32 %v5418_v47, %v3240_v57  ;;  %v2502_v13 = vmul.f32 %v5416_v7, %v10977_v30 }
 0x340   : > { %v9627_v50 = vpop.f32.mrf.mxu0  ;;  %v3811_v10 = vmul.f32 %v3718_v28, %v3331_v44  ;;  %v2581_v40 = vadd.f32 %v2501_v14, %v2396_v48  ;;  %v2212_v0 = vadd.f32 %v9563_v3, %v2027_v53  ;;  %v2578_v31 = vadd.f32 %v2498_v11, %v2393_v43 }
 0x341   : > { %v3166_v61 = vpop.permute.xlu1 %3165  ;;  %v3807_v5 = vmul.f32 %v9539_v24, %v3327_v55  ;;  %v3242_v41 = vmul.f32 %v9545_v45, %v2762_v20  ;;  %v3332_v39 = vadd.f32 %v5418_v47, %v3245_v16  ;;  %v2687_v36 = vmul.f32 %v5417_v2, %v10978_v25 }
 0x342   : > { %v3723_v6 = vpop.permute.xlu0 %3722  ;;  %v4358_v23 = vpop.f32.mrf.mxu0  ;;  %v2766_v60 = vadd.f32 %v2686_v32, %v2581_v40  ;;  %v2397_v29 = vadd.f32 %v9578_v9, %v2212_v0  ;;  %v2763_v46 = vadd.f32 %v2683_v8, %v2578_v31  ;;  %v3328_v28 = vadd.f32 %v5418_v47, %v3241_v26  ;;  %v9643_v9 = vld [vmem:[#allocation7] ss:$0 sm:$0xff] }
 0x343   : > { %v3891_v14 = vmax.f32 %v3811_v10, 0.0  ;;  %v3812_v38 = vmul.f32 %v3723_v6, %v3332_v39  ;;  %v3887_v54 = vmax.f32 %v3807_v5, 0.0  ;;  %v3329_v19 = vadd.f32 %v5418_v47, %v3242_v41 }
 0x344   : > { %v3246_v33 = vmul.f32 %v3161_v56, %v2766_v60  ;;  %v2582_v7 = vadd.f32 %v2502_v13, %v2397_v29  ;;  %v3808_v3 = vmul.f32 %v9555_v4, %v3328_v28  ;;  %v4643_v4 = vld [vmem:[#allocation9 + $0x2f8] sm:$0xff]  ;;  %v4342_v16 = vadd.f32 %v9643_v9, %v9543_v52 }
 0x345   : > { %v3728_v17 = vpop.permute.xlu1 %3727  ;;  %v4005_v57 = vsel %vm3895_vm0, %v3891_v14, -inf  ;;  %v3892_v1 = vmax.f32 %v3812_v38, 0.0  ;;  %v4004_v56 = vsel %vm3895_vm0, %v3887_v54, -inf  ;;  %4769 = vmatprep.subr.mxu1 %v4643_v4  ;;  %v4347_v40 = vadd.f32 %v9643_v9, %v9551_v27 }
 0x346   : > { %v3146_v63 = vpop.permute.xlu0 %3145  ;;  %v2767_v15 = vadd.f32 %v2687_v36, %v2582_v7  ;;  %v3333_v2 = vadd.f32 %v5418_v47, %v3246_v33  ;;  %v3888_v11 = vmax.f32 %v3808_v3, 0.0  ;;  %v4006_v49 = vmax.f32 %v4004_v56, %v4005_v57 }
 0x347   : > { %v3243_v59 = vmul.f32 %v3146_v63, %v2763_v46  ;;  %v4008_v44 = vsel %vm3895_vm0, %v3892_v1, -inf  ;;  %v4500_v10 = vmax.f32 %v4342_v16, 0.0  ;;  %v4501_v25 = vmax.f32 %v4347_v40, 0.0 }
 0x348   : > { %v3247_v62 = vmul.f32 %v3166_v61, %v2767_v15  ;;  %v3813_v42 = vmul.f32 %v3728_v17, %v3333_v2  ;;  %v4007_v30 = vsel %vm3895_vm0, %v3888_v11, -inf }
 0x349   : > { %v3713_v24 = vpop.permute.xlu1 %3712  ;;  %v3330_v32 = vadd.f32 %v5418_v47, %v3243_v59  ;;  %v4009_v43 = vmax.f32 %v4007_v30, %v4008_v44 }
 0x34a   : > { %v3708_v45 = vpop.permute.xlu0 %3707  ;;  %v3334_v23 = vadd.f32 %v5418_v47, %v3247_v62  ;;  %v3893_v8 = vmax.f32 %v3813_v42, 0.0 }
 0x34b   : > { %v3809_v51 = vmul.f32 %v3708_v45, %v3329_v19  ;;  %v3810_v20 = vmul.f32 %v3713_v24, %v3330_v32  ;;  %v4357_v45 = vadd.f32 %v9643_v9, %v9627_v50 }
 0x34c   : > { %v4011_v31 = vsel %vm3895_vm0, %v3893_v8, -inf }
 0x34d   : > { %v3889_v48 = vmax.f32 %v3809_v51, 0.0  ;;  %v4105_v6 = vpop.permute.xlu1 %4104  ;;  %v3890_v5 = vmax.f32 %v3810_v20, 0.0 }
 0x34e   : > { %v4103_v18 = vpop.permute.xlu0 %4102  ;;  %v4172_v52 = vsel %vm3895_vm0, %v9314_v35, %v4105_v6 }
 0x34f   : > { %v4171_v12 = vsel %vm3895_vm0, %v10967_v58, %v4103_v18  ;;  %v4010_v17 = vsel %vm3895_vm0, %v3889_v48, -inf  ;;  %v4013_v28 = vsel %vm3895_vm0, %v3890_v5, -inf }
 0x350   : > { %4475 = vmatmul.mubr.f32.gmra.mxu0 %v4171_v12  ;;  %v4012_v35 = vmax.f32 %v4010_v17, %v4011_v31  ;;  %v4638_v17 = vld [vmem:[#allocation9 + $0x2d0] sm:$0xff]  ;;  %v4636_v31 = vld [vmem:[#allocation9 + $0x2c0] sm:$0xff] }
 0x351   : > { %v4361_v61 = vpop.f32.mrf.mxu0  ;;  %5084 = vmatprep.mubr.msk.f32.mxu0 %vm3895_vm0, %v4006_v49 }
 0x352   : > { %v4362_v53 = vadd.f32 %v9643_v9, %v4361_v61  ;;  %v3733_v58 = vpop.permute.xlu0 %3732 }
 0x353   : > { %v3814_v26 = vmul.f32 %v3733_v58, %v3334_v23  ;;  %v4363_v55 = vpop.f32.mrf.mxu0 }
 0x354   : > { %v4504_v47 = vmax.f32 %v4362_v53, 0.0  ;;  %4480 = vmatmul.mubr.f32.gmra.mxu0 %v4172_v52  ;;  %v4642_v53 = vld [vmem:[#allocation9 + $0x2f0] sm:$0xff]  ;;  %v4640_v55 = vld [vmem:[#allocation9 + $0x2e0] sm:$0xff] }
 0x355   : > { %v3894_v13 = vmax.f32 %v3814_v26, 0.0  ;;  %v4366_v0 = vpop.f32.mrf.mxu0  ;;  %5085 = vmatprep.mubr.msk.f32.mxu0 %vm3895_vm0, %v4009_v43  ;;  %v4641_v26 = vld [vmem:[#allocation9 + $0x2e8] sm:$0xff] }
 0x356   : > { %v4532_v41 = vmax.f32 %v4500_v10, %v4504_v47  ;;  %v4367_v60 = vadd.f32 %v9643_v9, %v4366_v0  ;;  %v4107_v39 = vpop.permute.xlu0 %4106  ;;  %v4639_v10 = vld [vmem:[#allocation9 + $0x2d8] sm:$0xff] }
 0x357   : > { %v4368_v63 = vpop.f32.mrf.mxu0  ;;  %v4173_v27 = vsel %vm3895_vm0, %v10968_v37, %v4107_v39  ;;  %v4014_v36 = vsel %vm3895_vm0, %v3894_v13, -inf  ;;  %v4109_v46 = vpop.permute.xlu1 %4108  ;;  %v4352_v37 = vadd.f32 %v9643_v9, %v9614_v34  ;;  %v4503_v34 = vmax.f32 %v4357_v45, 0.0  ;;  %v4637_v13 = vld [vmem:[#allocation9 + $0x2c8] sm:$0xff] }
 0x358   : > { %v4505_v29 = vmax.f32 %v4367_v60, 0.0  ;;  %4485 = vmatmul.mubr.f32.gmra.mxu0 %v4173_v27  ;;  %v4015_v33 = vmax.f32 %v4013_v28, %v4014_v36  ;;  %v4174_v38 = vsel %vm3895_vm0, %v9373_v21, %v4109_v46  ;;  %v4634_v63 = vld [vmem:[#allocation9 + $0x2b0] sm:$0xff]  ;;  %v4632_v28 = vld [vmem:[#allocation9 + $0x2a0] sm:$0xff] }
 0x359   : > { %5086 = vmatprep.mubr.msk.f32.mxu0 %vm3895_vm0, %v4012_v35  ;;  %v4502_v19 = vmax.f32 %v4352_v37, 0.0  ;;  %v4630_v37 = vld [vmem:[#allocation9 + $0x290] sm:$0xff] }
 0x35a   : > { %v4533_v14 = vmax.f32 %v4501_v25, %v4505_v29  ;;  %v4633_v25 = vld [vmem:[#allocation9 + $0x2a8] sm:$0xff] }
 0x35b   : > { %v4111_v7 = vpop.permute.xlu0 %4110 }
 0x35c   : > { %4490 = vmatmul.mubr.f32.gmra.mxu0 %v4174_v38  ;;  %v4175_v54 = vsel %vm3895_vm0, %v9444_v22, %v4111_v7  ;;  %v4631_v38 = vld [vmem:[#allocation9 + $0x298] sm:$0xff] }
 0x35d   : > { %5087 = vmatprep.mubr.msk.f32.mxu0 %vm3895_vm0, %v4015_v33 }
 0x360   : > { %4495 = vmatmul.mubr.f32.gmra.mxu0 %v4175_v54  ;;  %v4371_v3 = vpop.f32.mrf.mxu0 }
 0x361   : > { %v4372_v59 = vadd.f32 %v9643_v9, %v4371_v3  ;;  %v4629_v3 = vld [vmem:[#allocation9 + $0x288] sm:$0xff] }
 0x362   : > { %v4373_v24 = vpop.f32.mrf.mxu0 }
 0x363   : > { %v4506_v21 = vmax.f32 %v4372_v59, 0.0  ;;  %v4628_v24 = vld [vmem:[#allocation9 + $0x280] sm:$0xff] }
 0x364   : > { %v4376_v15 = vpop.f32.mrf.mxu0 }
 0x365   : > { %v9677_v57 = vmax.f32 %v4502_v19, %v4506_v21  ;;  %v4377_v1 = vadd.f32 %v9643_v9, %v4376_v15  ;;  %v4627_v19 = vld [vmem:[#allocation9 + $0x278] sm:$0xff]  ;;  %v4626_v21 = vld [vmem:[#allocation9 + $0x270] sm:$0xff]  ;;  %v4625_v15 = vld [vmem:[#allocation9 + $0x268] sm:$0xff] }
 0x366   : > { %v4378_v2 = vpop.f32.mrf.mxu0 }
 0x367   : > { %v4507_v51 = vmax.f32 %v4377_v1, 0.0  ;;  %v4624_v1 = vld [vmem:[#allocation9 + $0x260] sm:$0xff]  ;;  %v4623_v2 = vld [vmem:[#allocation9 + $0x258] sm:$0xff] }
 0x369   : > { %v9680_v62 = vmax.f32 %v4503_v34, %v4507_v51  ;;  %v4622_v34 = vld [vmem:[#allocation9 + $0x250] sm:$0xff]  ;;  %v4621_v51 = vld [vmem:[#allocation9 + $0x248] sm:$0xff] }
 0x375   : > { %v4381_v22 = vpop.f32.mrf.mxu0 }
 0x376   : > { %v4382_v50 = vadd.f32 %v9643_v9, %v4381_v22  ;;  %v4620_v22 = vld [vmem:[#allocation9 + $0x240] sm:$0xff] }
 0x377   : > { %v4383_v56 = vpop.f32.mrf.mxu0 }
 0x378   : > { %v4508_v48 = vmax.f32 %v4382_v50, 0.0  ;;  %v4619_v56 = vld [vmem:[#allocation9 + $0x238] sm:$0xff] }
 0x37a   : > { %v4386_v11 = vpop.f32.mrf.mxu0 }
 0x37b   : > { %v4387_v6 = vadd.f32 %v9643_v9, %v4386_v11  ;;  %v4618_v11 = vld [vmem:[#allocation9 + $0x230] sm:$0xff] }
 0x37c   : > { %v4388_v42 = vpop.f32.mrf.mxu0 }
 0x37d   : > { %v4509_v58 = vmax.f32 %v4387_v6, 0.0  ;;  %v4617_v42 = vld [vmem:[#allocation9 + $0x228] sm:$0xff] }
 0x384   : > { %v4391_v32 = vpop.f32.mrf.mxu0 }
 0x385   : > { %v4392_v40 = vadd.f32 %v9643_v9, %v4391_v32  ;;  %v4616_v32 = vld [vmem:[#allocation9 + $0x220] sm:$0xff] }
 0x386   : > { %v4393_v18 = vpop.f32.mrf.mxu0 }
 0x387   : > { %v4510_v60 = vmax.f32 %v4392_v40, 0.0 }
 0x388   : > { %v4396_v4 = vpop.f32.mrf.mxu0 }
 0x389   : > { %v4397_v39 = vadd.f32 %v9643_v9, %v4396_v4  ;;  %v4615_v4 = vld [vmem:[#allocation9 + $0x218] sm:$0xff] }
 0x38a   : > { %v4398_v49 = vpop.f32.mrf.mxu0 }
 0x38b   : > { %v4614_v49 = vld [vmem:[#allocation9 + $0x210] sm:$0xff] }
 0x399   : > { %v4401_v12 = vpop.f32.mrf.mxu0 }
 0x39a   : > { %v4402_v16 = vadd.f32 %v9643_v9, %v4401_v12  ;;  %v4613_v12 = vld [vmem:[#allocation9 + $0x208] sm:$0xff] }
 0x39b   : > { %v4403_v44 = vpop.f32.mrf.mxu0 }
 0x39c   : > { %v4512_v61 = vmax.f32 %v4402_v16, 0.0  ;;  %v4612_v16 = vld [vmem:[#allocation9 + $0x200] sm:$0xff] }
 0x39d   : > { %v4406_v23 = vpop.f32.mrf.mxu0 }
 0x39e   : > { %v4407_v30 = vadd.f32 %v9643_v9, %v4406_v23  ;;  %v9686_v8 = vmax.f32 %v4508_v48, %v4512_v61 }
 0x39f   : > { %v4408_v20 = vpop.f32.mrf.mxu0 }
 0x3a0   : > { %v4513_v43 = vmax.f32 %v4407_v30, 0.0  ;;  %4720 = vmatprep.mubr.f32.mxu1 %v9686_v8 }
 0x3a1   : > { %4721 = vmatmul.mubr.f32.vlgmr.msra.gmra.mxu1 %v4532_v41  ;;  %v4635_v41 = vld [vmem:[#allocation9 + $0x2b8] sm:$0xff] }
 0x3a2   : > { %v9689_v52 = vmax.f32 %v4509_v58, %v4513_v43  ;;  %4770 = vmatpush1.msra.mxu1 %v4642_v53 }
 0x3a3   : > { %4771 = vmatprep.subr.mxu1 %v4641_v26 }
 0x3a4   : > { %4726 = vmatprep.mubr.f32.mxu1 %v9689_v52  ;;  %v4411_v47 = vpop.f32.mrf.mxu0  ;;  %4772 = vmatpush1.msra.mxu1 %v4640_v55 }
 0x3a5   : > { %v4412_v0 = vadd.f32 %v9643_v9, %v4411_v47  ;;  %4727 = vmatmul.mubr.f32.gmra.mxu1 %v4533_v14  ;;  %4773 = vmatprep.subr.mxu1 %v4639_v10  ;;  %v4511_v14 = vmax.f32 %v4397_v39, 0.0 }
 0x3a6   : > { %v4413_v5 = vpop.f32.mrf.mxu0  ;;  %4774 = vmatpush1.msra.mxu1 %v4638_v17 }
 0x3a7   : > { %v4514_v35 = vmax.f32 %v4412_v0, 0.0  ;;  %4775 = vmatprep.subr.mxu1 %v4637_v13 }
 0x3a8   : > { %v4416_v27 = vpop.f32.mrf.mxu0  ;;  %4776 = vmatpush1.msra.mxu1 %v4636_v31 }
 0x3a9   : > { %v9695_v36 = vmax.f32 %v4510_v60, %v4514_v35  ;;  %v4417_v29 = vadd.f32 %v9643_v9, %v4416_v27  ;;  %4777 = vmatprep.subr.mxu1 %v4635_v41 }
 0x3aa   : > { %v4418_v46 = vpop.f32.mrf.mxu0  ;;  %4778 = vmatpush1.msra.mxu1 %v4634_v63 }
 0x3ab   : > { %v4515_v33 = vmax.f32 %v4417_v29, 0.0  ;;  %4732 = vmatprep.mubr.f32.mxu1 %v9695_v36  ;;  %4779 = vmatprep.subr.mxu1 %v4633_v25  ;;  %v10979_v29 = vmov 0.0  }
 0x3ac   : > { %v4421_v7 = vpop.f32.mrf.mxu0  ;;  %4733 = vmatmul.mubr.f32.gmra.mxu1 %v9677_v57 }
 0x3ad   : > { %v9700_v54 = vmax.f32 %v4511_v14, %v4515_v33  ;;  %4780 = vmatpush1.msra.mxu1 %v4632_v28  ;;  %v4422_v48 = vadd.f32 %v9643_v9, %v4421_v7 }
 0x3ae   : > { %v4423_v59 = vpop.f32.mrf.mxu0  ;;  %4781 = vmatprep.subr.mxu1 %v4631_v38 }
 0x3af   : > { %4738 = vmatprep.mubr.f32.mxu1 %v9700_v54  ;;  %4782 = vmatpush1.msra.mxu1 %v4630_v37  ;;  %v4516_v30 = vmax.f32 %v4422_v48, 0.0 }
 0x3b0   : > { %v4426_v45 = vpop.f32.mrf.mxu0  ;;  %4739 = vmatmul.mubr.f32.gmra.mxu1 %v9680_v62  ;;  %4783 = vmatprep.subr.mxu1 %v4629_v3 }
 0x3b1   : > { %4784 = vmatpush1.msra.mxu1 %v4628_v24  ;;  %v4427_v20 = vadd.f32 %v9643_v9, %v4426_v45 }
 0x3b2   : > { %v4428_v57 = vpop.f32.mrf.mxu0  ;;  %4785 = vmatprep.subr.mxu1 %v4627_v19 }
 0x3b3   : > { %4786 = vmatpush1.msra.mxu1 %v4626_v21  ;;  %v4517_v10 = vmax.f32 %v4427_v20, 0.0 }
 0x3b4   : > { %4787 = vmatprep.subr.mxu1 %v4625_v15 }
 0x3b5   : > { %4788 = vmatpush1.msra.mxu1 %v4624_v1 }
 0x3b6   : > { %4789 = vmatprep.subr.mxu1 %v4623_v2 }
 0x3b7   : > { %4790 = vmatpush1.msra.mxu1 %v4622_v34 }
 0x3b8   : > { %4791 = vmatprep.subr.mxu1 %v4621_v51 }
 0x3b9   : > { %v4431_v62 = vpop.f32.mrf.mxu0  ;;  %4792 = vmatpush1.msra.mxu1 %v4620_v22 }
 0x3ba   : > { %4793 = vmatprep.subr.mxu1 %v4619_v56  ;;  %v4432_v47 = vadd.f32 %v9643_v9, %v4431_v62 }
 0x3bb   : > { %v4433_v18 = vpop.f32.mrf.mxu0  ;;  %4794 = vmatpush1.msra.mxu1 %v4618_v11 }
 0x3bc   : > { %4795 = vmatprep.subr.mxu1 %v4617_v42  ;;  %v4518_v5 = vmax.f32 %v4432_v47, 0.0 }
 0x3bd   : > { %v4436_v50 = vpop.f32.mrf.mxu0  ;;  %4796 = vmatpush1.msra.mxu1 %v4616_v32 }
 0x3be   : > { %4797 = vmatprep.subr.mxu1 %v4615_v4  ;;  %v4437_v41 = vadd.f32 %v9643_v9, %v4436_v50 }
 0x3bf   : > { %v4438_v44 = vpop.f32.mrf.mxu0  ;;  %4798 = vmatpush1.msra.mxu1 %v4614_v49 }
 0x3c0   : > { %4799 = vmatprep.subr.mxu1 %v4613_v12 }
 0x3c1   : > { %4800 = vmatpush1.msra.mxu1 %v4612_v16 }
 0x3c9   : > { %v4441_v6 = vpop.f32.mrf.mxu0 }
 0x3ca   : > { %v4442_v61 = vadd.f32 %v9643_v9, %v4441_v6 }
 0x3cb   : > { %v4443_v23 = vpop.f32.mrf.mxu0 }
 0x3cc   : > { %v4520_v53 = vmax.f32 %v4442_v61, 0.0 }
 0x3cd   : > { %v4446_v58 = vpop.f32.mrf.mxu0 }
 0x3ce   : > { %v4540_v43 = vmax.f32 %v4516_v30, %v4520_v53  ;;  %v4447_v26 = vadd.f32 %v9643_v9, %v4446_v58 }
 0x3cf   : > { %v4448_v55 = vpop.f32.mrf.mxu0 }
 0x3d0   : > { %v4521_v40 = vmax.f32 %v4447_v26, 0.0  ;;  %4744 = vmatprep.mubr.f32.mxu1 %v4540_v43 }
 0x3d1   : > { %4745 = vmatmul.mubr.f32.gmra.mxu1 %v9686_v8  ;;  %v4519_v8 = vmax.f32 %v4437_v41, 0.0 }
 0x3d2   : > { %v4541_v17 = vmax.f32 %v4517_v10, %v4521_v40 }
 0x3d4   : > { %4750 = vmatprep.mubr.f32.mxu1 %v4541_v17 }
 0x3d5   : > { %4751 = vmatmul.mubr.f32.gmra.mxu1 %v9689_v52 }
 0x3d9   : > { %v4451_v13 = vpop.f32.mrf.mxu0 }
 0x3da   : > { %v4452_v0 = vadd.f32 %v9643_v9, %v4451_v13 }
 0x3db   : > { %v4453_v31 = vpop.f32.mrf.mxu0 }
 0x3dc   : > { %v4522_v60 = vmax.f32 %v4452_v0, 0.0 }
 0x3dd   : > { %v4456_v39 = vpop.f32.mrf.mxu0 }
 0x3de   : > { %v4542_v35 = vmax.f32 %v4518_v5, %v4522_v60  ;;  %v4457_v63 = vadd.f32 %v9643_v9, %v4456_v39  ;;  %v4646_v60 = vlaneseq }
 0x3df   : > { %v4458_v27 = vpop.f32.mrf.mxu0 }
 0x3e0   : > { %v4523_v25 = vmax.f32 %v4457_v63, 0.0  ;;  %4756 = vmatprep.mubr.f32.mxu1 %v4542_v35 }
 0x3e1   : > { %4757 = vmatmul.mubr.f32.gmra.mxu1 %v9695_v36 }
 0x3e2   : > { %v4543_v52 = vmax.f32 %v4519_v8, %v4523_v25  ;;  %v4644_v8 = vld [vmem:[#allocation10] sm:$0x3] }
 0x3e4   : > { %4762 = vmatprep.mubr.f32.mxu1 %v4543_v52 }
 0x3e5   : > { %4763 = vmatmul.mubr.f32.gmra.mxu1 %v9700_v54 }
 0x3e6   : > { %4833 = vmatprep.mubr.f32.mxu1 %v10979_v29 }
 0x3e9   : > { %4834 = vmatmul.mubr.f32.vlgmr.msra.gmra.mxu1 %v4540_v43 }
 0x3ea   : > { %4839 = vmatprep.mubr.f32.mxu1 %v10979_v29 }
 0x3ed   : > { %v4461_v46 = vpop.f32.mrf.mxu0  ;;  %4840 = vmatmul.mubr.f32.gmra.mxu1 %v4541_v17 }
 0x3ee   : > { %4845 = vmatprep.mubr.f32.mxu1 %v10979_v29  ;;  %v4462_v54 = vadd.f32 %v9643_v9, %v4461_v46 }
 0x3ef   : > { %v4463_v28 = vpop.f32.mrf.mxu0 }
 0x3f0   : > { %v4524_v19 = vmax.f32 %v4462_v54, 0.0 }
 0x3f1   : > { %v4466_v14 = vpop.f32.mrf.mxu0  ;;  %4846 = vmatmul.mubr.f32.gmra.mxu1 %v4542_v35  ;;  %v4647_v35 = vshrl.u32 %v4646_v60, 7 }
 0x3f2   : > { %4851 = vmatprep.mubr.f32.mxu1 %v10979_v29  ;;  %v4467_v45 = vadd.f32 %v9643_v9, %v4466_v14 }
 0x3f3   : > { %v4468_v33 = vpop.f32.mrf.mxu0  ;;  %v4648_v27 = vsub.s32 0, %v4647_v35  ;;  %v4652_v25 = vsub.s32 1, %v4647_v35 }
 0x3f4   : > { %v4525_v34 = vmax.f32 %v4467_v45, 0.0 }
 0x3f5   : > { %4852 = vmatmul.mubr.f32.gmra.mxu1 %v4543_v52  ;;  %v4653_v46 = vrot.slane %v4644_v8, %v4652_v25 }
 0x3f6   : > { %4857 = vmatprep.mubr.f32.mxu1 %v10979_v29 }
 0x3f8   : > { %v4471_v36 = vpop.f32.mrf.mxu0 }
 0x3f9   : > { %v4472_v51 = vadd.f32 %v9643_v9, %v4471_v36 }
 0x3fa   : > { %v4473_v38 = vpop.f32.mrf.mxu0 }
 0x3fb   : > { %v4526_v32 = vmax.f32 %v4472_v51, 0.0 }
 0x410   : > { %v4476_v7 = vpop.f32.mrf.mxu0 }
 0x411   : > { %v4477_v18 = vadd.f32 %v9643_v9, %v4476_v7 }
 0x412   : > { %v4478_v37 = vpop.f32.mrf.mxu0 }
 0x413   : > { %v4527_v44 = vmax.f32 %v4477_v18, 0.0 }
 0x414   : > { %v4481_v3 = vpop.f32.mrf.mxu0 }
 0x415   : > { %v4482_v59 = vadd.f32 %v9643_v9, %v4481_v3 }
 0x416   : > { %v4483_v24 = vpop.f32.mrf.mxu0 }
 0x417   : > { %v4528_v21 = vmax.f32 %v4482_v59, 0.0 }
 0x418   : > { %v4486_v15 = vpop.f32.mrf.mxu0 }
 0x419   : > { %v4544_v57 = vmax.f32 %v4524_v19, %v4528_v21  ;;  %v4487_v1 = vadd.f32 %v9643_v9, %v4486_v15 }
 0x41a   : > { %v4488_v2 = vpop.f32.mrf.mxu0 }
 0x41b   : > { %v4529_v22 = vmax.f32 %v4487_v1, 0.0  ;;  %4858 = vmatmul.mubr.f32.gmra.mxu1 %v4544_v57 }
 0x41c   : > { %v4491_v56 = vpop.f32.mrf.mxu0  ;;  %4863 = vmatprep.mubr.f32.mxu1 %v10979_v29 }
 0x41d   : > { %v4545_v11 = vmax.f32 %v4525_v34, %v4529_v22  ;;  %v4492_v62 = vadd.f32 %v9643_v9, %v4491_v56 }
 0x41e   : > { %v4493_v42 = vpop.f32.mrf.mxu0 }
 0x41f   : > { %v4530_v4 = vmax.f32 %v4492_v62, 0.0  ;;  %4864 = vmatmul.mubr.f32.gmra.mxu1 %v4545_v11 }
 0x420   : > { %v4496_v49 = vpop.f32.mrf.mxu0  ;;  %4869 = vmatprep.mubr.f32.mxu1 %v10979_v29 }
 0x421   : > { %v4546_v50 = vmax.f32 %v4526_v32, %v4530_v4  ;;  %v4497_v12 = vadd.f32 %v9643_v9, %v4496_v49 }
 0x422   : > { %v4498_v16 = vpop.f32.mrf.mxu0 }
 0x423   : > { %v4531_v48 = vmax.f32 %v4497_v12, 0.0  ;;  %4870 = vmatmul.mubr.f32.gmra.mxu1 %v4546_v50 }
 0x424   : > { %4875 = vmatprep.mubr.f32.mxu1 %v10979_v29  ;;  %v4649_v29 = vrot.slane %v4644_v8, %v4648_v27 }
 0x425   : > { %v4547_v6 = vmax.f32 %v4527_v44, %v4531_v48 }
 0x427   : > { %4876 = vmatmul.mubr.f32.gmra.mxu1 %v4547_v6 }
 0x461   : > { %v4722_v61 = vpop.f32.mrf.mxu1 }
 0x462   : > { %v4723_v14 = vadd.f32 %v4722_v61, %v4649_v29 }
 0x463   : > { %v4724_v23 = vpop.f32.mrf.mxu1 }
 0x464   : > { %v4725_v33 = vadd.f32 %v4724_v23, %v4653_v46 }
 0x465   : > { %v4728_v30 = vpop.f32.mrf.mxu1 }
 0x466   : > { %v4729_v3 = vadd.f32 %v4728_v30, %v4649_v29 }
 0x467   : > { %v4730_v20 = vpop.f32.mrf.mxu1 }
 0x468   : > { %v4731_v19 = vadd.f32 %v4730_v20, %v4653_v46 }
 0x46c   : > { %v4734_v53 = vpop.f32.mrf.mxu1 }
 0x46d   : > { %v4735_v34 = vadd.f32 %v4734_v53, %v4649_v29 }
 0x46e   : > { %v4736_v58 = vpop.f32.mrf.mxu1 }
 0x46f   : > { %v4737_v18 = vadd.f32 %v4736_v58, %v4653_v46 }
 0x470   : > { %v4740_v43 = vpop.f32.mrf.mxu1 }
 0x471   : > { %v4741_v6 = vadd.f32 %v4740_v43, %v4649_v29 }
 0x472   : > { %v9732_v26 = vpop.f32.mrf.mxu1 }
 0x473   : > { %v4743_v58 = vadd.f32 %v9732_v26, %v4653_v46 }
 0x491   : > { %v4746_v55 = vpop.f32.mrf.mxu1 }
 0x492   : > { %v4747_v38 = vadd.f32 %v4746_v55, %v4649_v29 }
 0x493   : > { %v4748_v10 = vpop.f32.mrf.mxu1 }
 0x494   : > { %v4749_v59 = vadd.f32 %v4748_v10, %v4653_v46 }
 0x495   : > { %v4752_v9 = vpop.f32.mrf.mxu1 }
 0x496   : > { %v4753_v45 = vadd.f32 %v4752_v9, %v4649_v29 }
 0x497   : > { %v4754_v40 = vpop.f32.mrf.mxu1 }
 0x498   : > { %v4755_v51 = vadd.f32 %v4754_v40, %v4653_v46 }
 0x4a1   : > { %v4758_v17 = vpop.f32.mrf.mxu1 }
 0x4a2   : > { %v4759_v4 = vadd.f32 %v4758_v17, %v4649_v29 }
 0x4a3   : > { %v4760_v47 = vpop.f32.mrf.mxu1 }
 0x4a4   : > { %v4761_v61 = vadd.f32 %v4760_v47, %v4653_v46 }
 0x4a5   : > { %v4764_v13 = vpop.f32.mrf.mxu1 }
 0x4a6   : > { %v4765_v9 = vadd.f32 %v4764_v13, %v4649_v29 }
 0x4a7   : > { %v9734_v0 = vpop.f32.mrf.mxu1 }
 0x4a8   : > { %v4767_v47 = vadd.f32 %v9734_v0, %v4653_v46 }
 0x4a9   : > { %v4835_v31 = vpop.f32.mrf.mxu1 }
 0x4aa   : > { %v4836_v7 = vadd.f32 %v4835_v31, %v4723_v14 }
 0x4ab   : > { %v4837_v5 = vpop.f32.mrf.mxu1 }
 0x4ac   : > { %v4838_v37 = vadd.f32 %v4837_v5, %v4725_v33  ;;  %v4882_v15 = vmax.f32 %v4836_v7, 0.0 }
 0x4ad   : > { %v4841_v41 = vpop.f32.mrf.mxu1 }
 0x4ae   : > { %v4842_v57 = vadd.f32 %v4841_v41, %v4729_v3  ;;  %v4883_v22 = vmax.f32 %v4838_v37, 0.0 }
 0x4af   : > { %v4843_v39 = vpop.f32.mrf.mxu1 }
 0x4b0   : > { %v4844_v11 = vadd.f32 %v4843_v39, %v4731_v19  ;;  %v4884_v12 = vmax.f32 %v4842_v57, 0.0 }
 0x4b1   : > { %v4847_v63 = vpop.f32.mrf.mxu1 }
 0x4b2   : > { %v4848_v49 = vadd.f32 %v4847_v63, %v4735_v34  ;;  %v4885_v20 = vmax.f32 %v4844_v11, 0.0 }
 0x4b3   : > { %v4849_v52 = vpop.f32.mrf.mxu1 }
 0x4b4   : > { %v4850_v23 = vadd.f32 %v4849_v52, %v4737_v18  ;;  %v4886_v40 = vmax.f32 %v4848_v49, 0.0 }
 0x4b5   : > { %v4853_v28 = vpop.f32.mrf.mxu1 }
 0x4b6   : > { %v4854_v31 = vadd.f32 %v4853_v28, %v4741_v6  ;;  %v4887_v60 = vmax.f32 %v4850_v23, 0.0 }
 0x4b7   : > { %v4855_v36 = vpop.f32.mrf.mxu1 }
 0x4b8   : > { %v4856_v35 = vadd.f32 %v4855_v36, %v4743_v58  ;;  %v4888_v8 = vmax.f32 %v4854_v31, 0.0 }
 0x4ba   : > { %v4889_v28 = vmax.f32 %v4856_v35, 0.0 }
 0x4db   : > { %v4859_v54 = vpop.f32.mrf.mxu1 }
 0x4dc   : > { %v4860_v24 = vadd.f32 %v4859_v54, %v4747_v38 }
 0x4dd   : > { %v4861_v21 = vpop.f32.mrf.mxu1 }
 0x4de   : > { %v4890_v1 = vmax.f32 %v4860_v24, 0.0  ;;  %v4862_v2 = vadd.f32 %v4861_v21, %v4749_v59 }
 0x4df   : > { %v4865_v56 = vpop.f32.mrf.mxu1 }
 0x4e0   : > { %v4898_v62 = vmax.f32 %v4882_v15, %v4890_v1  ;;  %v4891_v42 = vmax.f32 %v4862_v2, 0.0  ;;  %v4866_v32 = vadd.f32 %v4865_v56, %v4753_v45 }
 0x4e1   : > { %v4867_v50 = vpop.f32.mrf.mxu1 }
 0x4e2   : > { %4906 = vst [vmem:[%s9740_s11] sm:$0xff] %v4898_v62  ;;  %v4899_v16 = vmax.f32 %v4883_v22, %v4891_v42  ;;  %v4892_v44 = vmax.f32 %v4866_v32, 0.0  ;;  %v4868_v48 = vadd.f32 %v4867_v50, %v4755_v51 }
 0x4e3   : > { %v4871_v30 = vpop.f32.mrf.mxu1 }
 0x4e4   : > { %4907 = vst [vmem:[%s9740_s11 + $0x8] sm:$0xff] %v4899_v16  ;;  %v4900_v53 = vmax.f32 %v4884_v12, %v4892_v44  ;;  %v4893_v55 = vmax.f32 %v4868_v48, 0.0  ;;  %v4872_v10 = vadd.f32 %v4871_v30, %v4759_v4 }
 0x4e5   : > { %v4873_v17 = vpop.f32.mrf.mxu1 }
 0x4e6   : > { %4908 = vst [vmem:[%s9740_s11 + $0x10] sm:$0xff] %v4900_v53  ;;  %v4901_v5 = vmax.f32 %v4885_v20, %v4893_v55  ;;  %v4894_v41 = vmax.f32 %v4872_v10, 0.0  ;;  %v4874_v43 = vadd.f32 %v4873_v17, %v4761_v61 }
 0x4e7   : > { %v4877_v39 = vpop.f32.mrf.mxu1 }
 0x4e8   : > { %4909 = vst [vmem:[%s9740_s11 + $0x18] sm:$0xff] %v4901_v5  ;;  %v4902_v63 = vmax.f32 %v4886_v40, %v4894_v41  ;;  %v4895_v26 = vmax.f32 %v4874_v43, 0.0  ;;  %v4878_v13 = vadd.f32 %v4877_v39, %v4765_v9 }
 0x4e9   : > { %v4879_v27 = vpop.f32.mrf.mxu1 }
 0x4ea   : > { %4910 = vst [vmem:[%s9740_s11 + $0x20] sm:$0xff] %v4902_v63  ;;  %v4903_v25 = vmax.f32 %v4887_v60, %v4895_v26  ;;  %v4896_v52 = vmax.f32 %v4878_v13, 0.0  ;;  %v4880_v29 = vadd.f32 %v4879_v27, %v4767_v47 }
 0x4ec   : > { %4911 = vst [vmem:[%s9740_s11 + $0x28] sm:$0xff] %v4903_v25  ;;  %v4904_v14 = vmax.f32 %v4888_v8, %v4896_v52  ;;  %v4897_v33 = vmax.f32 %v4880_v29, 0.0 }
 0x4ee   : > { %4912 = vst [vmem:[%s9740_s11 + $0x30] sm:$0xff] %v4904_v14  ;;  %v4905_v0 = vmax.f32 %v4889_v28, %v4897_v33 }
 0x4f0   : > { %4913 = vst [vmem:[%s9740_s11 + $0x38] sm:$0xff] %v4905_v0 }
 0x4f1 PF: > { %s21_s24 = sadd.s32 1, %s5597_s24  }
 0x4f2   : > { %p18_p2 = scmp.ge.s32.totalorder %s21_s24, 4  }
 0x4f4   :  { %20 = sbr.rel (!%p18_p2) target bundleno = 4 (0x4), region = 103 }
 0x4f9   :  { %4935 = vsyncpa [#allocation3], 1 }
 0x4fa   :  { %4937 = vsyncpa [#allocation3 + $0x1], 1 }
 0x4fb   :  { %4938 = vsyncpa [#allocation5], 1 }
 0x4fc   :  { %4939 = vsyncpa [#allocation8], 1 }
 0x4fd   :  { %4940 = vsyncpa [#allocation11], 1 }

// kernel: sat1_topological_forward.3
= control target key start
LH: loop header
LB: loop body
LE: loop exit
PB: predicated region body
PF: predicated region fallthrough
CT: control target
= control target key end

     0   :  { %10 = vsyncpa [#allocation3], 0  ;;  %s5275_s0 = inlined_call_operand.vmem [shape: f32[2,8192], index: 0, kind: input, shape index: {}]   ;;  %s5276_s1 = inlined_call_operand.hbm [shape: f32[8192,128], index: 1, kind: input, shape index: {}]   ;;  %s5277_s2 = inlined_call_operand.hbm [shape: f32[1,128], index: 2, kind: input, shape index: {}]   ;;  %s5278_s3 = inlined_call_operand.vmem [shape: f32[128,5], index: 3, kind: input, shape index: {}]   ;;  %s5279_s4 = inlined_call_operand.hbm [shape: f32[1,5], index: 4, kind: input, shape index: {}]   ;;  %s5280_s5 = inlined_call_operand.hbm [shape: f32[2,5], index: 5, kind: output, shape index: {}]  }
   0x1   :  { %11 = vsyncpa [#allocation6], 0 }
   0x2   :  { %12 = vsyncpa [#allocation4], 0  ;;  %s5094_s18 = smov [#allocation5]   ;;  %s5095_s20 = smov [#allocation2]  }
   0x3   :  { %s33_s19 = sshll.u32 %s5094_s18, 4  ;;  %s20_s21 = sshll.u32 %s5095_s20, 4  ;;  %s34_s19 = int_to_ptr.vmem [resolvable:$true] %s33_s19  ;;  %s21_s21 = int_to_ptr.vmem [resolvable:$true] %s20_s21 }
   0x4   :  { %s5016_s22 = scalar_lea.vmem %s34_s19, 16  ;;  %s5020_s23 = scalar_lea.vmem %s34_s19, 32 }
   0x5   :  { %p5017_p0 = scmp.ne.s32.totalorder %s34_s19, %s5016_s22  ;;  %p5021_p1 = scmp.lt.s32.totalorder %s34_s19, %s34_s19 }
   0x6   :  { %p5022_p2 = scmp.lt.s32.totalorder %s5020_s23, %s5016_s22 }
   0x8   :  { %p5023_p3 = por %p5022_p2, %p5021_p1 }
   0xa   :  { %p5024_p4 = pnand %p5023_p3, %p5017_p0 }
   0xc   :  { %5027 = shalt.err (!%p5024_p4)
}
   0xd   :  { %36 = dma.hbm_to_vmem [thread:$0]  %s5277_s2, 16, %s34_s19, [#allocation6]  }
   0xe   :  { %s5036_s26 = scalar_lea.vmem %s21_s21, 131072  ;;  %p5041_p6 = scmp.lt.s32.totalorder %s21_s21, %s21_s21 }
   0xf   :  { %p5037_p5 = scmp.ne.s32.totalorder %s21_s21, %s5036_s26  ;;  %p5042_p7 = scmp.lt.s32.totalorder %s5036_s26, %s5036_s26 }
  0x11   :  { %p5043_p8 = por %p5042_p7, %p5041_p6 }
  0x13   :  { %p5044_p9 = pnand %p5043_p8, %p5037_p5 }
  0x15   :  { %5047 = shalt.err (!%p5044_p9)
}
  0x16   :  { %s5096_s27 = smov 128   ;;  %s5097_s28 = smov 8  }
  0x17   :  { %26 = dma.hbm_to_vmem [thread:$0]  %s5276_s1, 131072, %s21_s21, [#allocation3], %s5096_s27, %s5096_s27, %s5097_s28  }
  0x18   :  { %s5098_s6 = smov [#allocation7]  }
  0x19   :  { %s45_s7 = sshll.u32 %s5098_s6, 4  ;;  %s46_s7 = int_to_ptr.vmem [resolvable:$true] %s45_s7 }
  0x1a   :  { %s5056_s8 = scalar_lea.vmem %s46_s7, 16  ;;  %s5060_s9 = scalar_lea.vmem %s46_s7, 32 }
  0x1b   :  { %p5057_p10 = scmp.ne.s32.totalorder %s46_s7, %s5056_s8  ;;  %p5061_p11 = scmp.lt.s32.totalorder %s46_s7, %s46_s7 }
  0x1c   :  { %p5062_p12 = scmp.lt.s32.totalorder %s5060_s9, %s5056_s8 }
  0x1e   :  { %p5063_p13 = por %p5062_p12, %p5061_p11 }
  0x20   :  { %p5064_p0 = pnand %p5063_p13, %p5057_p10 }
  0x22   :  { %5067 = shalt.err (!%p5064_p0)
}
  0x23   :  { %48 = dma.hbm_to_vmem [thread:$0]  %s5279_s4, 16, %s46_s7, [#allocation6]  }
  0x24   :  { %5088 = dma.done.wait [#allocation3], 131072  }
  0x25   :  { %5089 = vsyncadd [#allocation3], 4294836224 }
  0x26   :  { %5090 = dma.done.wait [#allocation6], 32  }
  0x27   :  { %5091 = vsyncadd [#allocation6], 4294967264  ;;  %v105_v0 = vld [vmem:[#allocation2 + $0xf8] sm:$0xff]  ;;  %v104_v4 = vld [vmem:[#allocation2 + $0xf0] sm:$0xff]  ;;  %v5099_v30 = vmov 1983009808   ;;  %v1125_v32 = vlaneseq }
  0x28   :  { %v137_v1 = vld [vmem:[#allocation2 + $0x1f8] sm:$0xff]  ;;  %3811 = vmatprep.subr.mxu0 %v105_v0  ;;  %v136_v5 = vld [vmem:[#allocation2 + $0x1f0] sm:$0xff]  ;;  %v103_v8 = vld [vmem:[#allocation2 + $0xe8] sm:$0xff]  ;;  %v1123_v31 = vunpack.c.l.s4 %v5099_v30  ;;  %vm5101_vm0 = vmmov 0   ;;  %vm3791_vm1 = vcmask 33792  }
  0x29   :  { %v89_v2 = vld [vmem:[#allocation2 + $0x78] sm:$0xff]  ;;  %3846 = vmatprep.subr.mxu1 %v137_v1  ;;  %v88_v6 = vld [vmem:[#allocation2 + $0x70] sm:$0xff]  ;;  %v135_v9 = vld [vmem:[#allocation2 + $0x1e8] sm:$0xff]  ;;  %v1126_v42 = vshrl.u32 %v1125_v32, 7 }
  0x2a   :  { %v121_v3 = vld [vmem:[#allocation2 + $0x178] sm:$0xff]  ;;  %3812 = vmatpush3.msra.mxu0 %v89_v2  ;;  %v120_v7 = vld [vmem:[#allocation2 + $0x170] sm:$0xff]  ;;  %v87_v10 = vld [vmem:[#allocation2 + $0x68] sm:$0xff]  ;;  %v1124_v41 = vunpack.c.0.s8 %v1123_v31 }
  0x2b   :  { %3847 = vmatpush3.msra.mxu1 %v121_v3  ;;  %3813 = vmatprep.subr.mxu0 %v104_v4  ;;  %v119_v11 = vld [vmem:[#allocation2 + $0x168] sm:$0xff]  ;;  %v102_v12 = vld [vmem:[#allocation2 + $0xe0] sm:$0xff]  ;;  %v101_v16 = vld [vmem:[#allocation2 + $0xd8] sm:$0xff] }
  0x2c   :  { %3848 = vmatprep.subr.mxu1 %v136_v5  ;;  %3814 = vmatpush3.msra.mxu0 %v88_v6  ;;  %v134_v13 = vld [vmem:[#allocation2 + $0x1e0] sm:$0xff]  ;;  %v133_v17 = vld [vmem:[#allocation2 + $0x1d8] sm:$0xff]  ;;  %v100_v20 = vld [vmem:[#allocation2 + $0xd0] sm:$0xff]  ;;  %v5142_v51 = vsub.s32 %v1124_v41, %v1126_v42 }
  0x2d   :  { %3849 = vmatpush3.msra.mxu1 %v120_v7  ;;  %3815 = vmatprep.subr.mxu0 %v103_v8  ;;  %v86_v14 = vld [vmem:[#allocation2 + $0x60] sm:$0xff]  ;;  %v85_v18 = vld [vmem:[#allocation2 + $0x58] sm:$0xff]  ;;  %v132_v21 = vld [vmem:[#allocation2 + $0x1d0] sm:$0xff] }
  0x2e   :  { %3850 = vmatprep.subr.mxu1 %v135_v9  ;;  %v118_v15 = vld [vmem:[#allocation2 + $0x160] sm:$0xff]  ;;  %3816 = vmatpush3.msra.mxu0 %v87_v10  ;;  %v117_v19 = vld [vmem:[#allocation2 + $0x158] sm:$0xff]  ;;  %v84_v22 = vld [vmem:[#allocation2 + $0x50] sm:$0xff] }
  0x2f   :  { %3851 = vmatpush3.msra.mxu1 %v119_v11  ;;  %3817 = vmatprep.subr.mxu0 %v102_v12  ;;  %v116_v23 = vld [vmem:[#allocation2 + $0x150] sm:$0xff]  ;;  %v99_v24 = vld [vmem:[#allocation2 + $0xc8] sm:$0xff]  ;;  %v98_v28 = vld [vmem:[#allocation2 + $0xc0] sm:$0xff] }
  0x30   :  { %3852 = vmatprep.subr.mxu1 %v134_v13  ;;  %3818 = vmatpush3.msra.mxu0 %v86_v14  ;;  %v131_v25 = vld [vmem:[#allocation2 + $0x1c8] sm:$0xff]  ;;  %v130_v29 = vld [vmem:[#allocation2 + $0x1c0] sm:$0xff]  ;;  %v97_v35 = vld [vmem:[#allocation2 + $0xb8] sm:$0xff] }
  0x31   :  { %3853 = vmatpush3.msra.mxu1 %v118_v15  ;;  %3819 = vmatprep.subr.mxu0 %v101_v16  ;;  %v83_v26 = vld [vmem:[#allocation2 + $0x48] sm:$0xff]  ;;  %v82_v33 = vld [vmem:[#allocation2 + $0x40] sm:$0xff]  ;;  %v129_v36 = vld [vmem:[#allocation2 + $0x1b8] sm:$0xff] }
  0x32   :  { %3854 = vmatprep.subr.mxu1 %v133_v17  ;;  %3820 = vmatpush3.msra.mxu0 %v85_v18  ;;  %v115_v27 = vld [vmem:[#allocation2 + $0x148] sm:$0xff]  ;;  %v114_v34 = vld [vmem:[#allocation2 + $0x140] sm:$0xff]  ;;  %v81_v37 = vld [vmem:[#allocation2 + $0x38] sm:$0xff] }
  0x33   :  { %3855 = vmatpush3.msra.mxu1 %v117_v19  ;;  %3821 = vmatprep.subr.mxu0 %v100_v20  ;;  %v113_v38 = vld [vmem:[#allocation2 + $0x138] sm:$0xff]  ;;  %v96_v39 = vld [vmem:[#allocation2 + $0xb0] sm:$0xff]  ;;  %v95_v45 = vld [vmem:[#allocation2 + $0xa8] sm:$0xff] }
  0x34   :  { %3856 = vmatprep.subr.mxu1 %v132_v21  ;;  %3822 = vmatpush3.msra.mxu0 %v84_v22  ;;  %v128_v40 = vld [vmem:[#allocation2 + $0x1b0] sm:$0xff]  ;;  %v127_v46 = vld [vmem:[#allocation2 + $0x1a8] sm:$0xff]  ;;  %v94_v49 = vld [vmem:[#allocation2 + $0xa0] sm:$0xff] }
  0x35   :  { %3857 = vmatpush3.msra.mxu1 %v116_v23  ;;  %3823 = vmatprep.subr.mxu0 %v99_v24  ;;  %v80_v43 = vld [vmem:[#allocation2 + $0x30] sm:$0xff]  ;;  %v79_v47 = vld [vmem:[#allocation2 + $0x28] sm:$0xff]  ;;  %v126_v50 = vld [vmem:[#allocation2 + $0x1a0] sm:$0xff] }
  0x36   :  { %3858 = vmatprep.subr.mxu1 %v131_v25  ;;  %3824 = vmatpush3.msra.mxu0 %v83_v26  ;;  %v112_v44 = vld [vmem:[#allocation2 + $0x130] sm:$0xff]  ;;  %v111_v48 = vld [vmem:[#allocation2 + $0x128] sm:$0xff]  ;;  %v78_v52 = vld [vmem:[#allocation2 + $0x20] sm:$0xff] }
  0x37   :  { %3859 = vmatpush3.msra.mxu1 %v115_v27  ;;  %3825 = vmatprep.subr.mxu0 %v98_v28  ;;  %v110_v53 = vld [vmem:[#allocation2 + $0x120] sm:$0xff]  ;;  %v93_v55 = vld [vmem:[#allocation2 + $0x98] sm:$0xff]  ;;  %v92_v60 = vld [vmem:[#allocation2 + $0x90] sm:$0xff] }
  0x38   :  { %3860 = vmatprep.subr.mxu1 %v130_v29  ;;  %3826 = vmatpush3.msra.mxu0 %v82_v33  ;;  %v58_v54 = vld [vmem:[%s5275_s0] sm:$0xff]  ;;  %v125_v56 = vld [vmem:[#allocation2 + $0x198] sm:$0xff]  ;;  %v124_v61 = vld [vmem:[#allocation2 + $0x190] sm:$0xff] }
  0x39   :  { %3861 = vmatpush3.msra.mxu1 %v114_v34  ;;  %3827 = vmatprep.subr.mxu0 %v97_v35  ;;  %v1121_v57 = vcombine.high %v58_v54, %v58_v54  ;;  %v77_v58 = vld [vmem:[#allocation2 + $0x18] sm:$0xff]  ;;  %v1128_v62 = vrot.slane %v58_v54, %v5142_v51  ;;  %v76_v63 = vld [vmem:[#allocation2 + $0x10] sm:$0xff]  ;;  %v91_v1 = vld [vmem:[#allocation2 + $0x88] sm:$0xff] }
  0x3a   :  { %3862 = vmatprep.subr.mxu1 %v129_v36  ;;  %3828 = vmatpush3.msra.mxu0 %v81_v37  ;;  %v109_v59 = vld [vmem:[#allocation2 + $0x118] sm:$0xff]  ;;  %v108_v0 = vld [vmem:[#allocation2 + $0x110] sm:$0xff]  ;;  %v123_v2 = vld [vmem:[#allocation2 + $0x188] sm:$0xff] }
  0x3b   :  { %3863 = vmatpush3.msra.mxu1 %v113_v38  ;;  %3829 = vmatprep.subr.mxu0 %v96_v39  ;;  %v1135_v3 = vrot.slane %v1121_v57, %v5142_v51  ;;  %v75_v4 = vld [vmem:[#allocation2 + $0x8] sm:$0xff]  ;;  %v90_v6 = vld [vmem:[#allocation2 + $0x80] sm:$0xff]  ;;  %v1136_v8 = vcombine.high %v1128_v62, %v1128_v62  ;;  %v169_v12 = vld [vmem:[#allocation2 + $0x2f8] sm:$0xff] }
  0x3c   :  { %3864 = vmatprep.subr.mxu1 %v128_v40  ;;  %3830 = vmatpush3.msra.mxu0 %v80_v43  ;;  %v107_v5 = vld [vmem:[#allocation2 + $0x108] sm:$0xff]  ;;  %v122_v7 = vld [vmem:[#allocation2 + $0x180] sm:$0xff]  ;;  %v201_v13 = vld [vmem:[#allocation2 + $0x3f8] sm:$0xff] }
  0x3d   :  { %3865 = vmatpush3.msra.mxu1 %v112_v44  ;;  %3831 = vmatprep.subr.mxu0 %v95_v45  ;;  %v74_v9 = vld [vmem:[#allocation2] sm:$0xff]  ;;  %v1137_v11 = vcombine.high %v1135_v3, %v1135_v3  ;;  %v153_v14 = vld [vmem:[#allocation2 + $0x278] sm:$0xff]  ;;  %v168_v16 = vld [vmem:[#allocation2 + $0x2f0] sm:$0xff] }
  0x3e   :  { %3866 = vmatprep.subr.mxu1 %v127_v46  ;;  %3832 = vmatpush3.msra.mxu0 %v79_v47  ;;  %v106_v10 = vld [vmem:[#allocation2 + $0x100] sm:$0xff]  ;;  %v185_v15 = vld [vmem:[#allocation2 + $0x378] sm:$0xff]  ;;  %v200_v17 = vld [vmem:[#allocation2 + $0x3f0] sm:$0xff] }
  0x3f   :  { %3867 = vmatpush3.msra.mxu1 %v111_v48  ;;  %3833 = vmatprep.subr.mxu0 %v94_v49  ;;  %v152_v18 = vld [vmem:[#allocation2 + $0x270] sm:$0xff]  ;;  %v167_v20 = vld [vmem:[#allocation2 + $0x2e8] sm:$0xff]  ;;  %v166_v24 = vld [vmem:[#allocation2 + $0x2e0] sm:$0xff] }
  0x40   :  { %3868 = vmatprep.subr.mxu1 %v126_v50  ;;  %3834 = vmatpush3.msra.mxu0 %v78_v52  ;;  %v184_v19 = vld [vmem:[#allocation2 + $0x370] sm:$0xff]  ;;  %v199_v21 = vld [vmem:[#allocation2 + $0x3e8] sm:$0xff]  ;;  %v198_v25 = vld [vmem:[#allocation2 + $0x3e0] sm:$0xff] }
  0x41   :  { %3869 = vmatpush3.msra.mxu1 %v110_v53  ;;  %3835 = vmatprep.subr.mxu0 %v93_v55  ;;  %v151_v22 = vld [vmem:[#allocation2 + $0x268] sm:$0xff]  ;;  %v150_v26 = vld [vmem:[#allocation2 + $0x260] sm:$0xff]  ;;  %v165_v28 = vld [vmem:[#allocation2 + $0x2d8] sm:$0xff] }
  0x42   :  { %3870 = vmatprep.subr.mxu1 %v125_v56  ;;  %3836 = vmatpush3.msra.mxu0 %v77_v58  ;;  %v183_v23 = vld [vmem:[#allocation2 + $0x368] sm:$0xff]  ;;  %v182_v27 = vld [vmem:[#allocation2 + $0x360] sm:$0xff]  ;;  %v197_v29 = vld [vmem:[#allocation2 + $0x3d8] sm:$0xff] }
  0x43   :  { %3871 = vmatpush3.msra.mxu1 %v109_v59  ;;  %3837 = vmatprep.subr.mxu0 %v92_v60  ;;  %v149_v30 = vld [vmem:[#allocation2 + $0x258] sm:$0xff]  ;;  %v164_v32 = vld [vmem:[#allocation2 + $0x2d0] sm:$0xff]  ;;  %v163_v36 = vld [vmem:[#allocation2 + $0x2c8] sm:$0xff] }
  0x44   :  { %3872 = vmatprep.subr.mxu1 %v124_v61  ;;  %3838 = vmatpush3.msra.mxu0 %v76_v63  ;;  %v181_v31 = vld [vmem:[#allocation2 + $0x358] sm:$0xff]  ;;  %v196_v33 = vld [vmem:[#allocation2 + $0x3d0] sm:$0xff]  ;;  %v195_v37 = vld [vmem:[#allocation2 + $0x3c8] sm:$0xff] }
  0x45   :  { %3873 = vmatpush3.msra.mxu1 %v108_v0  ;;  %3839 = vmatprep.subr.mxu0 %v91_v1  ;;  %v148_v34 = vld [vmem:[#allocation2 + $0x250] sm:$0xff]  ;;  %v147_v38 = vld [vmem:[#allocation2 + $0x248] sm:$0xff]  ;;  %v162_v40 = vld [vmem:[#allocation2 + $0x2c0] sm:$0xff] }
  0x46   :  { %3874 = vmatprep.subr.mxu1 %v123_v2  ;;  %3840 = vmatpush3.msra.mxu0 %v75_v4  ;;  %v180_v35 = vld [vmem:[#allocation2 + $0x350] sm:$0xff]  ;;  %v179_v39 = vld [vmem:[#allocation2 + $0x348] sm:$0xff]  ;;  %v194_v41 = vld [vmem:[#allocation2 + $0x3c0] sm:$0xff] }
  0x47   :  { %3875 = vmatpush3.msra.mxu1 %v107_v5  ;;  %3841 = vmatprep.subr.mxu0 %v90_v6  ;;  %v146_v42 = vld [vmem:[#allocation2 + $0x240] sm:$0xff]  ;;  %v161_v44 = vld [vmem:[#allocation2 + $0x2b8] sm:$0xff]  ;;  %v160_v48 = vld [vmem:[#allocation2 + $0x2b0] sm:$0xff] }
  0x48   :  { %3876 = vmatprep.subr.mxu1 %v122_v7  ;;  %3842 = vmatpush3.msra.mxu0 %v74_v9  ;;  %v178_v43 = vld [vmem:[#allocation2 + $0x340] sm:$0xff]  ;;  %v193_v45 = vld [vmem:[#allocation2 + $0x3b8] sm:$0xff]  ;;  %v192_v49 = vld [vmem:[#allocation2 + $0x3b0] sm:$0xff] }
  0x49   :  { %1521 = vmatprep.mubr.f32.mxu0 %v1136_v8  ;;  %3877 = vmatpush3.msra.mxu1 %v106_v10  ;;  %v145_v46 = vld [vmem:[#allocation2 + $0x238] sm:$0xff]  ;;  %v144_v50 = vld [vmem:[#allocation2 + $0x230] sm:$0xff]  ;;  %v159_v53 = vld [vmem:[#allocation2 + $0x2a8] sm:$0xff] }
  0x4a   :  { %1522 = vmatmul.mubr.f32.vlgmr.msra.gmra.mxu0 %v1128_v62  ;;  %1591 = vmatprep.mubr.f32.mxu1 %v1137_v11  ;;  %v177_v47 = vld [vmem:[#allocation2 + $0x338] sm:$0xff]  ;;  %v176_v52 = vld [vmem:[#allocation2 + $0x330] sm:$0xff]  ;;  %v191_v54 = vld [vmem:[#allocation2 + $0x3a8] sm:$0xff] }
  0x4b   :  { %3881 = vmatprep.subr.mxu0 %v169_v12  ;;  %3916 = vmatprep.subr.mxu1 %v201_v13  ;;  %v143_v55 = vld [vmem:[#allocation2 + $0x228] sm:$0xff]  ;;  %v158_v58 = vld [vmem:[#allocation2 + $0x2a0] sm:$0xff]  ;;  %v157_v62 = vld [vmem:[#allocation2 + $0x298] sm:$0xff] }
  0x4c   :  { %1592 = vmatmul.mubr.f32.vlgmr.msra.gmra.mxu1 %v1135_v3  ;;  %3882 = vmatpush3.msra.mxu0 %v153_v14  ;;  %v175_v56 = vld [vmem:[#allocation2 + $0x328] sm:$0xff]  ;;  %v190_v59 = vld [vmem:[#allocation2 + $0x3a0] sm:$0xff]  ;;  %v189_v63 = vld [vmem:[#allocation2 + $0x398] sm:$0xff] }
  0x4d   :  { %3917 = vmatpush3.msra.mxu1 %v185_v15  ;;  %3883 = vmatprep.subr.mxu0 %v168_v16  ;;  %v59_v57 = vld [vmem:[%s5275_s0 + $0x8] sm:$0xff]  ;;  %v142_v60 = vld [vmem:[#allocation2 + $0x220] sm:$0xff]  ;;  %v141_v1 = vld [vmem:[#allocation2 + $0x218] sm:$0xff] }
  0x4e   :  { %3918 = vmatprep.subr.mxu1 %v200_v17  ;;  %3884 = vmatpush3.msra.mxu0 %v152_v18  ;;  %v174_v61 = vld [vmem:[#allocation2 + $0x320] sm:$0xff]  ;;  %v1138_v0 = vcombine.high %v59_v57, %v59_v57  ;;  %v173_v2 = vld [vmem:[#allocation2 + $0x318] sm:$0xff]  ;;  %v156_v3 = vld [vmem:[#allocation2 + $0x290] sm:$0xff]  ;;  %v1145_v5 = vrot.slane %v59_v57, %v5142_v51 }
  0x4f   :  { %3919 = vmatpush3.msra.mxu1 %v184_v19  ;;  %3885 = vmatprep.subr.mxu0 %v167_v20  ;;  %v188_v4 = vld [vmem:[#allocation2 + $0x390] sm:$0xff]  ;;  %v155_v8 = vld [vmem:[#allocation2 + $0x288] sm:$0xff]  ;;  %v154_v13 = vld [vmem:[#allocation2 + $0x280] sm:$0xff] }
  0x50   :  { %3920 = vmatprep.subr.mxu1 %v199_v21  ;;  %3886 = vmatpush3.msra.mxu0 %v151_v22  ;;  %v140_v6 = vld [vmem:[#allocation2 + $0x210] sm:$0xff]  ;;  %v187_v9 = vld [vmem:[#allocation2 + $0x388] sm:$0xff]  ;;  %v1152_v10 = vrot.slane %v1138_v0, %v5142_v51  ;;  %v186_v14 = vld [vmem:[#allocation2 + $0x380] sm:$0xff]  ;;  %v1153_v15 = vcombine.high %v1145_v5, %v1145_v5 }
  0x51   :  { %3921 = vmatpush3.msra.mxu1 %v183_v23  ;;  %3887 = vmatprep.subr.mxu0 %v166_v24  ;;  %v172_v7 = vld [vmem:[#allocation2 + $0x310] sm:$0xff]  ;;  %v139_v11 = vld [vmem:[#allocation2 + $0x208] sm:$0xff]  ;;  %v138_v16 = vld [vmem:[#allocation2 + $0x200] sm:$0xff] }
  0x52   :  { %3922 = vmatprep.subr.mxu1 %v198_v25  ;;  %3888 = vmatpush3.msra.mxu0 %v150_v26  ;;  %v171_v12 = vld [vmem:[#allocation2 + $0x308] sm:$0xff]  ;;  %v170_v17 = vld [vmem:[#allocation2 + $0x300] sm:$0xff]  ;;  %v1154_v18 = vcombine.high %v1152_v10, %v1152_v10  ;;  %v233_v19 = vld [vmem:[#allocation2 + $0x4f8] sm:$0xff] }
  0x53   :  { %3923 = vmatpush3.msra.mxu1 %v182_v27  ;;  %3889 = vmatprep.subr.mxu0 %v165_v28  ;;  %v265_v20 = vld [vmem:[#allocation2 + $0x5f8] sm:$0xff]  ;;  %v232_v23 = vld [vmem:[#allocation2 + $0x4f0] sm:$0xff]  ;;  %v231_v27 = vld [vmem:[#allocation2 + $0x4e8] sm:$0xff] }
  0x54   :  { %3924 = vmatprep.subr.mxu1 %v197_v29  ;;  %3890 = vmatpush3.msra.mxu0 %v149_v30  ;;  %v217_v21 = vld [vmem:[#allocation2 + $0x478] sm:$0xff]  ;;  %v264_v24 = vld [vmem:[#allocation2 + $0x5f0] sm:$0xff]  ;;  %v263_v28 = vld [vmem:[#allocation2 + $0x5e8] sm:$0xff] }
  0x55   :  { %3925 = vmatpush3.msra.mxu1 %v181_v31  ;;  %3891 = vmatprep.subr.mxu0 %v164_v32  ;;  %v249_v22 = vld [vmem:[#allocation2 + $0x578] sm:$0xff]  ;;  %v216_v25 = vld [vmem:[#allocation2 + $0x470] sm:$0xff]  ;;  %v215_v29 = vld [vmem:[#allocation2 + $0x468] sm:$0xff] }
  0x56   :  { %3926 = vmatprep.subr.mxu1 %v196_v33  ;;  %3892 = vmatpush3.msra.mxu0 %v148_v34  ;;  %v248_v26 = vld [vmem:[#allocation2 + $0x570] sm:$0xff]  ;;  %v247_v30 = vld [vmem:[#allocation2 + $0x568] sm:$0xff]  ;;  %v230_v31 = vld [vmem:[#allocation2 + $0x4e0] sm:$0xff] }
  0x57   :  { %3927 = vmatpush3.msra.mxu1 %v180_v35  ;;  %3893 = vmatprep.subr.mxu0 %v163_v36  ;;  %v262_v32 = vld [vmem:[#allocation2 + $0x5e0] sm:$0xff]  ;;  %v229_v35 = vld [vmem:[#allocation2 + $0x4d8] sm:$0xff]  ;;  %v256_v57 = vld [vmem:[#allocation2 + $0x5b0] sm:$0xff] }
  0x58   :  { %3928 = vmatprep.subr.mxu1 %v195_v37  ;;  %3894 = vmatpush3.msra.mxu0 %v147_v38  ;;  %v214_v33 = vld [vmem:[#allocation2 + $0x460] sm:$0xff]  ;;  %v261_v36 = vld [vmem:[#allocation2 + $0x5d8] sm:$0xff]  ;;  %v60_v0 = vld [vmem:[%s5275_s0 + $0x10] sm:$0xff] }
  0x59   :  { %3929 = vmatpush3.msra.mxu1 %v179_v39  ;;  %3895 = vmatprep.subr.mxu0 %v162_v40  ;;  %v246_v34 = vld [vmem:[#allocation2 + $0x560] sm:$0xff]  ;;  %v213_v37 = vld [vmem:[#allocation2 + $0x458] sm:$0xff]  ;;  %v228_v39 = vld [vmem:[#allocation2 + $0x4d0] sm:$0xff] }
  0x5a   :  { %3930 = vmatprep.subr.mxu1 %v194_v41  ;;  %3896 = vmatpush3.msra.mxu0 %v146_v42  ;;  %v245_v38 = vld [vmem:[#allocation2 + $0x558] sm:$0xff]  ;;  %v260_v40 = vld [vmem:[#allocation2 + $0x5d0] sm:$0xff] }
  0x5b   :  { %3931 = vmatpush3.msra.mxu1 %v178_v43  ;;  %3897 = vmatprep.subr.mxu0 %v161_v44  ;;  %v212_v41 = vld [vmem:[#allocation2 + $0x450] sm:$0xff]  ;;  %v227_v43 = vld [vmem:[#allocation2 + $0x4c8] sm:$0xff] }
  0x5c   :  { %3932 = vmatprep.subr.mxu1 %v193_v45  ;;  %3898 = vmatpush3.msra.mxu0 %v145_v46  ;;  %v244_v42 = vld [vmem:[#allocation2 + $0x550] sm:$0xff]  ;;  %v259_v44 = vld [vmem:[#allocation2 + $0x5c8] sm:$0xff] }
  0x5d   :  { %3933 = vmatpush3.msra.mxu1 %v177_v47  ;;  %3899 = vmatprep.subr.mxu0 %v160_v48  ;;  %v211_v45 = vld [vmem:[#allocation2 + $0x448] sm:$0xff]  ;;  %v226_v47 = vld [vmem:[#allocation2 + $0x4c0] sm:$0xff] }
  0x5e   :  { %3934 = vmatprep.subr.mxu1 %v192_v49  ;;  %3900 = vmatpush3.msra.mxu0 %v144_v50  ;;  %v243_v46 = vld [vmem:[#allocation2 + $0x548] sm:$0xff]  ;;  %v258_v48 = vld [vmem:[#allocation2 + $0x5c0] sm:$0xff] }
  0x5f   :  { %3935 = vmatpush3.msra.mxu1 %v176_v52  ;;  %3901 = vmatprep.subr.mxu0 %v159_v53  ;;  %v210_v49 = vld [vmem:[#allocation2 + $0x440] sm:$0xff]  ;;  %v225_v52 = vld [vmem:[#allocation2 + $0x4b8] sm:$0xff] }
  0x60   :  { %3936 = vmatprep.subr.mxu1 %v191_v54  ;;  %3902 = vmatpush3.msra.mxu0 %v143_v55  ;;  %v242_v50 = vld [vmem:[#allocation2 + $0x540] sm:$0xff]  ;;  %v257_v53 = vld [vmem:[#allocation2 + $0x5b8] sm:$0xff] }
  0x61   :  { %3937 = vmatpush3.msra.mxu1 %v175_v56  ;;  %3903 = vmatprep.subr.mxu0 %v158_v58  ;;  %v209_v54 = vld [vmem:[#allocation2 + $0x438] sm:$0xff]  ;;  %v224_v56 = vld [vmem:[#allocation2 + $0x4b0] sm:$0xff] }
  0x62   :  { %3938 = vmatprep.subr.mxu1 %v190_v59  ;;  %3904 = vmatpush3.msra.mxu0 %v142_v60  ;;  %v241_v55 = vld [vmem:[#allocation2 + $0x538] sm:$0xff]  ;;  %v208_v58 = vld [vmem:[#allocation2 + $0x430] sm:$0xff]  ;;  %v223_v60 = vld [vmem:[#allocation2 + $0x4a8] sm:$0xff] }
  0x63   :  { %3939 = vmatpush3.msra.mxu1 %v174_v61  ;;  %3905 = vmatprep.subr.mxu0 %v157_v62  ;;  %v240_v59 = vld [vmem:[#allocation2 + $0x530] sm:$0xff]  ;;  %v255_v61 = vld [vmem:[#allocation2 + $0x5a8] sm:$0xff] }
  0x64   :  { %3940 = vmatprep.subr.mxu1 %v189_v63  ;;  %3906 = vmatpush3.msra.mxu0 %v141_v1  ;;  %v207_v62 = vld [vmem:[#allocation2 + $0x428] sm:$0xff]  ;;  %v222_v1 = vld [vmem:[#allocation2 + $0x4a0] sm:$0xff] }
  0x65   :  { %3941 = vmatpush3.msra.mxu1 %v173_v2  ;;  %3907 = vmatprep.subr.mxu0 %v156_v3  ;;  %v239_v63 = vld [vmem:[#allocation2 + $0x528] sm:$0xff]  ;;  %v254_v2 = vld [vmem:[#allocation2 + $0x5a0] sm:$0xff] }
  0x66   :  { %3942 = vmatprep.subr.mxu1 %v188_v4  ;;  %3908 = vmatpush3.msra.mxu0 %v140_v6  ;;  %v206_v3 = vld [vmem:[#allocation2 + $0x420] sm:$0xff]  ;;  %v253_v6 = vld [vmem:[#allocation2 + $0x598] sm:$0xff] }
  0x67   :  { %3943 = vmatpush3.msra.mxu1 %v172_v7  ;;  %3909 = vmatprep.subr.mxu0 %v155_v8  ;;  %v238_v4 = vld [vmem:[#allocation2 + $0x520] sm:$0xff]  ;;  %v1155_v7 = vcombine.high %v60_v0, %v60_v0  ;;  %v205_v8 = vld [vmem:[#allocation2 + $0x418] sm:$0xff] }
  0x68   :  { %3944 = vmatprep.subr.mxu1 %v187_v9  ;;  %3910 = vmatpush3.msra.mxu0 %v139_v11  ;;  %v237_v9 = vld [vmem:[#allocation2 + $0x518] sm:$0xff]  ;;  %v252_v11 = vld [vmem:[#allocation2 + $0x590] sm:$0xff] }
  0x69   :  { %3945 = vmatpush3.msra.mxu1 %v171_v12  ;;  %3911 = vmatprep.subr.mxu0 %v154_v13  ;;  %v1162_v12 = vrot.slane %v60_v0, %v5142_v51  ;;  %v204_v13 = vld [vmem:[#allocation2 + $0x410] sm:$0xff] }
  0x6a   :  { %3946 = vmatprep.subr.mxu1 %v186_v14  ;;  %3912 = vmatpush3.msra.mxu0 %v138_v16  ;;  %v236_v14 = vld [vmem:[#allocation2 + $0x510] sm:$0xff]  ;;  %v251_v16 = vld [vmem:[#allocation2 + $0x588] sm:$0xff] }
  0x6b   :  { %1661 = vmatprep.mubr.f32.mxu0 %v1153_v15  ;;  %3947 = vmatpush3.msra.mxu1 %v170_v17  ;;  %v219_v15 = vld [vmem:[#allocation2 + $0x488] sm:$0xff]  ;;  %v1169_v17 = vrot.slane %v1155_v7, %v5142_v51  ;;  %v320_v0 = vld [vmem:[#allocation2 + $0x7b0] sm:$0xff]  ;;  %v61_v7 = vld [vmem:[%s5275_s0 + $0x18] sm:$0xff] }
  0x6c   :  { %1662 = vmatmul.mubr.f32.vlgmr.msra.gmra.mxu0 %v1145_v5  ;;  %1731 = vmatprep.mubr.f32.mxu1 %v1154_v18  ;;  %v221_v5 = vld [vmem:[#allocation2 + $0x498] sm:$0xff]  ;;  %v203_v18 = vld [vmem:[#allocation2 + $0x408] sm:$0xff] }
  0x6d   :  { %3951 = vmatprep.subr.mxu0 %v233_v19  ;;  %3986 = vmatprep.subr.mxu1 %v265_v20  ;;  %v235_v19 = vld [vmem:[#allocation2 + $0x508] sm:$0xff]  ;;  %v218_v20 = vld [vmem:[#allocation2 + $0x480] sm:$0xff] }
  0x6e   :  { %1732 = vmatmul.mubr.f32.vlgmr.msra.gmra.mxu1 %v1152_v10  ;;  %3952 = vmatpush3.msra.mxu0 %v217_v21  ;;  %v220_v10 = vld [vmem:[#allocation2 + $0x490] sm:$0xff]  ;;  %v250_v21 = vld [vmem:[#allocation2 + $0x580] sm:$0xff] }
  0x6f   :  { %3987 = vmatpush3.msra.mxu1 %v249_v22  ;;  %3953 = vmatprep.subr.mxu0 %v232_v23  ;;  %v1170_v22 = vcombine.high %v1162_v12, %v1162_v12  ;;  %v202_v23 = vld [vmem:[#allocation2 + $0x400] sm:$0xff] }
  0x70   :  { %3988 = vmatprep.subr.mxu1 %v264_v24  ;;  %3954 = vmatpush3.msra.mxu0 %v216_v25  ;;  %v234_v24 = vld [vmem:[#allocation2 + $0x500] sm:$0xff]  ;;  %v1171_v25 = vcombine.high %v1169_v17, %v1169_v17 }
  0x71   :  { %3989 = vmatpush3.msra.mxu1 %v248_v26  ;;  %3955 = vmatprep.subr.mxu0 %v231_v27  ;;  %v297_v26 = vld [vmem:[#allocation2 + $0x6f8] sm:$0xff] }
  0x72   :  { %3990 = vmatprep.subr.mxu1 %v263_v28  ;;  %3956 = vmatpush3.msra.mxu0 %v215_v29  ;;  %v329_v27 = vld [vmem:[#allocation2 + $0x7f8] sm:$0xff] }
  0x73   :  { %3991 = vmatpush3.msra.mxu1 %v247_v30  ;;  %3957 = vmatprep.subr.mxu0 %v230_v31  ;;  %v281_v28 = vld [vmem:[#allocation2 + $0x678] sm:$0xff]  ;;  %v296_v30 = vld [vmem:[#allocation2 + $0x6f0] sm:$0xff] }
  0x74   :  { %3992 = vmatprep.subr.mxu1 %v262_v32  ;;  %3958 = vmatpush3.msra.mxu0 %v214_v33  ;;  %v313_v29 = vld [vmem:[#allocation2 + $0x778] sm:$0xff]  ;;  %v328_v31 = vld [vmem:[#allocation2 + $0x7f0] sm:$0xff] }
  0x75   :  { %3993 = vmatpush3.msra.mxu1 %v246_v34  ;;  %3959 = vmatprep.subr.mxu0 %v229_v35  ;;  %v280_v32 = vld [vmem:[#allocation2 + $0x670] sm:$0xff]  ;;  %v295_v34 = vld [vmem:[#allocation2 + $0x6e8] sm:$0xff] }
  0x76   :  { %3994 = vmatprep.subr.mxu1 %v261_v36  ;;  %3960 = vmatpush3.msra.mxu0 %v213_v37  ;;  %v312_v33 = vld [vmem:[#allocation2 + $0x770] sm:$0xff]  ;;  %v327_v35 = vld [vmem:[#allocation2 + $0x7e8] sm:$0xff] }
  0x77   :  { %3995 = vmatpush3.msra.mxu1 %v245_v38  ;;  %3961 = vmatprep.subr.mxu0 %v228_v39  ;;  %v279_v36 = vld [vmem:[#allocation2 + $0x668] sm:$0xff]  ;;  %v294_v38 = vld [vmem:[#allocation2 + $0x6e0] sm:$0xff] }
  0x78   :  { %3996 = vmatprep.subr.mxu1 %v260_v40  ;;  %3962 = vmatpush3.msra.mxu0 %v212_v41  ;;  %v311_v37 = vld [vmem:[#allocation2 + $0x768] sm:$0xff]  ;;  %v326_v39 = vld [vmem:[#allocation2 + $0x7e0] sm:$0xff] }
  0x79   :  { %3997 = vmatpush3.msra.mxu1 %v244_v42  ;;  %3963 = vmatprep.subr.mxu0 %v227_v43  ;;  %v278_v40 = vld [vmem:[#allocation2 + $0x660] sm:$0xff]  ;;  %v293_v42 = vld [vmem:[#allocation2 + $0x6d8] sm:$0xff] }
  0x7a   :  { %3998 = vmatprep.subr.mxu1 %v259_v44  ;;  %3964 = vmatpush3.msra.mxu0 %v211_v45  ;;  %v310_v41 = vld [vmem:[#allocation2 + $0x760] sm:$0xff]  ;;  %v325_v43 = vld [vmem:[#allocation2 + $0x7d8] sm:$0xff] }
  0x7b   :  { %3999 = vmatpush3.msra.mxu1 %v243_v46  ;;  %3965 = vmatprep.subr.mxu0 %v226_v47  ;;  %v277_v44 = vld [vmem:[#allocation2 + $0x658] sm:$0xff]  ;;  %v292_v46 = vld [vmem:[#allocation2 + $0x6d0] sm:$0xff] }
  0x7c   :  { %4000 = vmatprep.subr.mxu1 %v258_v48  ;;  %3966 = vmatpush3.msra.mxu0 %v210_v49  ;;  %v309_v45 = vld [vmem:[#allocation2 + $0x758] sm:$0xff]  ;;  %v324_v47 = vld [vmem:[#allocation2 + $0x7d0] sm:$0xff] }
  0x7d   :  { %4001 = vmatpush3.msra.mxu1 %v242_v50  ;;  %3967 = vmatprep.subr.mxu0 %v225_v52  ;;  %v276_v48 = vld [vmem:[#allocation2 + $0x650] sm:$0xff]  ;;  %v291_v50 = vld [vmem:[#allocation2 + $0x6c8] sm:$0xff] }
  0x7e   :  { %4002 = vmatprep.subr.mxu1 %v257_v53  ;;  %3968 = vmatpush3.msra.mxu0 %v209_v54  ;;  %v308_v49 = vld [vmem:[#allocation2 + $0x750] sm:$0xff]  ;;  %v323_v52 = vld [vmem:[#allocation2 + $0x7c8] sm:$0xff] }
  0x7f   :  { %4003 = vmatpush3.msra.mxu1 %v241_v55  ;;  %3969 = vmatprep.subr.mxu0 %v224_v56  ;;  %v275_v53 = vld [vmem:[#allocation2 + $0x648] sm:$0xff]  ;;  %v290_v55 = vld [vmem:[#allocation2 + $0x6c0] sm:$0xff] }
  0x80   :  { %4004 = vmatprep.subr.mxu1 %v256_v57  ;;  %3970 = vmatpush3.msra.mxu0 %v208_v58  ;;  %v307_v54 = vld [vmem:[#allocation2 + $0x748] sm:$0xff]  ;;  %v322_v56 = vld [vmem:[#allocation2 + $0x7c0] sm:$0xff] }
  0x81   :  { %4005 = vmatpush3.msra.mxu1 %v240_v59  ;;  %3971 = vmatprep.subr.mxu0 %v223_v60  ;;  %v274_v57 = vld [vmem:[#allocation2 + $0x640] sm:$0xff]  ;;  %v289_v59 = vld [vmem:[#allocation2 + $0x6b8] sm:$0xff] }
  0x82   :  { %4006 = vmatprep.subr.mxu1 %v255_v61  ;;  %3972 = vmatpush3.msra.mxu0 %v207_v62  ;;  %v306_v58 = vld [vmem:[#allocation2 + $0x740] sm:$0xff]  ;;  %v321_v60 = vld [vmem:[#allocation2 + $0x7b8] sm:$0xff] }
  0x83   :  { %4007 = vmatpush3.msra.mxu1 %v239_v63  ;;  %3973 = vmatprep.subr.mxu0 %v222_v1  ;;  %v273_v61 = vld [vmem:[#allocation2 + $0x638] sm:$0xff]  ;;  %v288_v63 = vld [vmem:[#allocation2 + $0x6b0] sm:$0xff] }
  0x84   :  { %4008 = vmatprep.subr.mxu1 %v254_v2  ;;  %3974 = vmatpush3.msra.mxu0 %v206_v3  ;;  %v305_v62 = vld [vmem:[#allocation2 + $0x738] sm:$0xff]  ;;  %v272_v1 = vld [vmem:[#allocation2 + $0x630] sm:$0xff]  ;;  %v287_v3 = vld [vmem:[#allocation2 + $0x6a8] sm:$0xff] }
  0x85   :  { %4009 = vmatpush3.msra.mxu1 %v238_v4  ;;  %3975 = vmatprep.subr.mxu0 %v221_v5  ;;  %v304_v2 = vld [vmem:[#allocation2 + $0x730] sm:$0xff]  ;;  %v319_v4 = vld [vmem:[#allocation2 + $0x7a8] sm:$0xff] }
  0x86   :  { %4010 = vmatprep.subr.mxu1 %v253_v6  ;;  %3976 = vmatpush3.msra.mxu0 %v205_v8  ;;  %v271_v5 = vld [vmem:[#allocation2 + $0x628] sm:$0xff]  ;;  %v286_v8 = vld [vmem:[#allocation2 + $0x6a0] sm:$0xff] }
  0x87   :  { %4011 = vmatpush3.msra.mxu1 %v237_v9  ;;  %3977 = vmatprep.subr.mxu0 %v220_v10  ;;  %v303_v6 = vld [vmem:[#allocation2 + $0x728] sm:$0xff]  ;;  %v318_v9 = vld [vmem:[#allocation2 + $0x7a0] sm:$0xff] }
  0x88   :  { %4012 = vmatprep.subr.mxu1 %v252_v11  ;;  %3978 = vmatpush3.msra.mxu0 %v204_v13  ;;  %v270_v10 = vld [vmem:[#allocation2 + $0x620] sm:$0xff]  ;;  %v317_v13 = vld [vmem:[#allocation2 + $0x798] sm:$0xff] }
  0x89   :  { %4013 = vmatpush3.msra.mxu1 %v236_v14  ;;  %3979 = vmatprep.subr.mxu0 %v219_v15  ;;  %v302_v11 = vld [vmem:[#allocation2 + $0x720] sm:$0xff]  ;;  %v1172_v14 = vcombine.high %v61_v7, %v61_v7  ;;  %v269_v15 = vld [vmem:[#allocation2 + $0x618] sm:$0xff] }
  0x8a   :  { %4014 = vmatprep.subr.mxu1 %v251_v16  ;;  %3980 = vmatpush3.msra.mxu0 %v203_v18  ;;  %v301_v16 = vld [vmem:[#allocation2 + $0x718] sm:$0xff]  ;;  %v316_v18 = vld [vmem:[#allocation2 + $0x790] sm:$0xff] }
  0x8b   :  { %4015 = vmatpush3.msra.mxu1 %v235_v19  ;;  %3981 = vmatprep.subr.mxu0 %v218_v20  ;;  %v1179_v19 = vrot.slane %v61_v7, %v5142_v51  ;;  %v268_v20 = vld [vmem:[#allocation2 + $0x610] sm:$0xff] }
  0x8c   :  { %4016 = vmatprep.subr.mxu1 %v250_v21  ;;  %3982 = vmatpush3.msra.mxu0 %v202_v23  ;;  %v300_v21 = vld [vmem:[#allocation2 + $0x710] sm:$0xff]  ;;  %v315_v23 = vld [vmem:[#allocation2 + $0x788] sm:$0xff] }
  0x8d   :  { %1801 = vmatprep.mubr.f32.mxu0 %v1170_v22  ;;  %4017 = vmatpush3.msra.mxu1 %v234_v24  ;;  %v283_v22 = vld [vmem:[#allocation2 + $0x688] sm:$0xff]  ;;  %v1186_v24 = vrot.slane %v1172_v14, %v5142_v51  ;;  %v384_v7 = vld [vmem:[#allocation2 + $0x9b0] sm:$0xff]  ;;  %v62_v14 = vld [vmem:[%s5275_s0 + $0x20] sm:$0xff] }
  0x8e   :  { %1802 = vmatmul.mubr.f32.vlgmr.msra.gmra.mxu0 %v1162_v12  ;;  %1871 = vmatprep.mubr.f32.mxu1 %v1171_v25  ;;  %v285_v12 = vld [vmem:[#allocation2 + $0x698] sm:$0xff]  ;;  %v267_v25 = vld [vmem:[#allocation2 + $0x608] sm:$0xff] }
  0x8f   :  { %4021 = vmatprep.subr.mxu0 %v297_v26  ;;  %4056 = vmatprep.subr.mxu1 %v329_v27  ;;  %v299_v26 = vld [vmem:[#allocation2 + $0x708] sm:$0xff]  ;;  %v282_v27 = vld [vmem:[#allocation2 + $0x680] sm:$0xff] }
  0x90   :  { %1872 = vmatmul.mubr.f32.vlgmr.msra.gmra.mxu1 %v1169_v17  ;;  %4022 = vmatpush3.msra.mxu0 %v281_v28  ;;  %v284_v17 = vld [vmem:[#allocation2 + $0x690] sm:$0xff]  ;;  %v314_v28 = vld [vmem:[#allocation2 + $0x780] sm:$0xff] }
  0x91   :  { %4057 = vmatpush3.msra.mxu1 %v313_v29  ;;  %4023 = vmatprep.subr.mxu0 %v296_v30  ;;  %v1187_v29 = vcombine.high %v1179_v19, %v1179_v19  ;;  %v266_v30 = vld [vmem:[#allocation2 + $0x600] sm:$0xff] }
  0x92   :  { %4058 = vmatprep.subr.mxu1 %v328_v31  ;;  %4024 = vmatpush3.msra.mxu0 %v280_v32  ;;  %v298_v31 = vld [vmem:[#allocation2 + $0x700] sm:$0xff]  ;;  %v1188_v32 = vcombine.high %v1186_v24, %v1186_v24 }
  0x93   :  { %4059 = vmatpush3.msra.mxu1 %v312_v33  ;;  %4025 = vmatprep.subr.mxu0 %v295_v34  ;;  %v361_v33 = vld [vmem:[#allocation2 + $0x8f8] sm:$0xff] }
  0x94   :  { %4060 = vmatprep.subr.mxu1 %v327_v35  ;;  %4026 = vmatpush3.msra.mxu0 %v279_v36  ;;  %v393_v34 = vld [vmem:[#allocation2 + $0x9f8] sm:$0xff] }
  0x95   :  { %4061 = vmatpush3.msra.mxu1 %v311_v37  ;;  %4027 = vmatprep.subr.mxu0 %v294_v38  ;;  %v345_v35 = vld [vmem:[#allocation2 + $0x878] sm:$0xff]  ;;  %v360_v37 = vld [vmem:[#allocation2 + $0x8f0] sm:$0xff] }
  0x96   :  { %4062 = vmatprep.subr.mxu1 %v326_v39  ;;  %4028 = vmatpush3.msra.mxu0 %v278_v40  ;;  %v377_v36 = vld [vmem:[#allocation2 + $0x978] sm:$0xff]  ;;  %v392_v38 = vld [vmem:[#allocation2 + $0x9f0] sm:$0xff] }
  0x97   :  { %4063 = vmatpush3.msra.mxu1 %v310_v41  ;;  %4029 = vmatprep.subr.mxu0 %v293_v42  ;;  %v344_v39 = vld [vmem:[#allocation2 + $0x870] sm:$0xff]  ;;  %v359_v41 = vld [vmem:[#allocation2 + $0x8e8] sm:$0xff] }
  0x98   :  { %4064 = vmatprep.subr.mxu1 %v325_v43  ;;  %4030 = vmatpush3.msra.mxu0 %v277_v44  ;;  %v376_v40 = vld [vmem:[#allocation2 + $0x970] sm:$0xff]  ;;  %v391_v42 = vld [vmem:[#allocation2 + $0x9e8] sm:$0xff] }
  0x99   :  { %4065 = vmatpush3.msra.mxu1 %v309_v45  ;;  %4031 = vmatprep.subr.mxu0 %v292_v46  ;;  %v343_v43 = vld [vmem:[#allocation2 + $0x868] sm:$0xff]  ;;  %v358_v45 = vld [vmem:[#allocation2 + $0x8e0] sm:$0xff] }
  0x9a   :  { %4066 = vmatprep.subr.mxu1 %v324_v47  ;;  %4032 = vmatpush3.msra.mxu0 %v276_v48  ;;  %v375_v44 = vld [vmem:[#allocation2 + $0x968] sm:$0xff]  ;;  %v390_v46 = vld [vmem:[#allocation2 + $0x9e0] sm:$0xff] }
  0x9b   :  { %4067 = vmatpush3.msra.mxu1 %v308_v49  ;;  %4033 = vmatprep.subr.mxu0 %v291_v50  ;;  %v342_v47 = vld [vmem:[#allocation2 + $0x860] sm:$0xff]  ;;  %v357_v49 = vld [vmem:[#allocation2 + $0x8d8] sm:$0xff] }
  0x9c   :  { %4068 = vmatprep.subr.mxu1 %v323_v52  ;;  %4034 = vmatpush3.msra.mxu0 %v275_v53  ;;  %v374_v48 = vld [vmem:[#allocation2 + $0x960] sm:$0xff]  ;;  %v389_v50 = vld [vmem:[#allocation2 + $0x9d8] sm:$0xff] }
  0x9d   :  { %4069 = vmatpush3.msra.mxu1 %v307_v54  ;;  %4035 = vmatprep.subr.mxu0 %v290_v55  ;;  %v341_v52 = vld [vmem:[#allocation2 + $0x858] sm:$0xff]  ;;  %v356_v54 = vld [vmem:[#allocation2 + $0x8d0] sm:$0xff] }
  0x9e   :  { %4070 = vmatprep.subr.mxu1 %v322_v56  ;;  %4036 = vmatpush3.msra.mxu0 %v274_v57  ;;  %v373_v53 = vld [vmem:[#allocation2 + $0x958] sm:$0xff]  ;;  %v388_v55 = vld [vmem:[#allocation2 + $0x9d0] sm:$0xff] }
  0x9f   :  { %4071 = vmatpush3.msra.mxu1 %v306_v58  ;;  %4037 = vmatprep.subr.mxu0 %v289_v59  ;;  %v340_v56 = vld [vmem:[#allocation2 + $0x850] sm:$0xff]  ;;  %v355_v58 = vld [vmem:[#allocation2 + $0x8c8] sm:$0xff] }
  0xa0   :  { %4072 = vmatprep.subr.mxu1 %v321_v60  ;;  %4038 = vmatpush3.msra.mxu0 %v273_v61  ;;  %v372_v57 = vld [vmem:[#allocation2 + $0x950] sm:$0xff]  ;;  %v387_v59 = vld [vmem:[#allocation2 + $0x9c8] sm:$0xff] }
  0xa1   :  { %4073 = vmatpush3.msra.mxu1 %v305_v62  ;;  %4039 = vmatprep.subr.mxu0 %v288_v63  ;;  %v339_v60 = vld [vmem:[#allocation2 + $0x848] sm:$0xff]  ;;  %v354_v62 = vld [vmem:[#allocation2 + $0x8c0] sm:$0xff] }
  0xa2   :  { %4074 = vmatprep.subr.mxu1 %v320_v0  ;;  %4040 = vmatpush3.msra.mxu0 %v272_v1  ;;  %v371_v61 = vld [vmem:[#allocation2 + $0x948] sm:$0xff]  ;;  %v386_v63 = vld [vmem:[#allocation2 + $0x9c0] sm:$0xff] }
  0xa3   :  { %4075 = vmatpush3.msra.mxu1 %v304_v2  ;;  %4041 = vmatprep.subr.mxu0 %v287_v3  ;;  %v338_v0 = vld [vmem:[#allocation2 + $0x840] sm:$0xff]  ;;  %v353_v2 = vld [vmem:[#allocation2 + $0x8b8] sm:$0xff] }
  0xa4   :  { %4076 = vmatprep.subr.mxu1 %v319_v4  ;;  %4042 = vmatpush3.msra.mxu0 %v271_v5  ;;  %v370_v1 = vld [vmem:[#allocation2 + $0x940] sm:$0xff]  ;;  %v385_v3 = vld [vmem:[#allocation2 + $0x9b8] sm:$0xff] }
  0xa5   :  { %4077 = vmatpush3.msra.mxu1 %v303_v6  ;;  %4043 = vmatprep.subr.mxu0 %v286_v8  ;;  %v337_v4 = vld [vmem:[#allocation2 + $0x838] sm:$0xff]  ;;  %v352_v6 = vld [vmem:[#allocation2 + $0x8b0] sm:$0xff] }
  0xa6   :  { %4078 = vmatprep.subr.mxu1 %v318_v9  ;;  %4044 = vmatpush3.msra.mxu0 %v270_v10  ;;  %v369_v5 = vld [vmem:[#allocation2 + $0x938] sm:$0xff]  ;;  %v336_v8 = vld [vmem:[#allocation2 + $0x830] sm:$0xff]  ;;  %v351_v10 = vld [vmem:[#allocation2 + $0x8a8] sm:$0xff] }
  0xa7   :  { %4079 = vmatpush3.msra.mxu1 %v302_v11  ;;  %4045 = vmatprep.subr.mxu0 %v285_v12  ;;  %v368_v9 = vld [vmem:[#allocation2 + $0x930] sm:$0xff]  ;;  %v383_v11 = vld [vmem:[#allocation2 + $0x9a8] sm:$0xff] }
  0xa8   :  { %4080 = vmatprep.subr.mxu1 %v317_v13  ;;  %4046 = vmatpush3.msra.mxu0 %v269_v15  ;;  %v335_v12 = vld [vmem:[#allocation2 + $0x828] sm:$0xff]  ;;  %v350_v15 = vld [vmem:[#allocation2 + $0x8a0] sm:$0xff] }
  0xa9   :  { %4081 = vmatpush3.msra.mxu1 %v301_v16  ;;  %4047 = vmatprep.subr.mxu0 %v284_v17  ;;  %v367_v13 = vld [vmem:[#allocation2 + $0x928] sm:$0xff]  ;;  %v382_v16 = vld [vmem:[#allocation2 + $0x9a0] sm:$0xff] }
  0xaa   :  { %4082 = vmatprep.subr.mxu1 %v316_v18  ;;  %4048 = vmatpush3.msra.mxu0 %v268_v20  ;;  %v334_v17 = vld [vmem:[#allocation2 + $0x820] sm:$0xff]  ;;  %v381_v20 = vld [vmem:[#allocation2 + $0x998] sm:$0xff] }
  0xab   :  { %4083 = vmatpush3.msra.mxu1 %v300_v21  ;;  %4049 = vmatprep.subr.mxu0 %v283_v22  ;;  %v366_v18 = vld [vmem:[#allocation2 + $0x920] sm:$0xff]  ;;  %v1189_v21 = vcombine.high %v62_v14, %v62_v14  ;;  %v333_v22 = vld [vmem:[#allocation2 + $0x818] sm:$0xff] }
  0xac   :  { %4084 = vmatprep.subr.mxu1 %v315_v23  ;;  %4050 = vmatpush3.msra.mxu0 %v267_v25  ;;  %v365_v23 = vld [vmem:[#allocation2 + $0x918] sm:$0xff]  ;;  %v380_v25 = vld [vmem:[#allocation2 + $0x990] sm:$0xff] }
  0xad   :  { %4085 = vmatpush3.msra.mxu1 %v299_v26  ;;  %4051 = vmatprep.subr.mxu0 %v282_v27  ;;  %v1196_v26 = vrot.slane %v62_v14, %v5142_v51  ;;  %v332_v27 = vld [vmem:[#allocation2 + $0x810] sm:$0xff] }
  0xae   :  { %4086 = vmatprep.subr.mxu1 %v314_v28  ;;  %4052 = vmatpush3.msra.mxu0 %v266_v30  ;;  %v364_v28 = vld [vmem:[#allocation2 + $0x910] sm:$0xff]  ;;  %v379_v30 = vld [vmem:[#allocation2 + $0x988] sm:$0xff] }
  0xaf   :  { %1941 = vmatprep.mubr.f32.mxu0 %v1187_v29  ;;  %4087 = vmatpush3.msra.mxu1 %v298_v31  ;;  %v347_v29 = vld [vmem:[#allocation2 + $0x888] sm:$0xff]  ;;  %v1203_v31 = vrot.slane %v1189_v21, %v5142_v51  ;;  %v448_v14 = vld [vmem:[#allocation2 + $0xbb0] sm:$0xff] }
  0xb0   :  { %1942 = vmatmul.mubr.f32.vlgmr.msra.gmra.mxu0 %v1179_v19  ;;  %2011 = vmatprep.mubr.f32.mxu1 %v1188_v32  ;;  %v349_v19 = vld [vmem:[#allocation2 + $0x898] sm:$0xff]  ;;  %v331_v32 = vld [vmem:[#allocation2 + $0x808] sm:$0xff] }
  0xb1   :  { %4091 = vmatprep.subr.mxu0 %v361_v33  ;;  %4126 = vmatprep.subr.mxu1 %v393_v34  ;;  %v363_v33 = vld [vmem:[#allocation2 + $0x908] sm:$0xff]  ;;  %v346_v34 = vld [vmem:[#allocation2 + $0x880] sm:$0xff] }
  0xb2   :  { %2012 = vmatmul.mubr.f32.vlgmr.msra.gmra.mxu1 %v1186_v24  ;;  %4092 = vmatpush3.msra.mxu0 %v345_v35  ;;  %v348_v24 = vld [vmem:[#allocation2 + $0x890] sm:$0xff]  ;;  %v378_v35 = vld [vmem:[#allocation2 + $0x980] sm:$0xff]  ;;  %v63_v21 = vld [vmem:[%s5275_s0 + $0x28] sm:$0xff] }
  0xb3   :  { %4127 = vmatpush3.msra.mxu1 %v377_v36  ;;  %4093 = vmatprep.subr.mxu0 %v360_v37  ;;  %v1204_v36 = vcombine.high %v1196_v26, %v1196_v26  ;;  %v330_v37 = vld [vmem:[#allocation2 + $0x800] sm:$0xff] }
  0xb4   :  { %4128 = vmatprep.subr.mxu1 %v392_v38  ;;  %4094 = vmatpush3.msra.mxu0 %v344_v39  ;;  %v362_v38 = vld [vmem:[#allocation2 + $0x900] sm:$0xff]  ;;  %v1205_v39 = vcombine.high %v1203_v31, %v1203_v31 }
  0xb5   :  { %4129 = vmatpush3.msra.mxu1 %v376_v40  ;;  %4095 = vmatprep.subr.mxu0 %v359_v41  ;;  %v425_v40 = vld [vmem:[#allocation2 + $0xaf8] sm:$0xff] }
  0xb6   :  { %4130 = vmatprep.subr.mxu1 %v391_v42  ;;  %4096 = vmatpush3.msra.mxu0 %v343_v43  ;;  %v457_v41 = vld [vmem:[#allocation2 + $0xbf8] sm:$0xff] }
  0xb7   :  { %4131 = vmatpush3.msra.mxu1 %v375_v44  ;;  %4097 = vmatprep.subr.mxu0 %v358_v45  ;;  %v409_v42 = vld [vmem:[#allocation2 + $0xa78] sm:$0xff]  ;;  %v424_v44 = vld [vmem:[#allocation2 + $0xaf0] sm:$0xff] }
  0xb8   :  { %4132 = vmatprep.subr.mxu1 %v390_v46  ;;  %4098 = vmatpush3.msra.mxu0 %v342_v47  ;;  %v441_v43 = vld [vmem:[#allocation2 + $0xb78] sm:$0xff]  ;;  %v456_v45 = vld [vmem:[#allocation2 + $0xbf0] sm:$0xff] }
  0xb9   :  { %4133 = vmatpush3.msra.mxu1 %v374_v48  ;;  %4099 = vmatprep.subr.mxu0 %v357_v49  ;;  %v408_v46 = vld [vmem:[#allocation2 + $0xa70] sm:$0xff]  ;;  %v423_v48 = vld [vmem:[#allocation2 + $0xae8] sm:$0xff] }
  0xba   :  { %4134 = vmatprep.subr.mxu1 %v389_v50  ;;  %4100 = vmatpush3.msra.mxu0 %v341_v52  ;;  %v440_v47 = vld [vmem:[#allocation2 + $0xb70] sm:$0xff]  ;;  %v455_v49 = vld [vmem:[#allocation2 + $0xbe8] sm:$0xff] }
  0xbb   :  { %4135 = vmatpush3.msra.mxu1 %v373_v53  ;;  %4101 = vmatprep.subr.mxu0 %v356_v54  ;;  %v407_v50 = vld [vmem:[#allocation2 + $0xa68] sm:$0xff]  ;;  %v422_v53 = vld [vmem:[#allocation2 + $0xae0] sm:$0xff] }
  0xbc   :  { %4136 = vmatprep.subr.mxu1 %v388_v55  ;;  %4102 = vmatpush3.msra.mxu0 %v340_v56  ;;  %v439_v52 = vld [vmem:[#allocation2 + $0xb68] sm:$0xff]  ;;  %v454_v54 = vld [vmem:[#allocation2 + $0xbe0] sm:$0xff] }
  0xbd   :  { %4137 = vmatpush3.msra.mxu1 %v372_v57  ;;  %4103 = vmatprep.subr.mxu0 %v355_v58  ;;  %v406_v55 = vld [vmem:[#allocation2 + $0xa60] sm:$0xff]  ;;  %v421_v57 = vld [vmem:[#allocation2 + $0xad8] sm:$0xff] }
  0xbe   :  { %4138 = vmatprep.subr.mxu1 %v387_v59  ;;  %4104 = vmatpush3.msra.mxu0 %v339_v60  ;;  %v438_v56 = vld [vmem:[#allocation2 + $0xb60] sm:$0xff]  ;;  %v453_v58 = vld [vmem:[#allocation2 + $0xbd8] sm:$0xff] }
  0xbf   :  { %4139 = vmatpush3.msra.mxu1 %v371_v61  ;;  %4105 = vmatprep.subr.mxu0 %v354_v62  ;;  %v405_v59 = vld [vmem:[#allocation2 + $0xa58] sm:$0xff]  ;;  %v420_v61 = vld [vmem:[#allocation2 + $0xad0] sm:$0xff] }
  0xc0   :  { %4140 = vmatprep.subr.mxu1 %v386_v63  ;;  %4106 = vmatpush3.msra.mxu0 %v338_v0  ;;  %v437_v60 = vld [vmem:[#allocation2 + $0xb58] sm:$0xff]  ;;  %v452_v62 = vld [vmem:[#allocation2 + $0xbd0] sm:$0xff] }
  0xc1   :  { %4141 = vmatpush3.msra.mxu1 %v370_v1  ;;  %4107 = vmatprep.subr.mxu0 %v353_v2  ;;  %v404_v63 = vld [vmem:[#allocation2 + $0xa50] sm:$0xff]  ;;  %v419_v1 = vld [vmem:[#allocation2 + $0xac8] sm:$0xff] }
  0xc2   :  { %4142 = vmatprep.subr.mxu1 %v385_v3  ;;  %4108 = vmatpush3.msra.mxu0 %v337_v4  ;;  %v436_v0 = vld [vmem:[#allocation2 + $0xb50] sm:$0xff]  ;;  %v451_v2 = vld [vmem:[#allocation2 + $0xbc8] sm:$0xff] }
  0xc3   :  { %4143 = vmatpush3.msra.mxu1 %v369_v5  ;;  %4109 = vmatprep.subr.mxu0 %v352_v6  ;;  %v403_v3 = vld [vmem:[#allocation2 + $0xa48] sm:$0xff]  ;;  %v418_v5 = vld [vmem:[#allocation2 + $0xac0] sm:$0xff] }
  0xc4   :  { %4144 = vmatprep.subr.mxu1 %v384_v7  ;;  %4110 = vmatpush3.msra.mxu0 %v336_v8  ;;  %v435_v4 = vld [vmem:[#allocation2 + $0xb48] sm:$0xff]  ;;  %v450_v6 = vld [vmem:[#allocation2 + $0xbc0] sm:$0xff] }
  0xc5   :  { %4145 = vmatpush3.msra.mxu1 %v368_v9  ;;  %4111 = vmatprep.subr.mxu0 %v351_v10  ;;  %v402_v7 = vld [vmem:[#allocation2 + $0xa40] sm:$0xff]  ;;  %v417_v9 = vld [vmem:[#allocation2 + $0xab8] sm:$0xff] }
  0xc6   :  { %4146 = vmatprep.subr.mxu1 %v383_v11  ;;  %4112 = vmatpush3.msra.mxu0 %v335_v12  ;;  %v434_v8 = vld [vmem:[#allocation2 + $0xb40] sm:$0xff]  ;;  %v449_v10 = vld [vmem:[#allocation2 + $0xbb8] sm:$0xff] }
  0xc7   :  { %4147 = vmatpush3.msra.mxu1 %v367_v13  ;;  %4113 = vmatprep.subr.mxu0 %v350_v15  ;;  %v401_v11 = vld [vmem:[#allocation2 + $0xa38] sm:$0xff]  ;;  %v416_v13 = vld [vmem:[#allocation2 + $0xab0] sm:$0xff] }
  0xc8   :  { %4148 = vmatprep.subr.mxu1 %v382_v16  ;;  %4114 = vmatpush3.msra.mxu0 %v334_v17  ;;  %v433_v12 = vld [vmem:[#allocation2 + $0xb38] sm:$0xff]  ;;  %v400_v15 = vld [vmem:[#allocation2 + $0xa30] sm:$0xff]  ;;  %v415_v17 = vld [vmem:[#allocation2 + $0xaa8] sm:$0xff] }
  0xc9   :  { %4149 = vmatpush3.msra.mxu1 %v366_v18  ;;  %4115 = vmatprep.subr.mxu0 %v349_v19  ;;  %v432_v16 = vld [vmem:[#allocation2 + $0xb30] sm:$0xff]  ;;  %v447_v18 = vld [vmem:[#allocation2 + $0xba8] sm:$0xff] }
  0xca   :  { %4150 = vmatprep.subr.mxu1 %v381_v20  ;;  %4116 = vmatpush3.msra.mxu0 %v333_v22  ;;  %v399_v19 = vld [vmem:[#allocation2 + $0xa28] sm:$0xff]  ;;  %v414_v22 = vld [vmem:[#allocation2 + $0xaa0] sm:$0xff] }
  0xcb   :  { %4151 = vmatpush3.msra.mxu1 %v365_v23  ;;  %4117 = vmatprep.subr.mxu0 %v348_v24  ;;  %v431_v20 = vld [vmem:[#allocation2 + $0xb28] sm:$0xff]  ;;  %v446_v23 = vld [vmem:[#allocation2 + $0xba0] sm:$0xff] }
  0xcc   :  { %4152 = vmatprep.subr.mxu1 %v380_v25  ;;  %4118 = vmatpush3.msra.mxu0 %v332_v27  ;;  %v398_v24 = vld [vmem:[#allocation2 + $0xa20] sm:$0xff]  ;;  %v445_v27 = vld [vmem:[#allocation2 + $0xb98] sm:$0xff] }
  0xcd   :  { %4153 = vmatpush3.msra.mxu1 %v364_v28  ;;  %4119 = vmatprep.subr.mxu0 %v347_v29  ;;  %v430_v25 = vld [vmem:[#allocation2 + $0xb20] sm:$0xff]  ;;  %v1206_v28 = vcombine.high %v63_v21, %v63_v21  ;;  %v397_v29 = vld [vmem:[#allocation2 + $0xa18] sm:$0xff] }
  0xce   :  { %4154 = vmatprep.subr.mxu1 %v379_v30  ;;  %4120 = vmatpush3.msra.mxu0 %v331_v32  ;;  %v429_v30 = vld [vmem:[#allocation2 + $0xb18] sm:$0xff]  ;;  %v444_v32 = vld [vmem:[#allocation2 + $0xb90] sm:$0xff] }
  0xcf   :  { %4155 = vmatpush3.msra.mxu1 %v363_v33  ;;  %4121 = vmatprep.subr.mxu0 %v346_v34  ;;  %v1213_v33 = vrot.slane %v63_v21, %v5142_v51  ;;  %v396_v34 = vld [vmem:[#allocation2 + $0xa10] sm:$0xff] }
  0xd0   :  { %4156 = vmatprep.subr.mxu1 %v378_v35  ;;  %4122 = vmatpush3.msra.mxu0 %v330_v37  ;;  %v428_v35 = vld [vmem:[#allocation2 + $0xb10] sm:$0xff]  ;;  %v443_v37 = vld [vmem:[#allocation2 + $0xb88] sm:$0xff] }
  0xd1   :  { %2081 = vmatprep.mubr.f32.mxu0 %v1204_v36  ;;  %4157 = vmatpush3.msra.mxu1 %v362_v38  ;;  %v411_v36 = vld [vmem:[#allocation2 + $0xa88] sm:$0xff]  ;;  %v1220_v38 = vrot.slane %v1206_v28, %v5142_v51  ;;  %v512_v21 = vld [vmem:[#allocation2 + $0xdb0] sm:$0xff] }
  0xd2   :  { %2082 = vmatmul.mubr.f32.vlgmr.msra.gmra.mxu0 %v1196_v26  ;;  %2151 = vmatprep.mubr.f32.mxu1 %v1205_v39  ;;  %v413_v26 = vld [vmem:[#allocation2 + $0xa98] sm:$0xff]  ;;  %v395_v39 = vld [vmem:[#allocation2 + $0xa08] sm:$0xff]  ;;  %v64_v28 = vld [vmem:[%s5275_s0 + $0x30] sm:$0xff] }
  0xd3   :  { %4161 = vmatprep.subr.mxu0 %v425_v40  ;;  %4196 = vmatprep.subr.mxu1 %v457_v41  ;;  %v427_v40 = vld [vmem:[#allocation2 + $0xb08] sm:$0xff]  ;;  %v410_v41 = vld [vmem:[#allocation2 + $0xa80] sm:$0xff] }
  0xd4   :  { %2152 = vmatmul.mubr.f32.vlgmr.msra.gmra.mxu1 %v1203_v31  ;;  %4162 = vmatpush3.msra.mxu0 %v409_v42  ;;  %v412_v31 = vld [vmem:[#allocation2 + $0xa90] sm:$0xff]  ;;  %v442_v42 = vld [vmem:[#allocation2 + $0xb80] sm:$0xff] }
  0xd5   :  { %4197 = vmatpush3.msra.mxu1 %v441_v43  ;;  %4163 = vmatprep.subr.mxu0 %v424_v44  ;;  %v1221_v43 = vcombine.high %v1213_v33, %v1213_v33  ;;  %v394_v44 = vld [vmem:[#allocation2 + $0xa00] sm:$0xff] }
  0xd6   :  { %4198 = vmatprep.subr.mxu1 %v456_v45  ;;  %4164 = vmatpush3.msra.mxu0 %v408_v46  ;;  %v426_v45 = vld [vmem:[#allocation2 + $0xb00] sm:$0xff]  ;;  %v1222_v46 = vcombine.high %v1220_v38, %v1220_v38 }
  0xd7   :  { %4199 = vmatpush3.msra.mxu1 %v440_v47  ;;  %4165 = vmatprep.subr.mxu0 %v423_v48  ;;  %v489_v47 = vld [vmem:[#allocation2 + $0xcf8] sm:$0xff] }
  0xd8   :  { %4200 = vmatprep.subr.mxu1 %v455_v49  ;;  %4166 = vmatpush3.msra.mxu0 %v407_v50  ;;  %v521_v48 = vld [vmem:[#allocation2 + $0xdf8] sm:$0xff] }
  0xd9   :  { %4201 = vmatpush3.msra.mxu1 %v439_v52  ;;  %4167 = vmatprep.subr.mxu0 %v422_v53  ;;  %v473_v49 = vld [vmem:[#allocation2 + $0xc78] sm:$0xff]  ;;  %v488_v52 = vld [vmem:[#allocation2 + $0xcf0] sm:$0xff] }
  0xda   :  { %4202 = vmatprep.subr.mxu1 %v454_v54  ;;  %4168 = vmatpush3.msra.mxu0 %v406_v55  ;;  %v505_v50 = vld [vmem:[#allocation2 + $0xd78] sm:$0xff]  ;;  %v520_v53 = vld [vmem:[#allocation2 + $0xdf0] sm:$0xff] }
  0xdb   :  { %4203 = vmatpush3.msra.mxu1 %v438_v56  ;;  %4169 = vmatprep.subr.mxu0 %v421_v57  ;;  %v472_v54 = vld [vmem:[#allocation2 + $0xc70] sm:$0xff]  ;;  %v487_v56 = vld [vmem:[#allocation2 + $0xce8] sm:$0xff] }
  0xdc   :  { %4204 = vmatprep.subr.mxu1 %v453_v58  ;;  %4170 = vmatpush3.msra.mxu0 %v405_v59  ;;  %v504_v55 = vld [vmem:[#allocation2 + $0xd70] sm:$0xff]  ;;  %v519_v57 = vld [vmem:[#allocation2 + $0xde8] sm:$0xff] }
  0xdd   :  { %4205 = vmatpush3.msra.mxu1 %v437_v60  ;;  %4171 = vmatprep.subr.mxu0 %v420_v61  ;;  %v471_v58 = vld [vmem:[#allocation2 + $0xc68] sm:$0xff]  ;;  %v486_v60 = vld [vmem:[#allocation2 + $0xce0] sm:$0xff] }
  0xde   :  { %4206 = vmatprep.subr.mxu1 %v452_v62  ;;  %4172 = vmatpush3.msra.mxu0 %v404_v63  ;;  %v503_v59 = vld [vmem:[#allocation2 + $0xd68] sm:$0xff]  ;;  %v518_v61 = vld [vmem:[#allocation2 + $0xde0] sm:$0xff] }
  0xdf   :  { %4207 = vmatpush3.msra.mxu1 %v436_v0  ;;  %4173 = vmatprep.subr.mxu0 %v419_v1  ;;  %v470_v62 = vld [vmem:[#allocation2 + $0xc60] sm:$0xff]  ;;  %v485_v0 = vld [vmem:[#allocation2 + $0xcd8] sm:$0xff] }
  0xe0   :  { %4208 = vmatprep.subr.mxu1 %v451_v2  ;;  %4174 = vmatpush3.msra.mxu0 %v403_v3  ;;  %v502_v63 = vld [vmem:[#allocation2 + $0xd60] sm:$0xff]  ;;  %v517_v1 = vld [vmem:[#allocation2 + $0xdd8] sm:$0xff] }
  0xe1   :  { %4209 = vmatpush3.msra.mxu1 %v435_v4  ;;  %4175 = vmatprep.subr.mxu0 %v418_v5  ;;  %v469_v2 = vld [vmem:[#allocation2 + $0xc58] sm:$0xff]  ;;  %v484_v4 = vld [vmem:[#allocation2 + $0xcd0] sm:$0xff] }
  0xe2   :  { %4210 = vmatprep.subr.mxu1 %v450_v6  ;;  %4176 = vmatpush3.msra.mxu0 %v402_v7  ;;  %v501_v3 = vld [vmem:[#allocation2 + $0xd58] sm:$0xff]  ;;  %v516_v5 = vld [vmem:[#allocation2 + $0xdd0] sm:$0xff] }
  0xe3   :  { %4211 = vmatpush3.msra.mxu1 %v434_v8  ;;  %4177 = vmatprep.subr.mxu0 %v417_v9  ;;  %v468_v6 = vld [vmem:[#allocation2 + $0xc50] sm:$0xff]  ;;  %v483_v8 = vld [vmem:[#allocation2 + $0xcc8] sm:$0xff] }
  0xe4   :  { %4212 = vmatprep.subr.mxu1 %v449_v10  ;;  %4178 = vmatpush3.msra.mxu0 %v401_v11  ;;  %v500_v7 = vld [vmem:[#allocation2 + $0xd50] sm:$0xff]  ;;  %v515_v9 = vld [vmem:[#allocation2 + $0xdc8] sm:$0xff] }
  0xe5   :  { %4213 = vmatpush3.msra.mxu1 %v433_v12  ;;  %4179 = vmatprep.subr.mxu0 %v416_v13  ;;  %v467_v10 = vld [vmem:[#allocation2 + $0xc48] sm:$0xff]  ;;  %v482_v12 = vld [vmem:[#allocation2 + $0xcc0] sm:$0xff] }
  0xe6   :  { %4214 = vmatprep.subr.mxu1 %v448_v14  ;;  %4180 = vmatpush3.msra.mxu0 %v400_v15  ;;  %v499_v11 = vld [vmem:[#allocation2 + $0xd48] sm:$0xff]  ;;  %v514_v13 = vld [vmem:[#allocation2 + $0xdc0] sm:$0xff] }
  0xe7   :  { %4215 = vmatpush3.msra.mxu1 %v432_v16  ;;  %4181 = vmatprep.subr.mxu0 %v415_v17  ;;  %v466_v14 = vld [vmem:[#allocation2 + $0xc40] sm:$0xff]  ;;  %v481_v16 = vld [vmem:[#allocation2 + $0xcb8] sm:$0xff] }
  0xe8   :  { %4216 = vmatprep.subr.mxu1 %v447_v18  ;;  %4182 = vmatpush3.msra.mxu0 %v399_v19  ;;  %v498_v15 = vld [vmem:[#allocation2 + $0xd40] sm:$0xff]  ;;  %v513_v17 = vld [vmem:[#allocation2 + $0xdb8] sm:$0xff] }
  0xe9   :  { %4217 = vmatpush3.msra.mxu1 %v431_v20  ;;  %4183 = vmatprep.subr.mxu0 %v414_v22  ;;  %v465_v18 = vld [vmem:[#allocation2 + $0xc38] sm:$0xff]  ;;  %v480_v20 = vld [vmem:[#allocation2 + $0xcb0] sm:$0xff] }
  0xea   :  { %4218 = vmatprep.subr.mxu1 %v446_v23  ;;  %4184 = vmatpush3.msra.mxu0 %v398_v24  ;;  %v497_v19 = vld [vmem:[#allocation2 + $0xd38] sm:$0xff]  ;;  %v464_v22 = vld [vmem:[#allocation2 + $0xc30] sm:$0xff]  ;;  %v479_v24 = vld [vmem:[#allocation2 + $0xca8] sm:$0xff] }
  0xeb   :  { %4219 = vmatpush3.msra.mxu1 %v430_v25  ;;  %4185 = vmatprep.subr.mxu0 %v413_v26  ;;  %v496_v23 = vld [vmem:[#allocation2 + $0xd30] sm:$0xff]  ;;  %v511_v25 = vld [vmem:[#allocation2 + $0xda8] sm:$0xff] }
  0xec   :  { %4220 = vmatprep.subr.mxu1 %v445_v27  ;;  %4186 = vmatpush3.msra.mxu0 %v397_v29  ;;  %v463_v26 = vld [vmem:[#allocation2 + $0xc28] sm:$0xff]  ;;  %v478_v29 = vld [vmem:[#allocation2 + $0xca0] sm:$0xff] }
  0xed   :  { %4221 = vmatpush3.msra.mxu1 %v429_v30  ;;  %4187 = vmatprep.subr.mxu0 %v412_v31  ;;  %v495_v27 = vld [vmem:[#allocation2 + $0xd28] sm:$0xff]  ;;  %v510_v30 = vld [vmem:[#allocation2 + $0xda0] sm:$0xff] }
  0xee   :  { %4222 = vmatprep.subr.mxu1 %v444_v32  ;;  %4188 = vmatpush3.msra.mxu0 %v396_v34  ;;  %v462_v31 = vld [vmem:[#allocation2 + $0xc20] sm:$0xff]  ;;  %v509_v34 = vld [vmem:[#allocation2 + $0xd98] sm:$0xff] }
  0xef   :  { %4223 = vmatpush3.msra.mxu1 %v428_v35  ;;  %4189 = vmatprep.subr.mxu0 %v411_v36  ;;  %v494_v32 = vld [vmem:[#allocation2 + $0xd20] sm:$0xff]  ;;  %v1223_v35 = vcombine.high %v64_v28, %v64_v28  ;;  %v461_v36 = vld [vmem:[#allocation2 + $0xc18] sm:$0xff] }
  0xf0   :  { %4224 = vmatprep.subr.mxu1 %v443_v37  ;;  %4190 = vmatpush3.msra.mxu0 %v395_v39  ;;  %v493_v37 = vld [vmem:[#allocation2 + $0xd18] sm:$0xff]  ;;  %v508_v39 = vld [vmem:[#allocation2 + $0xd90] sm:$0xff] }
  0xf1   :  { %4225 = vmatpush3.msra.mxu1 %v427_v40  ;;  %4191 = vmatprep.subr.mxu0 %v410_v41  ;;  %v1230_v40 = vrot.slane %v64_v28, %v5142_v51  ;;  %v460_v41 = vld [vmem:[#allocation2 + $0xc10] sm:$0xff] }
  0xf2   :  { %4226 = vmatprep.subr.mxu1 %v442_v42  ;;  %4192 = vmatpush3.msra.mxu0 %v394_v44  ;;  %v492_v42 = vld [vmem:[#allocation2 + $0xd10] sm:$0xff]  ;;  %v507_v44 = vld [vmem:[#allocation2 + $0xd88] sm:$0xff] }
  0xf3   :  { %2221 = vmatprep.mubr.f32.mxu0 %v1221_v43  ;;  %4227 = vmatpush3.msra.mxu1 %v426_v45  ;;  %v475_v43 = vld [vmem:[#allocation2 + $0xc88] sm:$0xff]  ;;  %v1237_v45 = vrot.slane %v1223_v35, %v5142_v51  ;;  %v576_v28 = vld [vmem:[#allocation2 + $0xfb0] sm:$0xff]  ;;  %v65_v35 = vld [vmem:[%s5275_s0 + $0x38] sm:$0xff] }
  0xf4   :  { %2222 = vmatmul.mubr.f32.vlgmr.msra.gmra.mxu0 %v1213_v33  ;;  %2291 = vmatprep.mubr.f32.mxu1 %v1222_v46  ;;  %v477_v33 = vld [vmem:[#allocation2 + $0xc98] sm:$0xff]  ;;  %v459_v46 = vld [vmem:[#allocation2 + $0xc08] sm:$0xff] }
  0xf5   :  { %4231 = vmatprep.subr.mxu0 %v489_v47  ;;  %4266 = vmatprep.subr.mxu1 %v521_v48  ;;  %v491_v47 = vld [vmem:[#allocation2 + $0xd08] sm:$0xff]  ;;  %v474_v48 = vld [vmem:[#allocation2 + $0xc80] sm:$0xff] }
  0xf6   :  { %2292 = vmatmul.mubr.f32.vlgmr.msra.gmra.mxu1 %v1220_v38  ;;  %4232 = vmatpush3.msra.mxu0 %v473_v49  ;;  %v476_v38 = vld [vmem:[#allocation2 + $0xc90] sm:$0xff]  ;;  %v506_v49 = vld [vmem:[#allocation2 + $0xd80] sm:$0xff] }
  0xf7   :  { %4267 = vmatpush3.msra.mxu1 %v505_v50  ;;  %4233 = vmatprep.subr.mxu0 %v488_v52  ;;  %v1238_v50 = vcombine.high %v1230_v40, %v1230_v40  ;;  %v458_v52 = vld [vmem:[#allocation2 + $0xc00] sm:$0xff] }
  0xf8   :  { %4268 = vmatprep.subr.mxu1 %v520_v53  ;;  %4234 = vmatpush3.msra.mxu0 %v472_v54  ;;  %v490_v53 = vld [vmem:[#allocation2 + $0xd00] sm:$0xff]  ;;  %v1239_v54 = vcombine.high %v1237_v45, %v1237_v45 }
  0xf9   :  { %4269 = vmatpush3.msra.mxu1 %v504_v55  ;;  %4235 = vmatprep.subr.mxu0 %v487_v56  ;;  %v553_v55 = vld [vmem:[#allocation2 + $0xef8] sm:$0xff] }
  0xfa   :  { %4270 = vmatprep.subr.mxu1 %v519_v57  ;;  %4236 = vmatpush3.msra.mxu0 %v471_v58  ;;  %v585_v56 = vld [vmem:[#allocation2 + $0xff8] sm:$0xff] }
  0xfb   :  { %4271 = vmatpush3.msra.mxu1 %v503_v59  ;;  %4237 = vmatprep.subr.mxu0 %v486_v60  ;;  %v537_v57 = vld [vmem:[#allocation2 + $0xe78] sm:$0xff]  ;;  %v552_v59 = vld [vmem:[#allocation2 + $0xef0] sm:$0xff] }
  0xfc   :  { %4272 = vmatprep.subr.mxu1 %v518_v61  ;;  %4238 = vmatpush3.msra.mxu0 %v470_v62  ;;  %v569_v58 = vld [vmem:[#allocation2 + $0xf78] sm:$0xff]  ;;  %v584_v60 = vld [vmem:[#allocation2 + $0xff0] sm:$0xff] }
  0xfd   :  { %4273 = vmatpush3.msra.mxu1 %v502_v63  ;;  %4239 = vmatprep.subr.mxu0 %v485_v0  ;;  %v536_v61 = vld [vmem:[#allocation2 + $0xe70] sm:$0xff]  ;;  %v551_v63 = vld [vmem:[#allocation2 + $0xee8] sm:$0xff] }
  0xfe   :  { %4274 = vmatprep.subr.mxu1 %v517_v1  ;;  %4240 = vmatpush3.msra.mxu0 %v469_v2  ;;  %v568_v62 = vld [vmem:[#allocation2 + $0xf70] sm:$0xff]  ;;  %v583_v0 = vld [vmem:[#allocation2 + $0xfe8] sm:$0xff] }
  0xff   :  { %4275 = vmatpush3.msra.mxu1 %v501_v3  ;;  %4241 = vmatprep.subr.mxu0 %v484_v4  ;;  %v535_v1 = vld [vmem:[#allocation2 + $0xe68] sm:$0xff]  ;;  %v550_v3 = vld [vmem:[#allocation2 + $0xee0] sm:$0xff] }
 0x100   :  { %4276 = vmatprep.subr.mxu1 %v516_v5  ;;  %4242 = vmatpush3.msra.mxu0 %v468_v6  ;;  %v567_v2 = vld [vmem:[#allocation2 + $0xf68] sm:$0xff]  ;;  %v582_v4 = vld [vmem:[#allocation2 + $0xfe0] sm:$0xff] }
 0x101   :  { %4277 = vmatpush3.msra.mxu1 %v500_v7  ;;  %4243 = vmatprep.subr.mxu0 %v483_v8  ;;  %v534_v5 = vld [vmem:[#allocation2 + $0xe60] sm:$0xff]  ;;  %v549_v7 = vld [vmem:[#allocation2 + $0xed8] sm:$0xff] }
 0x102   :  { %4278 = vmatprep.subr.mxu1 %v515_v9  ;;  %4244 = vmatpush3.msra.mxu0 %v467_v10  ;;  %v566_v6 = vld [vmem:[#allocation2 + $0xf60] sm:$0xff]  ;;  %v581_v8 = vld [vmem:[#allocation2 + $0xfd8] sm:$0xff] }
 0x103   :  { %4279 = vmatpush3.msra.mxu1 %v499_v11  ;;  %4245 = vmatprep.subr.mxu0 %v482_v12  ;;  %v533_v9 = vld [vmem:[#allocation2 + $0xe58] sm:$0xff]  ;;  %v548_v11 = vld [vmem:[#allocation2 + $0xed0] sm:$0xff] }
 0x104   :  { %4280 = vmatprep.subr.mxu1 %v514_v13  ;;  %4246 = vmatpush3.msra.mxu0 %v466_v14  ;;  %v565_v10 = vld [vmem:[#allocation2 + $0xf58] sm:$0xff]  ;;  %v580_v12 = vld [vmem:[#allocation2 + $0xfd0] sm:$0xff] }
 0x105   :  { %4281 = vmatpush3.msra.mxu1 %v498_v15  ;;  %4247 = vmatprep.subr.mxu0 %v481_v16  ;;  %v532_v13 = vld [vmem:[#allocation2 + $0xe50] sm:$0xff]  ;;  %v547_v15 = vld [vmem:[#allocation2 + $0xec8] sm:$0xff] }
 0x106   :  { %4282 = vmatprep.subr.mxu1 %v513_v17  ;;  %4248 = vmatpush3.msra.mxu0 %v465_v18  ;;  %v564_v14 = vld [vmem:[#allocation2 + $0xf50] sm:$0xff]  ;;  %v579_v16 = vld [vmem:[#allocation2 + $0xfc8] sm:$0xff] }
 0x107   :  { %4283 = vmatpush3.msra.mxu1 %v497_v19  ;;  %4249 = vmatprep.subr.mxu0 %v480_v20  ;;  %v531_v17 = vld [vmem:[#allocation2 + $0xe48] sm:$0xff]  ;;  %v546_v19 = vld [vmem:[#allocation2 + $0xec0] sm:$0xff] }
 0x108   :  { %4284 = vmatprep.subr.mxu1 %v512_v21  ;;  %4250 = vmatpush3.msra.mxu0 %v464_v22  ;;  %v563_v18 = vld [vmem:[#allocation2 + $0xf48] sm:$0xff]  ;;  %v578_v20 = vld [vmem:[#allocation2 + $0xfc0] sm:$0xff] }
 0x109   :  { %4285 = vmatpush3.msra.mxu1 %v496_v23  ;;  %4251 = vmatprep.subr.mxu0 %v479_v24  ;;  %v530_v21 = vld [vmem:[#allocation2 + $0xe40] sm:$0xff]  ;;  %v545_v23 = vld [vmem:[#allocation2 + $0xeb8] sm:$0xff] }
 0x10a   :  { %4286 = vmatprep.subr.mxu1 %v511_v25  ;;  %4252 = vmatpush3.msra.mxu0 %v463_v26  ;;  %v562_v22 = vld [vmem:[#allocation2 + $0xf40] sm:$0xff]  ;;  %v577_v24 = vld [vmem:[#allocation2 + $0xfb8] sm:$0xff] }
 0x10b   :  { %4287 = vmatpush3.msra.mxu1 %v495_v27  ;;  %4253 = vmatprep.subr.mxu0 %v478_v29  ;;  %v529_v25 = vld [vmem:[#allocation2 + $0xe38] sm:$0xff]  ;;  %v544_v27 = vld [vmem:[#allocation2 + $0xeb0] sm:$0xff] }
 0x10c   :  { %4288 = vmatprep.subr.mxu1 %v510_v30  ;;  %4254 = vmatpush3.msra.mxu0 %v462_v31  ;;  %v561_v26 = vld [vmem:[#allocation2 + $0xf38] sm:$0xff]  ;;  %v528_v29 = vld [vmem:[#allocation2 + $0xe30] sm:$0xff]  ;;  %v543_v31 = vld [vmem:[#allocation2 + $0xea8] sm:$0xff] }
 0x10d   :  { %4289 = vmatpush3.msra.mxu1 %v494_v32  ;;  %4255 = vmatprep.subr.mxu0 %v477_v33  ;;  %v560_v30 = vld [vmem:[#allocation2 + $0xf30] sm:$0xff]  ;;  %v575_v32 = vld [vmem:[#allocation2 + $0xfa8] sm:$0xff] }
 0x10e   :  { %4290 = vmatprep.subr.mxu1 %v509_v34  ;;  %4256 = vmatpush3.msra.mxu0 %v461_v36  ;;  %v527_v33 = vld [vmem:[#allocation2 + $0xe28] sm:$0xff]  ;;  %v542_v36 = vld [vmem:[#allocation2 + $0xea0] sm:$0xff] }
 0x10f   :  { %4291 = vmatpush3.msra.mxu1 %v493_v37  ;;  %4257 = vmatprep.subr.mxu0 %v476_v38  ;;  %v559_v34 = vld [vmem:[#allocation2 + $0xf28] sm:$0xff]  ;;  %v574_v37 = vld [vmem:[#allocation2 + $0xfa0] sm:$0xff] }
 0x110   :  { %4292 = vmatprep.subr.mxu1 %v508_v39  ;;  %4258 = vmatpush3.msra.mxu0 %v460_v41  ;;  %v526_v38 = vld [vmem:[#allocation2 + $0xe20] sm:$0xff]  ;;  %v573_v41 = vld [vmem:[#allocation2 + $0xf98] sm:$0xff] }
 0x111   :  { %4293 = vmatpush3.msra.mxu1 %v492_v42  ;;  %4259 = vmatprep.subr.mxu0 %v475_v43  ;;  %v558_v39 = vld [vmem:[#allocation2 + $0xf20] sm:$0xff]  ;;  %v1240_v42 = vcombine.high %v65_v35, %v65_v35  ;;  %v525_v43 = vld [vmem:[#allocation2 + $0xe18] sm:$0xff] }
 0x112   :  { %4294 = vmatprep.subr.mxu1 %v507_v44  ;;  %4260 = vmatpush3.msra.mxu0 %v459_v46  ;;  %v557_v44 = vld [vmem:[#allocation2 + $0xf18] sm:$0xff]  ;;  %v572_v46 = vld [vmem:[#allocation2 + $0xf90] sm:$0xff] }
 0x113   :  { %4295 = vmatpush3.msra.mxu1 %v491_v47  ;;  %4261 = vmatprep.subr.mxu0 %v474_v48  ;;  %v1247_v47 = vrot.slane %v65_v35, %v5142_v51  ;;  %v524_v48 = vld [vmem:[#allocation2 + $0xe10] sm:$0xff] }
 0x114   :  { %4296 = vmatprep.subr.mxu1 %v506_v49  ;;  %4262 = vmatpush3.msra.mxu0 %v458_v52  ;;  %v556_v49 = vld [vmem:[#allocation2 + $0xf10] sm:$0xff]  ;;  %v571_v52 = vld [vmem:[#allocation2 + $0xf88] sm:$0xff] }
 0x115   :  { %2361 = vmatprep.mubr.f32.mxu0 %v1238_v50  ;;  %4297 = vmatpush3.msra.mxu1 %v490_v53  ;;  %v539_v50 = vld [vmem:[#allocation2 + $0xe88] sm:$0xff]  ;;  %v1254_v53 = vrot.slane %v1240_v42, %v5142_v51  ;;  %v640_v35 = vld [vmem:[#allocation2 + $0x11b0] sm:$0xff]  ;;  %v66_v42 = vld [vmem:[%s5275_s0 + $0x40] sm:$0xff] }
 0x116   :  { %2362 = vmatmul.mubr.f32.vlgmr.msra.gmra.mxu0 %v1230_v40  ;;  %2431 = vmatprep.mubr.f32.mxu1 %v1239_v54  ;;  %v541_v40 = vld [vmem:[#allocation2 + $0xe98] sm:$0xff]  ;;  %v523_v54 = vld [vmem:[#allocation2 + $0xe08] sm:$0xff] }
 0x117   :  { %4301 = vmatprep.subr.mxu0 %v553_v55  ;;  %4336 = vmatprep.subr.mxu1 %v585_v56  ;;  %v555_v55 = vld [vmem:[#allocation2 + $0xf08] sm:$0xff]  ;;  %v538_v56 = vld [vmem:[#allocation2 + $0xe80] sm:$0xff] }
 0x118   :  { %2432 = vmatmul.mubr.f32.vlgmr.msra.gmra.mxu1 %v1237_v45  ;;  %4302 = vmatpush3.msra.mxu0 %v537_v57  ;;  %v540_v45 = vld [vmem:[#allocation2 + $0xe90] sm:$0xff]  ;;  %v570_v57 = vld [vmem:[#allocation2 + $0xf80] sm:$0xff] }
 0x119   :  { %4337 = vmatpush3.msra.mxu1 %v569_v58  ;;  %4303 = vmatprep.subr.mxu0 %v552_v59  ;;  %v1255_v58 = vcombine.high %v1247_v47, %v1247_v47  ;;  %v522_v59 = vld [vmem:[#allocation2 + $0xe00] sm:$0xff] }
 0x11a   :  { %4338 = vmatprep.subr.mxu1 %v584_v60  ;;  %4304 = vmatpush3.msra.mxu0 %v536_v61  ;;  %v554_v60 = vld [vmem:[#allocation2 + $0xf00] sm:$0xff]  ;;  %v1256_v61 = vcombine.high %v1254_v53, %v1254_v53 }
 0x11b   :  { %4339 = vmatpush3.msra.mxu1 %v568_v62  ;;  %4305 = vmatprep.subr.mxu0 %v551_v63  ;;  %v617_v62 = vld [vmem:[#allocation2 + $0x10f8] sm:$0xff] }
 0x11c   :  { %4340 = vmatprep.subr.mxu1 %v583_v0  ;;  %4306 = vmatpush3.msra.mxu0 %v535_v1  ;;  %v649_v63 = vld [vmem:[#allocation2 + $0x11f8] sm:$0xff] }
 0x11d   :  { %4341 = vmatpush3.msra.mxu1 %v567_v2  ;;  %4307 = vmatprep.subr.mxu0 %v550_v3  ;;  %v601_v0 = vld [vmem:[#allocation2 + $0x1078] sm:$0xff]  ;;  %v616_v2 = vld [vmem:[#allocation2 + $0x10f0] sm:$0xff] }
 0x11e   :  { %4342 = vmatprep.subr.mxu1 %v582_v4  ;;  %4308 = vmatpush3.msra.mxu0 %v534_v5  ;;  %v633_v1 = vld [vmem:[#allocation2 + $0x1178] sm:$0xff]  ;;  %v648_v3 = vld [vmem:[#allocation2 + $0x11f0] sm:$0xff] }
 0x11f   :  { %4343 = vmatpush3.msra.mxu1 %v566_v6  ;;  %4309 = vmatprep.subr.mxu0 %v549_v7  ;;  %v600_v4 = vld [vmem:[#allocation2 + $0x1070] sm:$0xff]  ;;  %v615_v6 = vld [vmem:[#allocation2 + $0x10e8] sm:$0xff] }
 0x120   :  { %4344 = vmatprep.subr.mxu1 %v581_v8  ;;  %4310 = vmatpush3.msra.mxu0 %v533_v9  ;;  %v632_v5 = vld [vmem:[#allocation2 + $0x1170] sm:$0xff]  ;;  %v647_v7 = vld [vmem:[#allocation2 + $0x11e8] sm:$0xff] }
 0x121   :  { %4345 = vmatpush3.msra.mxu1 %v565_v10  ;;  %4311 = vmatprep.subr.mxu0 %v548_v11  ;;  %v599_v8 = vld [vmem:[#allocation2 + $0x1068] sm:$0xff]  ;;  %v614_v10 = vld [vmem:[#allocation2 + $0x10e0] sm:$0xff] }
 0x122   :  { %4346 = vmatprep.subr.mxu1 %v580_v12  ;;  %4312 = vmatpush3.msra.mxu0 %v532_v13  ;;  %v631_v9 = vld [vmem:[#allocation2 + $0x1168] sm:$0xff]  ;;  %v646_v11 = vld [vmem:[#allocation2 + $0x11e0] sm:$0xff] }
 0x123   :  { %4347 = vmatpush3.msra.mxu1 %v564_v14  ;;  %4313 = vmatprep.subr.mxu0 %v547_v15  ;;  %v598_v12 = vld [vmem:[#allocation2 + $0x1060] sm:$0xff]  ;;  %v613_v14 = vld [vmem:[#allocation2 + $0x10d8] sm:$0xff] }
 0x124   :  { %4348 = vmatprep.subr.mxu1 %v579_v16  ;;  %4314 = vmatpush3.msra.mxu0 %v531_v17  ;;  %v630_v13 = vld [vmem:[#allocation2 + $0x1160] sm:$0xff]  ;;  %v645_v15 = vld [vmem:[#allocation2 + $0x11d8] sm:$0xff] }
 0x125   :  { %4349 = vmatpush3.msra.mxu1 %v563_v18  ;;  %4315 = vmatprep.subr.mxu0 %v546_v19  ;;  %v597_v16 = vld [vmem:[#allocation2 + $0x1058] sm:$0xff]  ;;  %v612_v18 = vld [vmem:[#allocation2 + $0x10d0] sm:$0xff] }
 0x126   :  { %4350 = vmatprep.subr.mxu1 %v578_v20  ;;  %4316 = vmatpush3.msra.mxu0 %v530_v21  ;;  %v629_v17 = vld [vmem:[#allocation2 + $0x1158] sm:$0xff]  ;;  %v644_v19 = vld [vmem:[#allocation2 + $0x11d0] sm:$0xff] }
 0x127   :  { %4351 = vmatpush3.msra.mxu1 %v562_v22  ;;  %4317 = vmatprep.subr.mxu0 %v545_v23  ;;  %v596_v20 = vld [vmem:[#allocation2 + $0x1050] sm:$0xff]  ;;  %v611_v22 = vld [vmem:[#allocation2 + $0x10c8] sm:$0xff] }
 0x128   :  { %4352 = vmatprep.subr.mxu1 %v577_v24  ;;  %4318 = vmatpush3.msra.mxu0 %v529_v25  ;;  %v628_v21 = vld [vmem:[#allocation2 + $0x1150] sm:$0xff]  ;;  %v643_v23 = vld [vmem:[#allocation2 + $0x11c8] sm:$0xff] }
 0x129   :  { %4353 = vmatpush3.msra.mxu1 %v561_v26  ;;  %4319 = vmatprep.subr.mxu0 %v544_v27  ;;  %v595_v24 = vld [vmem:[#allocation2 + $0x1048] sm:$0xff]  ;;  %v610_v26 = vld [vmem:[#allocation2 + $0x10c0] sm:$0xff] }
 0x12a   :  { %4354 = vmatprep.subr.mxu1 %v576_v28  ;;  %4320 = vmatpush3.msra.mxu0 %v528_v29  ;;  %v627_v25 = vld [vmem:[#allocation2 + $0x1148] sm:$0xff]  ;;  %v642_v27 = vld [vmem:[#allocation2 + $0x11c0] sm:$0xff] }
 0x12b   :  { %4355 = vmatpush3.msra.mxu1 %v560_v30  ;;  %4321 = vmatprep.subr.mxu0 %v543_v31  ;;  %v594_v28 = vld [vmem:[#allocation2 + $0x1040] sm:$0xff]  ;;  %v609_v30 = vld [vmem:[#allocation2 + $0x10b8] sm:$0xff] }
 0x12c   :  { %4356 = vmatprep.subr.mxu1 %v575_v32  ;;  %4322 = vmatpush3.msra.mxu0 %v527_v33  ;;  %v626_v29 = vld [vmem:[#allocation2 + $0x1140] sm:$0xff]  ;;  %v641_v31 = vld [vmem:[#allocation2 + $0x11b8] sm:$0xff] }
 0x12d   :  { %4357 = vmatpush3.msra.mxu1 %v559_v34  ;;  %4323 = vmatprep.subr.mxu0 %v542_v36  ;;  %v593_v32 = vld [vmem:[#allocation2 + $0x1038] sm:$0xff]  ;;  %v608_v34 = vld [vmem:[#allocation2 + $0x10b0] sm:$0xff] }
 0x12e   :  { %4358 = vmatprep.subr.mxu1 %v574_v37  ;;  %4324 = vmatpush3.msra.mxu0 %v526_v38  ;;  %v625_v33 = vld [vmem:[#allocation2 + $0x1138] sm:$0xff]  ;;  %v592_v36 = vld [vmem:[#allocation2 + $0x1030] sm:$0xff]  ;;  %v607_v38 = vld [vmem:[#allocation2 + $0x10a8] sm:$0xff] }
 0x12f   :  { %4359 = vmatpush3.msra.mxu1 %v558_v39  ;;  %4325 = vmatprep.subr.mxu0 %v541_v40  ;;  %v624_v37 = vld [vmem:[#allocation2 + $0x1130] sm:$0xff]  ;;  %v639_v39 = vld [vmem:[#allocation2 + $0x11a8] sm:$0xff] }
 0x130   :  { %4360 = vmatprep.subr.mxu1 %v573_v41  ;;  %4326 = vmatpush3.msra.mxu0 %v525_v43  ;;  %v591_v40 = vld [vmem:[#allocation2 + $0x1028] sm:$0xff]  ;;  %v606_v43 = vld [vmem:[#allocation2 + $0x10a0] sm:$0xff] }
 0x131   :  { %4361 = vmatpush3.msra.mxu1 %v557_v44  ;;  %4327 = vmatprep.subr.mxu0 %v540_v45  ;;  %v623_v41 = vld [vmem:[#allocation2 + $0x1128] sm:$0xff]  ;;  %v638_v44 = vld [vmem:[#allocation2 + $0x11a0] sm:$0xff] }
 0x132   :  { %4362 = vmatprep.subr.mxu1 %v572_v46  ;;  %4328 = vmatpush3.msra.mxu0 %v524_v48  ;;  %v590_v45 = vld [vmem:[#allocation2 + $0x1020] sm:$0xff]  ;;  %v637_v48 = vld [vmem:[#allocation2 + $0x1198] sm:$0xff] }
 0x133   :  { %4363 = vmatpush3.msra.mxu1 %v556_v49  ;;  %4329 = vmatprep.subr.mxu0 %v539_v50  ;;  %v622_v46 = vld [vmem:[#allocation2 + $0x1120] sm:$0xff]  ;;  %v1257_v49 = vcombine.high %v66_v42, %v66_v42  ;;  %v589_v50 = vld [vmem:[#allocation2 + $0x1018] sm:$0xff] }
 0x134   :  { %4364 = vmatprep.subr.mxu1 %v571_v52  ;;  %4330 = vmatpush3.msra.mxu0 %v523_v54  ;;  %v621_v52 = vld [vmem:[#allocation2 + $0x1118] sm:$0xff]  ;;  %v636_v54 = vld [vmem:[#allocation2 + $0x1190] sm:$0xff] }
 0x135   :  { %4365 = vmatpush3.msra.mxu1 %v555_v55  ;;  %4331 = vmatprep.subr.mxu0 %v538_v56  ;;  %v1264_v55 = vrot.slane %v66_v42, %v5142_v51  ;;  %v588_v56 = vld [vmem:[#allocation2 + $0x1010] sm:$0xff] }
 0x136   :  { %4366 = vmatprep.subr.mxu1 %v570_v57  ;;  %4332 = vmatpush3.msra.mxu0 %v522_v59  ;;  %v620_v57 = vld [vmem:[#allocation2 + $0x1110] sm:$0xff]  ;;  %v635_v59 = vld [vmem:[#allocation2 + $0x1188] sm:$0xff] }
 0x137   :  { %2501 = vmatprep.mubr.f32.mxu0 %v1255_v58  ;;  %4367 = vmatpush3.msra.mxu1 %v554_v60  ;;  %v603_v58 = vld [vmem:[#allocation2 + $0x1088] sm:$0xff]  ;;  %v1271_v60 = vrot.slane %v1257_v49, %v5142_v51  ;;  %v704_v42 = vld [vmem:[#allocation2 + $0x13b0] sm:$0xff] }
 0x138   :  { %2502 = vmatmul.mubr.f32.vlgmr.msra.gmra.mxu0 %v1247_v47  ;;  %2571 = vmatprep.mubr.f32.mxu1 %v1256_v61  ;;  %v605_v47 = vld [vmem:[#allocation2 + $0x1098] sm:$0xff]  ;;  %v587_v61 = vld [vmem:[#allocation2 + $0x1008] sm:$0xff] }
 0x139   :  { %4371 = vmatprep.subr.mxu0 %v617_v62  ;;  %4406 = vmatprep.subr.mxu1 %v649_v63  ;;  %v619_v62 = vld [vmem:[#allocation2 + $0x1108] sm:$0xff]  ;;  %v602_v63 = vld [vmem:[#allocation2 + $0x1080] sm:$0xff] }
 0x13a   :  { %2572 = vmatmul.mubr.f32.vlgmr.msra.gmra.mxu1 %v1254_v53  ;;  %4372 = vmatpush3.msra.mxu0 %v601_v0  ;;  %v604_v53 = vld [vmem:[#allocation2 + $0x1090] sm:$0xff]  ;;  %v634_v0 = vld [vmem:[#allocation2 + $0x1180] sm:$0xff]  ;;  %v67_v49 = vld [vmem:[%s5275_s0 + $0x48] sm:$0xff] }
 0x13b   :  { %4407 = vmatpush3.msra.mxu1 %v633_v1  ;;  %4373 = vmatprep.subr.mxu0 %v616_v2  ;;  %v1272_v1 = vcombine.high %v1264_v55, %v1264_v55  ;;  %v586_v2 = vld [vmem:[#allocation2 + $0x1000] sm:$0xff] }
 0x13c   :  { %4408 = vmatprep.subr.mxu1 %v648_v3  ;;  %4374 = vmatpush3.msra.mxu0 %v600_v4  ;;  %v618_v3 = vld [vmem:[#allocation2 + $0x1100] sm:$0xff]  ;;  %v1273_v4 = vcombine.high %v1271_v60, %v1271_v60 }
 0x13d   :  { %4409 = vmatpush3.msra.mxu1 %v632_v5  ;;  %4375 = vmatprep.subr.mxu0 %v615_v6  ;;  %v681_v5 = vld [vmem:[#allocation2 + $0x12f8] sm:$0xff] }
 0x13e   :  { %4410 = vmatprep.subr.mxu1 %v647_v7  ;;  %4376 = vmatpush3.msra.mxu0 %v599_v8  ;;  %v713_v6 = vld [vmem:[#allocation2 + $0x13f8] sm:$0xff] }
 0x13f   :  { %4411 = vmatpush3.msra.mxu1 %v631_v9  ;;  %4377 = vmatprep.subr.mxu0 %v614_v10  ;;  %v665_v7 = vld [vmem:[#allocation2 + $0x1278] sm:$0xff]  ;;  %v680_v9 = vld [vmem:[#allocation2 + $0x12f0] sm:$0xff] }
 0x140   :  { %4412 = vmatprep.subr.mxu1 %v646_v11  ;;  %4378 = vmatpush3.msra.mxu0 %v598_v12  ;;  %v697_v8 = vld [vmem:[#allocation2 + $0x1378] sm:$0xff]  ;;  %v712_v10 = vld [vmem:[#allocation2 + $0x13f0] sm:$0xff] }
 0x141   :  { %4413 = vmatpush3.msra.mxu1 %v630_v13  ;;  %4379 = vmatprep.subr.mxu0 %v613_v14  ;;  %v664_v11 = vld [vmem:[#allocation2 + $0x1270] sm:$0xff]  ;;  %v679_v13 = vld [vmem:[#allocation2 + $0x12e8] sm:$0xff] }
 0x142   :  { %4414 = vmatprep.subr.mxu1 %v645_v15  ;;  %4380 = vmatpush3.msra.mxu0 %v597_v16  ;;  %v696_v12 = vld [vmem:[#allocation2 + $0x1370] sm:$0xff]  ;;  %v711_v14 = vld [vmem:[#allocation2 + $0x13e8] sm:$0xff] }
 0x143   :  { %4415 = vmatpush3.msra.mxu1 %v629_v17  ;;  %4381 = vmatprep.subr.mxu0 %v612_v18  ;;  %v663_v15 = vld [vmem:[#allocation2 + $0x1268] sm:$0xff]  ;;  %v678_v17 = vld [vmem:[#allocation2 + $0x12e0] sm:$0xff] }
 0x144   :  { %4416 = vmatprep.subr.mxu1 %v644_v19  ;;  %4382 = vmatpush3.msra.mxu0 %v596_v20  ;;  %v695_v16 = vld [vmem:[#allocation2 + $0x1368] sm:$0xff]  ;;  %v710_v18 = vld [vmem:[#allocation2 + $0x13e0] sm:$0xff] }
 0x145   :  { %4417 = vmatpush3.msra.mxu1 %v628_v21  ;;  %4383 = vmatprep.subr.mxu0 %v611_v22  ;;  %v662_v19 = vld [vmem:[#allocation2 + $0x1260] sm:$0xff]  ;;  %v677_v21 = vld [vmem:[#allocation2 + $0x12d8] sm:$0xff] }
 0x146   :  { %4418 = vmatprep.subr.mxu1 %v643_v23  ;;  %4384 = vmatpush3.msra.mxu0 %v595_v24  ;;  %v694_v20 = vld [vmem:[#allocation2 + $0x1360] sm:$0xff]  ;;  %v709_v22 = vld [vmem:[#allocation2 + $0x13d8] sm:$0xff] }
 0x147   :  { %4419 = vmatpush3.msra.mxu1 %v627_v25  ;;  %4385 = vmatprep.subr.mxu0 %v610_v26  ;;  %v661_v23 = vld [vmem:[#allocation2 + $0x1258] sm:$0xff]  ;;  %v676_v25 = vld [vmem:[#allocation2 + $0x12d0] sm:$0xff] }
 0x148   :  { %4420 = vmatprep.subr.mxu1 %v642_v27  ;;  %4386 = vmatpush3.msra.mxu0 %v594_v28  ;;  %v693_v24 = vld [vmem:[#allocation2 + $0x1358] sm:$0xff]  ;;  %v708_v26 = vld [vmem:[#allocation2 + $0x13d0] sm:$0xff] }
 0x149   :  { %4421 = vmatpush3.msra.mxu1 %v626_v29  ;;  %4387 = vmatprep.subr.mxu0 %v609_v30  ;;  %v660_v27 = vld [vmem:[#allocation2 + $0x1250] sm:$0xff]  ;;  %v675_v29 = vld [vmem:[#allocation2 + $0x12c8] sm:$0xff] }
 0x14a   :  { %4422 = vmatprep.subr.mxu1 %v641_v31  ;;  %4388 = vmatpush3.msra.mxu0 %v593_v32  ;;  %v692_v28 = vld [vmem:[#allocation2 + $0x1350] sm:$0xff]  ;;  %v707_v30 = vld [vmem:[#allocation2 + $0x13c8] sm:$0xff] }
 0x14b   :  { %4423 = vmatpush3.msra.mxu1 %v625_v33  ;;  %4389 = vmatprep.subr.mxu0 %v608_v34  ;;  %v659_v31 = vld [vmem:[#allocation2 + $0x1248] sm:$0xff]  ;;  %v674_v33 = vld [vmem:[#allocation2 + $0x12c0] sm:$0xff] }
 0x14c   :  { %4424 = vmatprep.subr.mxu1 %v640_v35  ;;  %4390 = vmatpush3.msra.mxu0 %v592_v36  ;;  %v691_v32 = vld [vmem:[#allocation2 + $0x1348] sm:$0xff]  ;;  %v706_v34 = vld [vmem:[#allocation2 + $0x13c0] sm:$0xff] }
 0x14d   :  { %4425 = vmatpush3.msra.mxu1 %v624_v37  ;;  %4391 = vmatprep.subr.mxu0 %v607_v38  ;;  %v658_v35 = vld [vmem:[#allocation2 + $0x1240] sm:$0xff]  ;;  %v673_v37 = vld [vmem:[#allocation2 + $0x12b8] sm:$0xff] }
 0x14e   :  { %4426 = vmatprep.subr.mxu1 %v639_v39  ;;  %4392 = vmatpush3.msra.mxu0 %v591_v40  ;;  %v690_v36 = vld [vmem:[#allocation2 + $0x1340] sm:$0xff]  ;;  %v705_v38 = vld [vmem:[#allocation2 + $0x13b8] sm:$0xff] }
 0x14f   :  { %4427 = vmatpush3.msra.mxu1 %v623_v41  ;;  %4393 = vmatprep.subr.mxu0 %v606_v43  ;;  %v657_v39 = vld [vmem:[#allocation2 + $0x1238] sm:$0xff]  ;;  %v672_v41 = vld [vmem:[#allocation2 + $0x12b0] sm:$0xff] }
 0x150   :  { %4428 = vmatprep.subr.mxu1 %v638_v44  ;;  %4394 = vmatpush3.msra.mxu0 %v590_v45  ;;  %v689_v40 = vld [vmem:[#allocation2 + $0x1338] sm:$0xff]  ;;  %v656_v43 = vld [vmem:[#allocation2 + $0x1230] sm:$0xff]  ;;  %v671_v45 = vld [vmem:[#allocation2 + $0x12a8] sm:$0xff] }
 0x151   :  { %4429 = vmatpush3.msra.mxu1 %v622_v46  ;;  %4395 = vmatprep.subr.mxu0 %v605_v47  ;;  %v688_v44 = vld [vmem:[#allocation2 + $0x1330] sm:$0xff]  ;;  %v703_v46 = vld [vmem:[#allocation2 + $0x13a8] sm:$0xff] }
 0x152   :  { %4430 = vmatprep.subr.mxu1 %v637_v48  ;;  %4396 = vmatpush3.msra.mxu0 %v589_v50  ;;  %v655_v47 = vld [vmem:[#allocation2 + $0x1228] sm:$0xff]  ;;  %v670_v50 = vld [vmem:[#allocation2 + $0x12a0] sm:$0xff] }
 0x153   :  { %4431 = vmatpush3.msra.mxu1 %v621_v52  ;;  %4397 = vmatprep.subr.mxu0 %v604_v53  ;;  %v687_v48 = vld [vmem:[#allocation2 + $0x1328] sm:$0xff]  ;;  %v702_v52 = vld [vmem:[#allocation2 + $0x13a0] sm:$0xff] }
 0x154   :  { %4432 = vmatprep.subr.mxu1 %v636_v54  ;;  %4398 = vmatpush3.msra.mxu0 %v588_v56  ;;  %v654_v53 = vld [vmem:[#allocation2 + $0x1220] sm:$0xff]  ;;  %v701_v56 = vld [vmem:[#allocation2 + $0x1398] sm:$0xff] }
 0x155   :  { %4433 = vmatpush3.msra.mxu1 %v620_v57  ;;  %4399 = vmatprep.subr.mxu0 %v603_v58  ;;  %v686_v54 = vld [vmem:[#allocation2 + $0x1320] sm:$0xff]  ;;  %v1274_v57 = vcombine.high %v67_v49, %v67_v49  ;;  %v653_v58 = vld [vmem:[#allocation2 + $0x1218] sm:$0xff] }
 0x156   :  { %4434 = vmatprep.subr.mxu1 %v635_v59  ;;  %4400 = vmatpush3.msra.mxu0 %v587_v61  ;;  %v685_v59 = vld [vmem:[#allocation2 + $0x1318] sm:$0xff]  ;;  %v700_v61 = vld [vmem:[#allocation2 + $0x1390] sm:$0xff] }
 0x157   :  { %4435 = vmatpush3.msra.mxu1 %v619_v62  ;;  %4401 = vmatprep.subr.mxu0 %v602_v63  ;;  %v1281_v62 = vrot.slane %v67_v49, %v5142_v51  ;;  %v652_v63 = vld [vmem:[#allocation2 + $0x1210] sm:$0xff] }
 0x158   :  { %4436 = vmatprep.subr.mxu1 %v634_v0  ;;  %4402 = vmatpush3.msra.mxu0 %v586_v2  ;;  %v684_v0 = vld [vmem:[#allocation2 + $0x1310] sm:$0xff]  ;;  %v699_v2 = vld [vmem:[#allocation2 + $0x1388] sm:$0xff] }
 0x159   :  { %2641 = vmatprep.mubr.f32.mxu0 %v1272_v1  ;;  %4437 = vmatpush3.msra.mxu1 %v618_v3  ;;  %v667_v1 = vld [vmem:[#allocation2 + $0x1288] sm:$0xff]  ;;  %v1288_v3 = vrot.slane %v1274_v57, %v5142_v51  ;;  %v768_v49 = vld [vmem:[#allocation2 + $0x15b0] sm:$0xff] }
 0x15a   :  { %2642 = vmatmul.mubr.f32.vlgmr.msra.gmra.mxu0 %v1264_v55  ;;  %2711 = vmatprep.mubr.f32.mxu1 %v1273_v4  ;;  %v669_v55 = vld [vmem:[#allocation2 + $0x1298] sm:$0xff]  ;;  %v651_v4 = vld [vmem:[#allocation2 + $0x1208] sm:$0xff]  ;;  %v68_v57 = vld [vmem:[%s5275_s0 + $0x50] sm:$0xff] }
 0x15b   :  { %4441 = vmatprep.subr.mxu0 %v681_v5  ;;  %4476 = vmatprep.subr.mxu1 %v713_v6  ;;  %v683_v5 = vld [vmem:[#allocation2 + $0x1308] sm:$0xff]  ;;  %v666_v6 = vld [vmem:[#allocation2 + $0x1280] sm:$0xff] }
 0x15c   :  { %2712 = vmatmul.mubr.f32.vlgmr.msra.gmra.mxu1 %v1271_v60  ;;  %4442 = vmatpush3.msra.mxu0 %v665_v7  ;;  %v668_v60 = vld [vmem:[#allocation2 + $0x1290] sm:$0xff]  ;;  %v698_v7 = vld [vmem:[#allocation2 + $0x1380] sm:$0xff] }
 0x15d   :  { %4477 = vmatpush3.msra.mxu1 %v697_v8  ;;  %4443 = vmatprep.subr.mxu0 %v680_v9  ;;  %v1289_v8 = vcombine.high %v1281_v62, %v1281_v62  ;;  %v650_v9 = vld [vmem:[#allocation2 + $0x1200] sm:$0xff] }
 0x15e   :  { %4478 = vmatprep.subr.mxu1 %v712_v10  ;;  %4444 = vmatpush3.msra.mxu0 %v664_v11  ;;  %v682_v10 = vld [vmem:[#allocation2 + $0x1300] sm:$0xff]  ;;  %v1290_v11 = vcombine.high %v1288_v3, %v1288_v3 }
 0x15f   :  { %4479 = vmatpush3.msra.mxu1 %v696_v12  ;;  %4445 = vmatprep.subr.mxu0 %v679_v13  ;;  %v745_v12 = vld [vmem:[#allocation2 + $0x14f8] sm:$0xff] }
 0x160   :  { %4480 = vmatprep.subr.mxu1 %v711_v14  ;;  %4446 = vmatpush3.msra.mxu0 %v663_v15  ;;  %v777_v13 = vld [vmem:[#allocation2 + $0x15f8] sm:$0xff] }
 0x161   :  { %4481 = vmatpush3.msra.mxu1 %v695_v16  ;;  %4447 = vmatprep.subr.mxu0 %v678_v17  ;;  %v729_v14 = vld [vmem:[#allocation2 + $0x1478] sm:$0xff]  ;;  %v744_v16 = vld [vmem:[#allocation2 + $0x14f0] sm:$0xff] }
 0x162   :  { %4482 = vmatprep.subr.mxu1 %v710_v18  ;;  %4448 = vmatpush3.msra.mxu0 %v662_v19  ;;  %v761_v15 = vld [vmem:[#allocation2 + $0x1578] sm:$0xff]  ;;  %v776_v17 = vld [vmem:[#allocation2 + $0x15f0] sm:$0xff] }
 0x163   :  { %4483 = vmatpush3.msra.mxu1 %v694_v20  ;;  %4449 = vmatprep.subr.mxu0 %v677_v21  ;;  %v728_v18 = vld [vmem:[#allocation2 + $0x1470] sm:$0xff]  ;;  %v743_v20 = vld [vmem:[#allocation2 + $0x14e8] sm:$0xff] }
 0x164   :  { %4484 = vmatprep.subr.mxu1 %v709_v22  ;;  %4450 = vmatpush3.msra.mxu0 %v661_v23  ;;  %v760_v19 = vld [vmem:[#allocation2 + $0x1570] sm:$0xff]  ;;  %v775_v21 = vld [vmem:[#allocation2 + $0x15e8] sm:$0xff] }
 0x165   :  { %4485 = vmatpush3.msra.mxu1 %v693_v24  ;;  %4451 = vmatprep.subr.mxu0 %v676_v25  ;;  %v727_v22 = vld [vmem:[#allocation2 + $0x1468] sm:$0xff]  ;;  %v742_v24 = vld [vmem:[#allocation2 + $0x14e0] sm:$0xff] }
 0x166   :  { %4486 = vmatprep.subr.mxu1 %v708_v26  ;;  %4452 = vmatpush3.msra.mxu0 %v660_v27  ;;  %v759_v23 = vld [vmem:[#allocation2 + $0x1568] sm:$0xff]  ;;  %v774_v25 = vld [vmem:[#allocation2 + $0x15e0] sm:$0xff] }
 0x167   :  { %4487 = vmatpush3.msra.mxu1 %v692_v28  ;;  %4453 = vmatprep.subr.mxu0 %v675_v29  ;;  %v726_v26 = vld [vmem:[#allocation2 + $0x1460] sm:$0xff]  ;;  %v741_v28 = vld [vmem:[#allocation2 + $0x14d8] sm:$0xff] }
 0x168   :  { %4488 = vmatprep.subr.mxu1 %v707_v30  ;;  %4454 = vmatpush3.msra.mxu0 %v659_v31  ;;  %v758_v27 = vld [vmem:[#allocation2 + $0x1560] sm:$0xff]  ;;  %v773_v29 = vld [vmem:[#allocation2 + $0x15d8] sm:$0xff] }
 0x169   :  { %4489 = vmatpush3.msra.mxu1 %v691_v32  ;;  %4455 = vmatprep.subr.mxu0 %v674_v33  ;;  %v725_v30 = vld [vmem:[#allocation2 + $0x1458] sm:$0xff]  ;;  %v740_v32 = vld [vmem:[#allocation2 + $0x14d0] sm:$0xff] }
 0x16a   :  { %4490 = vmatprep.subr.mxu1 %v706_v34  ;;  %4456 = vmatpush3.msra.mxu0 %v658_v35  ;;  %v757_v31 = vld [vmem:[#allocation2 + $0x1558] sm:$0xff]  ;;  %v772_v33 = vld [vmem:[#allocation2 + $0x15d0] sm:$0xff] }
 0x16b   :  { %4491 = vmatpush3.msra.mxu1 %v690_v36  ;;  %4457 = vmatprep.subr.mxu0 %v673_v37  ;;  %v724_v34 = vld [vmem:[#allocation2 + $0x1450] sm:$0xff]  ;;  %v739_v36 = vld [vmem:[#allocation2 + $0x14c8] sm:$0xff] }
 0x16c   :  { %4492 = vmatprep.subr.mxu1 %v705_v38  ;;  %4458 = vmatpush3.msra.mxu0 %v657_v39  ;;  %v756_v35 = vld [vmem:[#allocation2 + $0x1550] sm:$0xff]  ;;  %v771_v37 = vld [vmem:[#allocation2 + $0x15c8] sm:$0xff] }
 0x16d   :  { %4493 = vmatpush3.msra.mxu1 %v689_v40  ;;  %4459 = vmatprep.subr.mxu0 %v672_v41  ;;  %v723_v38 = vld [vmem:[#allocation2 + $0x1448] sm:$0xff]  ;;  %v738_v40 = vld [vmem:[#allocation2 + $0x14c0] sm:$0xff] }
 0x16e   :  { %4494 = vmatprep.subr.mxu1 %v704_v42  ;;  %4460 = vmatpush3.msra.mxu0 %v656_v43  ;;  %v755_v39 = vld [vmem:[#allocation2 + $0x1548] sm:$0xff]  ;;  %v770_v41 = vld [vmem:[#allocation2 + $0x15c0] sm:$0xff] }
 0x16f   :  { %4495 = vmatpush3.msra.mxu1 %v688_v44  ;;  %4461 = vmatprep.subr.mxu0 %v671_v45  ;;  %v722_v42 = vld [vmem:[#allocation2 + $0x1440] sm:$0xff]  ;;  %v737_v44 = vld [vmem:[#allocation2 + $0x14b8] sm:$0xff] }
 0x170   :  { %4496 = vmatprep.subr.mxu1 %v703_v46  ;;  %4462 = vmatpush3.msra.mxu0 %v655_v47  ;;  %v754_v43 = vld [vmem:[#allocation2 + $0x1540] sm:$0xff]  ;;  %v769_v45 = vld [vmem:[#allocation2 + $0x15b8] sm:$0xff] }
 0x171   :  { %4497 = vmatpush3.msra.mxu1 %v687_v48  ;;  %4463 = vmatprep.subr.mxu0 %v670_v50  ;;  %v721_v46 = vld [vmem:[#allocation2 + $0x1438] sm:$0xff]  ;;  %v736_v48 = vld [vmem:[#allocation2 + $0x14b0] sm:$0xff] }
 0x172   :  { %4498 = vmatprep.subr.mxu1 %v702_v52  ;;  %4464 = vmatpush3.msra.mxu0 %v654_v53  ;;  %v753_v47 = vld [vmem:[#allocation2 + $0x1538] sm:$0xff]  ;;  %v720_v50 = vld [vmem:[#allocation2 + $0x1430] sm:$0xff]  ;;  %v735_v53 = vld [vmem:[#allocation2 + $0x14a8] sm:$0xff] }
 0x173   :  { %4499 = vmatpush3.msra.mxu1 %v686_v54  ;;  %4465 = vmatprep.subr.mxu0 %v669_v55  ;;  %v752_v52 = vld [vmem:[#allocation2 + $0x1530] sm:$0xff]  ;;  %v767_v54 = vld [vmem:[#allocation2 + $0x15a8] sm:$0xff] }
 0x174   :  { %4500 = vmatprep.subr.mxu1 %v701_v56  ;;  %4466 = vmatpush3.msra.mxu0 %v653_v58  ;;  %v719_v55 = vld [vmem:[#allocation2 + $0x1428] sm:$0xff]  ;;  %v734_v58 = vld [vmem:[#allocation2 + $0x14a0] sm:$0xff] }
 0x175   :  { %4501 = vmatpush3.msra.mxu1 %v685_v59  ;;  %4467 = vmatprep.subr.mxu0 %v668_v60  ;;  %v751_v56 = vld [vmem:[#allocation2 + $0x1528] sm:$0xff]  ;;  %v766_v59 = vld [vmem:[#allocation2 + $0x15a0] sm:$0xff] }
 0x176   :  { %4502 = vmatprep.subr.mxu1 %v700_v61  ;;  %4468 = vmatpush3.msra.mxu0 %v652_v63  ;;  %v718_v60 = vld [vmem:[#allocation2 + $0x1420] sm:$0xff]  ;;  %v765_v63 = vld [vmem:[#allocation2 + $0x1598] sm:$0xff] }
 0x177   :  { %4503 = vmatpush3.msra.mxu1 %v684_v0  ;;  %4469 = vmatprep.subr.mxu0 %v667_v1  ;;  %v750_v61 = vld [vmem:[#allocation2 + $0x1520] sm:$0xff]  ;;  %v1291_v0 = vcombine.high %v68_v57, %v68_v57  ;;  %v717_v1 = vld [vmem:[#allocation2 + $0x1418] sm:$0xff] }
 0x178   :  { %4504 = vmatprep.subr.mxu1 %v699_v2  ;;  %4470 = vmatpush3.msra.mxu0 %v651_v4  ;;  %v749_v2 = vld [vmem:[#allocation2 + $0x1518] sm:$0xff]  ;;  %v764_v4 = vld [vmem:[#allocation2 + $0x1590] sm:$0xff] }
 0x179   :  { %4505 = vmatpush3.msra.mxu1 %v683_v5  ;;  %4471 = vmatprep.subr.mxu0 %v666_v6  ;;  %v1298_v5 = vrot.slane %v68_v57, %v5142_v51  ;;  %v716_v6 = vld [vmem:[#allocation2 + $0x1410] sm:$0xff] }
 0x17a   :  { %4506 = vmatprep.subr.mxu1 %v698_v7  ;;  %4472 = vmatpush3.msra.mxu0 %v650_v9  ;;  %v748_v7 = vld [vmem:[#allocation2 + $0x1510] sm:$0xff]  ;;  %v763_v9 = vld [vmem:[#allocation2 + $0x1588] sm:$0xff] }
 0x17b   :  { %2781 = vmatprep.mubr.f32.mxu0 %v1289_v8  ;;  %4507 = vmatpush3.msra.mxu1 %v682_v10  ;;  %v731_v8 = vld [vmem:[#allocation2 + $0x1488] sm:$0xff]  ;;  %v1305_v10 = vrot.slane %v1291_v0, %v5142_v51  ;;  %v832_v57 = vld [vmem:[#allocation2 + $0x17b0] sm:$0xff]  ;;  %v69_v0 = vld [vmem:[%s5275_s0 + $0x58] sm:$0xff] }
 0x17c   :  { %2782 = vmatmul.mubr.f32.vlgmr.msra.gmra.mxu0 %v1281_v62  ;;  %2851 = vmatprep.mubr.f32.mxu1 %v1290_v11  ;;  %v733_v62 = vld [vmem:[#allocation2 + $0x1498] sm:$0xff]  ;;  %v715_v11 = vld [vmem:[#allocation2 + $0x1408] sm:$0xff] }
 0x17d   :  { %4511 = vmatprep.subr.mxu0 %v745_v12  ;;  %4546 = vmatprep.subr.mxu1 %v777_v13  ;;  %v747_v12 = vld [vmem:[#allocation2 + $0x1508] sm:$0xff]  ;;  %v730_v13 = vld [vmem:[#allocation2 + $0x1480] sm:$0xff] }
 0x17e   :  { %2852 = vmatmul.mubr.f32.vlgmr.msra.gmra.mxu1 %v1288_v3  ;;  %4512 = vmatpush3.msra.mxu0 %v729_v14  ;;  %v732_v3 = vld [vmem:[#allocation2 + $0x1490] sm:$0xff]  ;;  %v762_v14 = vld [vmem:[#allocation2 + $0x1580] sm:$0xff] }
 0x17f   :  { %4547 = vmatpush3.msra.mxu1 %v761_v15  ;;  %4513 = vmatprep.subr.mxu0 %v744_v16  ;;  %v1306_v15 = vcombine.high %v1298_v5, %v1298_v5  ;;  %v714_v16 = vld [vmem:[#allocation2 + $0x1400] sm:$0xff] }
 0x180   :  { %4548 = vmatprep.subr.mxu1 %v776_v17  ;;  %4514 = vmatpush3.msra.mxu0 %v728_v18  ;;  %v746_v17 = vld [vmem:[#allocation2 + $0x1500] sm:$0xff]  ;;  %v1307_v18 = vcombine.high %v1305_v10, %v1305_v10 }
 0x181   :  { %4549 = vmatpush3.msra.mxu1 %v760_v19  ;;  %4515 = vmatprep.subr.mxu0 %v743_v20  ;;  %v809_v19 = vld [vmem:[#allocation2 + $0x16f8] sm:$0xff] }
 0x182   :  { %4550 = vmatprep.subr.mxu1 %v775_v21  ;;  %4516 = vmatpush3.msra.mxu0 %v727_v22  ;;  %v841_v20 = vld [vmem:[#allocation2 + $0x17f8] sm:$0xff] }
 0x183   :  { %4551 = vmatpush3.msra.mxu1 %v759_v23  ;;  %4517 = vmatprep.subr.mxu0 %v742_v24  ;;  %v793_v21 = vld [vmem:[#allocation2 + $0x1678] sm:$0xff]  ;;  %v808_v23 = vld [vmem:[#allocation2 + $0x16f0] sm:$0xff] }
 0x184   :  { %4552 = vmatprep.subr.mxu1 %v774_v25  ;;  %4518 = vmatpush3.msra.mxu0 %v726_v26  ;;  %v825_v22 = vld [vmem:[#allocation2 + $0x1778] sm:$0xff]  ;;  %v840_v24 = vld [vmem:[#allocation2 + $0x17f0] sm:$0xff] }
 0x185   :  { %4553 = vmatpush3.msra.mxu1 %v758_v27  ;;  %4519 = vmatprep.subr.mxu0 %v741_v28  ;;  %v792_v25 = vld [vmem:[#allocation2 + $0x1670] sm:$0xff]  ;;  %v807_v27 = vld [vmem:[#allocation2 + $0x16e8] sm:$0xff] }
 0x186   :  { %4554 = vmatprep.subr.mxu1 %v773_v29  ;;  %4520 = vmatpush3.msra.mxu0 %v725_v30  ;;  %v824_v26 = vld [vmem:[#allocation2 + $0x1770] sm:$0xff]  ;;  %v839_v28 = vld [vmem:[#allocation2 + $0x17e8] sm:$0xff] }
 0x187   :  { %4555 = vmatpush3.msra.mxu1 %v757_v31  ;;  %4521 = vmatprep.subr.mxu0 %v740_v32  ;;  %v791_v29 = vld [vmem:[#allocation2 + $0x1668] sm:$0xff]  ;;  %v806_v31 = vld [vmem:[#allocation2 + $0x16e0] sm:$0xff] }
 0x188   :  { %4556 = vmatprep.subr.mxu1 %v772_v33  ;;  %4522 = vmatpush3.msra.mxu0 %v724_v34  ;;  %v823_v30 = vld [vmem:[#allocation2 + $0x1768] sm:$0xff]  ;;  %v838_v32 = vld [vmem:[#allocation2 + $0x17e0] sm:$0xff] }
 0x189   :  { %4557 = vmatpush3.msra.mxu1 %v756_v35  ;;  %4523 = vmatprep.subr.mxu0 %v739_v36  ;;  %v790_v33 = vld [vmem:[#allocation2 + $0x1660] sm:$0xff]  ;;  %v805_v35 = vld [vmem:[#allocation2 + $0x16d8] sm:$0xff] }
 0x18a   :  { %4558 = vmatprep.subr.mxu1 %v771_v37  ;;  %4524 = vmatpush3.msra.mxu0 %v723_v38  ;;  %v822_v34 = vld [vmem:[#allocation2 + $0x1760] sm:$0xff]  ;;  %v837_v36 = vld [vmem:[#allocation2 + $0x17d8] sm:$0xff] }
 0x18b   :  { %4559 = vmatpush3.msra.mxu1 %v755_v39  ;;  %4525 = vmatprep.subr.mxu0 %v738_v40  ;;  %v789_v37 = vld [vmem:[#allocation2 + $0x1658] sm:$0xff]  ;;  %v804_v39 = vld [vmem:[#allocation2 + $0x16d0] sm:$0xff] }
 0x18c   :  { %4560 = vmatprep.subr.mxu1 %v770_v41  ;;  %4526 = vmatpush3.msra.mxu0 %v722_v42  ;;  %v821_v38 = vld [vmem:[#allocation2 + $0x1758] sm:$0xff]  ;;  %v836_v40 = vld [vmem:[#allocation2 + $0x17d0] sm:$0xff] }
 0x18d   :  { %4561 = vmatpush3.msra.mxu1 %v754_v43  ;;  %4527 = vmatprep.subr.mxu0 %v737_v44  ;;  %v788_v41 = vld [vmem:[#allocation2 + $0x1650] sm:$0xff]  ;;  %v803_v43 = vld [vmem:[#allocation2 + $0x16c8] sm:$0xff] }
 0x18e   :  { %4562 = vmatprep.subr.mxu1 %v769_v45  ;;  %4528 = vmatpush3.msra.mxu0 %v721_v46  ;;  %v820_v42 = vld [vmem:[#allocation2 + $0x1750] sm:$0xff]  ;;  %v835_v44 = vld [vmem:[#allocation2 + $0x17c8] sm:$0xff] }
 0x18f   :  { %4563 = vmatpush3.msra.mxu1 %v753_v47  ;;  %4529 = vmatprep.subr.mxu0 %v736_v48  ;;  %v787_v45 = vld [vmem:[#allocation2 + $0x1648] sm:$0xff]  ;;  %v802_v47 = vld [vmem:[#allocation2 + $0x16c0] sm:$0xff] }
 0x190   :  { %4564 = vmatprep.subr.mxu1 %v768_v49  ;;  %4530 = vmatpush3.msra.mxu0 %v720_v50  ;;  %v819_v46 = vld [vmem:[#allocation2 + $0x1748] sm:$0xff]  ;;  %v834_v48 = vld [vmem:[#allocation2 + $0x17c0] sm:$0xff] }
 0x191   :  { %4565 = vmatpush3.msra.mxu1 %v752_v52  ;;  %4531 = vmatprep.subr.mxu0 %v735_v53  ;;  %v786_v49 = vld [vmem:[#allocation2 + $0x1640] sm:$0xff]  ;;  %v801_v52 = vld [vmem:[#allocation2 + $0x16b8] sm:$0xff] }
 0x192   :  { %4566 = vmatprep.subr.mxu1 %v767_v54  ;;  %4532 = vmatpush3.msra.mxu0 %v719_v55  ;;  %v818_v50 = vld [vmem:[#allocation2 + $0x1740] sm:$0xff]  ;;  %v833_v53 = vld [vmem:[#allocation2 + $0x17b8] sm:$0xff] }
 0x193   :  { %4567 = vmatpush3.msra.mxu1 %v751_v56  ;;  %4533 = vmatprep.subr.mxu0 %v734_v58  ;;  %v785_v54 = vld [vmem:[#allocation2 + $0x1638] sm:$0xff]  ;;  %v800_v56 = vld [vmem:[#allocation2 + $0x16b0] sm:$0xff] }
 0x194   :  { %4568 = vmatprep.subr.mxu1 %v766_v59  ;;  %4534 = vmatpush3.msra.mxu0 %v718_v60  ;;  %v817_v55 = vld [vmem:[#allocation2 + $0x1738] sm:$0xff]  ;;  %v784_v58 = vld [vmem:[#allocation2 + $0x1630] sm:$0xff]  ;;  %v799_v60 = vld [vmem:[#allocation2 + $0x16a8] sm:$0xff] }
 0x195   :  { %4569 = vmatpush3.msra.mxu1 %v750_v61  ;;  %4535 = vmatprep.subr.mxu0 %v733_v62  ;;  %v816_v59 = vld [vmem:[#allocation2 + $0x1730] sm:$0xff]  ;;  %v831_v61 = vld [vmem:[#allocation2 + $0x17a8] sm:$0xff] }
 0x196   :  { %4570 = vmatprep.subr.mxu1 %v765_v63  ;;  %4536 = vmatpush3.msra.mxu0 %v717_v1  ;;  %v783_v62 = vld [vmem:[#allocation2 + $0x1628] sm:$0xff]  ;;  %v798_v1 = vld [vmem:[#allocation2 + $0x16a0] sm:$0xff] }
 0x197   :  { %4571 = vmatpush3.msra.mxu1 %v749_v2  ;;  %4537 = vmatprep.subr.mxu0 %v732_v3  ;;  %v815_v63 = vld [vmem:[#allocation2 + $0x1728] sm:$0xff]  ;;  %v830_v2 = vld [vmem:[#allocation2 + $0x17a0] sm:$0xff] }
 0x198   :  { %4572 = vmatprep.subr.mxu1 %v764_v4  ;;  %4538 = vmatpush3.msra.mxu0 %v716_v6  ;;  %v782_v3 = vld [vmem:[#allocation2 + $0x1620] sm:$0xff]  ;;  %v829_v6 = vld [vmem:[#allocation2 + $0x1798] sm:$0xff] }
 0x199   :  { %4573 = vmatpush3.msra.mxu1 %v748_v7  ;;  %4539 = vmatprep.subr.mxu0 %v731_v8  ;;  %v814_v4 = vld [vmem:[#allocation2 + $0x1720] sm:$0xff]  ;;  %v1308_v7 = vcombine.high %v69_v0, %v69_v0  ;;  %v781_v8 = vld [vmem:[#allocation2 + $0x1618] sm:$0xff] }
 0x19a   :  { %4574 = vmatprep.subr.mxu1 %v763_v9  ;;  %4540 = vmatpush3.msra.mxu0 %v715_v11  ;;  %v813_v9 = vld [vmem:[#allocation2 + $0x1718] sm:$0xff]  ;;  %v828_v11 = vld [vmem:[#allocation2 + $0x1790] sm:$0xff] }
 0x19b   :  { %4575 = vmatpush3.msra.mxu1 %v747_v12  ;;  %4541 = vmatprep.subr.mxu0 %v730_v13  ;;  %v1315_v12 = vrot.slane %v69_v0, %v5142_v51  ;;  %v780_v13 = vld [vmem:[#allocation2 + $0x1610] sm:$0xff] }
 0x19c   :  { %4576 = vmatprep.subr.mxu1 %v762_v14  ;;  %4542 = vmatpush3.msra.mxu0 %v714_v16  ;;  %v812_v14 = vld [vmem:[#allocation2 + $0x1710] sm:$0xff]  ;;  %v827_v16 = vld [vmem:[#allocation2 + $0x1788] sm:$0xff] }
 0x19d   :  { %2921 = vmatprep.mubr.f32.mxu0 %v1306_v15  ;;  %4577 = vmatpush3.msra.mxu1 %v746_v17  ;;  %v795_v15 = vld [vmem:[#allocation2 + $0x1688] sm:$0xff]  ;;  %v1322_v17 = vrot.slane %v1308_v7, %v5142_v51  ;;  %v896_v0 = vld [vmem:[#allocation2 + $0x19b0] sm:$0xff]  ;;  %v70_v7 = vld [vmem:[%s5275_s0 + $0x60] sm:$0xff] }
 0x19e   :  { %2922 = vmatmul.mubr.f32.vlgmr.msra.gmra.mxu0 %v1298_v5  ;;  %2991 = vmatprep.mubr.f32.mxu1 %v1307_v18  ;;  %v797_v5 = vld [vmem:[#allocation2 + $0x1698] sm:$0xff]  ;;  %v779_v18 = vld [vmem:[#allocation2 + $0x1608] sm:$0xff] }
 0x19f   :  { %4581 = vmatprep.subr.mxu0 %v809_v19  ;;  %4616 = vmatprep.subr.mxu1 %v841_v20  ;;  %v811_v19 = vld [vmem:[#allocation2 + $0x1708] sm:$0xff]  ;;  %v794_v20 = vld [vmem:[#allocation2 + $0x1680] sm:$0xff] }
 0x1a0   :  { %2992 = vmatmul.mubr.f32.vlgmr.msra.gmra.mxu1 %v1305_v10  ;;  %4582 = vmatpush3.msra.mxu0 %v793_v21  ;;  %v796_v10 = vld [vmem:[#allocation2 + $0x1690] sm:$0xff]  ;;  %v826_v21 = vld [vmem:[#allocation2 + $0x1780] sm:$0xff] }
 0x1a1   :  { %4617 = vmatpush3.msra.mxu1 %v825_v22  ;;  %4583 = vmatprep.subr.mxu0 %v808_v23  ;;  %v1323_v22 = vcombine.high %v1315_v12, %v1315_v12  ;;  %v778_v23 = vld [vmem:[#allocation2 + $0x1600] sm:$0xff] }
 0x1a2   :  { %4618 = vmatprep.subr.mxu1 %v840_v24  ;;  %4584 = vmatpush3.msra.mxu0 %v792_v25  ;;  %v810_v24 = vld [vmem:[#allocation2 + $0x1700] sm:$0xff]  ;;  %v1324_v25 = vcombine.high %v1322_v17, %v1322_v17 }
 0x1a3   :  { %4619 = vmatpush3.msra.mxu1 %v824_v26  ;;  %4585 = vmatprep.subr.mxu0 %v807_v27  ;;  %v873_v26 = vld [vmem:[#allocation2 + $0x18f8] sm:$0xff] }
 0x1a4   :  { %4620 = vmatprep.subr.mxu1 %v839_v28  ;;  %4586 = vmatpush3.msra.mxu0 %v791_v29  ;;  %v905_v27 = vld [vmem:[#allocation2 + $0x19f8] sm:$0xff] }
 0x1a5   :  { %4621 = vmatpush3.msra.mxu1 %v823_v30  ;;  %4587 = vmatprep.subr.mxu0 %v806_v31  ;;  %v857_v28 = vld [vmem:[#allocation2 + $0x1878] sm:$0xff]  ;;  %v872_v30 = vld [vmem:[#allocation2 + $0x18f0] sm:$0xff] }
 0x1a6   :  { %4622 = vmatprep.subr.mxu1 %v838_v32  ;;  %4588 = vmatpush3.msra.mxu0 %v790_v33  ;;  %v889_v29 = vld [vmem:[#allocation2 + $0x1978] sm:$0xff]  ;;  %v904_v31 = vld [vmem:[#allocation2 + $0x19f0] sm:$0xff] }
 0x1a7   :  { %4623 = vmatpush3.msra.mxu1 %v822_v34  ;;  %4589 = vmatprep.subr.mxu0 %v805_v35  ;;  %v856_v32 = vld [vmem:[#allocation2 + $0x1870] sm:$0xff]  ;;  %v871_v34 = vld [vmem:[#allocation2 + $0x18e8] sm:$0xff] }
 0x1a8   :  { %4624 = vmatprep.subr.mxu1 %v837_v36  ;;  %4590 = vmatpush3.msra.mxu0 %v789_v37  ;;  %v888_v33 = vld [vmem:[#allocation2 + $0x1970] sm:$0xff]  ;;  %v903_v35 = vld [vmem:[#allocation2 + $0x19e8] sm:$0xff] }
 0x1a9   :  { %4625 = vmatpush3.msra.mxu1 %v821_v38  ;;  %4591 = vmatprep.subr.mxu0 %v804_v39  ;;  %v855_v36 = vld [vmem:[#allocation2 + $0x1868] sm:$0xff]  ;;  %v870_v38 = vld [vmem:[#allocation2 + $0x18e0] sm:$0xff] }
 0x1aa   :  { %4626 = vmatprep.subr.mxu1 %v836_v40  ;;  %4592 = vmatpush3.msra.mxu0 %v788_v41  ;;  %v887_v37 = vld [vmem:[#allocation2 + $0x1968] sm:$0xff]  ;;  %v902_v39 = vld [vmem:[#allocation2 + $0x19e0] sm:$0xff] }
 0x1ab   :  { %4627 = vmatpush3.msra.mxu1 %v820_v42  ;;  %4593 = vmatprep.subr.mxu0 %v803_v43  ;;  %v854_v40 = vld [vmem:[#allocation2 + $0x1860] sm:$0xff]  ;;  %v869_v42 = vld [vmem:[#allocation2 + $0x18d8] sm:$0xff] }
 0x1ac   :  { %4628 = vmatprep.subr.mxu1 %v835_v44  ;;  %4594 = vmatpush3.msra.mxu0 %v787_v45  ;;  %v886_v41 = vld [vmem:[#allocation2 + $0x1960] sm:$0xff]  ;;  %v901_v43 = vld [vmem:[#allocation2 + $0x19d8] sm:$0xff] }
 0x1ad   :  { %4629 = vmatpush3.msra.mxu1 %v819_v46  ;;  %4595 = vmatprep.subr.mxu0 %v802_v47  ;;  %v853_v44 = vld [vmem:[#allocation2 + $0x1858] sm:$0xff]  ;;  %v868_v46 = vld [vmem:[#allocation2 + $0x18d0] sm:$0xff] }
 0x1ae   :  { %4630 = vmatprep.subr.mxu1 %v834_v48  ;;  %4596 = vmatpush3.msra.mxu0 %v786_v49  ;;  %v885_v45 = vld [vmem:[#allocation2 + $0x1958] sm:$0xff]  ;;  %v900_v47 = vld [vmem:[#allocation2 + $0x19d0] sm:$0xff] }
 0x1af   :  { %4631 = vmatpush3.msra.mxu1 %v818_v50  ;;  %4597 = vmatprep.subr.mxu0 %v801_v52  ;;  %v852_v48 = vld [vmem:[#allocation2 + $0x1850] sm:$0xff]  ;;  %v867_v50 = vld [vmem:[#allocation2 + $0x18c8] sm:$0xff] }
 0x1b0   :  { %4632 = vmatprep.subr.mxu1 %v833_v53  ;;  %4598 = vmatpush3.msra.mxu0 %v785_v54  ;;  %v884_v49 = vld [vmem:[#allocation2 + $0x1950] sm:$0xff]  ;;  %v899_v52 = vld [vmem:[#allocation2 + $0x19c8] sm:$0xff] }
 0x1b1   :  { %4633 = vmatpush3.msra.mxu1 %v817_v55  ;;  %4599 = vmatprep.subr.mxu0 %v800_v56  ;;  %v851_v53 = vld [vmem:[#allocation2 + $0x1848] sm:$0xff]  ;;  %v866_v55 = vld [vmem:[#allocation2 + $0x18c0] sm:$0xff] }
 0x1b2   :  { %4634 = vmatprep.subr.mxu1 %v832_v57  ;;  %4600 = vmatpush3.msra.mxu0 %v784_v58  ;;  %v883_v54 = vld [vmem:[#allocation2 + $0x1948] sm:$0xff]  ;;  %v898_v56 = vld [vmem:[#allocation2 + $0x19c0] sm:$0xff] }
 0x1b3   :  { %4635 = vmatpush3.msra.mxu1 %v816_v59  ;;  %4601 = vmatprep.subr.mxu0 %v799_v60  ;;  %v850_v57 = vld [vmem:[#allocation2 + $0x1840] sm:$0xff]  ;;  %v865_v59 = vld [vmem:[#allocation2 + $0x18b8] sm:$0xff] }
 0x1b4   :  { %4636 = vmatprep.subr.mxu1 %v831_v61  ;;  %4602 = vmatpush3.msra.mxu0 %v783_v62  ;;  %v882_v58 = vld [vmem:[#allocation2 + $0x1940] sm:$0xff]  ;;  %v897_v60 = vld [vmem:[#allocation2 + $0x19b8] sm:$0xff] }
 0x1b5   :  { %4637 = vmatpush3.msra.mxu1 %v815_v63  ;;  %4603 = vmatprep.subr.mxu0 %v798_v1  ;;  %v849_v61 = vld [vmem:[#allocation2 + $0x1838] sm:$0xff]  ;;  %v864_v63 = vld [vmem:[#allocation2 + $0x18b0] sm:$0xff] }
 0x1b6   :  { %4638 = vmatprep.subr.mxu1 %v830_v2  ;;  %4604 = vmatpush3.msra.mxu0 %v782_v3  ;;  %v881_v62 = vld [vmem:[#allocation2 + $0x1938] sm:$0xff]  ;;  %v848_v1 = vld [vmem:[#allocation2 + $0x1830] sm:$0xff]  ;;  %v863_v3 = vld [vmem:[#allocation2 + $0x18a8] sm:$0xff] }
 0x1b7   :  { %4639 = vmatpush3.msra.mxu1 %v814_v4  ;;  %4605 = vmatprep.subr.mxu0 %v797_v5  ;;  %v880_v2 = vld [vmem:[#allocation2 + $0x1930] sm:$0xff]  ;;  %v895_v4 = vld [vmem:[#allocation2 + $0x19a8] sm:$0xff] }
 0x1b8   :  { %4640 = vmatprep.subr.mxu1 %v829_v6  ;;  %4606 = vmatpush3.msra.mxu0 %v781_v8  ;;  %v847_v5 = vld [vmem:[#allocation2 + $0x1828] sm:$0xff]  ;;  %v862_v8 = vld [vmem:[#allocation2 + $0x18a0] sm:$0xff] }
 0x1b9   :  { %4641 = vmatpush3.msra.mxu1 %v813_v9  ;;  %4607 = vmatprep.subr.mxu0 %v796_v10  ;;  %v879_v6 = vld [vmem:[#allocation2 + $0x1928] sm:$0xff]  ;;  %v894_v9 = vld [vmem:[#allocation2 + $0x19a0] sm:$0xff] }
 0x1ba   :  { %4642 = vmatprep.subr.mxu1 %v828_v11  ;;  %4608 = vmatpush3.msra.mxu0 %v780_v13  ;;  %v846_v10 = vld [vmem:[#allocation2 + $0x1820] sm:$0xff]  ;;  %v893_v13 = vld [vmem:[#allocation2 + $0x1998] sm:$0xff] }
 0x1bb   :  { %4643 = vmatpush3.msra.mxu1 %v812_v14  ;;  %4609 = vmatprep.subr.mxu0 %v795_v15  ;;  %v878_v11 = vld [vmem:[#allocation2 + $0x1920] sm:$0xff]  ;;  %v1325_v14 = vcombine.high %v70_v7, %v70_v7  ;;  %v845_v15 = vld [vmem:[#allocation2 + $0x1818] sm:$0xff] }
 0x1bc   :  { %4644 = vmatprep.subr.mxu1 %v827_v16  ;;  %4610 = vmatpush3.msra.mxu0 %v779_v18  ;;  %v877_v16 = vld [vmem:[#allocation2 + $0x1918] sm:$0xff]  ;;  %v892_v18 = vld [vmem:[#allocation2 + $0x1990] sm:$0xff] }
 0x1bd   :  { %4645 = vmatpush3.msra.mxu1 %v811_v19  ;;  %4611 = vmatprep.subr.mxu0 %v794_v20  ;;  %v1332_v19 = vrot.slane %v70_v7, %v5142_v51  ;;  %v844_v20 = vld [vmem:[#allocation2 + $0x1810] sm:$0xff] }
 0x1be   :  { %4646 = vmatprep.subr.mxu1 %v826_v21  ;;  %4612 = vmatpush3.msra.mxu0 %v778_v23  ;;  %v876_v21 = vld [vmem:[#allocation2 + $0x1910] sm:$0xff]  ;;  %v891_v23 = vld [vmem:[#allocation2 + $0x1988] sm:$0xff] }
 0x1bf   :  { %3061 = vmatprep.mubr.f32.mxu0 %v1323_v22  ;;  %4647 = vmatpush3.msra.mxu1 %v810_v24  ;;  %v859_v22 = vld [vmem:[#allocation2 + $0x1888] sm:$0xff]  ;;  %v1339_v24 = vrot.slane %v1325_v14, %v5142_v51  ;;  %v960_v7 = vld [vmem:[#allocation2 + $0x1bb0] sm:$0xff] }
 0x1c0   :  { %3062 = vmatmul.mubr.f32.vlgmr.msra.gmra.mxu0 %v1315_v12  ;;  %3131 = vmatprep.mubr.f32.mxu1 %v1324_v25  ;;  %v861_v12 = vld [vmem:[#allocation2 + $0x1898] sm:$0xff]  ;;  %v843_v25 = vld [vmem:[#allocation2 + $0x1808] sm:$0xff] }
 0x1c1   :  { %4651 = vmatprep.subr.mxu0 %v873_v26  ;;  %4686 = vmatprep.subr.mxu1 %v905_v27  ;;  %v875_v26 = vld [vmem:[#allocation2 + $0x1908] sm:$0xff]  ;;  %v858_v27 = vld [vmem:[#allocation2 + $0x1880] sm:$0xff] }
 0x1c2   :  { %3132 = vmatmul.mubr.f32.vlgmr.msra.gmra.mxu1 %v1322_v17  ;;  %4652 = vmatpush3.msra.mxu0 %v857_v28  ;;  %v860_v17 = vld [vmem:[#allocation2 + $0x1890] sm:$0xff]  ;;  %v890_v28 = vld [vmem:[#allocation2 + $0x1980] sm:$0xff]  ;;  %v71_v14 = vld [vmem:[%s5275_s0 + $0x68] sm:$0xff] }
 0x1c3   :  { %4687 = vmatpush3.msra.mxu1 %v889_v29  ;;  %4653 = vmatprep.subr.mxu0 %v872_v30  ;;  %v1340_v29 = vcombine.high %v1332_v19, %v1332_v19  ;;  %v842_v30 = vld [vmem:[#allocation2 + $0x1800] sm:$0xff] }
 0x1c4   :  { %4688 = vmatprep.subr.mxu1 %v904_v31  ;;  %4654 = vmatpush3.msra.mxu0 %v856_v32  ;;  %v874_v31 = vld [vmem:[#allocation2 + $0x1900] sm:$0xff]  ;;  %v1341_v32 = vcombine.high %v1339_v24, %v1339_v24 }
 0x1c5   :  { %4689 = vmatpush3.msra.mxu1 %v888_v33  ;;  %4655 = vmatprep.subr.mxu0 %v871_v34  ;;  %v937_v33 = vld [vmem:[#allocation2 + $0x1af8] sm:$0xff] }
 0x1c6   :  { %4690 = vmatprep.subr.mxu1 %v903_v35  ;;  %4656 = vmatpush3.msra.mxu0 %v855_v36  ;;  %v969_v34 = vld [vmem:[#allocation2 + $0x1bf8] sm:$0xff] }
 0x1c7   :  { %4691 = vmatpush3.msra.mxu1 %v887_v37  ;;  %4657 = vmatprep.subr.mxu0 %v870_v38  ;;  %v921_v35 = vld [vmem:[#allocation2 + $0x1a78] sm:$0xff]  ;;  %v936_v37 = vld [vmem:[#allocation2 + $0x1af0] sm:$0xff] }
 0x1c8   :  { %4692 = vmatprep.subr.mxu1 %v902_v39  ;;  %4658 = vmatpush3.msra.mxu0 %v854_v40  ;;  %v953_v36 = vld [vmem:[#allocation2 + $0x1b78] sm:$0xff]  ;;  %v968_v38 = vld [vmem:[#allocation2 + $0x1bf0] sm:$0xff] }
 0x1c9   :  { %4693 = vmatpush3.msra.mxu1 %v886_v41  ;;  %4659 = vmatprep.subr.mxu0 %v869_v42  ;;  %v920_v39 = vld [vmem:[#allocation2 + $0x1a70] sm:$0xff]  ;;  %v935_v41 = vld [vmem:[#allocation2 + $0x1ae8] sm:$0xff] }
 0x1ca   :  { %4694 = vmatprep.subr.mxu1 %v901_v43  ;;  %4660 = vmatpush3.msra.mxu0 %v853_v44  ;;  %v952_v40 = vld [vmem:[#allocation2 + $0x1b70] sm:$0xff]  ;;  %v967_v42 = vld [vmem:[#allocation2 + $0x1be8] sm:$0xff] }
 0x1cb   :  { %4695 = vmatpush3.msra.mxu1 %v885_v45  ;;  %4661 = vmatprep.subr.mxu0 %v868_v46  ;;  %v919_v43 = vld [vmem:[#allocation2 + $0x1a68] sm:$0xff]  ;;  %v934_v45 = vld [vmem:[#allocation2 + $0x1ae0] sm:$0xff] }
 0x1cc   :  { %4696 = vmatprep.subr.mxu1 %v900_v47  ;;  %4662 = vmatpush3.msra.mxu0 %v852_v48  ;;  %v951_v44 = vld [vmem:[#allocation2 + $0x1b68] sm:$0xff]  ;;  %v966_v46 = vld [vmem:[#allocation2 + $0x1be0] sm:$0xff] }
 0x1cd   :  { %4697 = vmatpush3.msra.mxu1 %v884_v49  ;;  %4663 = vmatprep.subr.mxu0 %v867_v50  ;;  %v918_v47 = vld [vmem:[#allocation2 + $0x1a60] sm:$0xff]  ;;  %v933_v49 = vld [vmem:[#allocation2 + $0x1ad8] sm:$0xff] }
 0x1ce   :  { %4698 = vmatprep.subr.mxu1 %v899_v52  ;;  %4664 = vmatpush3.msra.mxu0 %v851_v53  ;;  %v950_v48 = vld [vmem:[#allocation2 + $0x1b60] sm:$0xff]  ;;  %v965_v50 = vld [vmem:[#allocation2 + $0x1bd8] sm:$0xff] }
 0x1cf   :  { %4699 = vmatpush3.msra.mxu1 %v883_v54  ;;  %4665 = vmatprep.subr.mxu0 %v866_v55  ;;  %v917_v52 = vld [vmem:[#allocation2 + $0x1a58] sm:$0xff]  ;;  %v932_v54 = vld [vmem:[#allocation2 + $0x1ad0] sm:$0xff] }
 0x1d0   :  { %4700 = vmatprep.subr.mxu1 %v898_v56  ;;  %4666 = vmatpush3.msra.mxu0 %v850_v57  ;;  %v949_v53 = vld [vmem:[#allocation2 + $0x1b58] sm:$0xff]  ;;  %v964_v55 = vld [vmem:[#allocation2 + $0x1bd0] sm:$0xff] }
 0x1d1   :  { %4701 = vmatpush3.msra.mxu1 %v882_v58  ;;  %4667 = vmatprep.subr.mxu0 %v865_v59  ;;  %v916_v56 = vld [vmem:[#allocation2 + $0x1a50] sm:$0xff]  ;;  %v931_v58 = vld [vmem:[#allocation2 + $0x1ac8] sm:$0xff] }
 0x1d2   :  { %4702 = vmatprep.subr.mxu1 %v897_v60  ;;  %4668 = vmatpush3.msra.mxu0 %v849_v61  ;;  %v948_v57 = vld [vmem:[#allocation2 + $0x1b50] sm:$0xff]  ;;  %v963_v59 = vld [vmem:[#allocation2 + $0x1bc8] sm:$0xff] }
 0x1d3   :  { %4703 = vmatpush3.msra.mxu1 %v881_v62  ;;  %4669 = vmatprep.subr.mxu0 %v864_v63  ;;  %v915_v60 = vld [vmem:[#allocation2 + $0x1a48] sm:$0xff]  ;;  %v930_v62 = vld [vmem:[#allocation2 + $0x1ac0] sm:$0xff] }
 0x1d4   :  { %4704 = vmatprep.subr.mxu1 %v896_v0  ;;  %4670 = vmatpush3.msra.mxu0 %v848_v1  ;;  %v947_v61 = vld [vmem:[#allocation2 + $0x1b48] sm:$0xff]  ;;  %v962_v63 = vld [vmem:[#allocation2 + $0x1bc0] sm:$0xff] }
 0x1d5   :  { %4705 = vmatpush3.msra.mxu1 %v880_v2  ;;  %4671 = vmatprep.subr.mxu0 %v863_v3  ;;  %v914_v0 = vld [vmem:[#allocation2 + $0x1a40] sm:$0xff]  ;;  %v929_v2 = vld [vmem:[#allocation2 + $0x1ab8] sm:$0xff] }
 0x1d6   :  { %4706 = vmatprep.subr.mxu1 %v895_v4  ;;  %4672 = vmatpush3.msra.mxu0 %v847_v5  ;;  %v946_v1 = vld [vmem:[#allocation2 + $0x1b40] sm:$0xff]  ;;  %v961_v3 = vld [vmem:[#allocation2 + $0x1bb8] sm:$0xff] }
 0x1d7   :  { %4707 = vmatpush3.msra.mxu1 %v879_v6  ;;  %4673 = vmatprep.subr.mxu0 %v862_v8  ;;  %v913_v4 = vld [vmem:[#allocation2 + $0x1a38] sm:$0xff]  ;;  %v928_v6 = vld [vmem:[#allocation2 + $0x1ab0] sm:$0xff] }
 0x1d8   :  { %4708 = vmatprep.subr.mxu1 %v894_v9  ;;  %4674 = vmatpush3.msra.mxu0 %v846_v10  ;;  %v945_v5 = vld [vmem:[#allocation2 + $0x1b38] sm:$0xff]  ;;  %v912_v8 = vld [vmem:[#allocation2 + $0x1a30] sm:$0xff]  ;;  %v927_v10 = vld [vmem:[#allocation2 + $0x1aa8] sm:$0xff] }
 0x1d9   :  { %4709 = vmatpush3.msra.mxu1 %v878_v11  ;;  %4675 = vmatprep.subr.mxu0 %v861_v12  ;;  %v944_v9 = vld [vmem:[#allocation2 + $0x1b30] sm:$0xff]  ;;  %v959_v11 = vld [vmem:[#allocation2 + $0x1ba8] sm:$0xff] }
 0x1da   :  { %4710 = vmatprep.subr.mxu1 %v893_v13  ;;  %4676 = vmatpush3.msra.mxu0 %v845_v15  ;;  %v911_v12 = vld [vmem:[#allocation2 + $0x1a28] sm:$0xff]  ;;  %v926_v15 = vld [vmem:[#allocation2 + $0x1aa0] sm:$0xff] }
 0x1db   :  { %4711 = vmatpush3.msra.mxu1 %v877_v16  ;;  %4677 = vmatprep.subr.mxu0 %v860_v17  ;;  %v943_v13 = vld [vmem:[#allocation2 + $0x1b28] sm:$0xff]  ;;  %v958_v16 = vld [vmem:[#allocation2 + $0x1ba0] sm:$0xff] }
 0x1dc   :  { %4712 = vmatprep.subr.mxu1 %v892_v18  ;;  %4678 = vmatpush3.msra.mxu0 %v844_v20  ;;  %v910_v17 = vld [vmem:[#allocation2 + $0x1a20] sm:$0xff]  ;;  %v957_v20 = vld [vmem:[#allocation2 + $0x1b98] sm:$0xff] }
 0x1dd   :  { %4713 = vmatpush3.msra.mxu1 %v876_v21  ;;  %4679 = vmatprep.subr.mxu0 %v859_v22  ;;  %v942_v18 = vld [vmem:[#allocation2 + $0x1b20] sm:$0xff]  ;;  %v1342_v21 = vcombine.high %v71_v14, %v71_v14  ;;  %v909_v22 = vld [vmem:[#allocation2 + $0x1a18] sm:$0xff] }
 0x1de   :  { %4714 = vmatprep.subr.mxu1 %v891_v23  ;;  %4680 = vmatpush3.msra.mxu0 %v843_v25  ;;  %v941_v23 = vld [vmem:[#allocation2 + $0x1b18] sm:$0xff]  ;;  %v956_v25 = vld [vmem:[#allocation2 + $0x1b90] sm:$0xff] }
 0x1df   :  { %4715 = vmatpush3.msra.mxu1 %v875_v26  ;;  %4681 = vmatprep.subr.mxu0 %v858_v27  ;;  %v1349_v26 = vrot.slane %v71_v14, %v5142_v51  ;;  %v908_v27 = vld [vmem:[#allocation2 + $0x1a10] sm:$0xff] }
 0x1e0   :  { %4716 = vmatprep.subr.mxu1 %v890_v28  ;;  %4682 = vmatpush3.msra.mxu0 %v842_v30  ;;  %v940_v28 = vld [vmem:[#allocation2 + $0x1b10] sm:$0xff]  ;;  %v955_v30 = vld [vmem:[#allocation2 + $0x1b88] sm:$0xff] }
 0x1e1   :  { %3201 = vmatprep.mubr.f32.mxu0 %v1340_v29  ;;  %4717 = vmatpush3.msra.mxu1 %v874_v31  ;;  %v923_v29 = vld [vmem:[#allocation2 + $0x1a88] sm:$0xff]  ;;  %v1356_v31 = vrot.slane %v1342_v21, %v5142_v51  ;;  %v1024_v14 = vld [vmem:[#allocation2 + $0x1db0] sm:$0xff] }
 0x1e2   :  { %3202 = vmatmul.mubr.f32.vlgmr.msra.gmra.mxu0 %v1332_v19  ;;  %3271 = vmatprep.mubr.f32.mxu1 %v1341_v32  ;;  %v925_v19 = vld [vmem:[#allocation2 + $0x1a98] sm:$0xff]  ;;  %v907_v32 = vld [vmem:[#allocation2 + $0x1a08] sm:$0xff]  ;;  %v72_v21 = vld [vmem:[%s5275_s0 + $0x70] sm:$0xff] }
 0x1e3   :  { %4721 = vmatprep.subr.mxu0 %v937_v33  ;;  %4756 = vmatprep.subr.mxu1 %v969_v34  ;;  %v939_v33 = vld [vmem:[#allocation2 + $0x1b08] sm:$0xff]  ;;  %v922_v34 = vld [vmem:[#allocation2 + $0x1a80] sm:$0xff] }
 0x1e4   :  { %3272 = vmatmul.mubr.f32.vlgmr.msra.gmra.mxu1 %v1339_v24  ;;  %4722 = vmatpush3.msra.mxu0 %v921_v35  ;;  %v924_v24 = vld [vmem:[#allocation2 + $0x1a90] sm:$0xff]  ;;  %v954_v35 = vld [vmem:[#allocation2 + $0x1b80] sm:$0xff] }
 0x1e5   :  { %4757 = vmatpush3.msra.mxu1 %v953_v36  ;;  %4723 = vmatprep.subr.mxu0 %v936_v37  ;;  %v1357_v36 = vcombine.high %v1349_v26, %v1349_v26  ;;  %v906_v37 = vld [vmem:[#allocation2 + $0x1a00] sm:$0xff] }
 0x1e6   :  { %4758 = vmatprep.subr.mxu1 %v968_v38  ;;  %4724 = vmatpush3.msra.mxu0 %v920_v39  ;;  %v938_v38 = vld [vmem:[#allocation2 + $0x1b00] sm:$0xff]  ;;  %v1358_v39 = vcombine.high %v1356_v31, %v1356_v31 }
 0x1e7   :  { %4759 = vmatpush3.msra.mxu1 %v952_v40  ;;  %4725 = vmatprep.subr.mxu0 %v935_v41  ;;  %v1001_v40 = vld [vmem:[#allocation2 + $0x1cf8] sm:$0xff] }
 0x1e8   :  { %4760 = vmatprep.subr.mxu1 %v967_v42  ;;  %4726 = vmatpush3.msra.mxu0 %v919_v43  ;;  %v1033_v41 = vld [vmem:[#allocation2 + $0x1df8] sm:$0xff] }
 0x1e9   :  { %4761 = vmatpush3.msra.mxu1 %v951_v44  ;;  %4727 = vmatprep.subr.mxu0 %v934_v45  ;;  %v985_v42 = vld [vmem:[#allocation2 + $0x1c78] sm:$0xff]  ;;  %v1000_v44 = vld [vmem:[#allocation2 + $0x1cf0] sm:$0xff] }
 0x1ea   :  { %4762 = vmatprep.subr.mxu1 %v966_v46  ;;  %4728 = vmatpush3.msra.mxu0 %v918_v47  ;;  %v1017_v43 = vld [vmem:[#allocation2 + $0x1d78] sm:$0xff]  ;;  %v1032_v45 = vld [vmem:[#allocation2 + $0x1df0] sm:$0xff] }
 0x1eb   :  { %4763 = vmatpush3.msra.mxu1 %v950_v48  ;;  %4729 = vmatprep.subr.mxu0 %v933_v49  ;;  %v984_v46 = vld [vmem:[#allocation2 + $0x1c70] sm:$0xff]  ;;  %v999_v48 = vld [vmem:[#allocation2 + $0x1ce8] sm:$0xff] }
 0x1ec   :  { %4764 = vmatprep.subr.mxu1 %v965_v50  ;;  %4730 = vmatpush3.msra.mxu0 %v917_v52  ;;  %v1016_v47 = vld [vmem:[#allocation2 + $0x1d70] sm:$0xff]  ;;  %v1031_v49 = vld [vmem:[#allocation2 + $0x1de8] sm:$0xff] }
 0x1ed   :  { %4765 = vmatpush3.msra.mxu1 %v949_v53  ;;  %4731 = vmatprep.subr.mxu0 %v932_v54  ;;  %v983_v50 = vld [vmem:[#allocation2 + $0x1c68] sm:$0xff]  ;;  %v998_v53 = vld [vmem:[#allocation2 + $0x1ce0] sm:$0xff] }
 0x1ee   :  { %4766 = vmatprep.subr.mxu1 %v964_v55  ;;  %4732 = vmatpush3.msra.mxu0 %v916_v56  ;;  %v1015_v52 = vld [vmem:[#allocation2 + $0x1d68] sm:$0xff]  ;;  %v1030_v54 = vld [vmem:[#allocation2 + $0x1de0] sm:$0xff] }
 0x1ef   :  { %4767 = vmatpush3.msra.mxu1 %v948_v57  ;;  %4733 = vmatprep.subr.mxu0 %v931_v58  ;;  %v982_v55 = vld [vmem:[#allocation2 + $0x1c60] sm:$0xff]  ;;  %v997_v57 = vld [vmem:[#allocation2 + $0x1cd8] sm:$0xff] }
 0x1f0   :  { %4768 = vmatprep.subr.mxu1 %v963_v59  ;;  %4734 = vmatpush3.msra.mxu0 %v915_v60  ;;  %v1014_v56 = vld [vmem:[#allocation2 + $0x1d60] sm:$0xff]  ;;  %v1029_v58 = vld [vmem:[#allocation2 + $0x1dd8] sm:$0xff] }
 0x1f1   :  { %4769 = vmatpush3.msra.mxu1 %v947_v61  ;;  %4735 = vmatprep.subr.mxu0 %v930_v62  ;;  %v981_v59 = vld [vmem:[#allocation2 + $0x1c58] sm:$0xff]  ;;  %v996_v61 = vld [vmem:[#allocation2 + $0x1cd0] sm:$0xff] }
 0x1f2   :  { %4770 = vmatprep.subr.mxu1 %v962_v63  ;;  %4736 = vmatpush3.msra.mxu0 %v914_v0  ;;  %v1013_v60 = vld [vmem:[#allocation2 + $0x1d58] sm:$0xff]  ;;  %v1028_v62 = vld [vmem:[#allocation2 + $0x1dd0] sm:$0xff] }
 0x1f3   :  { %4771 = vmatpush3.msra.mxu1 %v946_v1  ;;  %4737 = vmatprep.subr.mxu0 %v929_v2  ;;  %v980_v63 = vld [vmem:[#allocation2 + $0x1c50] sm:$0xff]  ;;  %v995_v1 = vld [vmem:[#allocation2 + $0x1cc8] sm:$0xff] }
 0x1f4   :  { %4772 = vmatprep.subr.mxu1 %v961_v3  ;;  %4738 = vmatpush3.msra.mxu0 %v913_v4  ;;  %v1012_v0 = vld [vmem:[#allocation2 + $0x1d50] sm:$0xff]  ;;  %v1027_v2 = vld [vmem:[#allocation2 + $0x1dc8] sm:$0xff] }
 0x1f5   :  { %4773 = vmatpush3.msra.mxu1 %v945_v5  ;;  %4739 = vmatprep.subr.mxu0 %v928_v6  ;;  %v979_v3 = vld [vmem:[#allocation2 + $0x1c48] sm:$0xff]  ;;  %v994_v5 = vld [vmem:[#allocation2 + $0x1cc0] sm:$0xff] }
 0x1f6   :  { %4774 = vmatprep.subr.mxu1 %v960_v7  ;;  %4740 = vmatpush3.msra.mxu0 %v912_v8  ;;  %v1011_v4 = vld [vmem:[#allocation2 + $0x1d48] sm:$0xff]  ;;  %v1026_v6 = vld [vmem:[#allocation2 + $0x1dc0] sm:$0xff] }
 0x1f7   :  { %4775 = vmatpush3.msra.mxu1 %v944_v9  ;;  %4741 = vmatprep.subr.mxu0 %v927_v10  ;;  %v978_v7 = vld [vmem:[#allocation2 + $0x1c40] sm:$0xff]  ;;  %v993_v9 = vld [vmem:[#allocation2 + $0x1cb8] sm:$0xff] }
 0x1f8   :  { %4776 = vmatprep.subr.mxu1 %v959_v11  ;;  %4742 = vmatpush3.msra.mxu0 %v911_v12  ;;  %v1010_v8 = vld [vmem:[#allocation2 + $0x1d40] sm:$0xff]  ;;  %v1025_v10 = vld [vmem:[#allocation2 + $0x1db8] sm:$0xff] }
 0x1f9   :  { %4777 = vmatpush3.msra.mxu1 %v943_v13  ;;  %4743 = vmatprep.subr.mxu0 %v926_v15  ;;  %v977_v11 = vld [vmem:[#allocation2 + $0x1c38] sm:$0xff]  ;;  %v992_v13 = vld [vmem:[#allocation2 + $0x1cb0] sm:$0xff] }
 0x1fa   :  { %4778 = vmatprep.subr.mxu1 %v958_v16  ;;  %4744 = vmatpush3.msra.mxu0 %v910_v17  ;;  %v1009_v12 = vld [vmem:[#allocation2 + $0x1d38] sm:$0xff]  ;;  %v976_v15 = vld [vmem:[#allocation2 + $0x1c30] sm:$0xff]  ;;  %v991_v17 = vld [vmem:[#allocation2 + $0x1ca8] sm:$0xff] }
 0x1fb   :  { %4779 = vmatpush3.msra.mxu1 %v942_v18  ;;  %4745 = vmatprep.subr.mxu0 %v925_v19  ;;  %v1008_v16 = vld [vmem:[#allocation2 + $0x1d30] sm:$0xff]  ;;  %v1023_v18 = vld [vmem:[#allocation2 + $0x1da8] sm:$0xff] }
 0x1fc   :  { %4780 = vmatprep.subr.mxu1 %v957_v20  ;;  %4746 = vmatpush3.msra.mxu0 %v909_v22  ;;  %v975_v19 = vld [vmem:[#allocation2 + $0x1c28] sm:$0xff]  ;;  %v990_v22 = vld [vmem:[#allocation2 + $0x1ca0] sm:$0xff] }
 0x1fd   :  { %4781 = vmatpush3.msra.mxu1 %v941_v23  ;;  %4747 = vmatprep.subr.mxu0 %v924_v24  ;;  %v1007_v20 = vld [vmem:[#allocation2 + $0x1d28] sm:$0xff]  ;;  %v1022_v23 = vld [vmem:[#allocation2 + $0x1da0] sm:$0xff] }
 0x1fe   :  { %4782 = vmatprep.subr.mxu1 %v956_v25  ;;  %4748 = vmatpush3.msra.mxu0 %v908_v27  ;;  %v974_v24 = vld [vmem:[#allocation2 + $0x1c20] sm:$0xff]  ;;  %v1021_v27 = vld [vmem:[#allocation2 + $0x1d98] sm:$0xff] }
 0x1ff   :  { %4783 = vmatpush3.msra.mxu1 %v940_v28  ;;  %4749 = vmatprep.subr.mxu0 %v923_v29  ;;  %v1006_v25 = vld [vmem:[#allocation2 + $0x1d20] sm:$0xff]  ;;  %v1359_v28 = vcombine.high %v72_v21, %v72_v21  ;;  %v973_v29 = vld [vmem:[#allocation2 + $0x1c18] sm:$0xff] }
 0x200   :  { %4784 = vmatprep.subr.mxu1 %v955_v30  ;;  %4750 = vmatpush3.msra.mxu0 %v907_v32  ;;  %v1005_v30 = vld [vmem:[#allocation2 + $0x1d18] sm:$0xff]  ;;  %v1020_v32 = vld [vmem:[#allocation2 + $0x1d90] sm:$0xff] }
 0x201   :  { %4785 = vmatpush3.msra.mxu1 %v939_v33  ;;  %4751 = vmatprep.subr.mxu0 %v922_v34  ;;  %v1366_v33 = vrot.slane %v72_v21, %v5142_v51  ;;  %v972_v34 = vld [vmem:[#allocation2 + $0x1c10] sm:$0xff] }
 0x202   :  { %4786 = vmatprep.subr.mxu1 %v954_v35  ;;  %4752 = vmatpush3.msra.mxu0 %v906_v37  ;;  %v1004_v35 = vld [vmem:[#allocation2 + $0x1d10] sm:$0xff]  ;;  %v1019_v37 = vld [vmem:[#allocation2 + $0x1d88] sm:$0xff] }
 0x203   :  { %3341 = vmatprep.mubr.f32.mxu0 %v1357_v36  ;;  %4787 = vmatpush3.msra.mxu1 %v938_v38  ;;  %v987_v36 = vld [vmem:[#allocation2 + $0x1c88] sm:$0xff]  ;;  %v1373_v38 = vrot.slane %v1359_v28, %v5142_v51  ;;  %v1088_v21 = vld [vmem:[#allocation2 + $0x1fb0] sm:$0xff] }
 0x204   :  { %3342 = vmatmul.mubr.f32.vlgmr.msra.gmra.mxu0 %v1349_v26  ;;  %3411 = vmatprep.mubr.f32.mxu1 %v1358_v39  ;;  %v989_v26 = vld [vmem:[#allocation2 + $0x1c98] sm:$0xff]  ;;  %v971_v39 = vld [vmem:[#allocation2 + $0x1c08] sm:$0xff] }
 0x205   :  { %4791 = vmatprep.subr.mxu0 %v1001_v40  ;;  %4826 = vmatprep.subr.mxu1 %v1033_v41  ;;  %v1003_v40 = vld [vmem:[#allocation2 + $0x1d08] sm:$0xff]  ;;  %v986_v41 = vld [vmem:[#allocation2 + $0x1c80] sm:$0xff] }
 0x206   :  { %3412 = vmatmul.mubr.f32.vlgmr.msra.gmra.mxu1 %v1356_v31  ;;  %4792 = vmatpush3.msra.mxu0 %v985_v42  ;;  %v988_v31 = vld [vmem:[#allocation2 + $0x1c90] sm:$0xff]  ;;  %v1018_v42 = vld [vmem:[#allocation2 + $0x1d80] sm:$0xff]  ;;  %v1071_v28 = vld [vmem:[#allocation2 + $0x1f28] sm:$0xff] }
 0x207   :  { %4827 = vmatpush3.msra.mxu1 %v1017_v43  ;;  %4793 = vmatprep.subr.mxu0 %v1000_v44  ;;  %v1374_v43 = vcombine.high %v1366_v33, %v1366_v33  ;;  %v970_v44 = vld [vmem:[#allocation2 + $0x1c00] sm:$0xff] }
 0x208   :  { %4828 = vmatprep.subr.mxu1 %v1032_v45  ;;  %4794 = vmatpush3.msra.mxu0 %v984_v46  ;;  %v1002_v45 = vld [vmem:[#allocation2 + $0x1d00] sm:$0xff]  ;;  %v1375_v46 = vcombine.high %v1373_v38, %v1373_v38 }
 0x209   :  { %4829 = vmatpush3.msra.mxu1 %v1016_v47  ;;  %4795 = vmatprep.subr.mxu0 %v999_v48  ;;  %v1065_v47 = vld [vmem:[#allocation2 + $0x1ef8] sm:$0xff] }
 0x20a   :  { %4830 = vmatprep.subr.mxu1 %v1031_v49  ;;  %4796 = vmatpush3.msra.mxu0 %v983_v50  ;;  %v1097_v48 = vld [vmem:[#allocation2 + $0x1ff8] sm:$0xff] }
 0x20b   :  { %4831 = vmatpush3.msra.mxu1 %v1015_v52  ;;  %4797 = vmatprep.subr.mxu0 %v998_v53  ;;  %v1049_v49 = vld [vmem:[#allocation2 + $0x1e78] sm:$0xff]  ;;  %v1064_v52 = vld [vmem:[#allocation2 + $0x1ef0] sm:$0xff] }
 0x20c   :  { %4832 = vmatprep.subr.mxu1 %v1030_v54  ;;  %4798 = vmatpush3.msra.mxu0 %v982_v55  ;;  %v1081_v50 = vld [vmem:[#allocation2 + $0x1f78] sm:$0xff]  ;;  %v1096_v53 = vld [vmem:[#allocation2 + $0x1ff0] sm:$0xff] }
 0x20d   :  { %4833 = vmatpush3.msra.mxu1 %v1014_v56  ;;  %4799 = vmatprep.subr.mxu0 %v997_v57  ;;  %v1048_v54 = vld [vmem:[#allocation2 + $0x1e70] sm:$0xff]  ;;  %v1063_v56 = vld [vmem:[#allocation2 + $0x1ee8] sm:$0xff] }
 0x20e   :  { %4834 = vmatprep.subr.mxu1 %v1029_v58  ;;  %4800 = vmatpush3.msra.mxu0 %v981_v59  ;;  %v1080_v55 = vld [vmem:[#allocation2 + $0x1f70] sm:$0xff]  ;;  %v1095_v57 = vld [vmem:[#allocation2 + $0x1fe8] sm:$0xff] }
 0x20f   :  { %4835 = vmatpush3.msra.mxu1 %v1013_v60  ;;  %4801 = vmatprep.subr.mxu0 %v996_v61  ;;  %v1047_v58 = vld [vmem:[#allocation2 + $0x1e68] sm:$0xff]  ;;  %v1062_v60 = vld [vmem:[#allocation2 + $0x1ee0] sm:$0xff] }
 0x210   :  { %4836 = vmatprep.subr.mxu1 %v1028_v62  ;;  %4802 = vmatpush3.msra.mxu0 %v980_v63  ;;  %v1079_v59 = vld [vmem:[#allocation2 + $0x1f68] sm:$0xff]  ;;  %v1094_v61 = vld [vmem:[#allocation2 + $0x1fe0] sm:$0xff] }
 0x211   :  { %4837 = vmatpush3.msra.mxu1 %v1012_v0  ;;  %4803 = vmatprep.subr.mxu0 %v995_v1  ;;  %v1046_v62 = vld [vmem:[#allocation2 + $0x1e60] sm:$0xff]  ;;  %v1061_v0 = vld [vmem:[#allocation2 + $0x1ed8] sm:$0xff] }
 0x212   :  { %4838 = vmatprep.subr.mxu1 %v1027_v2  ;;  %4804 = vmatpush3.msra.mxu0 %v979_v3  ;;  %v1078_v63 = vld [vmem:[#allocation2 + $0x1f60] sm:$0xff]  ;;  %v1093_v1 = vld [vmem:[#allocation2 + $0x1fd8] sm:$0xff] }
 0x213   :  { %4839 = vmatpush3.msra.mxu1 %v1011_v4  ;;  %4805 = vmatprep.subr.mxu0 %v994_v5  ;;  %v1045_v2 = vld [vmem:[#allocation2 + $0x1e58] sm:$0xff]  ;;  %v1060_v4 = vld [vmem:[#allocation2 + $0x1ed0] sm:$0xff] }
 0x214   :  { %4840 = vmatprep.subr.mxu1 %v1026_v6  ;;  %4806 = vmatpush3.msra.mxu0 %v978_v7  ;;  %v1077_v3 = vld [vmem:[#allocation2 + $0x1f58] sm:$0xff]  ;;  %v1092_v5 = vld [vmem:[#allocation2 + $0x1fd0] sm:$0xff] }
 0x215   :  { %4841 = vmatpush3.msra.mxu1 %v1010_v8  ;;  %4807 = vmatprep.subr.mxu0 %v993_v9  ;;  %v1044_v6 = vld [vmem:[#allocation2 + $0x1e50] sm:$0xff]  ;;  %v1059_v8 = vld [vmem:[#allocation2 + $0x1ec8] sm:$0xff] }
 0x216   :  { %4842 = vmatprep.subr.mxu1 %v1025_v10  ;;  %4808 = vmatpush3.msra.mxu0 %v977_v11  ;;  %v1076_v7 = vld [vmem:[#allocation2 + $0x1f50] sm:$0xff]  ;;  %v1091_v9 = vld [vmem:[#allocation2 + $0x1fc8] sm:$0xff] }
 0x217   :  { %4843 = vmatpush3.msra.mxu1 %v1009_v12  ;;  %4809 = vmatprep.subr.mxu0 %v992_v13  ;;  %v1043_v10 = vld [vmem:[#allocation2 + $0x1e48] sm:$0xff]  ;;  %v1058_v12 = vld [vmem:[#allocation2 + $0x1ec0] sm:$0xff] }
 0x218   :  { %4844 = vmatprep.subr.mxu1 %v1024_v14  ;;  %4810 = vmatpush3.msra.mxu0 %v976_v15  ;;  %v1075_v11 = vld [vmem:[#allocation2 + $0x1f48] sm:$0xff]  ;;  %v1090_v13 = vld [vmem:[#allocation2 + $0x1fc0] sm:$0xff] }
 0x219   :  { %4845 = vmatpush3.msra.mxu1 %v1008_v16  ;;  %4811 = vmatprep.subr.mxu0 %v991_v17  ;;  %v1042_v14 = vld [vmem:[#allocation2 + $0x1e40] sm:$0xff]  ;;  %v1057_v16 = vld [vmem:[#allocation2 + $0x1eb8] sm:$0xff] }
 0x21a   :  { %4846 = vmatprep.subr.mxu1 %v1023_v18  ;;  %4812 = vmatpush3.msra.mxu0 %v975_v19  ;;  %v1074_v15 = vld [vmem:[#allocation2 + $0x1f40] sm:$0xff]  ;;  %v1089_v17 = vld [vmem:[#allocation2 + $0x1fb8] sm:$0xff] }
 0x21b   :  { %4847 = vmatpush3.msra.mxu1 %v1007_v20  ;;  %4813 = vmatprep.subr.mxu0 %v990_v22  ;;  %v1041_v18 = vld [vmem:[#allocation2 + $0x1e38] sm:$0xff]  ;;  %v1056_v20 = vld [vmem:[#allocation2 + $0x1eb0] sm:$0xff] }
 0x21c   :  { %4848 = vmatprep.subr.mxu1 %v1022_v23  ;;  %4814 = vmatpush3.msra.mxu0 %v974_v24  ;;  %v1073_v19 = vld [vmem:[#allocation2 + $0x1f38] sm:$0xff]  ;;  %v1040_v22 = vld [vmem:[#allocation2 + $0x1e30] sm:$0xff]  ;;  %v1055_v24 = vld [vmem:[#allocation2 + $0x1ea8] sm:$0xff] }
 0x21d   :  { %4849 = vmatpush3.msra.mxu1 %v1006_v25  ;;  %4815 = vmatprep.subr.mxu0 %v989_v26  ;;  %v1072_v23 = vld [vmem:[#allocation2 + $0x1f30] sm:$0xff]  ;;  %v1087_v25 = vld [vmem:[#allocation2 + $0x1fa8] sm:$0xff]  ;;  %v73_v26 = vld [vmem:[%s5275_s0 + $0x78] sm:$0xff] }
 0x21e   :  { %4850 = vmatprep.subr.mxu1 %v1021_v27  ;;  %4816 = vmatpush3.msra.mxu0 %v973_v29  ;;  %v1039_v27 = vld [vmem:[#allocation2 + $0x1e28] sm:$0xff]  ;;  %v1054_v29 = vld [vmem:[#allocation2 + $0x1ea0] sm:$0xff] }
 0x21f   :  { %4851 = vmatpush3.msra.mxu1 %v1005_v30  ;;  %4817 = vmatprep.subr.mxu0 %v988_v31  ;;  %v1086_v30 = vld [vmem:[#allocation2 + $0x1fa0] sm:$0xff] }
 0x220   :  { %4852 = vmatprep.subr.mxu1 %v1020_v32  ;;  %4818 = vmatpush3.msra.mxu0 %v972_v34  ;;  %v1038_v31 = vld [vmem:[#allocation2 + $0x1e20] sm:$0xff]  ;;  %v1053_v34 = vld [vmem:[#allocation2 + $0x1e98] sm:$0xff] }
 0x221   :  { %4853 = vmatpush3.msra.mxu1 %v1004_v35  ;;  %4819 = vmatprep.subr.mxu0 %v987_v36  ;;  %v1070_v32 = vld [vmem:[#allocation2 + $0x1f20] sm:$0xff]  ;;  %v1085_v35 = vld [vmem:[#allocation2 + $0x1f98] sm:$0xff] }
 0x222   :  { %4854 = vmatprep.subr.mxu1 %v1019_v37  ;;  %4820 = vmatpush3.msra.mxu0 %v971_v39  ;;  %v1037_v36 = vld [vmem:[#allocation2 + $0x1e18] sm:$0xff]  ;;  %v1084_v39 = vld [vmem:[#allocation2 + $0x1f90] sm:$0xff] }
 0x223   :  { %4855 = vmatpush3.msra.mxu1 %v1003_v40  ;;  %4821 = vmatprep.subr.mxu0 %v986_v41  ;;  %v1069_v37 = vld [vmem:[#allocation2 + $0x1f18] sm:$0xff]  ;;  %v1383_v40 = vrot.slane %v73_v26, %v5142_v51  ;;  %v1036_v41 = vld [vmem:[#allocation2 + $0x1e10] sm:$0xff] }
 0x224   :  { %4856 = vmatprep.subr.mxu1 %v1018_v42  ;;  %4822 = vmatpush3.msra.mxu0 %v970_v44  ;;  %v1068_v42 = vld [vmem:[#allocation2 + $0x1f10] sm:$0xff]  ;;  %v1051_v44 = vld [vmem:[#allocation2 + $0x1e88] sm:$0xff] }
 0x225   :  { %3481 = vmatprep.mubr.f32.mxu0 %v1374_v43  ;;  %4857 = vmatpush3.msra.mxu1 %v1002_v45  ;;  %v1083_v45 = vld [vmem:[#allocation2 + $0x1f88] sm:$0xff] }
 0x226   :  { %3482 = vmatmul.mubr.f32.vlgmr.msra.gmra.mxu0 %v1366_v33  ;;  %3551 = vmatprep.mubr.f32.mxu1 %v1375_v46  ;;  %v1376_v33 = vcombine.high %v73_v26, %v73_v26  ;;  %v1035_v46 = vld [vmem:[#allocation2 + $0x1e08] sm:$0xff] }
 0x227   :  { %4861 = vmatprep.subr.mxu0 %v1065_v47  ;;  %4896 = vmatprep.subr.mxu1 %v1097_v48  ;;  %v1067_v47 = vld [vmem:[#allocation2 + $0x1f08] sm:$0xff]  ;;  %v1050_v48 = vld [vmem:[#allocation2 + $0x1e80] sm:$0xff] }
 0x228   :  { %3552 = vmatmul.mubr.f32.vlgmr.msra.gmra.mxu1 %v1373_v38  ;;  %4862 = vmatpush3.msra.mxu0 %v1049_v49  ;;  %v1052_v38 = vld [vmem:[#allocation2 + $0x1e90] sm:$0xff]  ;;  %v1390_v43 = vrot.slane %v1376_v33, %v5142_v51  ;;  %v1082_v49 = vld [vmem:[#allocation2 + $0x1f80] sm:$0xff] }
 0x229   :  { %4897 = vmatpush3.msra.mxu1 %v1081_v50  ;;  %4863 = vmatprep.subr.mxu0 %v1064_v52  ;;  %v1391_v50 = vcombine.high %v1383_v40, %v1383_v40  ;;  %v1034_v52 = vld [vmem:[#allocation2 + $0x1e00] sm:$0xff] }
 0x22a   :  { %4898 = vmatprep.subr.mxu1 %v1096_v53  ;;  %4864 = vmatpush3.msra.mxu0 %v1048_v54  ;;  %v1392_v53 = vcombine.high %v1390_v43, %v1390_v43  ;;  %v1066_v51 = vld [vmem:[#allocation2 + $0x1f00] sm:$0xff]  ;;  %v3713_v54 = vld [vmem:[%s5278_s3 + $0x78] sm:$0xff] }
 0x22b   :  { %4899 = vmatpush3.msra.mxu1 %v1080_v55  ;;  %4865 = vmatprep.subr.mxu0 %v1063_v56  ;;  %v5100_v55 = vmov 0.0   ;;  %v3712_v56 = vld [vmem:[%s5278_s3 + $0x70] sm:$0xff] }
 0x22c   :  { %4900 = vmatprep.subr.mxu1 %v1095_v57  ;;  %4866 = vmatpush3.msra.mxu0 %v1047_v58  ;;  %v3711_v57 = vld [vmem:[%s5278_s3 + $0x68] sm:$0xff]  ;;  %v3710_v58 = vld [vmem:[%s5278_s3 + $0x60] sm:$0xff] }
 0x22d   :  { %4901 = vmatpush3.msra.mxu1 %v1079_v59  ;;  %4867 = vmatprep.subr.mxu0 %v1062_v60  ;;  %v3709_v59 = vld [vmem:[%s5278_s3 + $0x58] sm:$0xff]  ;;  %v3708_v60 = vld [vmem:[%s5278_s3 + $0x50] sm:$0xff] }
 0x22e   :  { %4902 = vmatprep.subr.mxu1 %v1094_v61  ;;  %4868 = vmatpush3.msra.mxu0 %v1046_v62  ;;  %v3707_v61 = vld [vmem:[%s5278_s3 + $0x48] sm:$0xff]  ;;  %v3706_v62 = vld [vmem:[%s5278_s3 + $0x40] sm:$0xff] }
 0x22f   :  { %4903 = vmatpush3.msra.mxu1 %v1078_v63  ;;  %4869 = vmatprep.subr.mxu0 %v1061_v0  ;;  %v3705_v63 = vld [vmem:[%s5278_s3 + $0x38] sm:$0xff]  ;;  %v3704_v0 = vld [vmem:[%s5278_s3 + $0x30] sm:$0xff] }
 0x230   :  { %4904 = vmatprep.subr.mxu1 %v1093_v1  ;;  %4870 = vmatpush3.msra.mxu0 %v1045_v2  ;;  %v3703_v1 = vld [vmem:[%s5278_s3 + $0x28] sm:$0xff]  ;;  %v3702_v2 = vld [vmem:[%s5278_s3 + $0x20] sm:$0xff] }
 0x231   :  { %4905 = vmatpush3.msra.mxu1 %v1077_v3  ;;  %4871 = vmatprep.subr.mxu0 %v1060_v4  ;;  %v3701_v3 = vld [vmem:[%s5278_s3 + $0x18] sm:$0xff]  ;;  %v3700_v4 = vld [vmem:[%s5278_s3 + $0x10] sm:$0xff] }
 0x232   :  { %4906 = vmatprep.subr.mxu1 %v1092_v5  ;;  %4872 = vmatpush3.msra.mxu0 %v1044_v6  ;;  %v3699_v5 = vld [vmem:[%s5278_s3 + $0x8] sm:$0xff]  ;;  %v3698_v6 = vld [vmem:[%s5278_s3] sm:$0xff]  ;;  %s5102_s3 = smov [#allocation8]  }
 0x233   :  { %4907 = vmatpush3.msra.mxu1 %v1076_v7  ;;  %4873 = vmatprep.subr.mxu0 %v1059_v8  ;;  %v3843_v7 = vpop.f32.mrf.mxu0  ;;  %v3878_v8 = vpop.f32.mrf.mxu1  ;;  %s3799_s15 = sshll.u32 %s5102_s3, 4  ;;  %s3800_s15 = int_to_ptr.vmem [resolvable:$true] %s3799_s15 }
 0x234   :  { %4908 = vmatprep.subr.mxu1 %v1091_v9  ;;  %4874 = vmatpush3.msra.mxu0 %v1043_v10  ;;  %s5068_s16 = scalar_lea.vmem %s3800_s15, 32  ;;  %p5073_p2 = scmp.lt.s32.totalorder %s3800_s15, %s3800_s15 }
 0x235   :  { %4909 = vmatpush3.msra.mxu1 %v1075_v11  ;;  %4875 = vmatprep.subr.mxu0 %v1058_v12  ;;  %v3844_v9 = vpop.f32.mrf.mxu0  ;;  %v3809_v12 = vld [vmem:[#allocation5] ss:$0 sm:$0xff]  ;;  %p5069_p1 = scmp.ne.s32.totalorder %s3800_s15, %s5068_s16  ;;  %p5074_p3 = scmp.lt.s32.totalorder %s5068_s16, %s5068_s16 }
 0x236   :  { %4910 = vmatprep.subr.mxu1 %v1090_v13  ;;  %4876 = vmatpush3.msra.mxu0 %v1042_v14  ;;  %v3845_v11 = vadd.f32 %v3844_v9, %v3843_v7  ;;  %v3879_v13 = vpop.f32.mrf.mxu1 }
 0x237   :  { %4911 = vmatpush3.msra.mxu1 %v1074_v15  ;;  %4877 = vmatprep.subr.mxu0 %v1057_v16  ;;  %v3913_v10 = vpop.f32.mrf.mxu0  ;;  %p5075_p4 = por %p5074_p3, %p5073_p2 }
 0x238   :  { %4912 = vmatprep.subr.mxu1 %v1089_v17  ;;  %4878 = vmatpush3.msra.mxu0 %v1041_v18  ;;  %v3948_v14 = vpop.f32.mrf.mxu1  ;;  %v1524_v16 = vadd.f32 %v3845_v11, %v3809_v12  ;;  %v3880_v17 = vadd.f32 %v3879_v13, %v3878_v8 }
 0x239   :  { %4913 = vmatpush3.msra.mxu1 %v1073_v19  ;;  %4879 = vmatprep.subr.mxu0 %v1056_v20  ;;  %v3914_v15 = vpop.f32.mrf.mxu0  ;;  %p5076_p5 = pnand %p5075_p4, %p5069_p1 }
 0x23a   :  { %4914 = vmatprep.subr.mxu1 %v1088_v21  ;;  %4880 = vmatpush3.msra.mxu0 %v1040_v22  ;;  %v3915_v19 = vadd.f32 %v3914_v15, %v3913_v10  ;;  %v3949_v20 = vpop.f32.mrf.mxu1  ;;  %v1594_v21 = vadd.f32 %v3880_v17, %v1524_v16 }
 0x23b   :  { %4915 = vmatpush3.msra.mxu1 %v1072_v23  ;;  %4881 = vmatprep.subr.mxu0 %v1055_v24  ;;  %v3983_v18 = vpop.f32.mrf.mxu0 }
 0x23c   :  { %4916 = vmatprep.subr.mxu1 %v1087_v25  ;;  %4882 = vmatpush3.msra.mxu0 %v1039_v27  ;;  %v4018_v22 = vpop.f32.mrf.mxu1  ;;  %v1664_v24 = vadd.f32 %v3915_v19, %v1594_v21  ;;  %v3950_v25 = vadd.f32 %v3949_v20, %v3948_v14 }
 0x23d   :  { %4917 = vmatpush3.msra.mxu1 %v1071_v28  ;;  %4883 = vmatprep.subr.mxu0 %v1054_v29  ;;  %v3984_v23 = vpop.f32.mrf.mxu0 }
 0x23e   :  { %4918 = vmatprep.subr.mxu1 %v1086_v30  ;;  %4884 = vmatpush3.msra.mxu0 %v1038_v31  ;;  %v3985_v27 = vadd.f32 %v3984_v23, %v3983_v18  ;;  %v4019_v28 = vpop.f32.mrf.mxu1  ;;  %v1734_v29 = vadd.f32 %v3950_v25, %v1664_v24 }
 0x23f   :  { %4919 = vmatpush3.msra.mxu1 %v1070_v32  ;;  %4885 = vmatprep.subr.mxu0 %v1053_v34  ;;  %v4053_v26 = vpop.f32.mrf.mxu0  ;;  %v4020_v33 = vadd.f32 %v4019_v28, %v4018_v22 }
 0x240   :  { %4920 = vmatprep.subr.mxu1 %v1085_v35  ;;  %4886 = vmatpush3.msra.mxu0 %v1037_v36  ;;  %v4088_v30 = vpop.f32.mrf.mxu1  ;;  %v1804_v32 = vadd.f32 %v3985_v27, %v1734_v29 }
 0x241   :  { %4921 = vmatpush3.msra.mxu1 %v1069_v37  ;;  %4887 = vmatprep.subr.mxu0 %v1052_v38  ;;  %v4054_v31 = vpop.f32.mrf.mxu0 }
 0x242   :  { %4922 = vmatprep.subr.mxu1 %v1084_v39  ;;  %4888 = vmatpush3.msra.mxu0 %v1036_v41  ;;  %v4055_v35 = vadd.f32 %v4054_v31, %v4053_v26  ;;  %v4089_v36 = vpop.f32.mrf.mxu1  ;;  %v1874_v37 = vadd.f32 %v4020_v33, %v1804_v32 }
 0x243   :  { %4923 = vmatpush3.msra.mxu1 %v1068_v42  ;;  %4889 = vmatprep.subr.mxu0 %v1051_v44  ;;  %v4123_v34 = vpop.f32.mrf.mxu0  ;;  %v4090_v41 = vadd.f32 %v4089_v36, %v4088_v30 }
 0x244   :  { %4924 = vmatprep.subr.mxu1 %v1083_v45  ;;  %4890 = vmatpush3.msra.mxu0 %v1035_v46  ;;  %v4158_v38 = vpop.f32.mrf.mxu1 }
 0x245   :  { %4925 = vmatpush3.msra.mxu1 %v1067_v47  ;;  %4891 = vmatprep.subr.mxu0 %v1050_v48  ;;  %v4124_v39 = vpop.f32.mrf.mxu0 }
 0x246   :  { %4926 = vmatprep.subr.mxu1 %v1082_v49  ;;  %4892 = vmatpush3.msra.mxu0 %v1034_v52  ;;  %v4159_v44 = vpop.f32.mrf.mxu1 }
 0x247   :  { %3621 = vmatprep.mubr.f32.mxu0 %v1391_v50  ;;  %4927 = vmatpush3.msra.mxu1 %v1066_v51  ;;  %v4193_v42 = vpop.f32.mrf.mxu0  ;;  %v4160_v49 = vadd.f32 %v4159_v44, %v4158_v38 }
 0x248   :  { %3691 = vmatprep.mubr.f32.mxu1 %v1392_v53  ;;  %3622 = vmatmul.mubr.f32.vlgmr.msra.gmra.mxu0 %v1383_v40  ;;  %v1944_v40 = vadd.f32 %v4055_v35, %v1874_v37  ;;  %v4228_v46 = vpop.f32.mrf.mxu1 }
 0x249   :  { %3692 = vmatmul.mubr.f32.vlgmr.msra.gmra.mxu1 %v1390_v43  ;;  %4948 = vmatprep.subr.mxu0 %v5100_v55  ;;  %v4125_v43 = vadd.f32 %v4124_v39, %v4123_v34  ;;  %v4194_v47 = vpop.f32.mrf.mxu0 }
 0x24a   :  { %4949 = vmatpush3.msra.mxu0 %v3713_v54  ;;  %4980 = vmatprep.mubr.msk.f32.mxu0 %vm5101_vm0, %v5100_v55  ;;  %v2014_v45 = vadd.f32 %v4090_v41, %v1944_v40  ;;  %v4195_v52 = vadd.f32 %v4194_v47, %v4193_v42  ;;  %v4229_v53 = vpop.f32.mrf.mxu1 }
 0x24b   :  { %4950 = vmatprep.subr.mxu0 %v5100_v55  ;;  %v4263_v50 = vpop.f32.mrf.mxu0 }
 0x24c   :  { %4951 = vmatpush3.msra.mxu0 %v3712_v56  ;;  %v2084_v48 = vadd.f32 %v4125_v43, %v2014_v45  ;;  %v4298_v54 = vpop.f32.mrf.mxu1 }
 0x24d   :  { %4952 = vmatprep.subr.mxu0 %v5100_v55 }
 0x24e   :  { %4953 = vmatpush3.msra.mxu0 %v3711_v57  ;;  %v2154_v51 = vadd.f32 %v4160_v49, %v2084_v48  ;;  %v4230_v57 = vadd.f32 %v4229_v53, %v4228_v46 }
 0x24f   :  { %4954 = vmatprep.subr.mxu0 %v5100_v55 }
 0x250   :  { %4955 = vmatpush3.msra.mxu0 %v3710_v58  ;;  %v2224_v56 = vadd.f32 %v4195_v52, %v2154_v51 }
 0x251   :  { %4956 = vmatprep.subr.mxu0 %v5100_v55 }
 0x252   :  { %4957 = vmatpush3.msra.mxu0 %v3709_v59 }
 0x253   :  { %4958 = vmatprep.subr.mxu0 %v5100_v55 }
 0x254   :  { %4959 = vmatpush3.msra.mxu0 %v3708_v60  ;;  %v4299_v60 = vpop.f32.mrf.mxu1 }
 0x255   :  { %4960 = vmatprep.subr.mxu0 %v5100_v55 }
 0x256   :  { %4961 = vmatpush3.msra.mxu0 %v3707_v61  ;;  %v2294_v61 = vadd.f32 %v4230_v57, %v2224_v56 }
 0x257   :  { %4962 = vmatprep.subr.mxu0 %v5100_v55 }
 0x258   :  { %4963 = vmatpush3.msra.mxu0 %v3706_v62  ;;  %v4368_v62 = vpop.f32.mrf.mxu1 }
 0x259   :  { %4964 = vmatprep.subr.mxu0 %v5100_v55 }
 0x25a   :  { %4965 = vmatpush3.msra.mxu0 %v3705_v63 }
 0x25b   :  { %4966 = vmatprep.subr.mxu0 %v5100_v55 }
 0x25c   :  { %4967 = vmatpush3.msra.mxu0 %v3704_v0 }
 0x25d   :  { %4968 = vmatprep.subr.mxu0 %v5100_v55 }
 0x25e   :  { %4969 = vmatpush3.msra.mxu0 %v3703_v1  ;;  %v4300_v1 = vadd.f32 %v4299_v60, %v4298_v54 }
 0x25f   :  { %4970 = vmatprep.subr.mxu0 %v5100_v55 }
 0x260   :  { %4971 = vmatpush3.msra.mxu0 %v3702_v2 }
 0x261   :  { %4972 = vmatprep.subr.mxu0 %v5100_v55 }
 0x262   :  { %4973 = vmatpush3.msra.mxu0 %v3701_v3 }
 0x263   :  { %4974 = vmatprep.subr.mxu0 %v5100_v55 }
 0x264   :  { %4975 = vmatpush3.msra.mxu0 %v3700_v4  ;;  %v4369_v4 = vpop.f32.mrf.mxu1 }
 0x265   :  { %4976 = vmatprep.subr.mxu0 %v5100_v55  ;;  %v4370_v9 = vadd.f32 %v4369_v4, %v4368_v62 }
 0x266   :  { %4977 = vmatpush3.msra.mxu0 %v3699_v5 }
 0x267   :  { %4978 = vmatprep.subr.mxu0 %v5100_v55  ;;  %v4264_v55 = vpop.f32.mrf.mxu0 }
 0x268   :  { %4979 = vmatpush3.msra.mxu0 %v3698_v6  ;;  %v4265_v59 = vadd.f32 %v4264_v55, %v4263_v50  ;;  %v4438_v6 = vpop.f32.mrf.mxu1 }
 0x269   :  { %v4333_v58 = vpop.f32.mrf.mxu0 }
 0x26a   :  { %v2364_v0 = vadd.f32 %v4265_v59, %v2294_v61  ;;  %v4439_v12 = vpop.f32.mrf.mxu1 }
 0x26b   :  { %v4334_v63 = vpop.f32.mrf.mxu0  ;;  %v4440_v17 = vadd.f32 %v4439_v12, %v4438_v6 }
 0x26c   :  { %v4335_v3 = vadd.f32 %v4334_v63, %v4333_v58  ;;  %v2434_v5 = vadd.f32 %v4300_v1, %v2364_v0  ;;  %v4508_v14 = vpop.f32.mrf.mxu1 }
 0x26d   :  { %v4403_v2 = vpop.f32.mrf.mxu0 }
 0x26e   :  { %v2504_v8 = vadd.f32 %v4335_v3, %v2434_v5  ;;  %v4509_v20 = vpop.f32.mrf.mxu1 }
 0x26f   :  { %v4404_v7 = vpop.f32.mrf.mxu0  ;;  %v4510_v25 = vadd.f32 %v4509_v20, %v4508_v14 }
 0x270   :  { %v4405_v11 = vadd.f32 %v4404_v7, %v4403_v2  ;;  %v2574_v13 = vadd.f32 %v4370_v9, %v2504_v8  ;;  %v4578_v22 = vpop.f32.mrf.mxu1  ;;  %v3810_v9 = vld [vmem:[#allocation7] ss:$0 sm:$0xff] }
 0x271   :  { %v4473_v10 = vpop.f32.mrf.mxu0 }
 0x272   :  { %v2644_v16 = vadd.f32 %v4405_v11, %v2574_v13  ;;  %v4579_v28 = vpop.f32.mrf.mxu1 }
 0x273   :  { %v4474_v15 = vpop.f32.mrf.mxu0  ;;  %v4580_v33 = vadd.f32 %v4579_v28, %v4578_v22 }
 0x274   :  { %v4475_v19 = vadd.f32 %v4474_v15, %v4473_v10  ;;  %v2714_v21 = vadd.f32 %v4440_v17, %v2644_v16 }
 0x275   :  { %v4543_v18 = vpop.f32.mrf.mxu0 }
 0x276   :  { %v2784_v24 = vadd.f32 %v4475_v19, %v2714_v21 }
 0x277   :  { %v4544_v23 = vpop.f32.mrf.mxu0 }
 0x278   :  { %v4545_v27 = vadd.f32 %v4544_v23, %v4543_v18  ;;  %v2854_v29 = vadd.f32 %v4510_v25, %v2784_v24 }
 0x27a   :  { %v2924_v32 = vadd.f32 %v4545_v27, %v2854_v29 }
 0x27c   :  { %v2994_v37 = vadd.f32 %v4580_v33, %v2924_v32 }
 0x280   :  { %v4613_v26 = vpop.f32.mrf.mxu0 }
 0x282   :  { %v4648_v30 = vpop.f32.mrf.mxu1  ;;  %v4614_v31 = vpop.f32.mrf.mxu0 }
 0x283   :  { %v4615_v35 = vadd.f32 %v4614_v31, %v4613_v26 }
 0x284   :  { %v4649_v36 = vpop.f32.mrf.mxu1 }
 0x285   :  { %v3064_v40 = vadd.f32 %v4615_v35, %v2994_v37  ;;  %v4650_v41 = vadd.f32 %v4649_v36, %v4648_v30 }
 0x287   :  { %v3134_v45 = vadd.f32 %v4650_v41, %v3064_v40 }
 0x2a2   :  { %v4683_v34 = vpop.f32.mrf.mxu0 }
 0x2a4   :  { %v4718_v38 = vpop.f32.mrf.mxu1  ;;  %v4684_v39 = vpop.f32.mrf.mxu0 }
 0x2a5   :  { %v4685_v43 = vadd.f32 %v4684_v39, %v4683_v34 }
 0x2a6   :  { %v4719_v44 = vpop.f32.mrf.mxu1 }
 0x2a7   :  { %v3204_v48 = vadd.f32 %v4685_v43, %v3134_v45  ;;  %v4720_v49 = vadd.f32 %v4719_v44, %v4718_v38 }
 0x2a9   :  { %v3274_v51 = vadd.f32 %v4720_v49, %v3204_v48 }
 0x2c4   :  { %v4753_v42 = vpop.f32.mrf.mxu0 }
 0x2c6   :  { %v4788_v46 = vpop.f32.mrf.mxu1  ;;  %v4754_v47 = vpop.f32.mrf.mxu0 }
 0x2c7   :  { %v4755_v52 = vadd.f32 %v4754_v47, %v4753_v42 }
 0x2c8   :  { %v4789_v53 = vpop.f32.mrf.mxu1 }
 0x2c9   :  { %v3344_v56 = vadd.f32 %v4755_v52, %v3274_v51  ;;  %v4790_v57 = vadd.f32 %v4789_v53, %v4788_v46 }
 0x2cb   :  { %v3414_v60 = vadd.f32 %v4790_v57, %v3344_v56 }
 0x2e6   :  { %v4823_v50 = vpop.f32.mrf.mxu0 }
 0x2e8   :  { %v4858_v54 = vpop.f32.mrf.mxu1  ;;  %v4824_v55 = vpop.f32.mrf.mxu0 }
 0x2e9   :  { %v4825_v58 = vadd.f32 %v4824_v55, %v4823_v50 }
 0x2ea   :  { %v4859_v59 = vpop.f32.mrf.mxu1 }
 0x2eb   :  { %v3484_v61 = vadd.f32 %v4825_v58, %v3414_v60  ;;  %v4860_v62 = vadd.f32 %v4859_v59, %v4858_v54 }
 0x2ed   :  { %v3554_v3 = vadd.f32 %v4860_v62, %v3484_v61 }
 0x308   :  { %v4893_v63 = vpop.f32.mrf.mxu0 }
 0x309   :  { %v4928_v0 = vpop.f32.mrf.mxu1 }
 0x30a   :  { %v4894_v1 = vpop.f32.mrf.mxu0 }
 0x30b   :  { %v4929_v2 = vpop.f32.mrf.mxu1  ;;  %v4895_v4 = vadd.f32 %v4894_v1, %v4893_v63 }
 0x30c   :  { %v4930_v6 = vadd.f32 %v4929_v2, %v4928_v0 }
 0x30d   :  { %v3624_v5 = vadd.f32 %v4895_v4, %v3554_v3 }
 0x30f   :  { %v3694_v7 = vadd.f32 %v4930_v6, %v3624_v5 }
 0x311   :  { %v3697_v8 = vmax.f32 %v3694_v7, 0.0 }
 0x313   :  { %4981 = vmatmul.mubr.f32.vlgmr.msra.gmra.mxu0 %v3697_v8 }
 0x3d3   :  { %v3787_v10 = vpop.f32.mrf.mxu0 }
 0x3d4   :  { %v3788_v11 = vadd.f32 %v3810_v9, %v3787_v10 }
 0x3d5   :  { %v4982_v12 = vpop.f32.mrf.mxu0 }
 0x3d6   :  { %3792 = vst.msk [vmem:[#allocation8] sm:$0x3] %vm3791_vm1, %v3788_v11 }
 0x3d7   :  { %5079 = shalt.err (!%p5076_p5)
}
 0x3d8   :  { %3802 = dma.vmem_to_hbm [thread:$0]  %s3800_s15, 32, %s5280_s5, [#allocation4]  }
 0x3d9   :  { %5092 = dma.done.wait [#allocation4], 32  }
 0x3da   :  { %5093 = vsyncadd [#allocation4], 4294967264 }
 0x3db   :  { %3806 = vsyncpa [#allocation3], 1 }
 0x3dc   :  { %3807 = vsyncpa [#allocation6], 1 }
 0x3dd   :  { %3808 = vsyncpa [#allocation4], 1 }

</bundles_post_ra>
